<compile_context>
chip_gen: v5e
topology: v5e:2x2
jax: 0.10.0
libtpu: 0.0.40
codegen_flags: <defaults>
</compile_context>

<pallas_src>
import functools

import jax
import jax.numpy as jnp
from jax import lax
from jax.experimental import pallas as pl
from jax.experimental.pallas import tpu as pltpu

LN_EPS = 1e-5      # torch_geometric LayerNorm(mode='graph', batch=None): x/(std+eps)
COORS_EPS = 1e-8   # CoorsNorm clamp eps
POS_DIM = 3

# Matmul operand dtype for the MLP / gather / scatter matmuls.  float32 keeps
# the fused kernel numerically equivalent to the reference; switch to
# jnp.bfloat16 on v6e/v7x once graph / feature sizes make MXU throughput the
# bottleneck.
MXU_DTYPE = jnp.float32


def _mm(a, b):
    return jnp.dot(a.astype(MXU_DTYPE), b.astype(MXU_DTYPE),
                   preferred_element_type=jnp.float32)


def _silu(x):
    return x * jax.nn.sigmoid(x)


# ------------------------------- fused kernel --------------------------------

def make_fused_kernel(num_layers, F, H, P):
    NG = 4     # graph operands per edge set   (G_src, G_dst, S, inv_count)
    NP = 13    # folded parameters per layer type

    def kernel(*refs):
        it = iter(refs)
        take = lambda n: tuple(next(it) for _ in range(n))

        atom_in, glob_in = take(2)
        g_aa, g_ag, g_ga = take(NG), take(NG), take(NG)
        p_aa, p_ag, p_ga = take(NP), take(NP), take(NP)
        atom_out, glob_out = take(2)
        gath_s, gath_d, cat_m, cat_a, agg_b, cat_u = take(6)

        # State slabs [x | pos | 0-pad] live in the VMEM output refs for the
        # entire fused forward; final HBM writeback is one dense DMA per set.
        atom_out[...] = atom_in[...]
        glob_out[...] = glob_in[...]

        def sublayer(dst_ref, src_ref, gops, prm):
            gsrc_r, gdst_r, scat_r, invc_r = gops
            (wm1_r, wm1d_r, bm1_r, wm2_r, bm2_r,
             wp1_r, bp1_r, wp2_r, bp2_r,
             wu1_r, bu1_r, wu2_r, bu2_r) = prm

            E = gsrc_r.shape[0]
            Nd = scat_r.shape[0]

            # --- gather x|pos per edge: one MXU matmul per side -------------
            gath_s[0:E, :] = _mm(gsrc_r[...], src_ref[:, 0:F + P])
            gath_d[0:E, :] = _mm(gdst_r[...], dst_ref[:, 0:F + P])
            x_j, pos_j = gath_s[0:E, 0:F], gath_s[0:E, F:F + P]
            x_i, pos_i = gath_d[0:E, 0:F], gath_d[0:E, F:F + P]

            pos_dir = pos_i - pos_j                                        # [E, P]
            dist = jnp.sqrt(jnp.sum(pos_dir * pos_dir, axis=-1, keepdims=True))

            # PyG LayerNorm mode='graph' (batch=None): (x - mean)/(std+eps),
            # applied to the *gathered* per-edge tensors exactly like
            # EGNNLayer.message().  Affine is folded into wm1/bm1.
            def gnorm(v):
                mu = jnp.mean(v, keepdims=True)
                vc = v - mu
                std = jnp.sqrt(jnp.mean(vc * vc, keepdims=True))
                return vc / (std + LN_EPS)

            # --- message_net: single K=2F matmul (concat via VMEM scratch) --
            cat_m[0:E, 0:F] = gnorm(x_i)
            cat_m[0:E, F:2 * F] = gnorm(x_j)
            # dist column of the first Linear as a VPU broadcast (no K=1 MXU op)
            h = _mm(cat_m[0:E, :], wm1_r[...]) + dist * wm1d_r[...] + bm1_r[...]
            h = _silu(h)
            node_msg = _mm(h, wm2_r[...]) + bm2_r[...]                     # [E, H]

            # --- pos_net: Linear(H,H)+SiLU, then Linear(H,1) as lane reduce --
            p = _silu(_mm(node_msg, wp1_r[...]) + bp1_r[...])
            p = jnp.sum(p * wp2_r[...], axis=-1, keepdims=True) + bp2_r[...]  # [E, 1]

            # --- CoorsNorm (scale already folded into wp2/bp2) ---------------
            pos_msg = pos_dir / jnp.maximum(dist, COORS_EPS) * p           # [E, P]

            # --- aggregation: ONE matmul over [node_msg | pos_msg] -----------
            cat_a[0:E, 0:H] = node_msg
            cat_a[0:E, H:H + P] = pos_msg
            agg_b[0:Nd, :] = _mm(scat_r[...], cat_a[0:E, :])
            agg_node = agg_b[0:Nd, 0:H]                    # SumAggregation
            agg_pos = agg_b[0:Nd, H:H + P] * invc_r[...]   # MeanAggregation (1/max(cnt,1))

            # --- update_net: single K=F+H matmul (concat via VMEM scratch) ---
            x_dst = dst_ref[:, 0:F]
            pos_dst = dst_ref[:, F:F + P]
            cat_u[0:Nd, 0:F] = x_dst
            cat_u[0:Nd, F:F + H] = agg_node
            u = _silu(_mm(cat_u[0:Nd, :], wu1_r[...]) + bu1_r[...])
            x_new = _mm(u, wu2_r[...]) + bu2_r[...]                        # [Nd, F]

            # residual=True / update_coords=True, written back into the slab
            dst_ref[:, 0:F] = x_dst + x_new
            dst_ref[:, F:F + P] = pos_dst + agg_pos

        def layer_body(i, carry):
            sublayer(atom_out, atom_out, g_aa, p_aa)   # atom_to_atom
            sublayer(glob_out, atom_out, g_ag, p_ag)   # atom_to_global_node
            sublayer(atom_out, glob_out, g_ga, p_ga)   # global_node_to_atom
            return carry

        # weight_share=True: the same folded parameter sets every iteration.
        lax.fori_loop(0, num_layers, layer_body, 0, unroll=True)

    return kernel


# ----------------------------- host-side glue --------------------------------

def build_graph_ops(edge_index, n_src, n_dst):
    """Static gather/scatter operators for one edge set (built once)."""
    src, dst = edge_index[0], edge_index[1]
    g_src = jax.nn.one_hot(src, n_src, dtype=jnp.float32)    # [E, N_src]
    g_dst = jax.nn.one_hot(dst, n_dst, dtype=jnp.float32)    # [E, N_dst]
    scat = g_dst.T                                           # [N_dst, E]
    cnt = jnp.sum(scat, axis=1, keepdims=True)
    inv_cnt = 1.0 / jnp.maximum(cnt, 1.0)                    # [N_dst, 1]
    return g_src, g_dst, scat, inv_cnt


def fold_layer_params(p):
    """Fold LayerNorm affine into wm1/bm1 and CoorsNorm scale into wp2/bp2."""
    F = p["ln_w"].shape[1]
    ln_w, ln_b = p["ln_w"], p["ln_b"]
    wm1 = p["wm1"]                                   # [2F+1, H]  (x_i | x_j | dist)
    w_xi = wm1[:F] * ln_w.T
    w_xj = wm1[F:2 * F] * ln_w.T
    wm1_d = wm1[2 * F:2 * F + 1]                     # [1, H]
    bm1 = p["bm1"] + ln_b @ wm1[:F] + ln_b @ wm1[F:2 * F]
    scale = p["coors_scale"]                         # (1, 1)
    wp2_row = (p["wp2"] * scale).T                   # [1, H]
    bp2 = p["bp2"] * scale                           # (1, 1)
    return (jnp.concatenate([w_xi, w_xj], axis=0),   # wm1  [2F, H]
            wm1_d, bm1,
            p["wm2"], p["bm2"],
            p["wp1"], p["bp1"],
            wp2_row, bp2,
            p["wu1"], p["bu1"],
            p["wu2"], p["bu2"])


def egnn_global_node_hetero_forward(params, x_atom, pos_atom, x_global, pos_global,
                                    ei_atom_atom, ei_atom_global, ei_global_atom,
                                    num_layers):
    n_a, F = x_atom.shape
    n_g = x_global.shape[0]
    P = pos_atom.shape[1]
    H = params["atom_to_atom"]["wm2"].shape[0]
    slab_w = pl.cdiv(F + P, 128) * 128               # lane-dense state/output width

    def pack(x, pos):
        pad = jnp.zeros((x.shape[0], slab_w - F - P), jnp.float32)
        return jnp.concatenate(
            [x.astype(jnp.float32), pos.astype(jnp.float32), pad], axis=-1)

    atom_slab = pack(x_atom, pos_atom)
    glob_slab = pack(x_global, pos_global)

    # Built once (edge_index is static across layers), reused by every layer.
    g_aa = build_graph_ops(ei_atom_atom, n_a, n_a)
    g_ag = build_graph_ops(ei_atom_global, n_a, n_g)
    g_ga = build_graph_ops(ei_global_atom, n_g, n_a)

    p_aa = fold_layer_params(params["atom_to_atom"])
    p_ag = fold_layer_params(params["atom_to_global_node"])
    p_ga = fold_layer_params(params["global_node_to_atom"])

    e_max = max(g_aa[0].shape[0], g_ag[0].shape[0], g_ga[0].shape[0])
    n_max = max(n_a, n_g)

    inputs = (atom_slab, glob_slab) + g_aa + g_ag + g_ga + p_aa + p_ag + p_ga

    vmem = pl.BlockSpec(memory_space=pltpu.MemorySpace.VMEM)
    atom_out, glob_out = pl.pallas_call(
        make_fused_kernel(num_layers, F, H, P),
        out_shape=(jax.ShapeDtypeStruct((n_a, slab_w), jnp.float32),
                   jax.ShapeDtypeStruct((n_g, slab_w), jnp.float32)),
        in_specs=[vmem] * len(inputs),
        out_specs=(vmem, vmem),
        scratch_shapes=[
            pltpu.VMEM((e_max, F + P), jnp.float32),    # gathered src [x|pos]
            pltpu.VMEM((e_max, F + P), jnp.float32),    # gathered dst [x|pos]
            pltpu.VMEM((e_max, 2 * F), jnp.float32),    # [norm(x_i) | norm(x_j)]
            pltpu.VMEM((e_max, H + P), jnp.float32),    # [node_msg | pos_msg]
            pltpu.VMEM((n_max, H + P), jnp.float32),    # aggregated messages
            pltpu.VMEM((n_max, F + H), jnp.float32),    # [x_dst | agg_node]
        ],
    )(*inputs)

    return (atom_out[:, :F], glob_out[:, :F],
            atom_out[:, F:F + P], glob_out[:, F:F + P])


# ------------------------- pure-JAX reference forward ------------------------

def _ref_sublayer(p, x_src, pos_src, x_dst, pos_dst, edge_index):
    hp = jax.lax.Precision.HIGHEST
    mm = lambda a, b: jnp.dot(a, b, precision=hp)
    src, dst = edge_index[0], edge_index[1]
    x_j, pos_j = x_src[src], pos_src[src]
    x_i, pos_i = x_dst[dst], pos_dst[dst]
    pos_dir = pos_i - pos_j
    dist = jnp.sqrt(jnp.sum(pos_dir * pos_dir, axis=-1, keepdims=True))

    def node_norm(v):
        vc = v - jnp.mean(v)
        std = jnp.sqrt(jnp.mean(vc * vc))
        return vc / (std + LN_EPS) * p["ln_w"] + p["ln_b"]

    m_in = jnp.concatenate([node_norm(x_i), node_norm(x_j), dist], axis=-1)
    h = _silu(mm(m_in, p["wm1"]) + p["bm1"])
    node_msg = mm(h, p["wm2"]) + p["bm2"]
    q = _silu(mm(node_msg, p["wp1"]) + p["bp1"])
    q = mm(q, p["wp2"]) + p["bp2"]
    pos_msg = pos_dir / jnp.maximum(dist, COORS_EPS) * p["coors_scale"] * q

    n_dst = x_dst.shape[0]
    agg_node = jax.ops.segment_sum(node_msg, dst, num_segments=n_dst)
    cnt = jax.ops.segment_sum(jnp.ones((dst.shape[0], 1), jnp.float32), dst,
                              num_segments=n_dst)
    agg_pos = jax.ops.segment_sum(pos_msg, dst, num_segments=n_dst) / jnp.maximum(cnt, 1.0)

    u = _silu(mm(jnp.concatenate([x_dst, agg_node], axis=-1), p["wu1"]) + p["bu1"])
    x_new = mm(u, p["wu2"]) + p["bu2"]
    return x_dst + x_new, pos_dst + agg_pos


def egnn_reference(params, x_a, pos_a, x_g, pos_g, ei_aa, ei_ag, ei_ga, num_layers):
    for _ in range(num_layers):
        x_a, pos_a = _ref_sublayer(params["atom_to_atom"], x_a, pos_a, x_a, pos_a, ei_aa)
        x_g, pos_g = _ref_sublayer(params["atom_to_global_node"], x_a, pos_a, x_g, pos_g, ei_ag)
        x_a, pos_a = _ref_sublayer(params["global_node_to_atom"], x_g, pos_g, x_a, pos_a, ei_ga)
    return x_a, x_g, pos_a, pos_g


# ----------------------------- init (torch-like) ------------------------------

def xavier_normal(key, fan_in, fan_out, gain=1.0):
    std = gain * (2.0 / (fan_in + fan_out)) ** 0.5
    return std * jax.random.normal(key, (fan_in, fan_out), dtype=jnp.float32)


def init_egnn_layer_params(key, node_features, hidden_features, out_features,
                           norm_coors_scale_init=0.01, gain=1.0):
    F, H, O = node_features, hidden_features, out_features
    ks = jax.random.split(key, 6)
    zeros = lambda *s: jnp.zeros(s, jnp.float32)
    return {
        "wm1": xavier_normal(ks[0], 2 * F + 1, H, gain),  # message_net Linear 1
        "bm1": zeros(1, H),
        "wm2": xavier_normal(ks[1], H, H, gain), "bm2": zeros(1, H),
        "wp1": xavier_normal(ks[2], H, H, gain), "bp1": zeros(1, H),
        "wp2": xavier_normal(ks[3], H, 1, gain), "bp2": zeros(1, 1),
        "wu1": xavier_normal(ks[4], F + H, H, gain), "bu1": zeros(1, H),
        "wu2": xavier_normal(ks[5], H, O, gain), "bu2": zeros(1, O),
        "ln_w": jnp.ones((1, F), jnp.float32), "ln_b": zeros(1, F),
        "coors_scale": jnp.full((1, 1), norm_coors_scale_init, jnp.float32),
    }


def init_hetero_params(key, node_features, hidden_features, out_features):
    k_aa, k_ag, k_ga = jax.random.split(key, 3)
    return {
        "atom_to_atom": init_egnn_layer_params(k_aa, node_features, hidden_features, out_features),
        "atom_to_global_node": init_egnn_layer_params(k_ag, node_features, hidden_features, out_features),
        "global_node_to_atom": init_egnn_layer_params(k_ga, node_features, hidden_features, out_features),
    }


if __name__ == "__main__":
    NODE_F = 32
    HIDDEN_F = 32
    OUT_F = 32          # residual=True requires out_features == node_features
    NUM_LAYERS = 2
    N_ATOM = 16
    N_GLOBAL = 2

    key = jax.random.PRNGKey(0)
    k1, k2, k3, k4, kp = jax.random.split(key, 5)
    x_atom = jax.random.normal(k1, (N_ATOM, NODE_F), jnp.float32)
    pos_atom = jax.random.normal(k2, (N_ATOM, POS_DIM), jnp.float32)
    x_global = jax.random.normal(k3, (N_GLOBAL, NODE_F), jnp.float32)
    pos_global = jax.random.normal(k4, (N_GLOBAL, POS_DIM), jnp.float32)

    # atom<->atom: ring graph, each atom receives edges from its two predecessors
    atoms = jnp.arange(N_ATOM, dtype=jnp.int32)
    ei_atom_atom = jnp.stack([
        jnp.concatenate([atoms, atoms]),
        jnp.concatenate([(atoms + 1) % N_ATOM, (atoms + 2) % N_ATOM]),
    ])                                                       # [2, 32]
    # atom -> global node (atom i belongs to graph i // 8), and the reverse
    graph_of_atom = (atoms // (N_ATOM // N_GLOBAL)).astype(jnp.int32)
    ei_atom_global = jnp.stack([atoms, graph_of_atom])       # [2, 16]
    ei_global_atom = jnp.stack([graph_of_atom, atoms])       # [2, 16]

    params = init_hetero_params(kp, NODE_F, HIDDEN_F, OUT_F)

    fwd = jax.jit(functools.partial(egnn_global_node_hetero_forward,
                                    num_layers=NUM_LAYERS))
    outs = fwd(params, x_atom, pos_atom, x_global, pos_global,
               ei_atom_atom, ei_atom_global, ei_global_atom)
    jax.block_until_ready(outs)
    x_atom_o, x_global_o, pos_atom_o, pos_global_o = outs

    assert x_atom_o.shape == (N_ATOM, OUT_F)
    assert x_global_o.shape == (N_GLOBAL, OUT_F)
    assert pos_atom_o.shape == (N_ATOM, POS_DIM)
    assert pos_global_o.shape == (N_GLOBAL, POS_DIM)
    assert bool(jnp.all(jnp.isfinite(x_atom_o)))
    assert bool(jnp.all(jnp.isfinite(x_global_o)))

    # Correctness against the pure-JAX reference of the PyTorch module
    # (tolerance absorbs MXU vs. XLA matmul precision differences).
    refs = egnn_reference(params, x_atom, pos_atom, x_global, pos_global,
                          ei_atom_atom, ei_atom_global, ei_global_atom, NUM_LAYERS)
    for name, o, r in zip(("x_atom", "x_global", "pos_atom", "pos_global"), outs, refs):
        err = float(jnp.max(jnp.abs(o - r)))
        tol = 5e-2 * (float(jnp.max(jnp.abs(r))) + 1.0)
        assert err <= tol, f"{name}: max abs err {err} exceeds tol {tol}"

    print("KERNEL_OK")
</pallas_src>

<mosaic_0001>
module attributes {stable_mosaic.version = 11 : i64} {
  func.func @kernel(%arg0: memref<16x128xf32, #tpu.memory_space<vmem>>, %arg1: memref<2x128xf32, #tpu.memory_space<vmem>>, %arg2: memref<32x16xf32, #tpu.memory_space<vmem>>, %arg3: memref<32x16xf32, #tpu.memory_space<vmem>>, %arg4: memref<16x32xf32, #tpu.memory_space<vmem>>, %arg5: memref<16x1xf32, #tpu.memory_space<vmem>>, %arg6: memref<16x16xf32, #tpu.memory_space<vmem>>, %arg7: memref<16x2xf32, #tpu.memory_space<vmem>>, %arg8: memref<2x16xf32, #tpu.memory_space<vmem>>, %arg9: memref<2x1xf32, #tpu.memory_space<vmem>>, %arg10: memref<16x2xf32, #tpu.memory_space<vmem>>, %arg11: memref<16x16xf32, #tpu.memory_space<vmem>>, %arg12: memref<16x16xf32, #tpu.memory_space<vmem>>, %arg13: memref<16x1xf32, #tpu.memory_space<vmem>>, %arg14: memref<64x32xf32, #tpu.memory_space<vmem>>, %arg15: memref<1x32xf32, #tpu.memory_space<vmem>>, %arg16: memref<1x32xf32, #tpu.memory_space<vmem>>, %arg17: memref<32x32xf32, #tpu.memory_space<vmem>>, %arg18: memref<1x32xf32, #tpu.memory_space<vmem>>, %arg19: memref<32x32xf32, #tpu.memory_space<vmem>>, %arg20: memref<1x32xf32, #tpu.memory_space<vmem>>, %arg21: memref<1x32xf32, #tpu.memory_space<vmem>>, %arg22: memref<1x1xf32, #tpu.memory_space<vmem>>, %arg23: memref<64x32xf32, #tpu.memory_space<vmem>>, %arg24: memref<1x32xf32, #tpu.memory_space<vmem>>, %arg25: memref<32x32xf32, #tpu.memory_space<vmem>>, %arg26: memref<1x32xf32, #tpu.memory_space<vmem>>, %arg27: memref<64x32xf32, #tpu.memory_space<vmem>>, %arg28: memref<1x32xf32, #tpu.memory_space<vmem>>, %arg29: memref<1x32xf32, #tpu.memory_space<vmem>>, %arg30: memref<32x32xf32, #tpu.memory_space<vmem>>, %arg31: memref<1x32xf32, #tpu.memory_space<vmem>>, %arg32: memref<32x32xf32, #tpu.memory_space<vmem>>, %arg33: memref<1x32xf32, #tpu.memory_space<vmem>>, %arg34: memref<1x32xf32, #tpu.memory_space<vmem>>, %arg35: memref<1x1xf32, #tpu.memory_space<vmem>>, %arg36: memref<64x32xf32, #tpu.memory_space<vmem>>, %arg37: memref<1x32xf32, #tpu.memory_space<vmem>>, %arg38: memref<32x32xf32, #tpu.memory_space<vmem>>, %arg39: memref<1x32xf32, #tpu.memory_space<vmem>>, %arg40: memref<64x32xf32, #tpu.memory_space<vmem>>, %arg41: memref<1x32xf32, #tpu.memory_space<vmem>>, %arg42: memref<1x32xf32, #tpu.memory_space<vmem>>, %arg43: memref<32x32xf32, #tpu.memory_space<vmem>>, %arg44: memref<1x32xf32, #tpu.memory_space<vmem>>, %arg45: memref<32x32xf32, #tpu.memory_space<vmem>>, %arg46: memref<1x32xf32, #tpu.memory_space<vmem>>, %arg47: memref<1x32xf32, #tpu.memory_space<vmem>>, %arg48: memref<1x1xf32, #tpu.memory_space<vmem>>, %arg49: memref<64x32xf32, #tpu.memory_space<vmem>>, %arg50: memref<1x32xf32, #tpu.memory_space<vmem>>, %arg51: memref<32x32xf32, #tpu.memory_space<vmem>>, %arg52: memref<1x32xf32, #tpu.memory_space<vmem>>, %arg53: memref<16x128xf32, #tpu.memory_space<vmem>>, %arg54: memref<2x128xf32, #tpu.memory_space<vmem>>, %arg55: memref<32x35xf32, #tpu.memory_space<vmem>>, %arg56: memref<32x35xf32, #tpu.memory_space<vmem>>, %arg57: memref<32x64xf32, #tpu.memory_space<vmem>>, %arg58: memref<32x35xf32, #tpu.memory_space<vmem>>, %arg59: memref<16x35xf32, #tpu.memory_space<vmem>>, %arg60: memref<16x64xf32, #tpu.memory_space<vmem>>) attributes {dimension_semantics = [], scalar_prefetch = 0 : i64, scratch_operands = 6 : i64, tpu.core_type = #tpu.core_type<tc>} {
    %c0 = arith.constant 0 : index
    %c0_0 = arith.constant 0 : index
    %0 = vector.load %arg0[%c0, %c0_0] : memref<16x128xf32, #tpu.memory_space<vmem>>, vector<16x128xf32>
    %c0_1 = arith.constant 0 : index
    %c0_2 = arith.constant 0 : index
    %1 = vector.load %arg53[%c0_1, %c0_2] : memref<16x128xf32, #tpu.memory_space<vmem>>, vector<16x128xf32>
    tpu.vector_store %arg53[%c0_1, %c0_2], %0 {strides = array<i32>} : memref<16x128xf32, #tpu.memory_space<vmem>>, vector<16x128xf32>,
    %c0_3 = arith.constant 0 : index
    %c0_4 = arith.constant 0 : index
    %2 = vector.load %arg1[%c0_3, %c0_4] : memref<2x128xf32, #tpu.memory_space<vmem>>, vector<2x128xf32>
    %c0_5 = arith.constant 0 : index
    %c0_6 = arith.constant 0 : index
    %3 = vector.load %arg54[%c0_5, %c0_6] : memref<2x128xf32, #tpu.memory_space<vmem>>, vector<2x128xf32>
    tpu.vector_store %arg54[%c0_5, %c0_6], %2 {strides = array<i32>} : memref<2x128xf32, #tpu.memory_space<vmem>>, vector<2x128xf32>,
    %c0_i32 = arith.constant 0 : i32
    %c0_7 = arith.constant 0 : index
    %c0_8 = arith.constant 0 : index
    %4 = vector.load %arg2[%c0_7, %c0_8] : memref<32x16xf32, #tpu.memory_space<vmem>>, vector<32x16xf32>
    %c0_9 = arith.constant 0 : index
    %c0_10 = arith.constant 0 : index
    %5 = vector.load %arg53[%c0_9, %c0_10] : memref<16x128xf32, #tpu.memory_space<vmem>>, vector<16x35xf32>
    %cst = arith.constant dense<0.000000e+00> : vector<32x35xf32>
    %6 = tpu.matmul %4, %5, %cst {dimension_numbers = #tpu.dot_dimension_numbers<[1], [0], [0], [1], [0, 0, 1, 1], [], []>} : vector<32x16xf32>, vector<16x35xf32>, vector<32x35xf32> -> vector<32x35xf32>
    %c0_11 = arith.constant 0 : index
    %c0_12 = arith.constant 0 : index
    %7 = vector.load %arg55[%c0_11, %c0_12] : memref<32x35xf32, #tpu.memory_space<vmem>>, vector<32x35xf32>
    tpu.vector_store %arg55[%c0_11, %c0_12], %6 {strides = array<i32>} : memref<32x35xf32, #tpu.memory_space<vmem>>, vector<32x35xf32>,
    %c0_13 = arith.constant 0 : index
    %c0_14 = arith.constant 0 : index
    %8 = vector.load %arg3[%c0_13, %c0_14] : memref<32x16xf32, #tpu.memory_space<vmem>>, vector<32x16xf32>
    %c0_15 = arith.constant 0 : index
    %c0_16 = arith.constant 0 : index
    %9 = vector.load %arg53[%c0_15, %c0_16] : memref<16x128xf32, #tpu.memory_space<vmem>>, vector<16x35xf32>
    %cst_17 = arith.constant dense<0.000000e+00> : vector<32x35xf32>
    %10 = tpu.matmul %8, %9, %cst_17 {dimension_numbers = #tpu.dot_dimension_numbers<[1], [0], [0], [1], [0, 0, 1, 1], [], []>} : vector<32x16xf32>, vector<16x35xf32>, vector<32x35xf32> -> vector<32x35xf32>
    %c0_18 = arith.constant 0 : index
    %c0_19 = arith.constant 0 : index
    %11 = vector.load %arg56[%c0_18, %c0_19] : memref<32x35xf32, #tpu.memory_space<vmem>>, vector<32x35xf32>
    tpu.vector_store %arg56[%c0_18, %c0_19], %10 {strides = array<i32>} : memref<32x35xf32, #tpu.memory_space<vmem>>, vector<32x35xf32>,
    %c0_20 = arith.constant 0 : index
    %c0_21 = arith.constant 0 : index
    %12 = vector.load %arg55[%c0_20, %c0_21] : memref<32x35xf32, #tpu.memory_space<vmem>>, vector<32x32xf32>
    %c0_22 = arith.constant 0 : index
    %c32 = arith.constant 32 : index
    %13 = vector.load %arg55[%c0_22, %c32] : memref<32x35xf32, #tpu.memory_space<vmem>>, vector<32x3xf32>
    %c0_23 = arith.constant 0 : index
    %c0_24 = arith.constant 0 : index
    %14 = vector.load %arg56[%c0_23, %c0_24] : memref<32x35xf32, #tpu.memory_space<vmem>>, vector<32x32xf32>
    %c0_25 = arith.constant 0 : index
    %c32_26 = arith.constant 32 : index
    %15 = vector.load %arg56[%c0_25, %c32_26] : memref<32x35xf32, #tpu.memory_space<vmem>>, vector<32x3xf32>
    %16 = arith.subf %15, %13 : vector<32x3xf32>
    %17 = arith.mulf %16, %16 : vector<32x3xf32>
    %cst_27 = arith.constant dense<0.000000e+00> : vector<32xf32>
    %18 = vector.multi_reduction <add>, %17, %cst_27 [1] : vector<32x3xf32> to vector<32xf32>
    %19 = vector.shape_cast %18 : vector<32xf32> to vector<32x1xf32>
    %20 = math.sqrt %19 : vector<32x1xf32>
    %21 = vector.shape_cast %14 : vector<32x32xf32> to vector<1x32x32xf32>
    %cst_28 = arith.constant dense<0.000000e+00> : vector<1xf32>
    %22 = vector.multi_reduction <add>, %21, %cst_28 [1, 2] : vector<1x32x32xf32> to vector<1xf32>
    %23 = vector.shape_cast %22 : vector<1xf32> to vector<1x1x1xf32>
    %24 = vector.extract %23[0, 0, 0] : f32 from vector<1x1x1xf32>
    %25 = vector.broadcast %24 : f32 to vector<1x1xf32>
    %cst_29 = arith.constant 1.024000e+03 : f32
    %26 = vector.broadcast %cst_29 : f32 to vector<1x1xf32>
    %27 = arith.divf %25, %26 : vector<1x1xf32>
    %28 = vector.broadcast %27 : vector<1x1xf32> to vector<32x32xf32>
    %29 = arith.subf %14, %28 : vector<32x32xf32>
    %30 = arith.mulf %29, %29 : vector<32x32xf32>
    %31 = vector.shape_cast %30 : vector<32x32xf32> to vector<1x32x32xf32>
    %cst_30 = arith.constant dense<0.000000e+00> : vector<1xf32>
    %32 = vector.multi_reduction <add>, %31, %cst_30 [1, 2] : vector<1x32x32xf32> to vector<1xf32>
    %33 = vector.shape_cast %32 : vector<1xf32> to vector<1x1x1xf32>
    %34 = vector.extract %33[0, 0, 0] : f32 from vector<1x1x1xf32>
    %35 = vector.broadcast %34 : f32 to vector<1x1xf32>
    %cst_31 = arith.constant 1.024000e+03 : f32
    %36 = vector.broadcast %cst_31 : f32 to vector<1x1xf32>
    %37 = arith.divf %35, %36 : vector<1x1xf32>
    %38 = math.sqrt %37 : vector<1x1xf32>
    %cst_32 = arith.constant 9.99999974E-6 : f32
    %39 = vector.broadcast %cst_32 : f32 to vector<1x1xf32>
    %40 = arith.addf %38, %39 : vector<1x1xf32>
    %41 = vector.broadcast %40 : vector<1x1xf32> to vector<32x32xf32>
    %42 = arith.divf %29, %41 : vector<32x32xf32>
    %c0_33 = arith.constant 0 : index
    %c0_34 = arith.constant 0 : index
    %43 = vector.load %arg57[%c0_33, %c0_34] : memref<32x64xf32, #tpu.memory_space<vmem>>, vector<32x32xf32>
    tpu.vector_store %arg57[%c0_33, %c0_34], %42 {strides = array<i32>} : memref<32x64xf32, #tpu.memory_space<vmem>>, vector<32x32xf32>,
    %44 = vector.shape_cast %12 : vector<32x32xf32> to vector<1x32x32xf32>
    %cst_35 = arith.constant dense<0.000000e+00> : vector<1xf32>
    %45 = vector.multi_reduction <add>, %44, %cst_35 [1, 2] : vector<1x32x32xf32> to vector<1xf32>
    %46 = vector.shape_cast %45 : vector<1xf32> to vector<1x1x1xf32>
    %47 = vector.extract %46[0, 0, 0] : f32 from vector<1x1x1xf32>
    %48 = vector.broadcast %47 : f32 to vector<1x1xf32>
    %cst_36 = arith.constant 1.024000e+03 : f32
    %49 = vector.broadcast %cst_36 : f32 to vector<1x1xf32>
    %50 = arith.divf %48, %49 : vector<1x1xf32>
    %51 = vector.broadcast %50 : vector<1x1xf32> to vector<32x32xf32>
    %52 = arith.subf %12, %51 : vector<32x32xf32>
    %53 = arith.mulf %52, %52 : vector<32x32xf32>
    %54 = vector.shape_cast %53 : vector<32x32xf32> to vector<1x32x32xf32>
    %cst_37 = arith.constant dense<0.000000e+00> : vector<1xf32>
    %55 = vector.multi_reduction <add>, %54, %cst_37 [1, 2] : vector<1x32x32xf32> to vector<1xf32>
    %56 = vector.shape_cast %55 : vector<1xf32> to vector<1x1x1xf32>
    %57 = vector.extract %56[0, 0, 0] : f32 from vector<1x1x1xf32>
    %58 = vector.broadcast %57 : f32 to vector<1x1xf32>
    %cst_38 = arith.constant 1.024000e+03 : f32
    %59 = vector.broadcast %cst_38 : f32 to vector<1x1xf32>
    %60 = arith.divf %58, %59 : vector<1x1xf32>
    %61 = math.sqrt %60 : vector<1x1xf32>
    %cst_39 = arith.constant 9.99999974E-6 : f32
    %62 = vector.broadcast %cst_39 : f32 to vector<1x1xf32>
    %63 = arith.addf %61, %62 : vector<1x1xf32>
    %64 = vector.broadcast %63 : vector<1x1xf32> to vector<32x32xf32>
    %65 = arith.divf %52, %64 : vector<32x32xf32>
    %c0_40 = arith.constant 0 : index
    %c32_41 = arith.constant 32 : index
    %66 = vector.load %arg57[%c0_40, %c32_41] : memref<32x64xf32, #tpu.memory_space<vmem>>, vector<32x32xf32>
    tpu.vector_store %arg57[%c0_40, %c32_41], %65 {strides = array<i32>} : memref<32x64xf32, #tpu.memory_space<vmem>>, vector<32x32xf32>,
    %c0_42 = arith.constant 0 : index
    %c0_43 = arith.constant 0 : index
    %67 = vector.load %arg57[%c0_42, %c0_43] : memref<32x64xf32, #tpu.memory_space<vmem>>, vector<32x64xf32>
    %c0_44 = arith.constant 0 : index
    %c0_45 = arith.constant 0 : index
    %68 = vector.load %arg14[%c0_44, %c0_45] : memref<64x32xf32, #tpu.memory_space<vmem>>, vector<64x32xf32>
    %cst_46 = arith.constant dense<0.000000e+00> : vector<32x32xf32>
    %69 = tpu.matmul %67, %68, %cst_46 {dimension_numbers = #tpu.dot_dimension_numbers<[1], [0], [0], [1], [0, 0, 1, 1], [], []>} : vector<32x64xf32>, vector<64x32xf32>, vector<32x32xf32> -> vector<32x32xf32>
    %c0_47 = arith.constant 0 : index
    %c0_48 = arith.constant 0 : index
    %70 = vector.load %arg15[%c0_47, %c0_48] : memref<1x32xf32, #tpu.memory_space<vmem>>, vector<1x32xf32>
    %71 = vector.broadcast %20 : vector<32x1xf32> to vector<32x32xf32>
    %72 = vector.broadcast %70 : vector<1x32xf32> to vector<32x32xf32>
    %73 = arith.mulf %71, %72 : vector<32x32xf32>
    %74 = arith.addf %69, %73 : vector<32x32xf32>
    %c0_49 = arith.constant 0 : index
    %c0_50 = arith.constant 0 : index
    %75 = vector.load %arg16[%c0_49, %c0_50] : memref<1x32xf32, #tpu.memory_space<vmem>>, vector<1x32xf32>
    %76 = vector.broadcast %75 : vector<1x32xf32> to vector<32x32xf32>
    %77 = arith.addf %74, %76 : vector<32x32xf32>
    %78 = arith.negf %77 : vector<32x32xf32>
    %79 = math.exp %78 : vector<32x32xf32>
    %cst_51 = arith.constant 1.000000e+00 : f32
    %80 = vector.broadcast %cst_51 : f32 to vector<32x32xf32>
    %81 = arith.addf %80, %79 : vector<32x32xf32>
    %82 = arith.divf %80, %81 : vector<32x32xf32>
    %83 = arith.mulf %77, %82 : vector<32x32xf32>
    %c0_52 = arith.constant 0 : index
    %c0_53 = arith.constant 0 : index
    %84 = vector.load %arg17[%c0_52, %c0_53] : memref<32x32xf32, #tpu.memory_space<vmem>>, vector<32x32xf32>
    %cst_54 = arith.constant dense<0.000000e+00> : vector<32x32xf32>
    %85 = tpu.matmul %83, %84, %cst_54 {dimension_numbers = #tpu.dot_dimension_numbers<[1], [0], [0], [1], [0, 0, 1, 1], [], []>} : vector<32x32xf32>, vector<32x32xf32>, vector<32x32xf32> -> vector<32x32xf32>
    %c0_55 = arith.constant 0 : index
    %c0_56 = arith.constant 0 : index
    %86 = vector.load %arg18[%c0_55, %c0_56] : memref<1x32xf32, #tpu.memory_space<vmem>>, vector<1x32xf32>
    %87 = vector.broadcast %86 : vector<1x32xf32> to vector<32x32xf32>
    %88 = arith.addf %85, %87 : vector<32x32xf32>
    %c0_57 = arith.constant 0 : index
    %c0_58 = arith.constant 0 : index
    %89 = vector.load %arg19[%c0_57, %c0_58] : memref<32x32xf32, #tpu.memory_space<vmem>>, vector<32x32xf32>
    %cst_59 = arith.constant dense<0.000000e+00> : vector<32x32xf32>
    %90 = tpu.matmul %88, %89, %cst_59 {dimension_numbers = #tpu.dot_dimension_numbers<[1], [0], [0], [1], [0, 0, 1, 1], [], []>} : vector<32x32xf32>, vector<32x32xf32>, vector<32x32xf32> -> vector<32x32xf32>
    %c0_60 = arith.constant 0 : index
    %c0_61 = arith.constant 0 : index
    %91 = vector.load %arg20[%c0_60, %c0_61] : memref<1x32xf32, #tpu.memory_space<vmem>>, vector<1x32xf32>
    %92 = vector.broadcast %91 : vector<1x32xf32> to vector<32x32xf32>
    %93 = arith.addf %90, %92 : vector<32x32xf32>
    %94 = arith.negf %93 : vector<32x32xf32>
    %95 = math.exp %94 : vector<32x32xf32>
    %cst_62 = arith.constant 1.000000e+00 : f32
    %96 = vector.broadcast %cst_62 : f32 to vector<32x32xf32>
    %97 = arith.addf %96, %95 : vector<32x32xf32>
    %98 = arith.divf %96, %97 : vector<32x32xf32>
    %99 = arith.mulf %93, %98 : vector<32x32xf32>
    %c0_63 = arith.constant 0 : index
    %c0_64 = arith.constant 0 : index
    %100 = vector.load %arg21[%c0_63, %c0_64] : memref<1x32xf32, #tpu.memory_space<vmem>>, vector<1x32xf32>
    %101 = vector.broadcast %100 : vector<1x32xf32> to vector<32x32xf32>
    %102 = arith.mulf %99, %101 : vector<32x32xf32>
    %cst_65 = arith.constant dense<0.000000e+00> : vector<32xf32>
    %103 = vector.multi_reduction <add>, %102, %cst_65 [1] : vector<32x32xf32> to vector<32xf32>
    %104 = vector.shape_cast %103 : vector<32xf32> to vector<32x1xf32>
    %c0_66 = arith.constant 0 : index
    %c0_67 = arith.constant 0 : index
    %105 = vector.load %arg22[%c0_66, %c0_67] : memref<1x1xf32, #tpu.memory_space<vmem>>, vector<1x1xf32>
    %106 = vector.broadcast %105 : vector<1x1xf32> to vector<32x1xf32>
    %107 = arith.addf %104, %106 : vector<32x1xf32>
    %cst_68 = arith.constant 9.99999993E-9 : f32
    %108 = vector.broadcast %cst_68 : f32 to vector<32x1xf32>
    %109 = arith.maximumf %20, %108 : vector<32x1xf32>
    %110 = vector.broadcast %109 : vector<32x1xf32> to vector<32x3xf32>
    %111 = arith.divf %16, %110 : vector<32x3xf32>
    %112 = vector.broadcast %107 : vector<32x1xf32> to vector<32x3xf32>
    %113 = arith.mulf %111, %112 : vector<32x3xf32>
    %c0_69 = arith.constant 0 : index
    %c0_70 = arith.constant 0 : index
    %114 = vector.load %arg58[%c0_69, %c0_70] : memref<32x35xf32, #tpu.memory_space<vmem>>, vector<32x32xf32>
    tpu.vector_store %arg58[%c0_69, %c0_70], %88 {strides = array<i32>} : memref<32x35xf32, #tpu.memory_space<vmem>>, vector<32x32xf32>,
    %c0_71 = arith.constant 0 : index
    %c32_72 = arith.constant 32 : index
    %115 = vector.load %arg58[%c0_71, %c32_72] : memref<32x35xf32, #tpu.memory_space<vmem>>, vector<32x3xf32>
    tpu.vector_store %arg58[%c0_71, %c32_72], %113 {strides = array<i32>} : memref<32x35xf32, #tpu.memory_space<vmem>>, vector<32x3xf32>,
    %c0_73 = arith.constant 0 : index
    %c0_74 = arith.constant 0 : index
    %116 = vector.load %arg4[%c0_73, %c0_74] : memref<16x32xf32, #tpu.memory_space<vmem>>, vector<16x32xf32>
    %c0_75 = arith.constant 0 : index
    %c0_76 = arith.constant 0 : index
    %117 = vector.load %arg58[%c0_75, %c0_76] : memref<32x35xf32, #tpu.memory_space<vmem>>, vector<32x35xf32>
    %cst_77 = arith.constant dense<0.000000e+00> : vector<16x35xf32>
    %118 = tpu.matmul %116, %117, %cst_77 {dimension_numbers = #tpu.dot_dimension_numbers<[1], [0], [0], [1], [0, 0, 1, 1], [], []>} : vector<16x32xf32>, vector<32x35xf32>, vector<16x35xf32> -> vector<16x35xf32>
    %c0_78 = arith.constant 0 : index
    %c0_79 = arith.constant 0 : index
    %119 = vector.load %arg59[%c0_78, %c0_79] : memref<16x35xf32, #tpu.memory_space<vmem>>, vector<16x35xf32>
    tpu.vector_store %arg59[%c0_78, %c0_79], %118 {strides = array<i32>} : memref<16x35xf32, #tpu.memory_space<vmem>>, vector<16x35xf32>,
    %c0_80 = arith.constant 0 : index
    %c0_81 = arith.constant 0 : index
    %120 = vector.load %arg59[%c0_80, %c0_81] : memref<16x35xf32, #tpu.memory_space<vmem>>, vector<16x32xf32>
    %c0_82 = arith.constant 0 : index
    %c32_83 = arith.constant 32 : index
    %121 = vector.load %arg59[%c0_82, %c32_83] : memref<16x35xf32, #tpu.memory_space<vmem>>, vector<16x3xf32>
    %c0_84 = arith.constant 0 : index
    %c0_85 = arith.constant 0 : index
    %122 = vector.load %arg5[%c0_84, %c0_85] : memref<16x1xf32, #tpu.memory_space<vmem>>, vector<16x1xf32>
    %123 = vector.broadcast %122 : vector<16x1xf32> to vector<16x3xf32>
    %124 = arith.mulf %121, %123 : vector<16x3xf32>
    %c0_86 = arith.constant 0 : index
    %c0_87 = arith.constant 0 : index
    %125 = vector.load %arg53[%c0_86, %c0_87] : memref<16x128xf32, #tpu.memory_space<vmem>>, vector<16x32xf32>
    %c0_88 = arith.constant 0 : index
    %c32_89 = arith.constant 32 : index
    %126 = vector.load %arg53[%c0_88, %c32_89] : memref<16x128xf32, #tpu.memory_space<vmem>>, vector<16x3xf32>
    %c0_90 = arith.constant 0 : index
    %c0_91 = arith.constant 0 : index
    %127 = vector.load %arg60[%c0_90, %c0_91] : memref<16x64xf32, #tpu.memory_space<vmem>>, vector<16x32xf32>
    tpu.vector_store %arg60[%c0_90, %c0_91], %125 {strides = array<i32>} : memref<16x64xf32, #tpu.memory_space<vmem>>, vector<16x32xf32>,
    %c0_92 = arith.constant 0 : index
    %c32_93 = arith.constant 32 : index
    %128 = vector.load %arg60[%c0_92, %c32_93] : memref<16x64xf32, #tpu.memory_space<vmem>>, vector<16x32xf32>
    tpu.vector_store %arg60[%c0_92, %c32_93], %120 {strides = array<i32>} : memref<16x64xf32, #tpu.memory_space<vmem>>, vector<16x32xf32>,
    %c0_94 = arith.constant 0 : index
    %c0_95 = arith.constant 0 : index
    %129 = vector.load %arg60[%c0_94, %c0_95] : memref<16x64xf32, #tpu.memory_space<vmem>>, vector<16x64xf32>
    %c0_96 = arith.constant 0 : index
    %c0_97 = arith.constant 0 : index
    %130 = vector.load %arg23[%c0_96, %c0_97] : memref<64x32xf32, #tpu.memory_space<vmem>>, vector<64x32xf32>
    %cst_98 = arith.constant dense<0.000000e+00> : vector<16x32xf32>
    %131 = tpu.matmul %129, %130, %cst_98 {dimension_numbers = #tpu.dot_dimension_numbers<[1], [0], [0], [1], [0, 0, 1, 1], [], []>} : vector<16x64xf32>, vector<64x32xf32>, vector<16x32xf32> -> vector<16x32xf32>
    %c0_99 = arith.constant 0 : index
    %c0_100 = arith.constant 0 : index
    %132 = vector.load %arg24[%c0_99, %c0_100] : memref<1x32xf32, #tpu.memory_space<vmem>>, vector<1x32xf32>
    %133 = vector.broadcast %132 : vector<1x32xf32> to vector<16x32xf32>
    %134 = arith.addf %131, %133 : vector<16x32xf32>
    %135 = arith.negf %134 : vector<16x32xf32>
    %136 = math.exp %135 : vector<16x32xf32>
    %cst_101 = arith.constant 1.000000e+00 : f32
    %137 = vector.broadcast %cst_101 : f32 to vector<16x32xf32>
    %138 = arith.addf %137, %136 : vector<16x32xf32>
    %139 = arith.divf %137, %138 : vector<16x32xf32>
    %140 = arith.mulf %134, %139 : vector<16x32xf32>
    %c0_102 = arith.constant 0 : index
    %c0_103 = arith.constant 0 : index
    %141 = vector.load %arg25[%c0_102, %c0_103] : memref<32x32xf32, #tpu.memory_space<vmem>>, vector<32x32xf32>
    %cst_104 = arith.constant dense<0.000000e+00> : vector<16x32xf32>
    %142 = tpu.matmul %140, %141, %cst_104 {dimension_numbers = #tpu.dot_dimension_numbers<[1], [0], [0], [1], [0, 0, 1, 1], [], []>} : vector<16x32xf32>, vector<32x32xf32>, vector<16x32xf32> -> vector<16x32xf32>
    %c0_105 = arith.constant 0 : index
    %c0_106 = arith.constant 0 : index
    %143 = vector.load %arg26[%c0_105, %c0_106] : memref<1x32xf32, #tpu.memory_space<vmem>>, vector<1x32xf32>
    %144 = vector.broadcast %143 : vector<1x32xf32> to vector<16x32xf32>
    %145 = arith.addf %142, %144 : vector<16x32xf32>
    %146 = arith.addf %125, %145 : vector<16x32xf32>
    %c0_107 = arith.constant 0 : index
    %c0_108 = arith.constant 0 : index
    %147 = vector.load %arg53[%c0_107, %c0_108] : memref<16x128xf32, #tpu.memory_space<vmem>>, vector<16x32xf32>
    tpu.vector_store %arg53[%c0_107, %c0_108], %146 {strides = array<i32>} : memref<16x128xf32, #tpu.memory_space<vmem>>, vector<16x32xf32>,
    %148 = arith.addf %126, %124 : vector<16x3xf32>
    %c0_109 = arith.constant 0 : index
    %c32_110 = arith.constant 32 : index
    %149 = vector.load %arg53[%c0_109, %c32_110] : memref<16x128xf32, #tpu.memory_space<vmem>>, vector<16x3xf32>
    tpu.vector_store %arg53[%c0_109, %c32_110], %148 {strides = array<i32>} : memref<16x128xf32, #tpu.memory_space<vmem>>, vector<16x3xf32>,
    %c0_111 = arith.constant 0 : index
    %c0_112 = arith.constant 0 : index
    %150 = vector.load %arg6[%c0_111, %c0_112] : memref<16x16xf32, #tpu.memory_space<vmem>>, vector<16x16xf32>
    %c0_113 = arith.constant 0 : index
    %c0_114 = arith.constant 0 : index
    %151 = vector.load %arg53[%c0_113, %c0_114] : memref<16x128xf32, #tpu.memory_space<vmem>>, vector<16x35xf32>
    %cst_115 = arith.constant dense<0.000000e+00> : vector<16x35xf32>
    %152 = tpu.matmul %150, %151, %cst_115 {dimension_numbers = #tpu.dot_dimension_numbers<[1], [0], [0], [1], [0, 0, 1, 1], [], []>} : vector<16x16xf32>, vector<16x35xf32>, vector<16x35xf32> -> vector<16x35xf32>
    %c0_116 = arith.constant 0 : index
    %c0_117 = arith.constant 0 : index
    %153 = vector.load %arg55[%c0_116, %c0_117] : memref<32x35xf32, #tpu.memory_space<vmem>>, vector<16x35xf32>
    tpu.vector_store %arg55[%c0_116, %c0_117], %152 {strides = array<i32>} : memref<32x35xf32, #tpu.memory_space<vmem>>, vector<16x35xf32>,
    %c0_118 = arith.constant 0 : index
    %c0_119 = arith.constant 0 : index
    %154 = vector.load %arg7[%c0_118, %c0_119] : memref<16x2xf32, #tpu.memory_space<vmem>>, vector<16x2xf32>
    %c0_120 = arith.constant 0 : index
    %c0_121 = arith.constant 0 : index
    %155 = vector.load %arg54[%c0_120, %c0_121] : memref<2x128xf32, #tpu.memory_space<vmem>>, vector<2x35xf32>
    %cst_122 = arith.constant dense<0.000000e+00> : vector<16x35xf32>
    %156 = tpu.matmul %154, %155, %cst_122 {dimension_numbers = #tpu.dot_dimension_numbers<[1], [0], [0], [1], [0, 0, 1, 1], [], []>} : vector<16x2xf32>, vector<2x35xf32>, vector<16x35xf32> -> vector<16x35xf32>
    %c0_123 = arith.constant 0 : index
    %c0_124 = arith.constant 0 : index
    %157 = vector.load %arg56[%c0_123, %c0_124] : memref<32x35xf32, #tpu.memory_space<vmem>>, vector<16x35xf32>
    tpu.vector_store %arg56[%c0_123, %c0_124], %156 {strides = array<i32>} : memref<32x35xf32, #tpu.memory_space<vmem>>, vector<16x35xf32>,
    %c0_125 = arith.constant 0 : index
    %c0_126 = arith.constant 0 : index
    %158 = vector.load %arg55[%c0_125, %c0_126] : memref<32x35xf32, #tpu.memory_space<vmem>>, vector<16x32xf32>
    %c0_127 = arith.constant 0 : index
    %c32_128 = arith.constant 32 : index
    %159 = vector.load %arg55[%c0_127, %c32_128] : memref<32x35xf32, #tpu.memory_space<vmem>>, vector<16x3xf32>
    %c0_129 = arith.constant 0 : index
    %c0_130 = arith.constant 0 : index
    %160 = vector.load %arg56[%c0_129, %c0_130] : memref<32x35xf32, #tpu.memory_space<vmem>>, vector<16x32xf32>
    %c0_131 = arith.constant 0 : index
    %c32_132 = arith.constant 32 : index
    %161 = vector.load %arg56[%c0_131, %c32_132] : memref<32x35xf32, #tpu.memory_space<vmem>>, vector<16x3xf32>
    %162 = arith.subf %161, %159 : vector<16x3xf32>
    %163 = arith.mulf %162, %162 : vector<16x3xf32>
    %cst_133 = arith.constant dense<0.000000e+00> : vector<16xf32>
    %164 = vector.multi_reduction <add>, %163, %cst_133 [1] : vector<16x3xf32> to vector<16xf32>
    %165 = vector.shape_cast %164 : vector<16xf32> to vector<16x1xf32>
    %166 = math.sqrt %165 : vector<16x1xf32>
    %167 = vector.shape_cast %160 : vector<16x32xf32> to vector<1x16x32xf32>
    %cst_134 = arith.constant dense<0.000000e+00> : vector<1xf32>
    %168 = vector.multi_reduction <add>, %167, %cst_134 [1, 2] : vector<1x16x32xf32> to vector<1xf32>
    %169 = vector.shape_cast %168 : vector<1xf32> to vector<1x1x1xf32>
    %170 = vector.extract %169[0, 0, 0] : f32 from vector<1x1x1xf32>
    %171 = vector.broadcast %170 : f32 to vector<1x1xf32>
    %cst_135 = arith.constant 5.120000e+02 : f32
    %172 = vector.broadcast %cst_135 : f32 to vector<1x1xf32>
    %173 = arith.divf %171, %172 : vector<1x1xf32>
    %174 = vector.broadcast %173 : vector<1x1xf32> to vector<16x32xf32>
    %175 = arith.subf %160, %174 : vector<16x32xf32>
    %176 = arith.mulf %175, %175 : vector<16x32xf32>
    %177 = vector.shape_cast %176 : vector<16x32xf32> to vector<1x16x32xf32>
    %cst_136 = arith.constant dense<0.000000e+00> : vector<1xf32>
    %178 = vector.multi_reduction <add>, %177, %cst_136 [1, 2] : vector<1x16x32xf32> to vector<1xf32>
    %179 = vector.shape_cast %178 : vector<1xf32> to vector<1x1x1xf32>
    %180 = vector.extract %179[0, 0, 0] : f32 from vector<1x1x1xf32>
    %181 = vector.broadcast %180 : f32 to vector<1x1xf32>
    %cst_137 = arith.constant 5.120000e+02 : f32
    %182 = vector.broadcast %cst_137 : f32 to vector<1x1xf32>
    %183 = arith.divf %181, %182 : vector<1x1xf32>
    %184 = math.sqrt %183 : vector<1x1xf32>
    %cst_138 = arith.constant 9.99999974E-6 : f32
    %185 = vector.broadcast %cst_138 : f32 to vector<1x1xf32>
    %186 = arith.addf %184, %185 : vector<1x1xf32>
    %187 = vector.broadcast %186 : vector<1x1xf32> to vector<16x32xf32>
    %188 = arith.divf %175, %187 : vector<16x32xf32>
    %c0_139 = arith.constant 0 : index
    %c0_140 = arith.constant 0 : index
    %189 = vector.load %arg57[%c0_139, %c0_140] : memref<32x64xf32, #tpu.memory_space<vmem>>, vector<16x32xf32>
    tpu.vector_store %arg57[%c0_139, %c0_140], %188 {strides = array<i32>} : memref<32x64xf32, #tpu.memory_space<vmem>>, vector<16x32xf32>,
    %190 = vector.shape_cast %158 : vector<16x32xf32> to vector<1x16x32xf32>
    %cst_141 = arith.constant dense<0.000000e+00> : vector<1xf32>
    %191 = vector.multi_reduction <add>, %190, %cst_141 [1, 2] : vector<1x16x32xf32> to vector<1xf32>
    %192 = vector.shape_cast %191 : vector<1xf32> to vector<1x1x1xf32>
    %193 = vector.extract %192[0, 0, 0] : f32 from vector<1x1x1xf32>
    %194 = vector.broadcast %193 : f32 to vector<1x1xf32>
    %cst_142 = arith.constant 5.120000e+02 : f32
    %195 = vector.broadcast %cst_142 : f32 to vector<1x1xf32>
    %196 = arith.divf %194, %195 : vector<1x1xf32>
    %197 = vector.broadcast %196 : vector<1x1xf32> to vector<16x32xf32>
    %198 = arith.subf %158, %197 : vector<16x32xf32>
    %199 = arith.mulf %198, %198 : vector<16x32xf32>
    %200 = vector.shape_cast %199 : vector<16x32xf32> to vector<1x16x32xf32>
    %cst_143 = arith.constant dense<0.000000e+00> : vector<1xf32>
    %201 = vector.multi_reduction <add>, %200, %cst_143 [1, 2] : vector<1x16x32xf32> to vector<1xf32>
    %202 = vector.shape_cast %201 : vector<1xf32> to vector<1x1x1xf32>
    %203 = vector.extract %202[0, 0, 0] : f32 from vector<1x1x1xf32>
    %204 = vector.broadcast %203 : f32 to vector<1x1xf32>
    %cst_144 = arith.constant 5.120000e+02 : f32
    %205 = vector.broadcast %cst_144 : f32 to vector<1x1xf32>
    %206 = arith.divf %204, %205 : vector<1x1xf32>
    %207 = math.sqrt %206 : vector<1x1xf32>
    %cst_145 = arith.constant 9.99999974E-6 : f32
    %208 = vector.broadcast %cst_145 : f32 to vector<1x1xf32>
    %209 = arith.addf %207, %208 : vector<1x1xf32>
    %210 = vector.broadcast %209 : vector<1x1xf32> to vector<16x32xf32>
    %211 = arith.divf %198, %210 : vector<16x32xf32>
    %c0_146 = arith.constant 0 : index
    %c32_147 = arith.constant 32 : index
    %212 = vector.load %arg57[%c0_146, %c32_147] : memref<32x64xf32, #tpu.memory_space<vmem>>, vector<16x32xf32>
    tpu.vector_store %arg57[%c0_146, %c32_147], %211 {strides = array<i32>} : memref<32x64xf32, #tpu.memory_space<vmem>>, vector<16x32xf32>,
    %c0_148 = arith.constant 0 : index
    %c0_149 = arith.constant 0 : index
    %213 = vector.load %arg57[%c0_148, %c0_149] : memref<32x64xf32, #tpu.memory_space<vmem>>, vector<16x64xf32>
    %c0_150 = arith.constant 0 : index
    %c0_151 = arith.constant 0 : index
    %214 = vector.load %arg27[%c0_150, %c0_151] : memref<64x32xf32, #tpu.memory_space<vmem>>, vector<64x32xf32>
    %cst_152 = arith.constant dense<0.000000e+00> : vector<16x32xf32>
    %215 = tpu.matmul %213, %214, %cst_152 {dimension_numbers = #tpu.dot_dimension_numbers<[1], [0], [0], [1], [0, 0, 1, 1], [], []>} : vector<16x64xf32>, vector<64x32xf32>, vector<16x32xf32> -> vector<16x32xf32>
    %c0_153 = arith.constant 0 : index
    %c0_154 = arith.constant 0 : index
    %216 = vector.load %arg28[%c0_153, %c0_154] : memref<1x32xf32, #tpu.memory_space<vmem>>, vector<1x32xf32>
    %217 = vector.broadcast %166 : vector<16x1xf32> to vector<16x32xf32>
    %218 = vector.broadcast %216 : vector<1x32xf32> to vector<16x32xf32>
    %219 = arith.mulf %217, %218 : vector<16x32xf32>
    %220 = arith.addf %215, %219 : vector<16x32xf32>
    %c0_155 = arith.constant 0 : index
    %c0_156 = arith.constant 0 : index
    %221 = vector.load %arg29[%c0_155, %c0_156] : memref<1x32xf32, #tpu.memory_space<vmem>>, vector<1x32xf32>
    %222 = vector.broadcast %221 : vector<1x32xf32> to vector<16x32xf32>
    %223 = arith.addf %220, %222 : vector<16x32xf32>
    %224 = arith.negf %223 : vector<16x32xf32>
    %225 = math.exp %224 : vector<16x32xf32>
    %cst_157 = arith.constant 1.000000e+00 : f32
    %226 = vector.broadcast %cst_157 : f32 to vector<16x32xf32>
    %227 = arith.addf %226, %225 : vector<16x32xf32>
    %228 = arith.divf %226, %227 : vector<16x32xf32>
    %229 = arith.mulf %223, %228 : vector<16x32xf32>
    %c0_158 = arith.constant 0 : index
    %c0_159 = arith.constant 0 : index
    %230 = vector.load %arg30[%c0_158, %c0_159] : memref<32x32xf32, #tpu.memory_space<vmem>>, vector<32x32xf32>
    %cst_160 = arith.constant dense<0.000000e+00> : vector<16x32xf32>
    %231 = tpu.matmul %229, %230, %cst_160 {dimension_numbers = #tpu.dot_dimension_numbers<[1], [0], [0], [1], [0, 0, 1, 1], [], []>} : vector<16x32xf32>, vector<32x32xf32>, vector<16x32xf32> -> vector<16x32xf32>
    %c0_161 = arith.constant 0 : index
    %c0_162 = arith.constant 0 : index
    %232 = vector.load %arg31[%c0_161, %c0_162] : memref<1x32xf32, #tpu.memory_space<vmem>>, vector<1x32xf32>
    %233 = vector.broadcast %232 : vector<1x32xf32> to vector<16x32xf32>
    %234 = arith.addf %231, %233 : vector<16x32xf32>
    %c0_163 = arith.constant 0 : index
    %c0_164 = arith.constant 0 : index
    %235 = vector.load %arg32[%c0_163, %c0_164] : memref<32x32xf32, #tpu.memory_space<vmem>>, vector<32x32xf32>
    %cst_165 = arith.constant dense<0.000000e+00> : vector<16x32xf32>
    %236 = tpu.matmul %234, %235, %cst_165 {dimension_numbers = #tpu.dot_dimension_numbers<[1], [0], [0], [1], [0, 0, 1, 1], [], []>} : vector<16x32xf32>, vector<32x32xf32>, vector<16x32xf32> -> vector<16x32xf32>
    %c0_166 = arith.constant 0 : index
    %c0_167 = arith.constant 0 : index
    %237 = vector.load %arg33[%c0_166, %c0_167] : memref<1x32xf32, #tpu.memory_space<vmem>>, vector<1x32xf32>
    %238 = vector.broadcast %237 : vector<1x32xf32> to vector<16x32xf32>
    %239 = arith.addf %236, %238 : vector<16x32xf32>
    %240 = arith.negf %239 : vector<16x32xf32>
    %241 = math.exp %240 : vector<16x32xf32>
    %cst_168 = arith.constant 1.000000e+00 : f32
    %242 = vector.broadcast %cst_168 : f32 to vector<16x32xf32>
    %243 = arith.addf %242, %241 : vector<16x32xf32>
    %244 = arith.divf %242, %243 : vector<16x32xf32>
    %245 = arith.mulf %239, %244 : vector<16x32xf32>
    %c0_169 = arith.constant 0 : index
    %c0_170 = arith.constant 0 : index
    %246 = vector.load %arg34[%c0_169, %c0_170] : memref<1x32xf32, #tpu.memory_space<vmem>>, vector<1x32xf32>
    %247 = vector.broadcast %246 : vector<1x32xf32> to vector<16x32xf32>
    %248 = arith.mulf %245, %247 : vector<16x32xf32>
    %cst_171 = arith.constant dense<0.000000e+00> : vector<16xf32>
    %249 = vector.multi_reduction <add>, %248, %cst_171 [1] : vector<16x32xf32> to vector<16xf32>
    %250 = vector.shape_cast %249 : vector<16xf32> to vector<16x1xf32>
    %c0_172 = arith.constant 0 : index
    %c0_173 = arith.constant 0 : index
    %251 = vector.load %arg35[%c0_172, %c0_173] : memref<1x1xf32, #tpu.memory_space<vmem>>, vector<1x1xf32>
    %252 = vector.broadcast %251 : vector<1x1xf32> to vector<16x1xf32>
    %253 = arith.addf %250, %252 : vector<16x1xf32>
    %cst_174 = arith.constant 9.99999993E-9 : f32
    %254 = vector.broadcast %cst_174 : f32 to vector<16x1xf32>
    %255 = arith.maximumf %166, %254 : vector<16x1xf32>
    %256 = vector.broadcast %255 : vector<16x1xf32> to vector<16x3xf32>
    %257 = arith.divf %162, %256 : vector<16x3xf32>
    %258 = vector.broadcast %253 : vector<16x1xf32> to vector<16x3xf32>
    %259 = arith.mulf %257, %258 : vector<16x3xf32>
    %c0_175 = arith.constant 0 : index
    %c0_176 = arith.constant 0 : index
    %260 = vector.load %arg58[%c0_175, %c0_176] : memref<32x35xf32, #tpu.memory_space<vmem>>, vector<16x32xf32>
    tpu.vector_store %arg58[%c0_175, %c0_176], %234 {strides = array<i32>} : memref<32x35xf32, #tpu.memory_space<vmem>>, vector<16x32xf32>,
    %c0_177 = arith.constant 0 : index
    %c32_178 = arith.constant 32 : index
    %261 = vector.load %arg58[%c0_177, %c32_178] : memref<32x35xf32, #tpu.memory_space<vmem>>, vector<16x3xf32>
    tpu.vector_store %arg58[%c0_177, %c32_178], %259 {strides = array<i32>} : memref<32x35xf32, #tpu.memory_space<vmem>>, vector<16x3xf32>,
    %c0_179 = arith.constant 0 : index
    %c0_180 = arith.constant 0 : index
    %262 = vector.load %arg8[%c0_179, %c0_180] : memref<2x16xf32, #tpu.memory_space<vmem>>, vector<2x16xf32>
    %c0_181 = arith.constant 0 : index
    %c0_182 = arith.constant 0 : index
    %263 = vector.load %arg58[%c0_181, %c0_182] : memref<32x35xf32, #tpu.memory_space<vmem>>, vector<16x35xf32>
    %cst_183 = arith.constant dense<0.000000e+00> : vector<2x35xf32>
    %264 = tpu.matmul %262, %263, %cst_183 {dimension_numbers = #tpu.dot_dimension_numbers<[1], [0], [0], [1], [0, 0, 1, 1], [], []>} : vector<2x16xf32>, vector<16x35xf32>, vector<2x35xf32> -> vector<2x35xf32>
    %c0_184 = arith.constant 0 : index
    %c0_185 = arith.constant 0 : index
    %265 = vector.load %arg59[%c0_184, %c0_185] : memref<16x35xf32, #tpu.memory_space<vmem>>, vector<2x35xf32>
    tpu.vector_store %arg59[%c0_184, %c0_185], %264 {strides = array<i32>} : memref<16x35xf32, #tpu.memory_space<vmem>>, vector<2x35xf32>,
    %c0_186 = arith.constant 0 : index
    %c0_187 = arith.constant 0 : index
    %266 = vector.load %arg59[%c0_186, %c0_187] : memref<16x35xf32, #tpu.memory_space<vmem>>, vector<2x32xf32>
    %c0_188 = arith.constant 0 : index
    %c32_189 = arith.constant 32 : index
    %267 = vector.load %arg59[%c0_188, %c32_189] : memref<16x35xf32, #tpu.memory_space<vmem>>, vector<2x3xf32>
    %c0_190 = arith.constant 0 : index
    %c0_191 = arith.constant 0 : index
    %268 = vector.load %arg9[%c0_190, %c0_191] : memref<2x1xf32, #tpu.memory_space<vmem>>, vector<2x1xf32>
    %269 = vector.broadcast %268 : vector<2x1xf32> to vector<2x3xf32>
    %270 = arith.mulf %267, %269 : vector<2x3xf32>
    %c0_192 = arith.constant 0 : index
    %c0_193 = arith.constant 0 : index
    %271 = vector.load %arg54[%c0_192, %c0_193] : memref<2x128xf32, #tpu.memory_space<vmem>>, vector<2x32xf32>
    %c0_194 = arith.constant 0 : index
    %c32_195 = arith.constant 32 : index
    %272 = vector.load %arg54[%c0_194, %c32_195] : memref<2x128xf32, #tpu.memory_space<vmem>>, vector<2x3xf32>
    %c0_196 = arith.constant 0 : index
    %c0_197 = arith.constant 0 : index
    %273 = vector.load %arg60[%c0_196, %c0_197] : memref<16x64xf32, #tpu.memory_space<vmem>>, vector<2x32xf32>
    tpu.vector_store %arg60[%c0_196, %c0_197], %271 {strides = array<i32>} : memref<16x64xf32, #tpu.memory_space<vmem>>, vector<2x32xf32>,
    %c0_198 = arith.constant 0 : index
    %c32_199 = arith.constant 32 : index
    %274 = vector.load %arg60[%c0_198, %c32_199] : memref<16x64xf32, #tpu.memory_space<vmem>>, vector<2x32xf32>
    tpu.vector_store %arg60[%c0_198, %c32_199], %266 {strides = array<i32>} : memref<16x64xf32, #tpu.memory_space<vmem>>, vector<2x32xf32>,
    %c0_200 = arith.constant 0 : index
    %c0_201 = arith.constant 0 : index
    %275 = vector.load %arg60[%c0_200, %c0_201] : memref<16x64xf32, #tpu.memory_space<vmem>>, vector<2x64xf32>
    %c0_202 = arith.constant 0 : index
    %c0_203 = arith.constant 0 : index
    %276 = vector.load %arg36[%c0_202, %c0_203] : memref<64x32xf32, #tpu.memory_space<vmem>>, vector<64x32xf32>
    %cst_204 = arith.constant dense<0.000000e+00> : vector<2x32xf32>
    %277 = tpu.matmul %275, %276, %cst_204 {dimension_numbers = #tpu.dot_dimension_numbers<[1], [0], [0], [1], [0, 0, 1, 1], [], []>} : vector<2x64xf32>, vector<64x32xf32>, vector<2x32xf32> -> vector<2x32xf32>
    %c0_205 = arith.constant 0 : index
    %c0_206 = arith.constant 0 : index
    %278 = vector.load %arg37[%c0_205, %c0_206] : memref<1x32xf32, #tpu.memory_space<vmem>>, vector<1x32xf32>
    %279 = vector.broadcast %278 : vector<1x32xf32> to vector<2x32xf32>
    %280 = arith.addf %277, %279 : vector<2x32xf32>
    %281 = arith.negf %280 : vector<2x32xf32>
    %282 = math.exp %281 : vector<2x32xf32>
    %cst_207 = arith.constant 1.000000e+00 : f32
    %283 = vector.broadcast %cst_207 : f32 to vector<2x32xf32>
    %284 = arith.addf %283, %282 : vector<2x32xf32>
    %285 = arith.divf %283, %284 : vector<2x32xf32>
    %286 = arith.mulf %280, %285 : vector<2x32xf32>
    %c0_208 = arith.constant 0 : index
    %c0_209 = arith.constant 0 : index
    %287 = vector.load %arg38[%c0_208, %c0_209] : memref<32x32xf32, #tpu.memory_space<vmem>>, vector<32x32xf32>
    %cst_210 = arith.constant dense<0.000000e+00> : vector<2x32xf32>
    %288 = tpu.matmul %286, %287, %cst_210 {dimension_numbers = #tpu.dot_dimension_numbers<[1], [0], [0], [1], [0, 0, 1, 1], [], []>} : vector<2x32xf32>, vector<32x32xf32>, vector<2x32xf32> -> vector<2x32xf32>
    %c0_211 = arith.constant 0 : index
    %c0_212 = arith.constant 0 : index
    %289 = vector.load %arg39[%c0_211, %c0_212] : memref<1x32xf32, #tpu.memory_space<vmem>>, vector<1x32xf32>
    %290 = vector.broadcast %289 : vector<1x32xf32> to vector<2x32xf32>
    %291 = arith.addf %288, %290 : vector<2x32xf32>
    %292 = arith.addf %271, %291 : vector<2x32xf32>
    %c0_213 = arith.constant 0 : index
    %c0_214 = arith.constant 0 : index
    %293 = vector.load %arg54[%c0_213, %c0_214] : memref<2x128xf32, #tpu.memory_space<vmem>>, vector<2x32xf32>
    tpu.vector_store %arg54[%c0_213, %c0_214], %292 {strides = array<i32>} : memref<2x128xf32, #tpu.memory_space<vmem>>, vector<2x32xf32>,
    %294 = arith.addf %272, %270 : vector<2x3xf32>
    %c0_215 = arith.constant 0 : index
    %c32_216 = arith.constant 32 : index
    %295 = vector.load %arg54[%c0_215, %c32_216] : memref<2x128xf32, #tpu.memory_space<vmem>>, vector<2x3xf32>
    tpu.vector_store %arg54[%c0_215, %c32_216], %294 {strides = array<i32>} : memref<2x128xf32, #tpu.memory_space<vmem>>, vector<2x3xf32>,
    %c0_217 = arith.constant 0 : index
    %c0_218 = arith.constant 0 : index
    %296 = vector.load %arg10[%c0_217, %c0_218] : memref<16x2xf32, #tpu.memory_space<vmem>>, vector<16x2xf32>
    %c0_219 = arith.constant 0 : index
    %c0_220 = arith.constant 0 : index
    %297 = vector.load %arg54[%c0_219, %c0_220] : memref<2x128xf32, #tpu.memory_space<vmem>>, vector<2x35xf32>
    %cst_221 = arith.constant dense<0.000000e+00> : vector<16x35xf32>
    %298 = tpu.matmul %296, %297, %cst_221 {dimension_numbers = #tpu.dot_dimension_numbers<[1], [0], [0], [1], [0, 0, 1, 1], [], []>} : vector<16x2xf32>, vector<2x35xf32>, vector<16x35xf32> -> vector<16x35xf32>
    %c0_222 = arith.constant 0 : index
    %c0_223 = arith.constant 0 : index
    %299 = vector.load %arg55[%c0_222, %c0_223] : memref<32x35xf32, #tpu.memory_space<vmem>>, vector<16x35xf32>
    tpu.vector_store %arg55[%c0_222, %c0_223], %298 {strides = array<i32>} : memref<32x35xf32, #tpu.memory_space<vmem>>, vector<16x35xf32>,
    %c0_224 = arith.constant 0 : index
    %c0_225 = arith.constant 0 : index
    %300 = vector.load %arg11[%c0_224, %c0_225] : memref<16x16xf32, #tpu.memory_space<vmem>>, vector<16x16xf32>
    %c0_226 = arith.constant 0 : index
    %c0_227 = arith.constant 0 : index
    %301 = vector.load %arg53[%c0_226, %c0_227] : memref<16x128xf32, #tpu.memory_space<vmem>>, vector<16x35xf32>
    %cst_228 = arith.constant dense<0.000000e+00> : vector<16x35xf32>
    %302 = tpu.matmul %300, %301, %cst_228 {dimension_numbers = #tpu.dot_dimension_numbers<[1], [0], [0], [1], [0, 0, 1, 1], [], []>} : vector<16x16xf32>, vector<16x35xf32>, vector<16x35xf32> -> vector<16x35xf32>
    %c0_229 = arith.constant 0 : index
    %c0_230 = arith.constant 0 : index
    %303 = vector.load %arg56[%c0_229, %c0_230] : memref<32x35xf32, #tpu.memory_space<vmem>>, vector<16x35xf32>
    tpu.vector_store %arg56[%c0_229, %c0_230], %302 {strides = array<i32>} : memref<32x35xf32, #tpu.memory_space<vmem>>, vector<16x35xf32>,
    %c0_231 = arith.constant 0 : index
    %c0_232 = arith.constant 0 : index
    %304 = vector.load %arg55[%c0_231, %c0_232] : memref<32x35xf32, #tpu.memory_space<vmem>>, vector<16x32xf32>
    %c0_233 = arith.constant 0 : index
    %c32_234 = arith.constant 32 : index
    %305 = vector.load %arg55[%c0_233, %c32_234] : memref<32x35xf32, #tpu.memory_space<vmem>>, vector<16x3xf32>
    %c0_235 = arith.constant 0 : index
    %c0_236 = arith.constant 0 : index
    %306 = vector.load %arg56[%c0_235, %c0_236] : memref<32x35xf32, #tpu.memory_space<vmem>>, vector<16x32xf32>
    %c0_237 = arith.constant 0 : index
    %c32_238 = arith.constant 32 : index
    %307 = vector.load %arg56[%c0_237, %c32_238] : memref<32x35xf32, #tpu.memory_space<vmem>>, vector<16x3xf32>
    %308 = arith.subf %307, %305 : vector<16x3xf32>
    %309 = arith.mulf %308, %308 : vector<16x3xf32>
    %cst_239 = arith.constant dense<0.000000e+00> : vector<16xf32>
    %310 = vector.multi_reduction <add>, %309, %cst_239 [1] : vector<16x3xf32> to vector<16xf32>
    %311 = vector.shape_cast %310 : vector<16xf32> to vector<16x1xf32>
    %312 = math.sqrt %311 : vector<16x1xf32>
    %313 = vector.shape_cast %306 : vector<16x32xf32> to vector<1x16x32xf32>
    %cst_240 = arith.constant dense<0.000000e+00> : vector<1xf32>
    %314 = vector.multi_reduction <add>, %313, %cst_240 [1, 2] : vector<1x16x32xf32> to vector<1xf32>
    %315 = vector.shape_cast %314 : vector<1xf32> to vector<1x1x1xf32>
    %316 = vector.extract %315[0, 0, 0] : f32 from vector<1x1x1xf32>
    %317 = vector.broadcast %316 : f32 to vector<1x1xf32>
    %cst_241 = arith.constant 5.120000e+02 : f32
    %318 = vector.broadcast %cst_241 : f32 to vector<1x1xf32>
    %319 = arith.divf %317, %318 : vector<1x1xf32>
    %320 = vector.broadcast %319 : vector<1x1xf32> to vector<16x32xf32>
    %321 = arith.subf %306, %320 : vector<16x32xf32>
    %322 = arith.mulf %321, %321 : vector<16x32xf32>
    %323 = vector.shape_cast %322 : vector<16x32xf32> to vector<1x16x32xf32>
    %cst_242 = arith.constant dense<0.000000e+00> : vector<1xf32>
    %324 = vector.multi_reduction <add>, %323, %cst_242 [1, 2] : vector<1x16x32xf32> to vector<1xf32>
    %325 = vector.shape_cast %324 : vector<1xf32> to vector<1x1x1xf32>
    %326 = vector.extract %325[0, 0, 0] : f32 from vector<1x1x1xf32>
    %327 = vector.broadcast %326 : f32 to vector<1x1xf32>
    %cst_243 = arith.constant 5.120000e+02 : f32
    %328 = vector.broadcast %cst_243 : f32 to vector<1x1xf32>
    %329 = arith.divf %327, %328 : vector<1x1xf32>
    %330 = math.sqrt %329 : vector<1x1xf32>
    %cst_244 = arith.constant 9.99999974E-6 : f32
    %331 = vector.broadcast %cst_244 : f32 to vector<1x1xf32>
    %332 = arith.addf %330, %331 : vector<1x1xf32>
    %333 = vector.broadcast %332 : vector<1x1xf32> to vector<16x32xf32>
    %334 = arith.divf %321, %333 : vector<16x32xf32>
    %c0_245 = arith.constant 0 : index
    %c0_246 = arith.constant 0 : index
    %335 = vector.load %arg57[%c0_245, %c0_246] : memref<32x64xf32, #tpu.memory_space<vmem>>, vector<16x32xf32>
    tpu.vector_store %arg57[%c0_245, %c0_246], %334 {strides = array<i32>} : memref<32x64xf32, #tpu.memory_space<vmem>>, vector<16x32xf32>,
    %336 = vector.shape_cast %304 : vector<16x32xf32> to vector<1x16x32xf32>
    %cst_247 = arith.constant dense<0.000000e+00> : vector<1xf32>
    %337 = vector.multi_reduction <add>, %336, %cst_247 [1, 2] : vector<1x16x32xf32> to vector<1xf32>
    %338 = vector.shape_cast %337 : vector<1xf32> to vector<1x1x1xf32>
    %339 = vector.extract %338[0, 0, 0] : f32 from vector<1x1x1xf32>
    %340 = vector.broadcast %339 : f32 to vector<1x1xf32>
    %cst_248 = arith.constant 5.120000e+02 : f32
    %341 = vector.broadcast %cst_248 : f32 to vector<1x1xf32>
    %342 = arith.divf %340, %341 : vector<1x1xf32>
    %343 = vector.broadcast %342 : vector<1x1xf32> to vector<16x32xf32>
    %344 = arith.subf %304, %343 : vector<16x32xf32>
    %345 = arith.mulf %344, %344 : vector<16x32xf32>
    %346 = vector.shape_cast %345 : vector<16x32xf32> to vector<1x16x32xf32>
    %cst_249 = arith.constant dense<0.000000e+00> : vector<1xf32>
    %347 = vector.multi_reduction <add>, %346, %cst_249 [1, 2] : vector<1x16x32xf32> to vector<1xf32>
    %348 = vector.shape_cast %347 : vector<1xf32> to vector<1x1x1xf32>
    %349 = vector.extract %348[0, 0, 0] : f32 from vector<1x1x1xf32>
    %350 = vector.broadcast %349 : f32 to vector<1x1xf32>
    %cst_250 = arith.constant 5.120000e+02 : f32
    %351 = vector.broadcast %cst_250 : f32 to vector<1x1xf32>
    %352 = arith.divf %350, %351 : vector<1x1xf32>
    %353 = math.sqrt %352 : vector<1x1xf32>
    %cst_251 = arith.constant 9.99999974E-6 : f32
    %354 = vector.broadcast %cst_251 : f32 to vector<1x1xf32>
    %355 = arith.addf %353, %354 : vector<1x1xf32>
    %356 = vector.broadcast %355 : vector<1x1xf32> to vector<16x32xf32>
    %357 = arith.divf %344, %356 : vector<16x32xf32>
    %c0_252 = arith.constant 0 : index
    %c32_253 = arith.constant 32 : index
    %358 = vector.load %arg57[%c0_252, %c32_253] : memref<32x64xf32, #tpu.memory_space<vmem>>, vector<16x32xf32>
    tpu.vector_store %arg57[%c0_252, %c32_253], %357 {strides = array<i32>} : memref<32x64xf32, #tpu.memory_space<vmem>>, vector<16x32xf32>,
    %c0_254 = arith.constant 0 : index
    %c0_255 = arith.constant 0 : index
    %359 = vector.load %arg57[%c0_254, %c0_255] : memref<32x64xf32, #tpu.memory_space<vmem>>, vector<16x64xf32>
    %c0_256 = arith.constant 0 : index
    %c0_257 = arith.constant 0 : index
    %360 = vector.load %arg40[%c0_256, %c0_257] : memref<64x32xf32, #tpu.memory_space<vmem>>, vector<64x32xf32>
    %cst_258 = arith.constant dense<0.000000e+00> : vector<16x32xf32>
    %361 = tpu.matmul %359, %360, %cst_258 {dimension_numbers = #tpu.dot_dimension_numbers<[1], [0], [0], [1], [0, 0, 1, 1], [], []>} : vector<16x64xf32>, vector<64x32xf32>, vector<16x32xf32> -> vector<16x32xf32>
    %c0_259 = arith.constant 0 : index
    %c0_260 = arith.constant 0 : index
    %362 = vector.load %arg41[%c0_259, %c0_260] : memref<1x32xf32, #tpu.memory_space<vmem>>, vector<1x32xf32>
    %363 = vector.broadcast %312 : vector<16x1xf32> to vector<16x32xf32>
    %364 = vector.broadcast %362 : vector<1x32xf32> to vector<16x32xf32>
    %365 = arith.mulf %363, %364 : vector<16x32xf32>
    %366 = arith.addf %361, %365 : vector<16x32xf32>
    %c0_261 = arith.constant 0 : index
    %c0_262 = arith.constant 0 : index
    %367 = vector.load %arg42[%c0_261, %c0_262] : memref<1x32xf32, #tpu.memory_space<vmem>>, vector<1x32xf32>
    %368 = vector.broadcast %367 : vector<1x32xf32> to vector<16x32xf32>
    %369 = arith.addf %366, %368 : vector<16x32xf32>
    %370 = arith.negf %369 : vector<16x32xf32>
    %371 = math.exp %370 : vector<16x32xf32>
    %cst_263 = arith.constant 1.000000e+00 : f32
    %372 = vector.broadcast %cst_263 : f32 to vector<16x32xf32>
    %373 = arith.addf %372, %371 : vector<16x32xf32>
    %374 = arith.divf %372, %373 : vector<16x32xf32>
    %375 = arith.mulf %369, %374 : vector<16x32xf32>
    %c0_264 = arith.constant 0 : index
    %c0_265 = arith.constant 0 : index
    %376 = vector.load %arg43[%c0_264, %c0_265] : memref<32x32xf32, #tpu.memory_space<vmem>>, vector<32x32xf32>
    %cst_266 = arith.constant dense<0.000000e+00> : vector<16x32xf32>
    %377 = tpu.matmul %375, %376, %cst_266 {dimension_numbers = #tpu.dot_dimension_numbers<[1], [0], [0], [1], [0, 0, 1, 1], [], []>} : vector<16x32xf32>, vector<32x32xf32>, vector<16x32xf32> -> vector<16x32xf32>
    %c0_267 = arith.constant 0 : index
    %c0_268 = arith.constant 0 : index
    %378 = vector.load %arg44[%c0_267, %c0_268] : memref<1x32xf32, #tpu.memory_space<vmem>>, vector<1x32xf32>
    %379 = vector.broadcast %378 : vector<1x32xf32> to vector<16x32xf32>
    %380 = arith.addf %377, %379 : vector<16x32xf32>
    %c0_269 = arith.constant 0 : index
    %c0_270 = arith.constant 0 : index
    %381 = vector.load %arg45[%c0_269, %c0_270] : memref<32x32xf32, #tpu.memory_space<vmem>>, vector<32x32xf32>
    %cst_271 = arith.constant dense<0.000000e+00> : vector<16x32xf32>
    %382 = tpu.matmul %380, %381, %cst_271 {dimension_numbers = #tpu.dot_dimension_numbers<[1], [0], [0], [1], [0, 0, 1, 1], [], []>} : vector<16x32xf32>, vector<32x32xf32>, vector<16x32xf32> -> vector<16x32xf32>
    %c0_272 = arith.constant 0 : index
    %c0_273 = arith.constant 0 : index
    %383 = vector.load %arg46[%c0_272, %c0_273] : memref<1x32xf32, #tpu.memory_space<vmem>>, vector<1x32xf32>
    %384 = vector.broadcast %383 : vector<1x32xf32> to vector<16x32xf32>
    %385 = arith.addf %382, %384 : vector<16x32xf32>
    %386 = arith.negf %385 : vector<16x32xf32>
    %387 = math.exp %386 : vector<16x32xf32>
    %cst_274 = arith.constant 1.000000e+00 : f32
    %388 = vector.broadcast %cst_274 : f32 to vector<16x32xf32>
    %389 = arith.addf %388, %387 : vector<16x32xf32>
    %390 = arith.divf %388, %389 : vector<16x32xf32>
    %391 = arith.mulf %385, %390 : vector<16x32xf32>
    %c0_275 = arith.constant 0 : index
    %c0_276 = arith.constant 0 : index
    %392 = vector.load %arg47[%c0_275, %c0_276] : memref<1x32xf32, #tpu.memory_space<vmem>>, vector<1x32xf32>
    %393 = vector.broadcast %392 : vector<1x32xf32> to vector<16x32xf32>
    %394 = arith.mulf %391, %393 : vector<16x32xf32>
    %cst_277 = arith.constant dense<0.000000e+00> : vector<16xf32>
    %395 = vector.multi_reduction <add>, %394, %cst_277 [1] : vector<16x32xf32> to vector<16xf32>
    %396 = vector.shape_cast %395 : vector<16xf32> to vector<16x1xf32>
    %c0_278 = arith.constant 0 : index
    %c0_279 = arith.constant 0 : index
    %397 = vector.load %arg48[%c0_278, %c0_279] : memref<1x1xf32, #tpu.memory_space<vmem>>, vector<1x1xf32>
    %398 = vector.broadcast %397 : vector<1x1xf32> to vector<16x1xf32>
    %399 = arith.addf %396, %398 : vector<16x1xf32>
    %cst_280 = arith.constant 9.99999993E-9 : f32
    %400 = vector.broadcast %cst_280 : f32 to vector<16x1xf32>
    %401 = arith.maximumf %312, %400 : vector<16x1xf32>
    %402 = vector.broadcast %401 : vector<16x1xf32> to vector<16x3xf32>
    %403 = arith.divf %308, %402 : vector<16x3xf32>
    %404 = vector.broadcast %399 : vector<16x1xf32> to vector<16x3xf32>
    %405 = arith.mulf %403, %404 : vector<16x3xf32>
    %c0_281 = arith.constant 0 : index
    %c0_282 = arith.constant 0 : index
    %406 = vector.load %arg58[%c0_281, %c0_282] : memref<32x35xf32, #tpu.memory_space<vmem>>, vector<16x32xf32>
    tpu.vector_store %arg58[%c0_281, %c0_282], %380 {strides = array<i32>} : memref<32x35xf32, #tpu.memory_space<vmem>>, vector<16x32xf32>,
    %c0_283 = arith.constant 0 : index
    %c32_284 = arith.constant 32 : index
    %407 = vector.load %arg58[%c0_283, %c32_284] : memref<32x35xf32, #tpu.memory_space<vmem>>, vector<16x3xf32>
    tpu.vector_store %arg58[%c0_283, %c32_284], %405 {strides = array<i32>} : memref<32x35xf32, #tpu.memory_space<vmem>>, vector<16x3xf32>,
    %c0_285 = arith.constant 0 : index
    %c0_286 = arith.constant 0 : index
    %408 = vector.load %arg12[%c0_285, %c0_286] : memref<16x16xf32, #tpu.memory_space<vmem>>, vector<16x16xf32>
    %c0_287 = arith.constant 0 : index
    %c0_288 = arith.constant 0 : index
    %409 = vector.load %arg58[%c0_287, %c0_288] : memref<32x35xf32, #tpu.memory_space<vmem>>, vector<16x35xf32>
    %cst_289 = arith.constant dense<0.000000e+00> : vector<16x35xf32>
    %410 = tpu.matmul %408, %409, %cst_289 {dimension_numbers = #tpu.dot_dimension_numbers<[1], [0], [0], [1], [0, 0, 1, 1], [], []>} : vector<16x16xf32>, vector<16x35xf32>, vector<16x35xf32> -> vector<16x35xf32>
    %c0_290 = arith.constant 0 : index
    %c0_291 = arith.constant 0 : index
    %411 = vector.load %arg59[%c0_290, %c0_291] : memref<16x35xf32, #tpu.memory_space<vmem>>, vector<16x35xf32>
    tpu.vector_store %arg59[%c0_290, %c0_291], %410 {strides = array<i32>} : memref<16x35xf32, #tpu.memory_space<vmem>>, vector<16x35xf32>,
    %c0_292 = arith.constant 0 : index
    %c0_293 = arith.constant 0 : index
    %412 = vector.load %arg59[%c0_292, %c0_293] : memref<16x35xf32, #tpu.memory_space<vmem>>, vector<16x32xf32>
    %c0_294 = arith.constant 0 : index
    %c32_295 = arith.constant 32 : index
    %413 = vector.load %arg59[%c0_294, %c32_295] : memref<16x35xf32, #tpu.memory_space<vmem>>, vector<16x3xf32>
    %c0_296 = arith.constant 0 : index
    %c0_297 = arith.constant 0 : index
    %414 = vector.load %arg13[%c0_296, %c0_297] : memref<16x1xf32, #tpu.memory_space<vmem>>, vector<16x1xf32>
    %415 = vector.broadcast %414 : vector<16x1xf32> to vector<16x3xf32>
    %416 = arith.mulf %413, %415 : vector<16x3xf32>
    %c0_298 = arith.constant 0 : index
    %c0_299 = arith.constant 0 : index
    %417 = vector.load %arg53[%c0_298, %c0_299] : memref<16x128xf32, #tpu.memory_space<vmem>>, vector<16x32xf32>
    %c0_300 = arith.constant 0 : index
    %c32_301 = arith.constant 32 : index
    %418 = vector.load %arg53[%c0_300, %c32_301] : memref<16x128xf32, #tpu.memory_space<vmem>>, vector<16x3xf32>
    %c0_302 = arith.constant 0 : index
    %c0_303 = arith.constant 0 : index
    %419 = vector.load %arg60[%c0_302, %c0_303] : memref<16x64xf32, #tpu.memory_space<vmem>>, vector<16x32xf32>
    tpu.vector_store %arg60[%c0_302, %c0_303], %417 {strides = array<i32>} : memref<16x64xf32, #tpu.memory_space<vmem>>, vector<16x32xf32>,
    %c0_304 = arith.constant 0 : index
    %c32_305 = arith.constant 32 : index
    %420 = vector.load %arg60[%c0_304, %c32_305] : memref<16x64xf32, #tpu.memory_space<vmem>>, vector<16x32xf32>
    tpu.vector_store %arg60[%c0_304, %c32_305], %412 {strides = array<i32>} : memref<16x64xf32, #tpu.memory_space<vmem>>, vector<16x32xf32>,
    %c0_306 = arith.constant 0 : index
    %c0_307 = arith.constant 0 : index
    %421 = vector.load %arg60[%c0_306, %c0_307] : memref<16x64xf32, #tpu.memory_space<vmem>>, vector<16x64xf32>
    %c0_308 = arith.constant 0 : index
    %c0_309 = arith.constant 0 : index
    %422 = vector.load %arg49[%c0_308, %c0_309] : memref<64x32xf32, #tpu.memory_space<vmem>>, vector<64x32xf32>
    %cst_310 = arith.constant dense<0.000000e+00> : vector<16x32xf32>
    %423 = tpu.matmul %421, %422, %cst_310 {dimension_numbers = #tpu.dot_dimension_numbers<[1], [0], [0], [1], [0, 0, 1, 1], [], []>} : vector<16x64xf32>, vector<64x32xf32>, vector<16x32xf32> -> vector<16x32xf32>
    %c0_311 = arith.constant 0 : index
    %c0_312 = arith.constant 0 : index
    %424 = vector.load %arg50[%c0_311, %c0_312] : memref<1x32xf32, #tpu.memory_space<vmem>>, vector<1x32xf32>
    %425 = vector.broadcast %424 : vector<1x32xf32> to vector<16x32xf32>
    %426 = arith.addf %423, %425 : vector<16x32xf32>
    %427 = arith.negf %426 : vector<16x32xf32>
    %428 = math.exp %427 : vector<16x32xf32>
    %cst_313 = arith.constant 1.000000e+00 : f32
    %429 = vector.broadcast %cst_313 : f32 to vector<16x32xf32>
    %430 = arith.addf %429, %428 : vector<16x32xf32>
    %431 = arith.divf %429, %430 : vector<16x32xf32>
    %432 = arith.mulf %426, %431 : vector<16x32xf32>
    %c0_314 = arith.constant 0 : index
    %c0_315 = arith.constant 0 : index
    %433 = vector.load %arg51[%c0_314, %c0_315] : memref<32x32xf32, #tpu.memory_space<vmem>>, vector<32x32xf32>
    %cst_316 = arith.constant dense<0.000000e+00> : vector<16x32xf32>
    %434 = tpu.matmul %432, %433, %cst_316 {dimension_numbers = #tpu.dot_dimension_numbers<[1], [0], [0], [1], [0, 0, 1, 1], [], []>} : vector<16x32xf32>, vector<32x32xf32>, vector<16x32xf32> -> vector<16x32xf32>
    %c0_317 = arith.constant 0 : index
    %c0_318 = arith.constant 0 : index
    %435 = vector.load %arg52[%c0_317, %c0_318] : memref<1x32xf32, #tpu.memory_space<vmem>>, vector<1x32xf32>
    %436 = vector.broadcast %435 : vector<1x32xf32> to vector<16x32xf32>
    %437 = arith.addf %434, %436 : vector<16x32xf32>
    %438 = arith.addf %417, %437 : vector<16x32xf32>
    %c0_319 = arith.constant 0 : index
    %c0_320 = arith.constant 0 : index
    %439 = vector.load %arg53[%c0_319, %c0_320] : memref<16x128xf32, #tpu.memory_space<vmem>>, vector<16x32xf32>
    tpu.vector_store %arg53[%c0_319, %c0_320], %438 {strides = array<i32>} : memref<16x128xf32, #tpu.memory_space<vmem>>, vector<16x32xf32>,
    %440 = arith.addf %418, %416 : vector<16x3xf32>
    %c0_321 = arith.constant 0 : index
    %c32_322 = arith.constant 32 : index
    %441 = vector.load %arg53[%c0_321, %c32_322] : memref<16x128xf32, #tpu.memory_space<vmem>>, vector<16x3xf32>
    tpu.vector_store %arg53[%c0_321, %c32_322], %440 {strides = array<i32>} : memref<16x128xf32, #tpu.memory_space<vmem>>, vector<16x3xf32>,
    %c1_i32 = arith.constant 1 : i32
    %c0_323 = arith.constant 0 : index
    %c0_324 = arith.constant 0 : index
    %442 = vector.load %arg2[%c0_323, %c0_324] : memref<32x16xf32, #tpu.memory_space<vmem>>, vector<32x16xf32>
    %c0_325 = arith.constant 0 : index
    %c0_326 = arith.constant 0 : index
    %443 = vector.load %arg53[%c0_325, %c0_326] : memref<16x128xf32, #tpu.memory_space<vmem>>, vector<16x35xf32>
    %cst_327 = arith.constant dense<0.000000e+00> : vector<32x35xf32>
    %444 = tpu.matmul %442, %443, %cst_327 {dimension_numbers = #tpu.dot_dimension_numbers<[1], [0], [0], [1], [0, 0, 1, 1], [], []>} : vector<32x16xf32>, vector<16x35xf32>, vector<32x35xf32> -> vector<32x35xf32>
    %c0_328 = arith.constant 0 : index
    %c0_329 = arith.constant 0 : index
    %445 = vector.load %arg55[%c0_328, %c0_329] : memref<32x35xf32, #tpu.memory_space<vmem>>, vector<32x35xf32>
    tpu.vector_store %arg55[%c0_328, %c0_329], %444 {strides = array<i32>} : memref<32x35xf32, #tpu.memory_space<vmem>>, vector<32x35xf32>,
    %c0_330 = arith.constant 0 : index
    %c0_331 = arith.constant 0 : index
    %446 = vector.load %arg3[%c0_330, %c0_331] : memref<32x16xf32, #tpu.memory_space<vmem>>, vector<32x16xf32>
    %c0_332 = arith.constant 0 : index
    %c0_333 = arith.constant 0 : index
    %447 = vector.load %arg53[%c0_332, %c0_333] : memref<16x128xf32, #tpu.memory_space<vmem>>, vector<16x35xf32>
    %cst_334 = arith.constant dense<0.000000e+00> : vector<32x35xf32>
    %448 = tpu.matmul %446, %447, %cst_334 {dimension_numbers = #tpu.dot_dimension_numbers<[1], [0], [0], [1], [0, 0, 1, 1], [], []>} : vector<32x16xf32>, vector<16x35xf32>, vector<32x35xf32> -> vector<32x35xf32>
    %c0_335 = arith.constant 0 : index
    %c0_336 = arith.constant 0 : index
    %449 = vector.load %arg56[%c0_335, %c0_336] : memref<32x35xf32, #tpu.memory_space<vmem>>, vector<32x35xf32>
    tpu.vector_store %arg56[%c0_335, %c0_336], %448 {strides = array<i32>} : memref<32x35xf32, #tpu.memory_space<vmem>>, vector<32x35xf32>,
    %c0_337 = arith.constant 0 : index
    %c0_338 = arith.constant 0 : index
    %450 = vector.load %arg55[%c0_337, %c0_338] : memref<32x35xf32, #tpu.memory_space<vmem>>, vector<32x32xf32>
    %c0_339 = arith.constant 0 : index
    %c32_340 = arith.constant 32 : index
    %451 = vector.load %arg55[%c0_339, %c32_340] : memref<32x35xf32, #tpu.memory_space<vmem>>, vector<32x3xf32>
    %c0_341 = arith.constant 0 : index
    %c0_342 = arith.constant 0 : index
    %452 = vector.load %arg56[%c0_341, %c0_342] : memref<32x35xf32, #tpu.memory_space<vmem>>, vector<32x32xf32>
    %c0_343 = arith.constant 0 : index
    %c32_344 = arith.constant 32 : index
    %453 = vector.load %arg56[%c0_343, %c32_344] : memref<32x35xf32, #tpu.memory_space<vmem>>, vector<32x3xf32>
    %454 = arith.subf %453, %451 : vector<32x3xf32>
    %455 = arith.mulf %454, %454 : vector<32x3xf32>
    %cst_345 = arith.constant dense<0.000000e+00> : vector<32xf32>
    %456 = vector.multi_reduction <add>, %455, %cst_345 [1] : vector<32x3xf32> to vector<32xf32>
    %457 = vector.shape_cast %456 : vector<32xf32> to vector<32x1xf32>
    %458 = math.sqrt %457 : vector<32x1xf32>
    %459 = vector.shape_cast %452 : vector<32x32xf32> to vector<1x32x32xf32>
    %cst_346 = arith.constant dense<0.000000e+00> : vector<1xf32>
    %460 = vector.multi_reduction <add>, %459, %cst_346 [1, 2] : vector<1x32x32xf32> to vector<1xf32>
    %461 = vector.shape_cast %460 : vector<1xf32> to vector<1x1x1xf32>
    %462 = vector.extract %461[0, 0, 0] : f32 from vector<1x1x1xf32>
    %463 = vector.broadcast %462 : f32 to vector<1x1xf32>
    %cst_347 = arith.constant 1.024000e+03 : f32
    %464 = vector.broadcast %cst_347 : f32 to vector<1x1xf32>
    %465 = arith.divf %463, %464 : vector<1x1xf32>
    %466 = vector.broadcast %465 : vector<1x1xf32> to vector<32x32xf32>
    %467 = arith.subf %452, %466 : vector<32x32xf32>
    %468 = arith.mulf %467, %467 : vector<32x32xf32>
    %469 = vector.shape_cast %468 : vector<32x32xf32> to vector<1x32x32xf32>
    %cst_348 = arith.constant dense<0.000000e+00> : vector<1xf32>
    %470 = vector.multi_reduction <add>, %469, %cst_348 [1, 2] : vector<1x32x32xf32> to vector<1xf32>
    %471 = vector.shape_cast %470 : vector<1xf32> to vector<1x1x1xf32>
    %472 = vector.extract %471[0, 0, 0] : f32 from vector<1x1x1xf32>
    %473 = vector.broadcast %472 : f32 to vector<1x1xf32>
    %cst_349 = arith.constant 1.024000e+03 : f32
    %474 = vector.broadcast %cst_349 : f32 to vector<1x1xf32>
    %475 = arith.divf %473, %474 : vector<1x1xf32>
    %476 = math.sqrt %475 : vector<1x1xf32>
    %cst_350 = arith.constant 9.99999974E-6 : f32
    %477 = vector.broadcast %cst_350 : f32 to vector<1x1xf32>
    %478 = arith.addf %476, %477 : vector<1x1xf32>
    %479 = vector.broadcast %478 : vector<1x1xf32> to vector<32x32xf32>
    %480 = arith.divf %467, %479 : vector<32x32xf32>
    %c0_351 = arith.constant 0 : index
    %c0_352 = arith.constant 0 : index
    %481 = vector.load %arg57[%c0_351, %c0_352] : memref<32x64xf32, #tpu.memory_space<vmem>>, vector<32x32xf32>
    tpu.vector_store %arg57[%c0_351, %c0_352], %480 {strides = array<i32>} : memref<32x64xf32, #tpu.memory_space<vmem>>, vector<32x32xf32>,
    %482 = vector.shape_cast %450 : vector<32x32xf32> to vector<1x32x32xf32>
    %cst_353 = arith.constant dense<0.000000e+00> : vector<1xf32>
    %483 = vector.multi_reduction <add>, %482, %cst_353 [1, 2] : vector<1x32x32xf32> to vector<1xf32>
    %484 = vector.shape_cast %483 : vector<1xf32> to vector<1x1x1xf32>
    %485 = vector.extract %484[0, 0, 0] : f32 from vector<1x1x1xf32>
    %486 = vector.broadcast %485 : f32 to vector<1x1xf32>
    %cst_354 = arith.constant 1.024000e+03 : f32
    %487 = vector.broadcast %cst_354 : f32 to vector<1x1xf32>
    %488 = arith.divf %486, %487 : vector<1x1xf32>
    %489 = vector.broadcast %488 : vector<1x1xf32> to vector<32x32xf32>
    %490 = arith.subf %450, %489 : vector<32x32xf32>
    %491 = arith.mulf %490, %490 : vector<32x32xf32>
    %492 = vector.shape_cast %491 : vector<32x32xf32> to vector<1x32x32xf32>
    %cst_355 = arith.constant dense<0.000000e+00> : vector<1xf32>
    %493 = vector.multi_reduction <add>, %492, %cst_355 [1, 2] : vector<1x32x32xf32> to vector<1xf32>
    %494 = vector.shape_cast %493 : vector<1xf32> to vector<1x1x1xf32>
    %495 = vector.extract %494[0, 0, 0] : f32 from vector<1x1x1xf32>
    %496 = vector.broadcast %495 : f32 to vector<1x1xf32>
    %cst_356 = arith.constant 1.024000e+03 : f32
    %497 = vector.broadcast %cst_356 : f32 to vector<1x1xf32>
    %498 = arith.divf %496, %497 : vector<1x1xf32>
    %499 = math.sqrt %498 : vector<1x1xf32>
    %cst_357 = arith.constant 9.99999974E-6 : f32
    %500 = vector.broadcast %cst_357 : f32 to vector<1x1xf32>
    %501 = arith.addf %499, %500 : vector<1x1xf32>
    %502 = vector.broadcast %501 : vector<1x1xf32> to vector<32x32xf32>
    %503 = arith.divf %490, %502 : vector<32x32xf32>
    %c0_358 = arith.constant 0 : index
    %c32_359 = arith.constant 32 : index
    %504 = vector.load %arg57[%c0_358, %c32_359] : memref<32x64xf32, #tpu.memory_space<vmem>>, vector<32x32xf32>
    tpu.vector_store %arg57[%c0_358, %c32_359], %503 {strides = array<i32>} : memref<32x64xf32, #tpu.memory_space<vmem>>, vector<32x32xf32>,
    %c0_360 = arith.constant 0 : index
    %c0_361 = arith.constant 0 : index
    %505 = vector.load %arg57[%c0_360, %c0_361] : memref<32x64xf32, #tpu.memory_space<vmem>>, vector<32x64xf32>
    %c0_362 = arith.constant 0 : index
    %c0_363 = arith.constant 0 : index
    %506 = vector.load %arg14[%c0_362, %c0_363] : memref<64x32xf32, #tpu.memory_space<vmem>>, vector<64x32xf32>
    %cst_364 = arith.constant dense<0.000000e+00> : vector<32x32xf32>
    %507 = tpu.matmul %505, %506, %cst_364 {dimension_numbers = #tpu.dot_dimension_numbers<[1], [0], [0], [1], [0, 0, 1, 1], [], []>} : vector<32x64xf32>, vector<64x32xf32>, vector<32x32xf32> -> vector<32x32xf32>
    %c0_365 = arith.constant 0 : index
    %c0_366 = arith.constant 0 : index
    %508 = vector.load %arg15[%c0_365, %c0_366] : memref<1x32xf32, #tpu.memory_space<vmem>>, vector<1x32xf32>
    %509 = vector.broadcast %458 : vector<32x1xf32> to vector<32x32xf32>
    %510 = vector.broadcast %508 : vector<1x32xf32> to vector<32x32xf32>
    %511 = arith.mulf %509, %510 : vector<32x32xf32>
    %512 = arith.addf %507, %511 : vector<32x32xf32>
    %c0_367 = arith.constant 0 : index
    %c0_368 = arith.constant 0 : index
    %513 = vector.load %arg16[%c0_367, %c0_368] : memref<1x32xf32, #tpu.memory_space<vmem>>, vector<1x32xf32>
    %514 = vector.broadcast %513 : vector<1x32xf32> to vector<32x32xf32>
    %515 = arith.addf %512, %514 : vector<32x32xf32>
    %516 = arith.negf %515 : vector<32x32xf32>
    %517 = math.exp %516 : vector<32x32xf32>
    %cst_369 = arith.constant 1.000000e+00 : f32
    %518 = vector.broadcast %cst_369 : f32 to vector<32x32xf32>
    %519 = arith.addf %518, %517 : vector<32x32xf32>
    %520 = arith.divf %518, %519 : vector<32x32xf32>
    %521 = arith.mulf %515, %520 : vector<32x32xf32>
    %c0_370 = arith.constant 0 : index
    %c0_371 = arith.constant 0 : index
    %522 = vector.load %arg17[%c0_370, %c0_371] : memref<32x32xf32, #tpu.memory_space<vmem>>, vector<32x32xf32>
    %cst_372 = arith.constant dense<0.000000e+00> : vector<32x32xf32>
    %523 = tpu.matmul %521, %522, %cst_372 {dimension_numbers = #tpu.dot_dimension_numbers<[1], [0], [0], [1], [0, 0, 1, 1], [], []>} : vector<32x32xf32>, vector<32x32xf32>, vector<32x32xf32> -> vector<32x32xf32>
    %c0_373 = arith.constant 0 : index
    %c0_374 = arith.constant 0 : index
    %524 = vector.load %arg18[%c0_373, %c0_374] : memref<1x32xf32, #tpu.memory_space<vmem>>, vector<1x32xf32>
    %525 = vector.broadcast %524 : vector<1x32xf32> to vector<32x32xf32>
    %526 = arith.addf %523, %525 : vector<32x32xf32>
    %c0_375 = arith.constant 0 : index
    %c0_376 = arith.constant 0 : index
    %527 = vector.load %arg19[%c0_375, %c0_376] : memref<32x32xf32, #tpu.memory_space<vmem>>, vector<32x32xf32>
    %cst_377 = arith.constant dense<0.000000e+00> : vector<32x32xf32>
    %528 = tpu.matmul %526, %527, %cst_377 {dimension_numbers = #tpu.dot_dimension_numbers<[1], [0], [0], [1], [0, 0, 1, 1], [], []>} : vector<32x32xf32>, vector<32x32xf32>, vector<32x32xf32> -> vector<32x32xf32>
    %c0_378 = arith.constant 0 : index
    %c0_379 = arith.constant 0 : index
    %529 = vector.load %arg20[%c0_378, %c0_379] : memref<1x32xf32, #tpu.memory_space<vmem>>, vector<1x32xf32>
    %530 = vector.broadcast %529 : vector<1x32xf32> to vector<32x32xf32>
    %531 = arith.addf %528, %530 : vector<32x32xf32>
    %532 = arith.negf %531 : vector<32x32xf32>
    %533 = math.exp %532 : vector<32x32xf32>
    %cst_380 = arith.constant 1.000000e+00 : f32
    %534 = vector.broadcast %cst_380 : f32 to vector<32x32xf32>
    %535 = arith.addf %534, %533 : vector<32x32xf32>
    %536 = arith.divf %534, %535 : vector<32x32xf32>
    %537 = arith.mulf %531, %536 : vector<32x32xf32>
    %c0_381 = arith.constant 0 : index
    %c0_382 = arith.constant 0 : index
    %538 = vector.load %arg21[%c0_381, %c0_382] : memref<1x32xf32, #tpu.memory_space<vmem>>, vector<1x32xf32>
    %539 = vector.broadcast %538 : vector<1x32xf32> to vector<32x32xf32>
    %540 = arith.mulf %537, %539 : vector<32x32xf32>
    %cst_383 = arith.constant dense<0.000000e+00> : vector<32xf32>
    %541 = vector.multi_reduction <add>, %540, %cst_383 [1] : vector<32x32xf32> to vector<32xf32>
    %542 = vector.shape_cast %541 : vector<32xf32> to vector<32x1xf32>
    %c0_384 = arith.constant 0 : index
    %c0_385 = arith.constant 0 : index
    %543 = vector.load %arg22[%c0_384, %c0_385] : memref<1x1xf32, #tpu.memory_space<vmem>>, vector<1x1xf32>
    %544 = vector.broadcast %543 : vector<1x1xf32> to vector<32x1xf32>
    %545 = arith.addf %542, %544 : vector<32x1xf32>
    %cst_386 = arith.constant 9.99999993E-9 : f32
    %546 = vector.broadcast %cst_386 : f32 to vector<32x1xf32>
    %547 = arith.maximumf %458, %546 : vector<32x1xf32>
    %548 = vector.broadcast %547 : vector<32x1xf32> to vector<32x3xf32>
    %549 = arith.divf %454, %548 : vector<32x3xf32>
    %550 = vector.broadcast %545 : vector<32x1xf32> to vector<32x3xf32>
    %551 = arith.mulf %549, %550 : vector<32x3xf32>
    %c0_387 = arith.constant 0 : index
    %c0_388 = arith.constant 0 : index
    %552 = vector.load %arg58[%c0_387, %c0_388] : memref<32x35xf32, #tpu.memory_space<vmem>>, vector<32x32xf32>
    tpu.vector_store %arg58[%c0_387, %c0_388], %526 {strides = array<i32>} : memref<32x35xf32, #tpu.memory_space<vmem>>, vector<32x32xf32>,
    %c0_389 = arith.constant 0 : index
    %c32_390 = arith.constant 32 : index
    %553 = vector.load %arg58[%c0_389, %c32_390] : memref<32x35xf32, #tpu.memory_space<vmem>>, vector<32x3xf32>
    tpu.vector_store %arg58[%c0_389, %c32_390], %551 {strides = array<i32>} : memref<32x35xf32, #tpu.memory_space<vmem>>, vector<32x3xf32>,
    %c0_391 = arith.constant 0 : index
    %c0_392 = arith.constant 0 : index
    %554 = vector.load %arg4[%c0_391, %c0_392] : memref<16x32xf32, #tpu.memory_space<vmem>>, vector<16x32xf32>
    %c0_393 = arith.constant 0 : index
    %c0_394 = arith.constant 0 : index
    %555 = vector.load %arg58[%c0_393, %c0_394] : memref<32x35xf32, #tpu.memory_space<vmem>>, vector<32x35xf32>
    %cst_395 = arith.constant dense<0.000000e+00> : vector<16x35xf32>
    %556 = tpu.matmul %554, %555, %cst_395 {dimension_numbers = #tpu.dot_dimension_numbers<[1], [0], [0], [1], [0, 0, 1, 1], [], []>} : vector<16x32xf32>, vector<32x35xf32>, vector<16x35xf32> -> vector<16x35xf32>
    %c0_396 = arith.constant 0 : index
    %c0_397 = arith.constant 0 : index
    %557 = vector.load %arg59[%c0_396, %c0_397] : memref<16x35xf32, #tpu.memory_space<vmem>>, vector<16x35xf32>
    tpu.vector_store %arg59[%c0_396, %c0_397], %556 {strides = array<i32>} : memref<16x35xf32, #tpu.memory_space<vmem>>, vector<16x35xf32>,
    %c0_398 = arith.constant 0 : index
    %c0_399 = arith.constant 0 : index
    %558 = vector.load %arg59[%c0_398, %c0_399] : memref<16x35xf32, #tpu.memory_space<vmem>>, vector<16x32xf32>
    %c0_400 = arith.constant 0 : index
    %c32_401 = arith.constant 32 : index
    %559 = vector.load %arg59[%c0_400, %c32_401] : memref<16x35xf32, #tpu.memory_space<vmem>>, vector<16x3xf32>
    %c0_402 = arith.constant 0 : index
    %c0_403 = arith.constant 0 : index
    %560 = vector.load %arg5[%c0_402, %c0_403] : memref<16x1xf32, #tpu.memory_space<vmem>>, vector<16x1xf32>
    %561 = vector.broadcast %560 : vector<16x1xf32> to vector<16x3xf32>
    %562 = arith.mulf %559, %561 : vector<16x3xf32>
    %c0_404 = arith.constant 0 : index
    %c0_405 = arith.constant 0 : index
    %563 = vector.load %arg53[%c0_404, %c0_405] : memref<16x128xf32, #tpu.memory_space<vmem>>, vector<16x32xf32>
    %c0_406 = arith.constant 0 : index
    %c32_407 = arith.constant 32 : index
    %564 = vector.load %arg53[%c0_406, %c32_407] : memref<16x128xf32, #tpu.memory_space<vmem>>, vector<16x3xf32>
    %c0_408 = arith.constant 0 : index
    %c0_409 = arith.constant 0 : index
    %565 = vector.load %arg60[%c0_408, %c0_409] : memref<16x64xf32, #tpu.memory_space<vmem>>, vector<16x32xf32>
    tpu.vector_store %arg60[%c0_408, %c0_409], %563 {strides = array<i32>} : memref<16x64xf32, #tpu.memory_space<vmem>>, vector<16x32xf32>,
    %c0_410 = arith.constant 0 : index
    %c32_411 = arith.constant 32 : index
    %566 = vector.load %arg60[%c0_410, %c32_411] : memref<16x64xf32, #tpu.memory_space<vmem>>, vector<16x32xf32>
    tpu.vector_store %arg60[%c0_410, %c32_411], %558 {strides = array<i32>} : memref<16x64xf32, #tpu.memory_space<vmem>>, vector<16x32xf32>,
    %c0_412 = arith.constant 0 : index
    %c0_413 = arith.constant 0 : index
    %567 = vector.load %arg60[%c0_412, %c0_413] : memref<16x64xf32, #tpu.memory_space<vmem>>, vector<16x64xf32>
    %c0_414 = arith.constant 0 : index
    %c0_415 = arith.constant 0 : index
    %568 = vector.load %arg23[%c0_414, %c0_415] : memref<64x32xf32, #tpu.memory_space<vmem>>, vector<64x32xf32>
    %cst_416 = arith.constant dense<0.000000e+00> : vector<16x32xf32>
    %569 = tpu.matmul %567, %568, %cst_416 {dimension_numbers = #tpu.dot_dimension_numbers<[1], [0], [0], [1], [0, 0, 1, 1], [], []>} : vector<16x64xf32>, vector<64x32xf32>, vector<16x32xf32> -> vector<16x32xf32>
    %c0_417 = arith.constant 0 : index
    %c0_418 = arith.constant 0 : index
    %570 = vector.load %arg24[%c0_417, %c0_418] : memref<1x32xf32, #tpu.memory_space<vmem>>, vector<1x32xf32>
    %571 = vector.broadcast %570 : vector<1x32xf32> to vector<16x32xf32>
    %572 = arith.addf %569, %571 : vector<16x32xf32>
    %573 = arith.negf %572 : vector<16x32xf32>
    %574 = math.exp %573 : vector<16x32xf32>
    %cst_419 = arith.constant 1.000000e+00 : f32
    %575 = vector.broadcast %cst_419 : f32 to vector<16x32xf32>
    %576 = arith.addf %575, %574 : vector<16x32xf32>
    %577 = arith.divf %575, %576 : vector<16x32xf32>
    %578 = arith.mulf %572, %577 : vector<16x32xf32>
    %c0_420 = arith.constant 0 : index
    %c0_421 = arith.constant 0 : index
    %579 = vector.load %arg25[%c0_420, %c0_421] : memref<32x32xf32, #tpu.memory_space<vmem>>, vector<32x32xf32>
    %cst_422 = arith.constant dense<0.000000e+00> : vector<16x32xf32>
    %580 = tpu.matmul %578, %579, %cst_422 {dimension_numbers = #tpu.dot_dimension_numbers<[1], [0], [0], [1], [0, 0, 1, 1], [], []>} : vector<16x32xf32>, vector<32x32xf32>, vector<16x32xf32> -> vector<16x32xf32>
    %c0_423 = arith.constant 0 : index
    %c0_424 = arith.constant 0 : index
    %581 = vector.load %arg26[%c0_423, %c0_424] : memref<1x32xf32, #tpu.memory_space<vmem>>, vector<1x32xf32>
    %582 = vector.broadcast %581 : vector<1x32xf32> to vector<16x32xf32>
    %583 = arith.addf %580, %582 : vector<16x32xf32>
    %584 = arith.addf %563, %583 : vector<16x32xf32>
    %c0_425 = arith.constant 0 : index
    %c0_426 = arith.constant 0 : index
    %585 = vector.load %arg53[%c0_425, %c0_426] : memref<16x128xf32, #tpu.memory_space<vmem>>, vector<16x32xf32>
    tpu.vector_store %arg53[%c0_425, %c0_426], %584 {strides = array<i32>} : memref<16x128xf32, #tpu.memory_space<vmem>>, vector<16x32xf32>,
    %586 = arith.addf %564, %562 : vector<16x3xf32>
    %c0_427 = arith.constant 0 : index
    %c32_428 = arith.constant 32 : index
    %587 = vector.load %arg53[%c0_427, %c32_428] : memref<16x128xf32, #tpu.memory_space<vmem>>, vector<16x3xf32>
    tpu.vector_store %arg53[%c0_427, %c32_428], %586 {strides = array<i32>} : memref<16x128xf32, #tpu.memory_space<vmem>>, vector<16x3xf32>,
    %c0_429 = arith.constant 0 : index
    %c0_430 = arith.constant 0 : index
    %588 = vector.load %arg6[%c0_429, %c0_430] : memref<16x16xf32, #tpu.memory_space<vmem>>, vector<16x16xf32>
    %c0_431 = arith.constant 0 : index
    %c0_432 = arith.constant 0 : index
    %589 = vector.load %arg53[%c0_431, %c0_432] : memref<16x128xf32, #tpu.memory_space<vmem>>, vector<16x35xf32>
    %cst_433 = arith.constant dense<0.000000e+00> : vector<16x35xf32>
    %590 = tpu.matmul %588, %589, %cst_433 {dimension_numbers = #tpu.dot_dimension_numbers<[1], [0], [0], [1], [0, 0, 1, 1], [], []>} : vector<16x16xf32>, vector<16x35xf32>, vector<16x35xf32> -> vector<16x35xf32>
    %c0_434 = arith.constant 0 : index
    %c0_435 = arith.constant 0 : index
    %591 = vector.load %arg55[%c0_434, %c0_435] : memref<32x35xf32, #tpu.memory_space<vmem>>, vector<16x35xf32>
    tpu.vector_store %arg55[%c0_434, %c0_435], %590 {strides = array<i32>} : memref<32x35xf32, #tpu.memory_space<vmem>>, vector<16x35xf32>,
    %c0_436 = arith.constant 0 : index
    %c0_437 = arith.constant 0 : index
    %592 = vector.load %arg7[%c0_436, %c0_437] : memref<16x2xf32, #tpu.memory_space<vmem>>, vector<16x2xf32>
    %c0_438 = arith.constant 0 : index
    %c0_439 = arith.constant 0 : index
    %593 = vector.load %arg54[%c0_438, %c0_439] : memref<2x128xf32, #tpu.memory_space<vmem>>, vector<2x35xf32>
    %cst_440 = arith.constant dense<0.000000e+00> : vector<16x35xf32>
    %594 = tpu.matmul %592, %593, %cst_440 {dimension_numbers = #tpu.dot_dimension_numbers<[1], [0], [0], [1], [0, 0, 1, 1], [], []>} : vector<16x2xf32>, vector<2x35xf32>, vector<16x35xf32> -> vector<16x35xf32>
    %c0_441 = arith.constant 0 : index
    %c0_442 = arith.constant 0 : index
    %595 = vector.load %arg56[%c0_441, %c0_442] : memref<32x35xf32, #tpu.memory_space<vmem>>, vector<16x35xf32>
    tpu.vector_store %arg56[%c0_441, %c0_442], %594 {strides = array<i32>} : memref<32x35xf32, #tpu.memory_space<vmem>>, vector<16x35xf32>,
    %c0_443 = arith.constant 0 : index
    %c0_444 = arith.constant 0 : index
    %596 = vector.load %arg55[%c0_443, %c0_444] : memref<32x35xf32, #tpu.memory_space<vmem>>, vector<16x32xf32>
    %c0_445 = arith.constant 0 : index
    %c32_446 = arith.constant 32 : index
    %597 = vector.load %arg55[%c0_445, %c32_446] : memref<32x35xf32, #tpu.memory_space<vmem>>, vector<16x3xf32>
    %c0_447 = arith.constant 0 : index
    %c0_448 = arith.constant 0 : index
    %598 = vector.load %arg56[%c0_447, %c0_448] : memref<32x35xf32, #tpu.memory_space<vmem>>, vector<16x32xf32>
    %c0_449 = arith.constant 0 : index
    %c32_450 = arith.constant 32 : index
    %599 = vector.load %arg56[%c0_449, %c32_450] : memref<32x35xf32, #tpu.memory_space<vmem>>, vector<16x3xf32>
    %600 = arith.subf %599, %597 : vector<16x3xf32>
    %601 = arith.mulf %600, %600 : vector<16x3xf32>
    %cst_451 = arith.constant dense<0.000000e+00> : vector<16xf32>
    %602 = vector.multi_reduction <add>, %601, %cst_451 [1] : vector<16x3xf32> to vector<16xf32>
    %603 = vector.shape_cast %602 : vector<16xf32> to vector<16x1xf32>
    %604 = math.sqrt %603 : vector<16x1xf32>
    %605 = vector.shape_cast %598 : vector<16x32xf32> to vector<1x16x32xf32>
    %cst_452 = arith.constant dense<0.000000e+00> : vector<1xf32>
    %606 = vector.multi_reduction <add>, %605, %cst_452 [1, 2] : vector<1x16x32xf32> to vector<1xf32>
    %607 = vector.shape_cast %606 : vector<1xf32> to vector<1x1x1xf32>
    %608 = vector.extract %607[0, 0, 0] : f32 from vector<1x1x1xf32>
    %609 = vector.broadcast %608 : f32 to vector<1x1xf32>
    %cst_453 = arith.constant 5.120000e+02 : f32
    %610 = vector.broadcast %cst_453 : f32 to vector<1x1xf32>
    %611 = arith.divf %609, %610 : vector<1x1xf32>
    %612 = vector.broadcast %611 : vector<1x1xf32> to vector<16x32xf32>
    %613 = arith.subf %598, %612 : vector<16x32xf32>
    %614 = arith.mulf %613, %613 : vector<16x32xf32>
    %615 = vector.shape_cast %614 : vector<16x32xf32> to vector<1x16x32xf32>
    %cst_454 = arith.constant dense<0.000000e+00> : vector<1xf32>
    %616 = vector.multi_reduction <add>, %615, %cst_454 [1, 2] : vector<1x16x32xf32> to vector<1xf32>
    %617 = vector.shape_cast %616 : vector<1xf32> to vector<1x1x1xf32>
    %618 = vector.extract %617[0, 0, 0] : f32 from vector<1x1x1xf32>
    %619 = vector.broadcast %618 : f32 to vector<1x1xf32>
    %cst_455 = arith.constant 5.120000e+02 : f32
    %620 = vector.broadcast %cst_455 : f32 to vector<1x1xf32>
    %621 = arith.divf %619, %620 : vector<1x1xf32>
    %622 = math.sqrt %621 : vector<1x1xf32>
    %cst_456 = arith.constant 9.99999974E-6 : f32
    %623 = vector.broadcast %cst_456 : f32 to vector<1x1xf32>
    %624 = arith.addf %622, %623 : vector<1x1xf32>
    %625 = vector.broadcast %624 : vector<1x1xf32> to vector<16x32xf32>
    %626 = arith.divf %613, %625 : vector<16x32xf32>
    %c0_457 = arith.constant 0 : index
    %c0_458 = arith.constant 0 : index
    %627 = vector.load %arg57[%c0_457, %c0_458] : memref<32x64xf32, #tpu.memory_space<vmem>>, vector<16x32xf32>
    tpu.vector_store %arg57[%c0_457, %c0_458], %626 {strides = array<i32>} : memref<32x64xf32, #tpu.memory_space<vmem>>, vector<16x32xf32>,
    %628 = vector.shape_cast %596 : vector<16x32xf32> to vector<1x16x32xf32>
    %cst_459 = arith.constant dense<0.000000e+00> : vector<1xf32>
    %629 = vector.multi_reduction <add>, %628, %cst_459 [1, 2] : vector<1x16x32xf32> to vector<1xf32>
    %630 = vector.shape_cast %629 : vector<1xf32> to vector<1x1x1xf32>
    %631 = vector.extract %630[0, 0, 0] : f32 from vector<1x1x1xf32>
    %632 = vector.broadcast %631 : f32 to vector<1x1xf32>
    %cst_460 = arith.constant 5.120000e+02 : f32
    %633 = vector.broadcast %cst_460 : f32 to vector<1x1xf32>
    %634 = arith.divf %632, %633 : vector<1x1xf32>
    %635 = vector.broadcast %634 : vector<1x1xf32> to vector<16x32xf32>
    %636 = arith.subf %596, %635 : vector<16x32xf32>
    %637 = arith.mulf %636, %636 : vector<16x32xf32>
    %638 = vector.shape_cast %637 : vector<16x32xf32> to vector<1x16x32xf32>
    %cst_461 = arith.constant dense<0.000000e+00> : vector<1xf32>
    %639 = vector.multi_reduction <add>, %638, %cst_461 [1, 2] : vector<1x16x32xf32> to vector<1xf32>
    %640 = vector.shape_cast %639 : vector<1xf32> to vector<1x1x1xf32>
    %641 = vector.extract %640[0, 0, 0] : f32 from vector<1x1x1xf32>
    %642 = vector.broadcast %641 : f32 to vector<1x1xf32>
    %cst_462 = arith.constant 5.120000e+02 : f32
    %643 = vector.broadcast %cst_462 : f32 to vector<1x1xf32>
    %644 = arith.divf %642, %643 : vector<1x1xf32>
    %645 = math.sqrt %644 : vector<1x1xf32>
    %cst_463 = arith.constant 9.99999974E-6 : f32
    %646 = vector.broadcast %cst_463 : f32 to vector<1x1xf32>
    %647 = arith.addf %645, %646 : vector<1x1xf32>
    %648 = vector.broadcast %647 : vector<1x1xf32> to vector<16x32xf32>
    %649 = arith.divf %636, %648 : vector<16x32xf32>
    %c0_464 = arith.constant 0 : index
    %c32_465 = arith.constant 32 : index
    %650 = vector.load %arg57[%c0_464, %c32_465] : memref<32x64xf32, #tpu.memory_space<vmem>>, vector<16x32xf32>
    tpu.vector_store %arg57[%c0_464, %c32_465], %649 {strides = array<i32>} : memref<32x64xf32, #tpu.memory_space<vmem>>, vector<16x32xf32>,
    %c0_466 = arith.constant 0 : index
    %c0_467 = arith.constant 0 : index
    %651 = vector.load %arg57[%c0_466, %c0_467] : memref<32x64xf32, #tpu.memory_space<vmem>>, vector<16x64xf32>
    %c0_468 = arith.constant 0 : index
    %c0_469 = arith.constant 0 : index
    %652 = vector.load %arg27[%c0_468, %c0_469] : memref<64x32xf32, #tpu.memory_space<vmem>>, vector<64x32xf32>
    %cst_470 = arith.constant dense<0.000000e+00> : vector<16x32xf32>
    %653 = tpu.matmul %651, %652, %cst_470 {dimension_numbers = #tpu.dot_dimension_numbers<[1], [0], [0], [1], [0, 0, 1, 1], [], []>} : vector<16x64xf32>, vector<64x32xf32>, vector<16x32xf32> -> vector<16x32xf32>
    %c0_471 = arith.constant 0 : index
    %c0_472 = arith.constant 0 : index
    %654 = vector.load %arg28[%c0_471, %c0_472] : memref<1x32xf32, #tpu.memory_space<vmem>>, vector<1x32xf32>
    %655 = vector.broadcast %604 : vector<16x1xf32> to vector<16x32xf32>
    %656 = vector.broadcast %654 : vector<1x32xf32> to vector<16x32xf32>
    %657 = arith.mulf %655, %656 : vector<16x32xf32>
    %658 = arith.addf %653, %657 : vector<16x32xf32>
    %c0_473 = arith.constant 0 : index
    %c0_474 = arith.constant 0 : index
    %659 = vector.load %arg29[%c0_473, %c0_474] : memref<1x32xf32, #tpu.memory_space<vmem>>, vector<1x32xf32>
    %660 = vector.broadcast %659 : vector<1x32xf32> to vector<16x32xf32>
    %661 = arith.addf %658, %660 : vector<16x32xf32>
    %662 = arith.negf %661 : vector<16x32xf32>
    %663 = math.exp %662 : vector<16x32xf32>
    %cst_475 = arith.constant 1.000000e+00 : f32
    %664 = vector.broadcast %cst_475 : f32 to vector<16x32xf32>
    %665 = arith.addf %664, %663 : vector<16x32xf32>
    %666 = arith.divf %664, %665 : vector<16x32xf32>
    %667 = arith.mulf %661, %666 : vector<16x32xf32>
    %c0_476 = arith.constant 0 : index
    %c0_477 = arith.constant 0 : index
    %668 = vector.load %arg30[%c0_476, %c0_477] : memref<32x32xf32, #tpu.memory_space<vmem>>, vector<32x32xf32>
    %cst_478 = arith.constant dense<0.000000e+00> : vector<16x32xf32>
    %669 = tpu.matmul %667, %668, %cst_478 {dimension_numbers = #tpu.dot_dimension_numbers<[1], [0], [0], [1], [0, 0, 1, 1], [], []>} : vector<16x32xf32>, vector<32x32xf32>, vector<16x32xf32> -> vector<16x32xf32>
    %c0_479 = arith.constant 0 : index
    %c0_480 = arith.constant 0 : index
    %670 = vector.load %arg31[%c0_479, %c0_480] : memref<1x32xf32, #tpu.memory_space<vmem>>, vector<1x32xf32>
    %671 = vector.broadcast %670 : vector<1x32xf32> to vector<16x32xf32>
    %672 = arith.addf %669, %671 : vector<16x32xf32>
    %c0_481 = arith.constant 0 : index
    %c0_482 = arith.constant 0 : index
    %673 = vector.load %arg32[%c0_481, %c0_482] : memref<32x32xf32, #tpu.memory_space<vmem>>, vector<32x32xf32>
    %cst_483 = arith.constant dense<0.000000e+00> : vector<16x32xf32>
    %674 = tpu.matmul %672, %673, %cst_483 {dimension_numbers = #tpu.dot_dimension_numbers<[1], [0], [0], [1], [0, 0, 1, 1], [], []>} : vector<16x32xf32>, vector<32x32xf32>, vector<16x32xf32> -> vector<16x32xf32>
    %c0_484 = arith.constant 0 : index
    %c0_485 = arith.constant 0 : index
    %675 = vector.load %arg33[%c0_484, %c0_485] : memref<1x32xf32, #tpu.memory_space<vmem>>, vector<1x32xf32>
    %676 = vector.broadcast %675 : vector<1x32xf32> to vector<16x32xf32>
    %677 = arith.addf %674, %676 : vector<16x32xf32>
    %678 = arith.negf %677 : vector<16x32xf32>
    %679 = math.exp %678 : vector<16x32xf32>
    %cst_486 = arith.constant 1.000000e+00 : f32
    %680 = vector.broadcast %cst_486 : f32 to vector<16x32xf32>
    %681 = arith.addf %680, %679 : vector<16x32xf32>
    %682 = arith.divf %680, %681 : vector<16x32xf32>
    %683 = arith.mulf %677, %682 : vector<16x32xf32>
    %c0_487 = arith.constant 0 : index
    %c0_488 = arith.constant 0 : index
    %684 = vector.load %arg34[%c0_487, %c0_488] : memref<1x32xf32, #tpu.memory_space<vmem>>, vector<1x32xf32>
    %685 = vector.broadcast %684 : vector<1x32xf32> to vector<16x32xf32>
    %686 = arith.mulf %683, %685 : vector<16x32xf32>
    %cst_489 = arith.constant dense<0.000000e+00> : vector<16xf32>
    %687 = vector.multi_reduction <add>, %686, %cst_489 [1] : vector<16x32xf32> to vector<16xf32>
    %688 = vector.shape_cast %687 : vector<16xf32> to vector<16x1xf32>
    %c0_490 = arith.constant 0 : index
    %c0_491 = arith.constant 0 : index
    %689 = vector.load %arg35[%c0_490, %c0_491] : memref<1x1xf32, #tpu.memory_space<vmem>>, vector<1x1xf32>
    %690 = vector.broadcast %689 : vector<1x1xf32> to vector<16x1xf32>
    %691 = arith.addf %688, %690 : vector<16x1xf32>
    %cst_492 = arith.constant 9.99999993E-9 : f32
    %692 = vector.broadcast %cst_492 : f32 to vector<16x1xf32>
    %693 = arith.maximumf %604, %692 : vector<16x1xf32>
    %694 = vector.broadcast %693 : vector<16x1xf32> to vector<16x3xf32>
    %695 = arith.divf %600, %694 : vector<16x3xf32>
    %696 = vector.broadcast %691 : vector<16x1xf32> to vector<16x3xf32>
    %697 = arith.mulf %695, %696 : vector<16x3xf32>
    %c0_493 = arith.constant 0 : index
    %c0_494 = arith.constant 0 : index
    %698 = vector.load %arg58[%c0_493, %c0_494] : memref<32x35xf32, #tpu.memory_space<vmem>>, vector<16x32xf32>
    tpu.vector_store %arg58[%c0_493, %c0_494], %672 {strides = array<i32>} : memref<32x35xf32, #tpu.memory_space<vmem>>, vector<16x32xf32>,
    %c0_495 = arith.constant 0 : index
    %c32_496 = arith.constant 32 : index
    %699 = vector.load %arg58[%c0_495, %c32_496] : memref<32x35xf32, #tpu.memory_space<vmem>>, vector<16x3xf32>
    tpu.vector_store %arg58[%c0_495, %c32_496], %697 {strides = array<i32>} : memref<32x35xf32, #tpu.memory_space<vmem>>, vector<16x3xf32>,
    %c0_497 = arith.constant 0 : index
    %c0_498 = arith.constant 0 : index
    %700 = vector.load %arg8[%c0_497, %c0_498] : memref<2x16xf32, #tpu.memory_space<vmem>>, vector<2x16xf32>
    %c0_499 = arith.constant 0 : index
    %c0_500 = arith.constant 0 : index
    %701 = vector.load %arg58[%c0_499, %c0_500] : memref<32x35xf32, #tpu.memory_space<vmem>>, vector<16x35xf32>
    %cst_501 = arith.constant dense<0.000000e+00> : vector<2x35xf32>
    %702 = tpu.matmul %700, %701, %cst_501 {dimension_numbers = #tpu.dot_dimension_numbers<[1], [0], [0], [1], [0, 0, 1, 1], [], []>} : vector<2x16xf32>, vector<16x35xf32>, vector<2x35xf32> -> vector<2x35xf32>
    %c0_502 = arith.constant 0 : index
    %c0_503 = arith.constant 0 : index
    %703 = vector.load %arg59[%c0_502, %c0_503] : memref<16x35xf32, #tpu.memory_space<vmem>>, vector<2x35xf32>
    tpu.vector_store %arg59[%c0_502, %c0_503], %702 {strides = array<i32>} : memref<16x35xf32, #tpu.memory_space<vmem>>, vector<2x35xf32>,
    %c0_504 = arith.constant 0 : index
    %c0_505 = arith.constant 0 : index
    %704 = vector.load %arg59[%c0_504, %c0_505] : memref<16x35xf32, #tpu.memory_space<vmem>>, vector<2x32xf32>
    %c0_506 = arith.constant 0 : index
    %c32_507 = arith.constant 32 : index
    %705 = vector.load %arg59[%c0_506, %c32_507] : memref<16x35xf32, #tpu.memory_space<vmem>>, vector<2x3xf32>
    %c0_508 = arith.constant 0 : index
    %c0_509 = arith.constant 0 : index
    %706 = vector.load %arg9[%c0_508, %c0_509] : memref<2x1xf32, #tpu.memory_space<vmem>>, vector<2x1xf32>
    %707 = vector.broadcast %706 : vector<2x1xf32> to vector<2x3xf32>
    %708 = arith.mulf %705, %707 : vector<2x3xf32>
    %c0_510 = arith.constant 0 : index
    %c0_511 = arith.constant 0 : index
    %709 = vector.load %arg54[%c0_510, %c0_511] : memref<2x128xf32, #tpu.memory_space<vmem>>, vector<2x32xf32>
    %c0_512 = arith.constant 0 : index
    %c32_513 = arith.constant 32 : index
    %710 = vector.load %arg54[%c0_512, %c32_513] : memref<2x128xf32, #tpu.memory_space<vmem>>, vector<2x3xf32>
    %c0_514 = arith.constant 0 : index
    %c0_515 = arith.constant 0 : index
    %711 = vector.load %arg60[%c0_514, %c0_515] : memref<16x64xf32, #tpu.memory_space<vmem>>, vector<2x32xf32>
    tpu.vector_store %arg60[%c0_514, %c0_515], %709 {strides = array<i32>} : memref<16x64xf32, #tpu.memory_space<vmem>>, vector<2x32xf32>,
    %c0_516 = arith.constant 0 : index
    %c32_517 = arith.constant 32 : index
    %712 = vector.load %arg60[%c0_516, %c32_517] : memref<16x64xf32, #tpu.memory_space<vmem>>, vector<2x32xf32>
    tpu.vector_store %arg60[%c0_516, %c32_517], %704 {strides = array<i32>} : memref<16x64xf32, #tpu.memory_space<vmem>>, vector<2x32xf32>,
    %c0_518 = arith.constant 0 : index
    %c0_519 = arith.constant 0 : index
    %713 = vector.load %arg60[%c0_518, %c0_519] : memref<16x64xf32, #tpu.memory_space<vmem>>, vector<2x64xf32>
    %c0_520 = arith.constant 0 : index
    %c0_521 = arith.constant 0 : index
    %714 = vector.load %arg36[%c0_520, %c0_521] : memref<64x32xf32, #tpu.memory_space<vmem>>, vector<64x32xf32>
    %cst_522 = arith.constant dense<0.000000e+00> : vector<2x32xf32>
    %715 = tpu.matmul %713, %714, %cst_522 {dimension_numbers = #tpu.dot_dimension_numbers<[1], [0], [0], [1], [0, 0, 1, 1], [], []>} : vector<2x64xf32>, vector<64x32xf32>, vector<2x32xf32> -> vector<2x32xf32>
    %c0_523 = arith.constant 0 : index
    %c0_524 = arith.constant 0 : index
    %716 = vector.load %arg37[%c0_523, %c0_524] : memref<1x32xf32, #tpu.memory_space<vmem>>, vector<1x32xf32>
    %717 = vector.broadcast %716 : vector<1x32xf32> to vector<2x32xf32>
    %718 = arith.addf %715, %717 : vector<2x32xf32>
    %719 = arith.negf %718 : vector<2x32xf32>
    %720 = math.exp %719 : vector<2x32xf32>
    %cst_525 = arith.constant 1.000000e+00 : f32
    %721 = vector.broadcast %cst_525 : f32 to vector<2x32xf32>
    %722 = arith.addf %721, %720 : vector<2x32xf32>
    %723 = arith.divf %721, %722 : vector<2x32xf32>
    %724 = arith.mulf %718, %723 : vector<2x32xf32>
    %c0_526 = arith.constant 0 : index
    %c0_527 = arith.constant 0 : index
    %725 = vector.load %arg38[%c0_526, %c0_527] : memref<32x32xf32, #tpu.memory_space<vmem>>, vector<32x32xf32>
    %cst_528 = arith.constant dense<0.000000e+00> : vector<2x32xf32>
    %726 = tpu.matmul %724, %725, %cst_528 {dimension_numbers = #tpu.dot_dimension_numbers<[1], [0], [0], [1], [0, 0, 1, 1], [], []>} : vector<2x32xf32>, vector<32x32xf32>, vector<2x32xf32> -> vector<2x32xf32>
    %c0_529 = arith.constant 0 : index
    %c0_530 = arith.constant 0 : index
    %727 = vector.load %arg39[%c0_529, %c0_530] : memref<1x32xf32, #tpu.memory_space<vmem>>, vector<1x32xf32>
    %728 = vector.broadcast %727 : vector<1x32xf32> to vector<2x32xf32>
    %729 = arith.addf %726, %728 : vector<2x32xf32>
    %730 = arith.addf %709, %729 : vector<2x32xf32>
    %c0_531 = arith.constant 0 : index
    %c0_532 = arith.constant 0 : index
    %731 = vector.load %arg54[%c0_531, %c0_532] : memref<2x128xf32, #tpu.memory_space<vmem>>, vector<2x32xf32>
    tpu.vector_store %arg54[%c0_531, %c0_532], %730 {strides = array<i32>} : memref<2x128xf32, #tpu.memory_space<vmem>>, vector<2x32xf32>,
    %732 = arith.addf %710, %708 : vector<2x3xf32>
    %c0_533 = arith.constant 0 : index
    %c32_534 = arith.constant 32 : index
    %733 = vector.load %arg54[%c0_533, %c32_534] : memref<2x128xf32, #tpu.memory_space<vmem>>, vector<2x3xf32>
    tpu.vector_store %arg54[%c0_533, %c32_534], %732 {strides = array<i32>} : memref<2x128xf32, #tpu.memory_space<vmem>>, vector<2x3xf32>,
    %c0_535 = arith.constant 0 : index
    %c0_536 = arith.constant 0 : index
    %734 = vector.load %arg10[%c0_535, %c0_536] : memref<16x2xf32, #tpu.memory_space<vmem>>, vector<16x2xf32>
    %c0_537 = arith.constant 0 : index
    %c0_538 = arith.constant 0 : index
    %735 = vector.load %arg54[%c0_537, %c0_538] : memref<2x128xf32, #tpu.memory_space<vmem>>, vector<2x35xf32>
    %cst_539 = arith.constant dense<0.000000e+00> : vector<16x35xf32>
    %736 = tpu.matmul %734, %735, %cst_539 {dimension_numbers = #tpu.dot_dimension_numbers<[1], [0], [0], [1], [0, 0, 1, 1], [], []>} : vector<16x2xf32>, vector<2x35xf32>, vector<16x35xf32> -> vector<16x35xf32>
    %c0_540 = arith.constant 0 : index
    %c0_541 = arith.constant 0 : index
    %737 = vector.load %arg55[%c0_540, %c0_541] : memref<32x35xf32, #tpu.memory_space<vmem>>, vector<16x35xf32>
    tpu.vector_store %arg55[%c0_540, %c0_541], %736 {strides = array<i32>} : memref<32x35xf32, #tpu.memory_space<vmem>>, vector<16x35xf32>,
    %c0_542 = arith.constant 0 : index
    %c0_543 = arith.constant 0 : index
    %738 = vector.load %arg11[%c0_542, %c0_543] : memref<16x16xf32, #tpu.memory_space<vmem>>, vector<16x16xf32>
    %c0_544 = arith.constant 0 : index
    %c0_545 = arith.constant 0 : index
    %739 = vector.load %arg53[%c0_544, %c0_545] : memref<16x128xf32, #tpu.memory_space<vmem>>, vector<16x35xf32>
    %cst_546 = arith.constant dense<0.000000e+00> : vector<16x35xf32>
    %740 = tpu.matmul %738, %739, %cst_546 {dimension_numbers = #tpu.dot_dimension_numbers<[1], [0], [0], [1], [0, 0, 1, 1], [], []>} : vector<16x16xf32>, vector<16x35xf32>, vector<16x35xf32> -> vector<16x35xf32>
    %c0_547 = arith.constant 0 : index
    %c0_548 = arith.constant 0 : index
    %741 = vector.load %arg56[%c0_547, %c0_548] : memref<32x35xf32, #tpu.memory_space<vmem>>, vector<16x35xf32>
    tpu.vector_store %arg56[%c0_547, %c0_548], %740 {strides = array<i32>} : memref<32x35xf32, #tpu.memory_space<vmem>>, vector<16x35xf32>,
    %c0_549 = arith.constant 0 : index
    %c0_550 = arith.constant 0 : index
    %742 = vector.load %arg55[%c0_549, %c0_550] : memref<32x35xf32, #tpu.memory_space<vmem>>, vector<16x32xf32>
    %c0_551 = arith.constant 0 : index
    %c32_552 = arith.constant 32 : index
    %743 = vector.load %arg55[%c0_551, %c32_552] : memref<32x35xf32, #tpu.memory_space<vmem>>, vector<16x3xf32>
    %c0_553 = arith.constant 0 : index
    %c0_554 = arith.constant 0 : index
    %744 = vector.load %arg56[%c0_553, %c0_554] : memref<32x35xf32, #tpu.memory_space<vmem>>, vector<16x32xf32>
    %c0_555 = arith.constant 0 : index
    %c32_556 = arith.constant 32 : index
    %745 = vector.load %arg56[%c0_555, %c32_556] : memref<32x35xf32, #tpu.memory_space<vmem>>, vector<16x3xf32>
    %746 = arith.subf %745, %743 : vector<16x3xf32>
    %747 = arith.mulf %746, %746 : vector<16x3xf32>
    %cst_557 = arith.constant dense<0.000000e+00> : vector<16xf32>
    %748 = vector.multi_reduction <add>, %747, %cst_557 [1] : vector<16x3xf32> to vector<16xf32>
    %749 = vector.shape_cast %748 : vector<16xf32> to vector<16x1xf32>
    %750 = math.sqrt %749 : vector<16x1xf32>
    %751 = vector.shape_cast %744 : vector<16x32xf32> to vector<1x16x32xf32>
    %cst_558 = arith.constant dense<0.000000e+00> : vector<1xf32>
    %752 = vector.multi_reduction <add>, %751, %cst_558 [1, 2] : vector<1x16x32xf32> to vector<1xf32>
    %753 = vector.shape_cast %752 : vector<1xf32> to vector<1x1x1xf32>
    %754 = vector.extract %753[0, 0, 0] : f32 from vector<1x1x1xf32>
    %755 = vector.broadcast %754 : f32 to vector<1x1xf32>
    %cst_559 = arith.constant 5.120000e+02 : f32
    %756 = vector.broadcast %cst_559 : f32 to vector<1x1xf32>
    %757 = arith.divf %755, %756 : vector<1x1xf32>
    %758 = vector.broadcast %757 : vector<1x1xf32> to vector<16x32xf32>
    %759 = arith.subf %744, %758 : vector<16x32xf32>
    %760 = arith.mulf %759, %759 : vector<16x32xf32>
    %761 = vector.shape_cast %760 : vector<16x32xf32> to vector<1x16x32xf32>
    %cst_560 = arith.constant dense<0.000000e+00> : vector<1xf32>
    %762 = vector.multi_reduction <add>, %761, %cst_560 [1, 2] : vector<1x16x32xf32> to vector<1xf32>
    %763 = vector.shape_cast %762 : vector<1xf32> to vector<1x1x1xf32>
    %764 = vector.extract %763[0, 0, 0] : f32 from vector<1x1x1xf32>
    %765 = vector.broadcast %764 : f32 to vector<1x1xf32>
    %cst_561 = arith.constant 5.120000e+02 : f32
    %766 = vector.broadcast %cst_561 : f32 to vector<1x1xf32>
    %767 = arith.divf %765, %766 : vector<1x1xf32>
    %768 = math.sqrt %767 : vector<1x1xf32>
    %cst_562 = arith.constant 9.99999974E-6 : f32
    %769 = vector.broadcast %cst_562 : f32 to vector<1x1xf32>
    %770 = arith.addf %768, %769 : vector<1x1xf32>
    %771 = vector.broadcast %770 : vector<1x1xf32> to vector<16x32xf32>
    %772 = arith.divf %759, %771 : vector<16x32xf32>
    %c0_563 = arith.constant 0 : index
    %c0_564 = arith.constant 0 : index
    %773 = vector.load %arg57[%c0_563, %c0_564] : memref<32x64xf32, #tpu.memory_space<vmem>>, vector<16x32xf32>
    tpu.vector_store %arg57[%c0_563, %c0_564], %772 {strides = array<i32>} : memref<32x64xf32, #tpu.memory_space<vmem>>, vector<16x32xf32>,
    %774 = vector.shape_cast %742 : vector<16x32xf32> to vector<1x16x32xf32>
    %cst_565 = arith.constant dense<0.000000e+00> : vector<1xf32>
    %775 = vector.multi_reduction <add>, %774, %cst_565 [1, 2] : vector<1x16x32xf32> to vector<1xf32>
    %776 = vector.shape_cast %775 : vector<1xf32> to vector<1x1x1xf32>
    %777 = vector.extract %776[0, 0, 0] : f32 from vector<1x1x1xf32>
    %778 = vector.broadcast %777 : f32 to vector<1x1xf32>
    %cst_566 = arith.constant 5.120000e+02 : f32
    %779 = vector.broadcast %cst_566 : f32 to vector<1x1xf32>
    %780 = arith.divf %778, %779 : vector<1x1xf32>
    %781 = vector.broadcast %780 : vector<1x1xf32> to vector<16x32xf32>
    %782 = arith.subf %742, %781 : vector<16x32xf32>
    %783 = arith.mulf %782, %782 : vector<16x32xf32>
    %784 = vector.shape_cast %783 : vector<16x32xf32> to vector<1x16x32xf32>
    %cst_567 = arith.constant dense<0.000000e+00> : vector<1xf32>
    %785 = vector.multi_reduction <add>, %784, %cst_567 [1, 2] : vector<1x16x32xf32> to vector<1xf32>
    %786 = vector.shape_cast %785 : vector<1xf32> to vector<1x1x1xf32>
    %787 = vector.extract %786[0, 0, 0] : f32 from vector<1x1x1xf32>
    %788 = vector.broadcast %787 : f32 to vector<1x1xf32>
    %cst_568 = arith.constant 5.120000e+02 : f32
    %789 = vector.broadcast %cst_568 : f32 to vector<1x1xf32>
    %790 = arith.divf %788, %789 : vector<1x1xf32>
    %791 = math.sqrt %790 : vector<1x1xf32>
    %cst_569 = arith.constant 9.99999974E-6 : f32
    %792 = vector.broadcast %cst_569 : f32 to vector<1x1xf32>
    %793 = arith.addf %791, %792 : vector<1x1xf32>
    %794 = vector.broadcast %793 : vector<1x1xf32> to vector<16x32xf32>
    %795 = arith.divf %782, %794 : vector<16x32xf32>
    %c0_570 = arith.constant 0 : index
    %c32_571 = arith.constant 32 : index
    %796 = vector.load %arg57[%c0_570, %c32_571] : memref<32x64xf32, #tpu.memory_space<vmem>>, vector<16x32xf32>
    tpu.vector_store %arg57[%c0_570, %c32_571], %795 {strides = array<i32>} : memref<32x64xf32, #tpu.memory_space<vmem>>, vector<16x32xf32>,
    %c0_572 = arith.constant 0 : index
    %c0_573 = arith.constant 0 : index
    %797 = vector.load %arg57[%c0_572, %c0_573] : memref<32x64xf32, #tpu.memory_space<vmem>>, vector<16x64xf32>
    %c0_574 = arith.constant 0 : index
    %c0_575 = arith.constant 0 : index
    %798 = vector.load %arg40[%c0_574, %c0_575] : memref<64x32xf32, #tpu.memory_space<vmem>>, vector<64x32xf32>
    %cst_576 = arith.constant dense<0.000000e+00> : vector<16x32xf32>
    %799 = tpu.matmul %797, %798, %cst_576 {dimension_numbers = #tpu.dot_dimension_numbers<[1], [0], [0], [1], [0, 0, 1, 1], [], []>} : vector<16x64xf32>, vector<64x32xf32>, vector<16x32xf32> -> vector<16x32xf32>
    %c0_577 = arith.constant 0 : index
    %c0_578 = arith.constant 0 : index
    %800 = vector.load %arg41[%c0_577, %c0_578] : memref<1x32xf32, #tpu.memory_space<vmem>>, vector<1x32xf32>
    %801 = vector.broadcast %750 : vector<16x1xf32> to vector<16x32xf32>
    %802 = vector.broadcast %800 : vector<1x32xf32> to vector<16x32xf32>
    %803 = arith.mulf %801, %802 : vector<16x32xf32>
    %804 = arith.addf %799, %803 : vector<16x32xf32>
    %c0_579 = arith.constant 0 : index
    %c0_580 = arith.constant 0 : index
    %805 = vector.load %arg42[%c0_579, %c0_580] : memref<1x32xf32, #tpu.memory_space<vmem>>, vector<1x32xf32>
    %806 = vector.broadcast %805 : vector<1x32xf32> to vector<16x32xf32>
    %807 = arith.addf %804, %806 : vector<16x32xf32>
    %808 = arith.negf %807 : vector<16x32xf32>
    %809 = math.exp %808 : vector<16x32xf32>
    %cst_581 = arith.constant 1.000000e+00 : f32
    %810 = vector.broadcast %cst_581 : f32 to vector<16x32xf32>
    %811 = arith.addf %810, %809 : vector<16x32xf32>
    %812 = arith.divf %810, %811 : vector<16x32xf32>
    %813 = arith.mulf %807, %812 : vector<16x32xf32>
    %c0_582 = arith.constant 0 : index
    %c0_583 = arith.constant 0 : index
    %814 = vector.load %arg43[%c0_582, %c0_583] : memref<32x32xf32, #tpu.memory_space<vmem>>, vector<32x32xf32>
    %cst_584 = arith.constant dense<0.000000e+00> : vector<16x32xf32>
    %815 = tpu.matmul %813, %814, %cst_584 {dimension_numbers = #tpu.dot_dimension_numbers<[1], [0], [0], [1], [0, 0, 1, 1], [], []>} : vector<16x32xf32>, vector<32x32xf32>, vector<16x32xf32> -> vector<16x32xf32>
    %c0_585 = arith.constant 0 : index
    %c0_586 = arith.constant 0 : index
    %816 = vector.load %arg44[%c0_585, %c0_586] : memref<1x32xf32, #tpu.memory_space<vmem>>, vector<1x32xf32>
    %817 = vector.broadcast %816 : vector<1x32xf32> to vector<16x32xf32>
    %818 = arith.addf %815, %817 : vector<16x32xf32>
    %c0_587 = arith.constant 0 : index
    %c0_588 = arith.constant 0 : index
    %819 = vector.load %arg45[%c0_587, %c0_588] : memref<32x32xf32, #tpu.memory_space<vmem>>, vector<32x32xf32>
    %cst_589 = arith.constant dense<0.000000e+00> : vector<16x32xf32>
    %820 = tpu.matmul %818, %819, %cst_589 {dimension_numbers = #tpu.dot_dimension_numbers<[1], [0], [0], [1], [0, 0, 1, 1], [], []>} : vector<16x32xf32>, vector<32x32xf32>, vector<16x32xf32> -> vector<16x32xf32>
    %c0_590 = arith.constant 0 : index
    %c0_591 = arith.constant 0 : index
    %821 = vector.load %arg46[%c0_590, %c0_591] : memref<1x32xf32, #tpu.memory_space<vmem>>, vector<1x32xf32>
    %822 = vector.broadcast %821 : vector<1x32xf32> to vector<16x32xf32>
    %823 = arith.addf %820, %822 : vector<16x32xf32>
    %824 = arith.negf %823 : vector<16x32xf32>
    %825 = math.exp %824 : vector<16x32xf32>
    %cst_592 = arith.constant 1.000000e+00 : f32
    %826 = vector.broadcast %cst_592 : f32 to vector<16x32xf32>
    %827 = arith.addf %826, %825 : vector<16x32xf32>
    %828 = arith.divf %826, %827 : vector<16x32xf32>
    %829 = arith.mulf %823, %828 : vector<16x32xf32>
    %c0_593 = arith.constant 0 : index
    %c0_594 = arith.constant 0 : index
    %830 = vector.load %arg47[%c0_593, %c0_594] : memref<1x32xf32, #tpu.memory_space<vmem>>, vector<1x32xf32>
    %831 = vector.broadcast %830 : vector<1x32xf32> to vector<16x32xf32>
    %832 = arith.mulf %829, %831 : vector<16x32xf32>
    %cst_595 = arith.constant dense<0.000000e+00> : vector<16xf32>
    %833 = vector.multi_reduction <add>, %832, %cst_595 [1] : vector<16x32xf32> to vector<16xf32>
    %834 = vector.shape_cast %833 : vector<16xf32> to vector<16x1xf32>
    %c0_596 = arith.constant 0 : index
    %c0_597 = arith.constant 0 : index
    %835 = vector.load %arg48[%c0_596, %c0_597] : memref<1x1xf32, #tpu.memory_space<vmem>>, vector<1x1xf32>
    %836 = vector.broadcast %835 : vector<1x1xf32> to vector<16x1xf32>
    %837 = arith.addf %834, %836 : vector<16x1xf32>
    %cst_598 = arith.constant 9.99999993E-9 : f32
    %838 = vector.broadcast %cst_598 : f32 to vector<16x1xf32>
    %839 = arith.maximumf %750, %838 : vector<16x1xf32>
    %840 = vector.broadcast %839 : vector<16x1xf32> to vector<16x3xf32>
    %841 = arith.divf %746, %840 : vector<16x3xf32>
    %842 = vector.broadcast %837 : vector<16x1xf32> to vector<16x3xf32>
    %843 = arith.mulf %841, %842 : vector<16x3xf32>
    %c0_599 = arith.constant 0 : index
    %c0_600 = arith.constant 0 : index
    %844 = vector.load %arg58[%c0_599, %c0_600] : memref<32x35xf32, #tpu.memory_space<vmem>>, vector<16x32xf32>
    tpu.vector_store %arg58[%c0_599, %c0_600], %818 {strides = array<i32>} : memref<32x35xf32, #tpu.memory_space<vmem>>, vector<16x32xf32>,
    %c0_601 = arith.constant 0 : index
    %c32_602 = arith.constant 32 : index
    %845 = vector.load %arg58[%c0_601, %c32_602] : memref<32x35xf32, #tpu.memory_space<vmem>>, vector<16x3xf32>
    tpu.vector_store %arg58[%c0_601, %c32_602], %843 {strides = array<i32>} : memref<32x35xf32, #tpu.memory_space<vmem>>, vector<16x3xf32>,
    %c0_603 = arith.constant 0 : index
    %c0_604 = arith.constant 0 : index
    %846 = vector.load %arg12[%c0_603, %c0_604] : memref<16x16xf32, #tpu.memory_space<vmem>>, vector<16x16xf32>
    %c0_605 = arith.constant 0 : index
    %c0_606 = arith.constant 0 : index
    %847 = vector.load %arg58[%c0_605, %c0_606] : memref<32x35xf32, #tpu.memory_space<vmem>>, vector<16x35xf32>
    %cst_607 = arith.constant dense<0.000000e+00> : vector<16x35xf32>
    %848 = tpu.matmul %846, %847, %cst_607 {dimension_numbers = #tpu.dot_dimension_numbers<[1], [0], [0], [1], [0, 0, 1, 1], [], []>} : vector<16x16xf32>, vector<16x35xf32>, vector<16x35xf32> -> vector<16x35xf32>
    %c0_608 = arith.constant 0 : index
    %c0_609 = arith.constant 0 : index
    %849 = vector.load %arg59[%c0_608, %c0_609] : memref<16x35xf32, #tpu.memory_space<vmem>>, vector<16x35xf32>
    tpu.vector_store %arg59[%c0_608, %c0_609], %848 {strides = array<i32>} : memref<16x35xf32, #tpu.memory_space<vmem>>, vector<16x35xf32>,
    %c0_610 = arith.constant 0 : index
    %c0_611 = arith.constant 0 : index
    %850 = vector.load %arg59[%c0_610, %c0_611] : memref<16x35xf32, #tpu.memory_space<vmem>>, vector<16x32xf32>
    %c0_612 = arith.constant 0 : index
    %c32_613 = arith.constant 32 : index
    %851 = vector.load %arg59[%c0_612, %c32_613] : memref<16x35xf32, #tpu.memory_space<vmem>>, vector<16x3xf32>
    %c0_614 = arith.constant 0 : index
    %c0_615 = arith.constant 0 : index
    %852 = vector.load %arg13[%c0_614, %c0_615] : memref<16x1xf32, #tpu.memory_space<vmem>>, vector<16x1xf32>
    %853 = vector.broadcast %852 : vector<16x1xf32> to vector<16x3xf32>
    %854 = arith.mulf %851, %853 : vector<16x3xf32>
    %c0_616 = arith.constant 0 : index
    %c0_617 = arith.constant 0 : index
    %855 = vector.load %arg53[%c0_616, %c0_617] : memref<16x128xf32, #tpu.memory_space<vmem>>, vector<16x32xf32>
    %c0_618 = arith.constant 0 : index
    %c32_619 = arith.constant 32 : index
    %856 = vector.load %arg53[%c0_618, %c32_619] : memref<16x128xf32, #tpu.memory_space<vmem>>, vector<16x3xf32>
    %c0_620 = arith.constant 0 : index
    %c0_621 = arith.constant 0 : index
    %857 = vector.load %arg60[%c0_620, %c0_621] : memref<16x64xf32, #tpu.memory_space<vmem>>, vector<16x32xf32>
    tpu.vector_store %arg60[%c0_620, %c0_621], %855 {strides = array<i32>} : memref<16x64xf32, #tpu.memory_space<vmem>>, vector<16x32xf32>,
    %c0_622 = arith.constant 0 : index
    %c32_623 = arith.constant 32 : index
    %858 = vector.load %arg60[%c0_622, %c32_623] : memref<16x64xf32, #tpu.memory_space<vmem>>, vector<16x32xf32>
    tpu.vector_store %arg60[%c0_622, %c32_623], %850 {strides = array<i32>} : memref<16x64xf32, #tpu.memory_space<vmem>>, vector<16x32xf32>,
    %c0_624 = arith.constant 0 : index
    %c0_625 = arith.constant 0 : index
    %859 = vector.load %arg60[%c0_624, %c0_625] : memref<16x64xf32, #tpu.memory_space<vmem>>, vector<16x64xf32>
    %c0_626 = arith.constant 0 : index
    %c0_627 = arith.constant 0 : index
    %860 = vector.load %arg49[%c0_626, %c0_627] : memref<64x32xf32, #tpu.memory_space<vmem>>, vector<64x32xf32>
    %cst_628 = arith.constant dense<0.000000e+00> : vector<16x32xf32>
    %861 = tpu.matmul %859, %860, %cst_628 {dimension_numbers = #tpu.dot_dimension_numbers<[1], [0], [0], [1], [0, 0, 1, 1], [], []>} : vector<16x64xf32>, vector<64x32xf32>, vector<16x32xf32> -> vector<16x32xf32>
    %c0_629 = arith.constant 0 : index
    %c0_630 = arith.constant 0 : index
    %862 = vector.load %arg50[%c0_629, %c0_630] : memref<1x32xf32, #tpu.memory_space<vmem>>, vector<1x32xf32>
    %863 = vector.broadcast %862 : vector<1x32xf32> to vector<16x32xf32>
    %864 = arith.addf %861, %863 : vector<16x32xf32>
    %865 = arith.negf %864 : vector<16x32xf32>
    %866 = math.exp %865 : vector<16x32xf32>
    %cst_631 = arith.constant 1.000000e+00 : f32
    %867 = vector.broadcast %cst_631 : f32 to vector<16x32xf32>
    %868 = arith.addf %867, %866 : vector<16x32xf32>
    %869 = arith.divf %867, %868 : vector<16x32xf32>
    %870 = arith.mulf %864, %869 : vector<16x32xf32>
    %c0_632 = arith.constant 0 : index
    %c0_633 = arith.constant 0 : index
    %871 = vector.load %arg51[%c0_632, %c0_633] : memref<32x32xf32, #tpu.memory_space<vmem>>, vector<32x32xf32>
    %cst_634 = arith.constant dense<0.000000e+00> : vector<16x32xf32>
    %872 = tpu.matmul %870, %871, %cst_634 {dimension_numbers = #tpu.dot_dimension_numbers<[1], [0], [0], [1], [0, 0, 1, 1], [], []>} : vector<16x32xf32>, vector<32x32xf32>, vector<16x32xf32> -> vector<16x32xf32>
    %c0_635 = arith.constant 0 : index
    %c0_636 = arith.constant 0 : index
    %873 = vector.load %arg52[%c0_635, %c0_636] : memref<1x32xf32, #tpu.memory_space<vmem>>, vector<1x32xf32>
    %874 = vector.broadcast %873 : vector<1x32xf32> to vector<16x32xf32>
    %875 = arith.addf %872, %874 : vector<16x32xf32>
    %876 = arith.addf %855, %875 : vector<16x32xf32>
    %c0_637 = arith.constant 0 : index
    %c0_638 = arith.constant 0 : index
    %877 = vector.load %arg53[%c0_637, %c0_638] : memref<16x128xf32, #tpu.memory_space<vmem>>, vector<16x32xf32>
    tpu.vector_store %arg53[%c0_637, %c0_638], %876 {strides = array<i32>} : memref<16x128xf32, #tpu.memory_space<vmem>>, vector<16x32xf32>,
    %878 = arith.addf %856, %854 : vector<16x3xf32>
    %c0_639 = arith.constant 0 : index
    %c32_640 = arith.constant 32 : index
    %879 = vector.load %arg53[%c0_639, %c32_640] : memref<16x128xf32, #tpu.memory_space<vmem>>, vector<16x3xf32>
    tpu.vector_store %arg53[%c0_639, %c32_640], %878 {strides = array<i32>} : memref<16x128xf32, #tpu.memory_space<vmem>>, vector<16x3xf32>,
    return
  }
}

</mosaic_0001>

<bundles_post_ra>
// kernel: egnn_global_node_hetero_forward.1
= control target key start
LH: loop header
LB: loop body
LE: loop exit
PB: predicated region body
PF: predicated region fallthrough
CT: control target
= control target key end

     0   :  { %s5699_s6 = smov 53   ;;  %s5700_s10 = smov 2   ;;  %vm239_vm0 = vcmask 130048   ;;  %vm281_vm1 = vcmask 285696   ;;  %vm430_vm2 = vcmask 261120   ;;  %v5702_v47 = vmov 1024.0   ;;  %s7381_s0 = inlined_call_operand.smem [shape: u32[55], index: -1, kind: input, shape index: {}] }
   0x1   :  { %s1_s5 = sld [smem:[%s7381_s0]]   ;;  %s5701_s14 = smov 3   ;;  %5415 = vrcp.f32 %v5702_v47 }
   0x2   :  { %s5768_s9 = sld [smem:[%s7381_s0 + %s5699_s6]]   ;;  %s5703_s22 = smov 14  }
   0x3   :  { %s5773_s13 = sld [smem:[%s7381_s0 + %s5700_s10]]   ;;  %s7384_s26 = smov 32  }
   0x4   :  { %s5778_s17 = sld [smem:[%s7381_s0 + %s5701_s14]]   ;;  %s7382_s27 = smov 96  }
   0x5   :  { %s5903_s25 = sld [smem:[%s7381_s0 + %s5703_s22]]   ;;  %s5706_s28 = smov 15  }
   0x6   :  { %s5955_s1 = sld [smem:[%s7381_s0 + %s5706_s28]]   ;;  %s5707_s2 = smov 16  }
   0x7   :  { %v228_v0 = vld [vmem:[%s1_s5 + $0x8] sm:$0xff]  ;;  %v227_v1 = vld [vmem:[%s1_s5] sm:$0xff]  ;;  %v5416_v48 = vpop.eup %5415  ;;  %s5960_s5 = sld [smem:[%s7381_s0 + %s5707_s2]]   ;;  %s5708_s6 = smov 18  }
   0x8   :  { %230 = vst [vmem:[%s5768_s9 + $0x8] sm:$0xff] %v228_v0  ;;  %266 = vmatpush.msra.mxu0 %v228_v0  ;;  %318 = vmatpush.msra.mxu1 %v228_v0  ;;  %v449_v49 = vmul.f32 1024.0, %v5416_v48  ;;  %vm453_vm3 = vweird.f32 %v5416_v48  ;;  %s5974_s10 = sld [smem:[%s7381_s0 + %s5708_s6]]   ;;  %s5709_s11 = smov 17  }
   0x9   :  { %229 = vst [vmem:[%s5768_s9] sm:$0xff] %v227_v1  ;;  %v233_v2 = vld [vmem:[%s5773_s13] sm:$0xff]  ;;  %v234_v4 = vld [vmem:[%s5773_s13 + $0x8] sm:$0xff]  ;;  %v235_v6 = vld [vmem:[%s5773_s13 + $0x10] sm:$0xff]  ;;  %s5979_s15 = sld [smem:[%s7381_s0 + %s5709_s11]]   ;;  %s5710_s16 = smov 19  }
   0xa   :  { %267 = vmatpush.msra.mxu0 %v227_v1  ;;  %319 = vmatpush.msra.mxu1 %v227_v1  ;;  %v286_v3 = vld [vmem:[%s5778_s17] sm:$0xff]  ;;  %v287_v5 = vld [vmem:[%s5778_s17 + $0x8] sm:$0xff]  ;;  %v288_v7 = vld [vmem:[%s5778_s17 + $0x10] sm:$0xff]  ;;  %v450_v50 = vsub.f32 1.0, %v449_v49  ;;  %s5712_s28 = smov 21   ;;  %s5713_s3 = smov 22  }
   0xb   :  { %5094 = vmatmul.msk.f32.vlgmr.msra.gmra.mxu0 %vm239_vm0, %v233_v2  ;;  %5098 = vmatmul.msk.f32.vlgmr.msra.gmra.mxu1 %vm239_vm0, %v286_v3  ;;  %v236_v8 = vld [vmem:[%s5773_s13 + $0x18] sm:$0xff]  ;;  %s6069_s2 = sld [smem:[%s7381_s0 + %s5712_s28]]   ;;  %s5715_s8 = smov 5  }
   0xc   :  { %v289_v9 = vld [vmem:[%s5778_s17 + $0x18] sm:$0xff]  ;;  %v451_v51 = vmul.f32 %v5416_v48, %v450_v50  ;;  %s5061_s7 = sld [smem:[%s7381_s0 + %s5713_s3]]   ;;  %s5717_s22 = smov 23  }
   0xd   :  { %s6115_s14 = sld [smem:[%s7381_s0 + %s5715_s8]]   ;;  %s5718_s30 = smov 24  }
   0xe   :  { %v452_v52 = vadd.f32 %v5416_v48, %v451_v51  ;;  %s6142_s29 = sld [smem:[%s7381_s0 + %s5717_s22]]   ;;  %s5721_s23 = smov 7  }
   0xf   :  { %s6167_s6 = sld [smem:[%s7381_s0 + %s5718_s30]]   ;;  %s5722_s4 = smov 25  }
  0x10   :  { %v5838_v53 = vsel %vm453_vm3, %v5416_v48, %v452_v52  ;;  %vm608_vm3 = vcmask 523520   ;;  %s6195_s3 = sld [smem:[%s7381_s0 + %s5721_s23]]   ;;  %s5724_s23 = smov 6  }
  0x11   :  { %s6205_s11 = sld [smem:[%s7381_s0 + %s5722_s4]]   ;;  %s5726_s30 = smov 27  }
  0x12   :  { %s6247_s4 = sld [smem:[%s7381_s0 + %s5724_s23]]  }
  0x13   :  { %5095 = vmatmul.msk.f32.gmra.mxu0 %vm239_vm0, %v234_v4  ;;  %5099 = vmatmul.msk.f32.gmra.mxu1 %vm239_vm0, %v287_v5 }
  0x18   :  { %7434 = sst [smem:[#allocation11_spill]] %s6247_s4 }
  0x1b   :  { %5096 = vmatmul.msk.f32.gmra.mxu0 %vm239_vm0, %v235_v6  ;;  %5100 = vmatmul.msk.f32.gmra.mxu1 %vm239_vm0, %v288_v7 }
  0x23   :  { %5097 = vmatmul.msk.f32.gmra.mxu0 %vm239_vm0, %v236_v8  ;;  %5101 = vmatmul.msk.f32.gmra.mxu1 %vm239_vm0, %v289_v9 }
  0x88   :  { %v269_v10 = vpop.f32.mrf.mxu0  ;;  %v321_v11 = vpop.f32.mrf.mxu1 }
  0x89   :  { %282 = vst.msk [vmem:[#allocation2] sm:$0xff] %vm281_vm1, %v269_v10 }
  0x8a   :  { %333 = vst.msk [vmem:[#allocation3] sm:$0xff] %vm281_vm1, %v321_v11 }
  0x90   :  { %v272_v12 = vpop.f32.mrf.mxu0  ;;  %v324_v13 = vpop.f32.mrf.mxu1  ;;  %v5822_v29 = vld [vmem:[#allocation2] sm:$0xff] }
  0x91   :  { %283 = vst.msk [vmem:[#allocation2 + $0x8] sm:$0xff] %vm281_vm1, %v272_v12  ;;  %v5808_v19 = vld [vmem:[#allocation3] sm:$0xff]  ;;  %v517_v32 = vsel %vm430_vm2, %v5822_v29, 0.0 }
  0x92   :  { %334 = vst.msk [vmem:[#allocation3 + $0x8] sm:$0xff] %vm281_vm1, %v324_v13  ;;  %v431_v22 = vsel %vm430_vm2, %v5808_v19, 0.0 }
  0x98   :  { %v275_v14 = vpop.f32.mrf.mxu0  ;;  %v327_v15 = vpop.f32.mrf.mxu1  ;;  %v5824_v30 = vld [vmem:[#allocation2 + $0x8] sm:$0xff] }
  0x99   :  { %284 = vst.msk [vmem:[#allocation2 + $0x10] sm:$0xff] %vm281_vm1, %v275_v14  ;;  %v5805_v18 = vld [vmem:[#allocation3 + $0x8] sm:$0xff]  ;;  %v518_v33 = vsel %vm430_vm2, %v5824_v30, 0.0 }
  0x9a   :  { %335 = vst.msk [vmem:[#allocation3 + $0x10] sm:$0xff] %vm281_vm1, %v327_v15  ;;  %v432_v21 = vsel %vm430_vm2, %v5805_v18, 0.0  ;;  %v519_v36 = vadd.f32 %v518_v33, %v517_v32 }
  0x9b   :  { %v433_v24 = vadd.f32 %v432_v21, %v431_v22 }
  0xa0   :  { %v278_v16 = vpop.f32.mrf.mxu0  ;;  %v330_v17 = vpop.f32.mrf.mxu1  ;;  %v5826_v31 = vld [vmem:[#allocation2 + $0x10] sm:$0xff] }
  0xa1   :  { %285 = vst.msk [vmem:[#allocation2 + $0x18] sm:$0xff] %vm281_vm1, %v278_v16  ;;  %v5810_v20 = vld [vmem:[#allocation3 + $0x10] sm:$0xff]  ;;  %v520_v34 = vsel %vm430_vm2, %v5826_v31, 0.0 }
  0xa2   :  { %336 = vst.msk [vmem:[#allocation3 + $0x18] sm:$0xff] %vm281_vm1, %v330_v17  ;;  %v434_v23 = vsel %vm430_vm2, %v5810_v20, 0.0  ;;  %v521_v38 = vadd.f32 %v520_v34, %v519_v36 }
  0xa3   :  { %v435_v26 = vadd.f32 %v434_v23, %v433_v24 }
  0xa8   :  { %v5834_v35 = vld [vmem:[#allocation2 + $0x18] sm:$0xff] }
  0xa9   :  { %v5818_v25 = vld [vmem:[#allocation3 + $0x18] sm:$0xff]  ;;  %v522_v37 = vsel %vm430_vm2, %v5834_v35, 0.0 }
  0xaa   :  { %v436_v27 = vsel %vm430_vm2, %v5818_v25, 0.0  ;;  %v523_v39 = vadd.f32 %v522_v37, %v521_v38 }
  0xab   :  { %v437_v28 = vadd.f32 %v436_v27, %v435_v26 }
  0xac   :  { %524 = vadd.xlane.f32.xlu1 %v523_v39 }
  0xad   :  { %438 = vadd.xlane.f32.xlu0 %v437_v28 }
 0x11f   :  { %v525_v7 = vpop.xlane.xlu1 %524 }
 0x120   :  { %v439_v40 = vpop.xlane.xlu0 %438  ;;  %v526_v8 = vrot.slane %v525_v7, 4 }
 0x121   :  { %v440_v41 = vrot.slane %v439_v40, 4 }
 0x122   :  { %v527_v9 = vadd.f32 %v526_v8, %v525_v7 }
 0x123   :  { %v441_v42 = vadd.f32 %v440_v41, %v439_v40 }
 0x124   :  { %v528_v10 = vrot.slane %v527_v9, 2 }
 0x125   :  { %v442_v43 = vrot.slane %v441_v42, 2 }
 0x126   :  { %v529_v14 = vadd.f32 %v528_v10, %v527_v9 }
 0x127   :  { %v443_v44 = vadd.f32 %v442_v43, %v441_v42 }
 0x128   :  { %v530_v17 = vrot.slane %v529_v14, 1 }
 0x129   :  { %v444_v45 = vrot.slane %v443_v44, 1 }
 0x12a   :  { %v531_v23 = vadd.f32 %v530_v17, %v529_v14 }
 0x12b   :  { %v445_v46 = vadd.f32 %v444_v45, %v443_v44 }
 0x12d   :  { %5258 = vpush %v445_v46 }
 0x15e   :  { %s5259_s18 = spop %5258 }
 0x15f   :  { %v447_v54 = vstv %s5259_s18 }
 0x160   :  { %v455_v55 = vmul.f32 %v5838_v53, %v447_v54 }
 0x162   :  { %v5842_v56 = vsub.f32 %v5808_v19, %v455_v55  ;;  %v5845_v57 = vsub.f32 %v5805_v18, %v455_v55  ;;  %v5848_v58 = vsub.f32 %v5810_v20, %v455_v55  ;;  %v5851_v59 = vsub.f32 %v5818_v25, %v455_v55 }
 0x164   :  { %v460_v60 = vmul.f32 %v5842_v56, %v5842_v56  ;;  %v461_v61 = vmul.f32 %v5845_v57, %v5845_v57  ;;  %v462_v62 = vmul.f32 %v5848_v58, %v5848_v58  ;;  %v463_v63 = vmul.f32 %v5851_v59, %v5851_v59 }
 0x166   :  { %v464_v0 = vsel %vm430_vm2, %v460_v60, 0.0  ;;  %v465_v1 = vsel %vm430_vm2, %v461_v61, 0.0  ;;  %v467_v3 = vsel %vm430_vm2, %v462_v62, 0.0  ;;  %v469_v5 = vsel %vm430_vm2, %v463_v63, 0.0 }
 0x167   :  { %v466_v2 = vadd.f32 %v465_v1, %v464_v0 }
 0x169   :  { %v468_v4 = vadd.f32 %v467_v3, %v466_v2 }
 0x16b   :  { %v470_v6 = vadd.f32 %v469_v5, %v468_v4 }
 0x16d   :  { %471 = vadd.xlane.f32.xlu0 %v470_v6 }
 0x1e0   :  { %v472_v11 = vpop.xlane.xlu0 %471 }
 0x1e1   :  { %v473_v12 = vrot.slane %v472_v11, 4 }
 0x1e3   :  { %v474_v13 = vadd.f32 %v473_v12, %v472_v11 }
 0x1e5   :  { %v475_v15 = vrot.slane %v474_v13, 2 }
 0x1e7   :  { %v476_v16 = vadd.f32 %v475_v15, %v474_v13 }
 0x1e9   :  { %v477_v21 = vrot.slane %v476_v16, 1 }
 0x1eb   :  { %v478_v22 = vadd.f32 %v477_v21, %v476_v16 }
 0x1ed   :  { %5260 = vpush %v478_v22 }
 0x1ee   :  { %5262 = vpush %v531_v23 }
 0x21e   :  { %s5261_s19 = spop %5260 }
 0x21f   :  { %v480_v24 = vstv %s5261_s19  ;;  %s5263_s20 = spop %5262 }
 0x220   :  { %v481_v26 = vmul.f32 %v480_v24, %v5838_v53  ;;  %v533_v27 = vstv %s5263_s20  ;;  %s6036_s20 = sld [smem:[%s7381_s0 + %s5710_s16]]   ;;  %s5716_s16 = smov 4  }
 0x221   :  { %v534_v28 = vmul.f32 %v533_v27, %v5838_v53 }
 0x222   :  { %5417 = vrsqrt.f32 %v481_v26  ;;  %vm489_vm4 = vcmp.eq.f32.partialorder %v481_v26, inf  ;;  %v492_v60 = vand.u32 2147483648, %v481_v26  ;;  %vm491_vm5 = vcmp.eq.f32.partialorder %v481_v26, 0.0 }
 0x223   :  { %v5868_v32 = vsub.f32 %v5822_v29, %v534_v28  ;;  %v5871_v33 = vsub.f32 %v5824_v30, %v534_v28  ;;  %v5874_v34 = vsub.f32 %v5826_v31, %v534_v28  ;;  %v5877_v36 = vsub.f32 %v5834_v35, %v534_v28 }
 0x225   :  { %v539_v37 = vmul.f32 %v5868_v32, %v5868_v32  ;;  %v540_v38 = vmul.f32 %v5871_v33, %v5871_v33  ;;  %v541_v39 = vmul.f32 %v5874_v34, %v5874_v34  ;;  %v542_v40 = vmul.f32 %v5877_v36, %v5877_v36 }
 0x227   :  { %v543_v41 = vsel %vm430_vm2, %v539_v37, 0.0  ;;  %v544_v42 = vsel %vm430_vm2, %v540_v38, 0.0  ;;  %v546_v46 = vsel %vm430_vm2, %v541_v39, 0.0  ;;  %v548_v49 = vsel %vm430_vm2, %v542_v40, 0.0 }
 0x228   :  { %v5418_v43 = vpop.eup %5417  ;;  %v545_v44 = vadd.f32 %v544_v42, %v543_v41 }
 0x229   :  { %v483_v45 = vmul.f32 %v5418_v43, %v481_v26 }
 0x22a   :  { %v547_v47 = vadd.f32 %v546_v46, %v545_v44 }
 0x22b   :  { %v484_v48 = vmul.f32 %v5418_v43, %v483_v45 }
 0x22c   :  { %v549_v50 = vadd.f32 %v548_v49, %v547_v47 }
 0x22d   :  { %v485_v51 = vmul.f32 0.5, %v484_v48 }
 0x22e   :  { %550 = vadd.xlane.f32.xlu1 %v549_v50 }
 0x22f   :  { %v486_v52 = vsub.f32 1.5, %v485_v51 }
 0x231   :  { %v487_v54 = vmul.f32 %v5418_v43, %v486_v52 }
 0x233   :  { %v488_v55 = vmul.f32 %v487_v54, %v481_v26 }
 0x235   :  { %v490_v61 = vsel %vm489_vm4, %v481_v26, %v488_v55  ;;  %vm633_vm4 = vcmask 523264  }
 0x236   :  { %v493_v62 = vsel %vm491_vm5, %v492_v60, %v490_v61  ;;  %v624_v60 = vld [vmem:[%s5903_s25 + $0x38] sm:$0xff]  ;;  %v623_v61 = vld [vmem:[%s5903_s25 + $0x30] sm:$0xff]  ;;  %vm369_vm5 = vcmask 23552  }
 0x237   :  { %v494_v63 = vadd.f32 1e-05, %v493_v62  ;;  %v5915_v62 = vsub.f32 %v5818_v25, %v5834_v35  ;;  %654 = vmatpush.msrb.mxu0 %v624_v60  ;;  %5250 = vmatpush.msra.mxu2 %v624_v60  ;;  %v5926_v25 = vsub.f32 %v5808_v19, %v5822_v29  ;;  %v620_v29 = vld [vmem:[%s5903_s25 + $0x18] sm:$0xff] }
 0x239   :  { %5419 = vrcp.f32 %v494_v63  ;;  %v506_v3 = vand.u32 2147483648, %v494_v63  ;;  %v504_v5 = vand.u32 2147483647, %v494_v63  ;;  %vm500_vm7 = vweird.f32 %v494_v63  ;;  %655 = vmatpush.msrb.mxu0 %v623_v61  ;;  %5251 = vmatpush.msra.mxu2 %v623_v61 }
 0x23a   :  { %v349_v35 = vmul.f32 %v5926_v25, %v5926_v25 }
 0x23b   :  { %v507_v7 = vor.u32 1.1754944e-38, %v506_v3  ;;  %vm505_vm9 = vcmp.eq.f32.partialorder %v504_v5, 8.507059e+37 }
 0x23f   :  { %v5420_v0 = vpop.eup %5419 }
 0x240   :  { %v496_v1 = vmul.f32 %v5420_v0, %v494_v63  ;;  %vm501_vm6 = vweird.f32 %v5420_v0 }
 0x241   :  { %vm502_vm8 = vmor %vm500_vm7, %vm501_vm6 }
 0x242   :  { %v497_v2 = vsub.f32 1.0, %v496_v1  ;;  %v5940_v1 = vsub.f32 %v5810_v20, %v5826_v31 }
 0x244   :  { %v498_v4 = vmul.f32 %v5420_v0, %v497_v2  ;;  %v351_v19 = vmul.f32 %v5940_v1, %v5940_v1  ;;  %v619_v2 = vld [vmem:[%s5903_s25 + $0x10] sm:$0xff] }
 0x246   :  { %v499_v6 = vadd.f32 %v5420_v0, %v498_v4 }
 0x248   :  { %v503_v8 = vsel %vm502_vm8, %v5420_v0, %v499_v6 }
 0x249   :  { %v508_v9 = vsel %vm505_vm9, %v507_v7, %v503_v8 }
 0x24a   :  { %v509_v10 = vmul.f32 %v508_v9, %v5842_v56  ;;  %v510_v11 = vmul.f32 %v508_v9, %v5845_v57  ;;  %v512_v12 = vmul.f32 %v508_v9, %v5851_v59  ;;  %v511_v13 = vmul.f32 %v508_v9, %v5848_v58 }
 0x24c   :  { %513 = vst.msk [vmem:[#allocation4] sm:$0xff] %vm430_vm2, %v509_v10 }
 0x24d   :  { %514 = vst.msk [vmem:[#allocation4 + $0x8] sm:$0xff] %vm430_vm2, %v510_v11 }
 0x24e   :  { %516 = vst.msk [vmem:[#allocation4 + $0x18] sm:$0xff] %vm430_vm2, %v512_v12 }
 0x24f   :  { %515 = vst.msk [vmem:[#allocation4 + $0x10] sm:$0xff] %vm430_vm2, %v511_v13 }
 0x2a1   :  { %v551_v14 = vpop.xlane.xlu1 %550 }
 0x2a2   :  { %v552_v15 = vrot.slane %v551_v14, 4 }
 0x2a4   :  { %v553_v16 = vadd.f32 %v552_v15, %v551_v14 }
 0x2a6   :  { %v554_v17 = vrot.slane %v553_v16, 2 }
 0x2a8   :  { %v555_v21 = vadd.f32 %v554_v17, %v553_v16 }
 0x2aa   :  { %v556_v56 = vrot.slane %v555_v21, 1 }
 0x2ac   :  { %v557_v22 = vadd.f32 %v556_v56, %v555_v21 }
 0x2ae   :  { %5264 = vpush %v557_v22 }
 0x2df   :  { %s5265_s21 = spop %5264 }
 0x2e0   :  { %v559_v57 = vstv %s5265_s21  ;;  %s5711_s21 = smov 20  }
 0x2e1   :  { %v560_v58 = vmul.f32 %v559_v57, %v5838_v53  ;;  %s6053_s24 = sld [smem:[%s7381_s0 + %s5711_s21]]  }
 0x2e2   :  { %s6133_s21 = sld [smem:[%s7381_s0 + %s5716_s16]]   ;;  %s5720_s16 = smov 54  }
 0x2e3   :  { %5421 = vrsqrt.f32 %v560_v58  ;;  %vm568_vm10 = vcmp.eq.f32.partialorder %v560_v58, inf  ;;  %v571_v38 = vand.u32 2147483648, %v560_v58  ;;  %vm570_vm11 = vcmp.eq.f32.partialorder %v560_v58, 0.0  ;;  %s6184_s22 = sld [smem:[%s7381_s0 + %s5720_s16]]  }
 0x2e9   :  { %v5422_v59 = vpop.eup %5421 }
 0x2ea   :  { %v562_v23 = vmul.f32 %v5422_v59, %v560_v58 }
 0x2ec   :  { %v563_v24 = vmul.f32 %v5422_v59, %v562_v23 }
 0x2ee   :  { %v564_v26 = vmul.f32 0.5, %v563_v24 }
 0x2f0   :  { %v565_v27 = vsub.f32 1.5, %v564_v26 }
 0x2f2   :  { %v566_v28 = vmul.f32 %v5422_v59, %v565_v27 }
 0x2f4   :  { %v567_v37 = vmul.f32 %v566_v28, %v560_v58 }
 0x2f6   :  { %v569_v39 = vsel %vm568_vm10, %v560_v58, %v567_v37 }
 0x2f7   :  { %v572_v40 = vsel %vm570_vm11, %v571_v38, %v569_v39  ;;  %v5988_v38 = vld [vmem:[%s5955_s1] ss:$0 sm:$0xff] }
 0x2f8   :  { %v573_v41 = vadd.f32 1e-05, %v572_v40 }
 0x2fa   :  { %5423 = vrcp.f32 %v573_v41  ;;  %v585_v45 = vand.u32 2147483648, %v573_v41  ;;  %v583_v47 = vand.u32 2147483647, %v573_v41  ;;  %vm579_vm13 = vweird.f32 %v573_v41 }
 0x2fc   :  { %v586_v49 = vor.u32 1.1754944e-38, %v585_v45  ;;  %vm584_vm15 = vcmp.eq.f32.partialorder %v583_v47, 8.507059e+37  ;;  %v5368_v47 = vld [vmem:[%s5960_s5] ss:$0 sm:$0xff] }
 0x300   :  { %v5424_v42 = vpop.eup %5423 }
 0x301   :  { %v575_v43 = vmul.f32 %v5424_v42, %v573_v41  ;;  %vm580_vm12 = vweird.f32 %v5424_v42 }
 0x302   :  { %vm581_vm14 = vmor %vm579_vm13, %vm580_vm12 }
 0x303   :  { %v576_v44 = vsub.f32 1.0, %v575_v43  ;;  %v766_v43 = vld [vmem:[%s5979_s15 + $0x18] sm:$0xff] }
 0x304   :  { %795 = vmatpush.msra.mxu3 %v766_v43 }
 0x305   :  { %v577_v46 = vmul.f32 %v5424_v42, %v576_v44 }
 0x307   :  { %v578_v48 = vadd.f32 %v5424_v42, %v577_v46 }
 0x309   :  { %v582_v50 = vsel %vm581_vm14, %v5424_v42, %v578_v48 }
 0x30a   :  { %v587_v51 = vsel %vm584_vm15, %v586_v49, %v582_v50  ;;  %v765_v49 = vld [vmem:[%s5979_s15 + $0x10] sm:$0xff] }
 0x30b   :  { %v591_v52 = vmul.f32 %v587_v51, %v5877_v36  ;;  %v590_v54 = vmul.f32 %v587_v51, %v5874_v34  ;;  %v588_v55 = vmul.f32 %v587_v51, %v5868_v32  ;;  %v622_v36 = vld [vmem:[%s5903_s25 + $0x28] sm:$0xff]  ;;  %v621_v34 = vld [vmem:[%s5903_s25 + $0x20] sm:$0xff]  ;;  %v352_v32 = vmul.f32 %v5915_v62, %v5915_v62  ;;  %796 = vmatpush.msra.mxu3 %v765_v49 }
 0x30c   :  { %656 = vmatpush.msrb.mxu0 %v622_v36  ;;  %5252 = vmatpush.msra.mxu2 %v622_v36  ;;  %v589_v63 = vmul.f32 %v587_v51, %v5871_v33  ;;  %v5933_v33 = vsub.f32 %v5805_v18, %v5824_v30  ;;  %v618_v18 = vld [vmem:[%s5903_s25 + $0x8] sm:$0xff]  ;;  %v617_v30 = vld [vmem:[%s5903_s25] sm:$0xff] }
 0x30d   :  { %602 = vrot.lane.b32.xlu1 %v591_v52, %s7384_s26  ;;  %600 = vrot.lane.b32.xlu0 %v590_v54, %s7384_s26  ;;  %v764_v36 = vld [vmem:[%s5979_s15 + $0x8] sm:$0xff] }
 0x30e   :  { %596 = vrot.lane.b32.xlu2 %v588_v55, %s7384_s26  ;;  %657 = vmatpush.msrb.mxu0 %v621_v34  ;;  %v350_v0 = vmul.f32 %v5933_v33, %v5933_v33 }
 0x30f   :  { %5253 = vmatpush.msra.mxu2 %v621_v34  ;;  %797 = vmatpush.msra.mxu3 %v764_v36 }
 0x310   :  { %658 = vmatpush.msrb.mxu0 %v620_v29 }
 0x311   :  { %5254 = vmatpush.msra.mxu2 %v620_v29 }
 0x312   :  { %659 = vmatpush.msrb.mxu0 %v619_v2 }
 0x313   :  { %5255 = vmatpush.msra.mxu2 %v619_v2 }
 0x314   :  { %660 = vmatpush.msrb.mxu0 %v618_v18 }
 0x315   :  { %363 = vrot.lane.b32.xlu0 %v352_v32, %s7382_s27  ;;  %5256 = vmatpush.msra.mxu2 %v618_v18  ;;  %v763_v32 = vld [vmem:[%s5979_s15] sm:$0xff] }
 0x316   :  { %598 = vrot.lane.b32.xlu2 %v589_v63, %s7384_s26  ;;  %661 = vmatpush.msrb.mxu0 %v617_v30 }
 0x317   :  { %5257 = vmatpush.msra.mxu2 %v617_v30  ;;  %798 = vmatpush.msra.mxu3 %v763_v32 }
 0x31e   :  { %357 = vrot.lane.b32.xlu2 %v349_v35, %s7382_s27 }
 0x326   :  { %359 = vrot.lane.b32.xlu2 %v350_v0, %s7382_s27 }
 0x32e   :  { %361 = vrot.lane.b32.xlu2 %v351_v19, %s7382_s27 }
 0x368   :  { %v597_v20 = vpop.permute.xlu2 %596 }
 0x369   :  { %609 = vst.msk [vmem:[#allocation4] sm:$0xff] %vm608_vm3, %v597_v20 }
 0x370   :  { %v599_v31 = vpop.permute.xlu2 %598  ;;  %v613_v3 = vld [vmem:[#allocation4] sm:$0xff] }
 0x371   :  { %610 = vst.msk [vmem:[#allocation4 + $0x8] sm:$0xff] %vm608_vm3, %v599_v31  ;;  %5102 = vmatmul.msk.f32.vlgmr.msrb.gmra.mxu0 %vm633_vm4, %v613_v3 }
 0x378   :  { %v358_v4 = vpop.permute.xlu2 %357  ;;  %v614_v5 = vld [vmem:[#allocation4 + $0x8] sm:$0xff] }
 0x379   :  { %5103 = vmatmul.msk.f32.vlgmr.msra.gmra.mxu2 %vm633_vm4, %v614_v5  ;;  %v370_v6 = vsel %vm369_vm5, %v358_v4, 0.0 }
 0x37a   :  { %371 = vadd.xlane.f32.xlu2 %v370_v6 }
 0x37f   :  { %v603_v7 = vpop.permute.xlu1 %602  ;;  %v601_v8 = vpop.permute.xlu0 %600 }
 0x380   :  { %612 = vst.msk [vmem:[#allocation4 + $0x18] sm:$0xff] %vm608_vm3, %v603_v7  ;;  %v360_v9 = vpop.permute.xlu2 %359 }
 0x381   :  { %611 = vst.msk [vmem:[#allocation4 + $0x10] sm:$0xff] %vm608_vm3, %v601_v8  ;;  %v373_v10 = vsel %vm369_vm5, %v360_v9, 0.0 }
 0x382   :  { %374 = vadd.xlane.f32.xlu1 %v373_v10 }
 0x387   :  { %v364_v11 = vpop.permute.xlu0 %363  ;;  %v616_v16 = vld [vmem:[#allocation4 + $0x18] sm:$0xff] }
 0x388   :  { %v362_v12 = vpop.permute.xlu2 %361  ;;  %v615_v13 = vld [vmem:[#allocation4 + $0x10] sm:$0xff]  ;;  %v379_v14 = vsel %vm369_vm5, %v364_v11, 0.0 }
 0x389   :  { %5104 = vmatmul.msk.f32.gmra.mxu2 %vm633_vm4, %v615_v13  ;;  %v376_v15 = vsel %vm369_vm5, %v362_v12, 0.0  ;;  %380 = vadd.xlane.f32.xlu2 %v379_v14 }
 0x38a   :  { %377 = vadd.xlane.f32.xlu0 %v376_v15 }
 0x391   :  { %5105 = vmatmul.msk.f32.gmra.mxu2 %vm633_vm4, %v616_v16 }
 0x3ed   :  { %v372_v17 = vpop.xlane.xlu2 %371 }
 0x3ee   :  { %5425 = vrsqrt.f32 %v372_v17  ;;  %vm389_vm6 = vcmp.eq.f32.partialorder %v372_v17, inf  ;;  %v392_v40 = vand.u32 2147483648, %v372_v17  ;;  %vm391_vm7 = vcmp.eq.f32.partialorder %v372_v17, 0.0  ;;  %v663_v51 = vpop.f32.mrf.mxu0 }
 0x3f4   :  { %v5426_v21 = vpop.eup %5425 }
 0x3f5   :  { %v383_v56 = vmul.f32 %v5426_v21, %v372_v17  ;;  %v375_v22 = vpop.xlane.xlu1 %374 }
 0x3f6   :  { %5427 = vrsqrt.f32 %v375_v22  ;;  %vm401_vm8 = vcmp.eq.f32.partialorder %v375_v22, inf  ;;  %v404_v19 = vand.u32 2147483648, %v375_v22  ;;  %vm403_vm9 = vcmp.eq.f32.partialorder %v375_v22, 0.0 }
 0x3f7   :  { %v384_v57 = vmul.f32 %v5426_v21, %v383_v56 }
 0x3f9   :  { %v385_v58 = vmul.f32 0.5, %v384_v57 }
 0x3fb   :  { %v386_v59 = vsub.f32 1.5, %v385_v58 }
 0x3fc   :  { %v5428_v23 = vpop.eup %5427  ;;  %v5981_v24 = vpop.xlane.xlu2 %380 }
 0x3fd   :  { %v387_v26 = vmul.f32 %v5426_v21, %v386_v59  ;;  %v395_v27 = vmul.f32 %v5428_v23, %v375_v22  ;;  %5429 = vrsqrt.f32 %v5981_v24  ;;  %v5984_v28 = vpop.xlane.xlu0 %377  ;;  %v666_v52 = vpop.f32.mrf.mxu2  ;;  %vm425_vm10 = vcmp.eq.f32.partialorder %v5981_v24, inf }
 0x3fe   :  { %5431 = vrsqrt.f32 %v5984_v28  ;;  %v428_v12 = vand.u32 2147483648, %v5981_v24  ;;  %vm413_vm11 = vcmp.eq.f32.partialorder %v5984_v28, inf  ;;  %v416_v13 = vand.u32 2147483648, %v5984_v28 }
 0x3ff   :  { %v388_v37 = vmul.f32 %v387_v26, %v372_v17  ;;  %v396_v39 = vmul.f32 %v5428_v23, %v395_v27  ;;  %vm427_vm12 = vcmp.eq.f32.partialorder %v5981_v24, 0.0  ;;  %vm415_vm13 = vcmp.eq.f32.partialorder %v5984_v28, 0.0 }
 0x401   :  { %v390_v41 = vsel %vm389_vm6, %v372_v17, %v388_v37  ;;  %v397_v42 = vmul.f32 0.5, %v396_v39 }
 0x402   :  { %v5991_v44 = vsel %vm391_vm7, %v392_v40, %v390_v41 }
 0x403   :  { %v5430_v45 = vpop.eup %5429  ;;  %v629_v46 = vmul.f32 %v5988_v38, %v5991_v44  ;;  %v398_v48 = vsub.f32 1.5, %v397_v42 }
 0x404   :  { %v5432_v50 = vpop.eup %5431  ;;  %v419_v54 = vmul.f32 %v5430_v45, %v5981_v24 }
 0x405   :  { %v664_v55 = vadd.f32 %v663_v51, %v629_v46  ;;  %v399_v60 = vmul.f32 %v5428_v23, %v398_v48  ;;  %v407_v61 = vmul.f32 %v5432_v50, %v5984_v28  ;;  %v814_v48 = vld [vmem:[%s6036_s20 + $0x10] sm:$0xff] }
 0x406   :  { %v420_v34 = vmul.f32 %v5430_v45, %v419_v54 }
 0x407   :  { %v6001_v63 = vadd.f32 %v5368_v47, %v664_v55  ;;  %v400_v35 = vmul.f32 %v399_v60, %v375_v22  ;;  %v408_v0 = vmul.f32 %v5432_v50, %v407_v61 }
 0x408   :  { %v421_v29 = vmul.f32 0.5, %v420_v34 }
 0x409   :  { %v5106_v2 = vmul.f32 -1.442695, %v6001_v63  ;;  %v402_v18 = vsel %vm401_vm8, %v375_v22, %v400_v35  ;;  %v409_v30 = vmul.f32 0.5, %v408_v0 }
 0x40a   :  { %v6004_v20 = vsel %vm403_vm9, %v404_v19, %v402_v18  ;;  %v422_v31 = vsub.f32 1.5, %v421_v29 }
 0x40b   :  { %5433 = vpow2.f32 %v5106_v2  ;;  %v630_v3 = vmul.f32 %v5988_v38, %v6004_v20  ;;  %v410_v4 = vsub.f32 1.5, %v409_v30 }
 0x40c   :  { %v669_v5 = vpop.f32.mrf.mxu2  ;;  %v423_v6 = vmul.f32 %v5430_v45, %v422_v31 }
 0x40d   :  { %v667_v7 = vadd.f32 %v666_v52, %v630_v3  ;;  %v411_v8 = vmul.f32 %v5432_v50, %v410_v4 }
 0x40e   :  { %v424_v9 = vmul.f32 %v423_v6, %v5981_v24 }
 0x40f   :  { %v6009_v10 = vadd.f32 %v5368_v47, %v667_v7  ;;  %v412_v11 = vmul.f32 %v411_v8, %v5984_v28 }
 0x410   :  { %v426_v14 = vsel %vm425_vm10, %v5981_v24, %v424_v9 }
 0x411   :  { %v5434_v15 = vpop.eup %5433  ;;  %v5107_v16 = vmul.f32 -1.442695, %v6009_v10  ;;  %v414_v17 = vsel %vm413_vm11, %v5984_v28, %v412_v11  ;;  %v6021_v21 = vsel %vm427_vm12, %v428_v12, %v426_v14 }
 0x412   :  { %v695_v56 = vadd.f32 1.0, %v5434_v15  ;;  %v6023_v22 = vsel %vm415_vm13, %v416_v13, %v414_v17  ;;  %v632_v57 = vmul.f32 %v5988_v38, %v6021_v21 }
 0x413   :  { %5435 = vpow2.f32 %v5107_v16  ;;  %v631_v58 = vmul.f32 %v5988_v38, %v6023_v22 }
 0x414   :  { %5437 = vrcp.f32 %v695_v56  ;;  %v672_v59 = vpop.f32.mrf.mxu2  ;;  %v710_v43 = vand.u32 2147483648, %v695_v56  ;;  %v708_v46 = vand.u32 2147483647, %v695_v56  ;;  %vm704_vm15 = vweird.f32 %v695_v56 }
 0x415   :  { %v670_v23 = vadd.f32 %v669_v5, %v631_v58  ;;  %v673_v24 = vadd.f32 %v672_v59, %v632_v57 }
 0x416   :  { %v711_v54 = vor.u32 1.1754944e-38, %v710_v43  ;;  %vm709_vm7 = vcmp.eq.f32.partialorder %v708_v46, 8.507059e+37 }
 0x417   :  { %v6029_v26 = vadd.f32 %v5368_v47, %v670_v23  ;;  %v6031_v27 = vadd.f32 %v5368_v47, %v673_v24  ;;  %v815_v47 = vld [vmem:[%s6036_s20 + $0x18] sm:$0xff] }
 0x418   :  { %844 = vmatpush.msra.mxu0 %v815_v47 }
 0x419   :  { %v5436_v28 = vpop.eup %5435  ;;  %v5108_v37 = vmul.f32 -1.442695, %v6029_v26  ;;  %v5109_v38 = vmul.f32 -1.442695, %v6031_v27 }
 0x41a   :  { %v5438_v39 = vpop.eup %5437  ;;  %v696_v40 = vadd.f32 1.0, %v5436_v28  ;;  %845 = vmatpush.msra.mxu0 %v814_v48  ;;  %v5370_v48 = vld [vmem:[%s6053_s24] ss:$0 sm:$0xff] }
 0x41b   :  { %5439 = vpow2.f32 %v5108_v37  ;;  %v700_v41 = vmul.f32 %v5438_v39, %v695_v56  ;;  %vm705_vm14 = vweird.f32 %v5438_v39  ;;  %v812_v37 = vld [vmem:[%s6036_s20] sm:$0xff] }
 0x41c   :  { %5441 = vrcp.f32 %v696_v40  ;;  %vm706_vm6 = vmor %vm704_vm15, %vm705_vm14  ;;  %v725_v0 = vand.u32 2147483648, %v696_v40  ;;  %v723_v29 = vand.u32 2147483647, %v696_v40  ;;  %vm719_vm9 = vweird.f32 %v696_v40 }
 0x41d   :  { %5443 = vpow2.f32 %v5109_v38  ;;  %v701_v42 = vsub.f32 1.0, %v700_v41  ;;  %v5369_v38 = vld [vmem:[%s5974_s10] ss:$0 sm:$0xff] }
 0x41e   :  { %v726_v30 = vor.u32 1.1754944e-38, %v725_v0  ;;  %vm724_vm11 = vcmp.eq.f32.partialorder %v723_v29, 8.507059e+37 }
 0x41f   :  { %v702_v45 = vmul.f32 %v5438_v39, %v701_v42 }
 0x421   :  { %v5440_v49 = vpop.eup %5439  ;;  %v703_v50 = vadd.f32 %v5438_v39, %v702_v45 }
 0x422   :  { %v5442_v51 = vpop.eup %5441  ;;  %v697_v52 = vadd.f32 1.0, %v5440_v49 }
 0x423   :  { %v5444_v55 = vpop.eup %5443  ;;  %v707_v60 = vsel %vm706_vm6, %v5438_v39, %v703_v50  ;;  %v715_v61 = vmul.f32 %v5442_v51, %v696_v40  ;;  %vm720_vm8 = vweird.f32 %v5442_v51 }
 0x424   :  { %5445 = vrcp.f32 %v697_v52  ;;  %v698_v36 = vadd.f32 1.0, %v5444_v55  ;;  %v712_v34 = vsel %vm709_vm7, %v711_v54, %v707_v60  ;;  %vm721_vm10 = vmor %vm719_vm9, %vm720_vm8  ;;  %v740_v8 = vand.u32 2147483648, %v697_v52 }
 0x425   :  { %v759_v32 = vmul.f32 %v712_v34, %v6001_v63  ;;  %v716_v35 = vsub.f32 1.0, %v715_v61  ;;  %v738_v11 = vand.u32 2147483647, %v697_v52  ;;  %vm734_vm13 = vweird.f32 %v697_v52 }
 0x426   :  { %5447 = vrcp.f32 %v698_v36  ;;  %v741_v15 = vor.u32 1.1754944e-38, %v740_v8  ;;  %v755_v56 = vand.u32 2147483648, %v698_v36  ;;  %vm749_vm7 = vweird.f32 %v698_v36 }
 0x427   :  { %5110 = vmatmul.msk.f32.vlgmr.msra.gmra.mxu3 %vm430_vm2, %v759_v32  ;;  %v717_v19 = vmul.f32 %v5442_v51, %v716_v35  ;;  %vm739_vm15 = vcmp.eq.f32.partialorder %v738_v11, 8.507059e+37  ;;  %v753_v58 = vand.u32 2147483647, %v698_v36 }
 0x428   :  { %v756_v23 = vor.u32 1.1754944e-38, %v755_v56 }
 0x429   :  { %v718_v2 = vadd.f32 %v5442_v51, %v717_v19  ;;  %vm754_vm9 = vcmp.eq.f32.partialorder %v753_v58, 8.507059e+37 }
 0x42a   :  { %v5446_v18 = vpop.eup %5445 }
 0x42b   :  { %v722_v31 = vsel %vm721_vm10, %v5442_v51, %v718_v2  ;;  %v730_v3 = vmul.f32 %v5446_v18, %v697_v52  ;;  %vm735_vm12 = vweird.f32 %v5446_v18 }
 0x42c   :  { %v5448_v4 = vpop.eup %5447  ;;  %v727_v5 = vsel %vm724_vm11, %v726_v30, %v722_v31  ;;  %vm736_vm14 = vmor %vm734_vm13, %vm735_vm12 }
 0x42d   :  { %v760_v63 = vmul.f32 %v727_v5, %v6009_v10  ;;  %v731_v6 = vsub.f32 1.0, %v730_v3  ;;  %v745_v7 = vmul.f32 %v5448_v4, %v698_v36  ;;  %vm750_vm6 = vweird.f32 %v5448_v4 }
 0x42e   :  { %vm751_vm8 = vmor %vm749_vm7, %vm750_vm6 }
 0x42f   :  { %5111 = vmatmul.msk.f32.gmra.mxu3 %vm430_vm2, %v760_v63  ;;  %v732_v9 = vmul.f32 %v5446_v18, %v731_v6  ;;  %v746_v12 = vsub.f32 1.0, %v745_v7 }
 0x431   :  { %v733_v13 = vadd.f32 %v5446_v18, %v732_v9  ;;  %v747_v14 = vmul.f32 %v5448_v4, %v746_v12 }
 0x433   :  { %v737_v16 = vsel %vm736_vm14, %v5446_v18, %v733_v13  ;;  %v748_v17 = vadd.f32 %v5448_v4, %v747_v14  ;;  %v115_v14 = vstv %s5061_s7  ;;  %s5719_s7 = smov 1  }
 0x434   :  { %v742_v10 = vsel %vm739_vm15, %v741_v15, %v737_v16  ;;  %116 = vst [vmem:[#allocation8] sm:$0x1] %v115_v14  ;;  %v971_v14 = vmax.f32 %v6023_v22, 1e-08  ;;  %s5040_s12 = sld [smem:[%s7381_s0 + %s5719_s7]]   ;;  %s5728_s7 = smov 29  }
 0x435   :  { %v761_v57 = vmul.f32 %v742_v10, %v6029_v26  ;;  %v752_v59 = vsel %vm751_vm8, %v5448_v4, %v748_v17  ;;  %v813_v26 = vld [vmem:[%s6036_s20 + $0x8] sm:$0xff] }
 0x436   :  { %v757_v24 = vsel %vm754_vm9, %v756_v23, %v752_v59  ;;  %846 = vmatpush.msra.mxu0 %v813_v26 }
 0x437   :  { %5112 = vmatmul.msk.f32.gmra.mxu3 %vm430_vm2, %v761_v57  ;;  %v762_v28 = vmul.f32 %v757_v24, %v6031_v27  ;;  %v5371_v57 = vld [vmem:[%s6069_s2] ss:$0 sm:$0xff] }
 0x438   :  { %847 = vmatpush.msra.mxu0 %v812_v37 }
 0x43f   :  { %5113 = vmatmul.msk.f32.gmra.mxu3 %vm430_vm2, %v762_v28 }
 0x4aa   :  { %v800_v39 = vpop.f32.mrf.mxu3 }
 0x4ab   :  { %v801_v40 = vadd.f32 %v5369_v38, %v800_v39 }
 0x4ad   :  { %1057 = vst.msk [vmem:[#allocation5] sm:$0xff] %vm430_vm2, %v801_v40  ;;  %5114 = vmatmul.msk.f32.vlgmr.msra.gmra.mxu0 %vm430_vm2, %v801_v40 }
 0x4b2   :  { %v803_v27 = vpop.f32.mrf.mxu3 }
 0x4b3   :  { %v804_v41 = vadd.f32 %v5369_v38, %v803_v27 }
 0x4b5   :  { %1058 = vst.msk [vmem:[#allocation5 + $0x8] sm:$0xff] %vm430_vm2, %v804_v41  ;;  %5115 = vmatmul.msk.f32.gmra.mxu0 %vm430_vm2, %v804_v41 }
 0x4ba   :  { %v806_v42 = vpop.f32.mrf.mxu3 }
 0x4bb   :  { %v807_v43 = vadd.f32 %v5369_v38, %v806_v42 }
 0x4bd   :  { %1059 = vst.msk [vmem:[#allocation5 + $0x10] sm:$0xff] %vm430_vm2, %v807_v43  ;;  %5116 = vmatmul.msk.f32.gmra.mxu0 %vm430_vm2, %v807_v43 }
 0x4c2   :  { %v809_v45 = vpop.f32.mrf.mxu3 }
 0x4c3   :  { %v810_v46 = vadd.f32 %v5369_v38, %v809_v45 }
 0x4c5   :  { %1060 = vst.msk [vmem:[#allocation5 + $0x18] sm:$0xff] %vm430_vm2, %v810_v46  ;;  %5117 = vmatmul.msk.f32.gmra.mxu0 %vm430_vm2, %v810_v46 }
 0x52a   :  { %v849_v47 = vpop.f32.mrf.mxu0 }
 0x52b   :  { %v6072_v49 = vadd.f32 %v5370_v48, %v849_v47 }
 0x52d   :  { %v5118_v52 = vmul.f32 -1.442695, %v6072_v49 }
 0x532   :  { %v852_v50 = vpop.f32.mrf.mxu0 }
 0x533   :  { %v853_v51 = vadd.f32 %v5370_v48, %v852_v50 }
 0x535   :  { %v5119_v54 = vmul.f32 -1.442695, %v853_v51 }
 0x537   :  { %5449 = vpow2.f32 %v5119_v54 }
 0x538   :  { %5451 = vpow2.f32 %v5118_v52 }
 0x53a   :  { %v855_v55 = vpop.f32.mrf.mxu0 }
 0x53b   :  { %v6075_v60 = vadd.f32 %v5370_v48, %v855_v55 }
 0x53d   :  { %v5450_v61 = vpop.eup %5449  ;;  %v5120_v36 = vmul.f32 -1.442695, %v6075_v60 }
 0x53e   :  { %v5452_v34 = vpop.eup %5451  ;;  %v874_v32 = vadd.f32 1.0, %v5450_v61 }
 0x53f   :  { %5453 = vpow2.f32 %v5120_v36  ;;  %v6078_v35 = vadd.f32 1.0, %v5452_v34 }
 0x540   :  { %5455 = vrcp.f32 %v874_v32  ;;  %v903_v4 = vand.u32 2147483648, %v874_v32  ;;  %v901_v6 = vand.u32 2147483647, %v874_v32  ;;  %vm897_vm11 = vweird.f32 %v874_v32 }
 0x541   :  { %5457 = vrcp.f32 %v6078_v35  ;;  %v888_v52 = vand.u32 2147483648, %v6078_v35  ;;  %v886_v55 = vand.u32 2147483647, %v6078_v35 }
 0x542   :  { %v858_v0 = vpop.f32.mrf.mxu0  ;;  %v904_v12 = vor.u32 1.1754944e-38, %v903_v4  ;;  %vm902_vm13 = vcmp.eq.f32.partialorder %v901_v6, 8.507059e+37 }
 0x543   :  { %v6080_v19 = vadd.f32 %v5370_v48, %v858_v0  ;;  %v889_v0 = vor.u32 1.1754944e-38, %v888_v52 }
 0x545   :  { %v5454_v29 = vpop.eup %5453  ;;  %v5121_v2 = vmul.f32 -1.442695, %v6080_v19 }
 0x546   :  { %v5456_v18 = vpop.eup %5455  ;;  %v875_v30 = vadd.f32 1.0, %v5454_v29 }
 0x547   :  { %v893_v31 = vmul.f32 %v5456_v18, %v874_v32  ;;  %5459 = vpow2.f32 %v5121_v2  ;;  %v6087_v5 = vpop.eup %5457  ;;  %vm898_vm10 = vweird.f32 %v5456_v18 }
 0x548   :  { %5461 = vrcp.f32 %v875_v30  ;;  %v878_v11 = vmul.f32 %v6087_v5, %v6078_v35  ;;  %vm899_vm12 = vmor %vm897_vm11, %vm898_vm10  ;;  %v918_v59 = vand.u32 2147483648, %v875_v30  ;;  %v916_v24 = vand.u32 2147483647, %v875_v30 }
 0x549   :  { %v894_v3 = vsub.f32 1.0, %v893_v31  ;;  %vm912_vm15 = vweird.f32 %v875_v30  ;;  %vm883_vm8 = vweird.f32 %v6087_v5  ;;  %vm882_vm10 = vweird.f32 %v6078_v35 }
 0x54a   :  { %v879_v58 = vsub.f32 1.0, %v878_v11  ;;  %v919_v40 = vor.u32 1.1754944e-38, %v918_v59  ;;  %vm917_vm7 = vcmp.eq.f32.partialorder %v916_v24, 8.507059e+37  ;;  %vm6099_vm11 = vmor %vm882_vm10, %vm883_vm8  ;;  %v1014_v24 = vand.u32 2147483648, %v971_v14 }
 0x54b   :  { %v895_v63 = vmul.f32 %v5456_v18, %v894_v3  ;;  %vm1061_vm10 = vcmask 285952  }
 0x54c   :  { %v880_v39 = vmul.f32 %v6087_v5, %v879_v58 }
 0x54d   :  { %v5460_v7 = vpop.eup %5459  ;;  %v896_v8 = vadd.f32 %v5456_v18, %v895_v63  ;;  %v5714_v63 = vmov 0  }
 0x54e   :  { %v5462_v9 = vpop.eup %5461  ;;  %v876_v13 = vadd.f32 1.0, %v5460_v7  ;;  %v881_v46 = vadd.f32 %v6087_v5, %v880_v39  ;;  %5366 = vset.pattern.permute.xlu1 %v5714_v63  ;;  %5365 = vset.pattern.permute.xlu2 %v5714_v63 }
 0x54f   :  { %v900_v15 = vsel %vm899_vm12, %v5456_v18, %v896_v8  ;;  %v908_v16 = vmul.f32 %v5462_v9, %v875_v30  ;;  %vm913_vm14 = vweird.f32 %v5462_v9  ;;  %5364 = vset.pattern.permute.xlu0 %v5714_v63 }
 0x550   :  { %v905_v17 = vsel %vm902_vm13, %v904_v12, %v900_v15  ;;  %5463 = vrcp.f32 %v876_v13  ;;  %vm914_vm6 = vmor %vm912_vm15, %vm913_vm14  ;;  %v933_v47 = vand.u32 2147483648, %v876_v13  ;;  %v931_v50 = vand.u32 2147483647, %v876_v13  ;;  %v1105_v12 = vld [vmem:[%s6115_s14] sm:$0xff] }
 0x551   :  { %v938_v10 = vmul.f32 %v905_v17, %v853_v51  ;;  %v909_v56 = vsub.f32 1.0, %v908_v16  ;;  %vm927_vm12 = vweird.f32 %v876_v13  ;;  %v885_v34 = vsel %vm6099_vm11, %v6087_v5, %v881_v46  ;;  %v5372_v5 = vld [vmem:[#allocation8] ss:$0 sm:$0xff] }
 0x552   :  { %v934_v36 = vor.u32 1.1754944e-38, %v933_v47  ;;  %vm932_vm14 = vcmp.eq.f32.partialorder %v931_v50, 8.507059e+37  ;;  %vm887_vm15 = vcmp.eq.f32.partialorder %v886_v55, 8.507059e+37  ;;  %5465 = vrcp.f32 %v971_v14 }
 0x553   :  { %v910_v23 = vmul.f32 %v5462_v9, %v909_v56  ;;  %v946_v28 = vmul.f32 %v5371_v57, %v938_v10  ;;  %v890_v18 = vsel %vm887_vm15, %v889_v0, %v885_v34  ;;  %v969_v17 = vmax.f32 %v5991_v44, 1e-08 }
 0x554   :  { %v937_v30 = vmul.f32 %v890_v18, %v6072_v49  ;;  %v970_v10 = vmax.f32 %v6004_v20, 1e-08  ;;  %v972_v44 = vmax.f32 %v6021_v21, 1e-08 }
 0x555   :  { %v911_v26 = vadd.f32 %v5462_v9, %v910_v23  ;;  %v952_v37 = vsel %vm430_vm2, %v946_v28, 0.0  ;;  %5467 = vrcp.f32 %v969_v17  ;;  %v1012_v28 = vand.u32 2147483647, %v971_v14 }
 0x556   :  { %v5464_v38 = vpop.eup %5463  ;;  %953 = vadd.xlane.f32.xlu2 %v952_v37  ;;  %v945_v3 = vmul.f32 %v5371_v57, %v937_v30  ;;  %5469 = vrcp.f32 %v970_v10  ;;  %v999_v50 = vand.u32 2147483648, %v970_v10  ;;  %v984_v21 = vand.u32 2147483648, %v969_v17 }
 0x557   :  { %v915_v27 = vsel %vm914_vm6, %v5462_v9, %v911_v26  ;;  %v923_v41 = vmul.f32 %v5464_v38, %v876_v13  ;;  %vm928_vm9 = vweird.f32 %v5464_v38  ;;  %5471 = vrcp.f32 %v972_v44 }
 0x558   :  { %v920_v42 = vsel %vm917_vm7, %v919_v40, %v915_v27  ;;  %vm929_vm13 = vmor %vm927_vm12, %vm928_vm9  ;;  %v949_v4 = vsel %vm430_vm2, %v945_v3, 0.0  ;;  %v5466_v15 = vpop.eup %5465  ;;  %vm1008_vm7 = vweird.f32 %v971_v14  ;;  %vm1013_vm9 = vcmp.eq.f32.partialorder %v1012_v28, 8.507059e+37  ;;  %v6172_v28 = vld [vmem:[%s5768_s9 + $0x8] sm:$0xff] }
 0x559   :  { %v939_v43 = vmul.f32 %v920_v42, %v6075_v60  ;;  %v924_v45 = vsub.f32 1.0, %v923_v41  ;;  %v1004_v16 = vmul.f32 %v5466_v15, %v971_v14  ;;  %vm1009_vm6 = vweird.f32 %v5466_v15  ;;  %v1141_v14 = vld [vmem:[%s6142_s29 + $0x30] sm:$0xff]  ;;  %1122 = vst.msk [vmem:[#allocation7 + $0x8] sm:$0xff] %vm430_vm2, %v6172_v28 }
 0x55a   :  { %vm1010_vm8 = vmor %vm1008_vm7, %vm1009_vm6  ;;  %v1027_v63 = vand.u32 2147483647, %v972_v44 }
 0x55b   :  { %v925_v48 = vmul.f32 %v5464_v38, %v924_v45  ;;  %v947_v51 = vmul.f32 %v5371_v57, %v939_v43  ;;  %v1005_v56 = vsub.f32 1.0, %v1004_v16  ;;  %v5468_v58 = vpop.eup %5467  ;;  %v1140_v16 = vld [vmem:[%s6142_s29 + $0x28] sm:$0xff] }
 0x55c   :  { %v5470_v23 = vpop.eup %5469  ;;  %v974_v37 = vmul.f32 %v5468_v58, %v969_v17  ;;  %vm979_vm11 = vweird.f32 %v5468_v58 }
 0x55d   :  { %v926_v60 = vadd.f32 %v5464_v38, %v925_v48  ;;  %v955_v61 = vsel %vm430_vm2, %v947_v51, 0.0  ;;  %v989_v26 = vmul.f32 %v5470_v23, %v970_v10  ;;  %vm994_vm12 = vweird.f32 %v5470_v23  ;;  %v5472_v48 = vpop.eup %5471 }
 0x55e   :  { %956 = vadd.xlane.f32.xlu0 %v955_v61  ;;  %v975_v40 = vsub.f32 1.0, %v974_v37  ;;  %v997_v51 = vand.u32 2147483647, %v970_v10  ;;  %v1019_v55 = vmul.f32 %v5472_v48, %v972_v44  ;;  %v985_v61 = vor.u32 1.1754944e-38, %v984_v21  ;;  %v1216_v21 = vld [vmem:[%s6205_s11] sm:$0xff] }
 0x55f   :  { %v930_v32 = vsel %vm929_vm13, %v5464_v38, %v926_v60  ;;  %v1015_v38 = vor.u32 1.1754944e-38, %v1014_v24  ;;  %v990_v39 = vsub.f32 1.0, %v989_v26  ;;  %vm978_vm13 = vweird.f32 %v969_v17  ;;  %v1137_v24 = vld [vmem:[%s6142_s29 + $0x10] sm:$0xff]  ;;  %v1135_v26 = vld [vmem:[%s6142_s29] sm:$0xff] }
 0x560   :  { %v935_v29 = vsel %vm932_vm14, %v934_v36, %v930_v32  ;;  %v976_v45 = vmul.f32 %v5468_v58, %v975_v40  ;;  %vm993_vm14 = vweird.f32 %v970_v10  ;;  %vm980_vm15 = vmor %vm978_vm13, %vm979_vm11  ;;  %v1000_v60 = vor.u32 1.1754944e-38, %v999_v50  ;;  %v1217_v50 = vld [vmem:[%s6205_s11 + $0x8] sm:$0xff] }
 0x561   :  { %v940_v2 = vmul.f32 %v935_v29, %v6080_v19  ;;  %v991_v43 = vmul.f32 %v5470_v23, %v990_v39  ;;  %vm995_vm6 = vmor %vm993_vm14, %vm994_vm12  ;;  %vm998_vm7 = vcmp.eq.f32.partialorder %v997_v51, 8.507059e+37  ;;  %v1020_v32 = vsub.f32 1.0, %v1019_v55 }
 0x562   :  { %v977_v47 = vadd.f32 %v5468_v58, %v976_v45  ;;  %vm1023_vm11 = vweird.f32 %v972_v44  ;;  %vm1028_vm13 = vcmp.eq.f32.partialorder %v1027_v63, 8.507059e+37  ;;  %vm1306_vm14 = vcmask 1041408  }
 0x563   :  { %v948_v35 = vmul.f32 %v5371_v57, %v940_v2  ;;  %v1006_v57 = vmul.f32 %v5466_v15, %v1005_v56  ;;  %v992_v46 = vadd.f32 %v5470_v23, %v991_v43 }
 0x564   :  { %v981_v54 = vsel %vm980_vm15, %v5468_v58, %v977_v47  ;;  %v1106_v58 = vld [vmem:[%s6115_s14 + $0x8] sm:$0xff]  ;;  %vm7416_vm15 = vcmask 15360  }
 0x565   :  { %v958_v31 = vsel %vm430_vm2, %v948_v35, 0.0  ;;  %v1007_v59 = vadd.f32 %v5466_v15, %v1006_v57  ;;  %v996_v52 = vsel %vm995_vm6, %v5470_v23, %v992_v46  ;;  %v1138_v23 = vld [vmem:[%s6142_s29 + $0x18] sm:$0xff] }
 0x566   :  { %959 = vadd.xlane.f32.xlu1 %v958_v31  ;;  %v1001_v36 = vsel %vm998_vm7, %v1000_v60, %v996_v52  ;;  %v1021_v31 = vmul.f32 %v5472_v48, %v1020_v32  ;;  %v1219_v46 = vld [vmem:[%s6205_s11 + $0x18] sm:$0xff] }
 0x567   :  { %v1011_v22 = vsel %vm1010_vm8, %v5466_v15, %v1007_v59  ;;  %v1002_v0 = vmul.f32 %v1001_v36, %v5933_v33  ;;  %v6147_v15 = vld [vmem:[%s5768_s9] sm:$0xff]  ;;  %1242 = vmatpush.msrb.mxu2 %v1219_v46 }
 0x568   :  { %v1016_v20 = vsel %vm1013_vm9, %v1015_v38, %v1011_v22  ;;  %v1022_v3 = vadd.f32 %v5472_v48, %v1021_v31  ;;  %vm1024_vm9 = vweird.f32 %v5472_v48  ;;  %1121 = vst.msk [vmem:[#allocation7] sm:$0xff] %vm430_vm2, %v6147_v15  ;;  %v1136_v22 = vld [vmem:[%s6142_s29 + $0x8] sm:$0xff]  ;;  %v231_v38 = vld [vmem:[%s5040_s12] sm:$0x3]  ;;  %s5723_s12 = smov 26  }
 0x569   :  { %v1017_v27 = vmul.f32 %v1016_v20, %v5940_v1  ;;  %v982_v1 = vand.u32 2147483647, %v969_v17  ;;  %vm1025_vm12 = vmor %vm1023_vm11, %vm1024_vm9  ;;  %v1139_v17 = vld [vmem:[%s6142_s29 + $0x20] sm:$0xff]  ;;  %232 = vst [vmem:[%s6184_s22] sm:$0x3] %v231_v38  ;;  %s6219_s19 = sld [smem:[%s7381_s0 + %s5723_s12]]  }
 0x56a   :  { %s6253_s12 = sld [smem:[%s7381_s0 + %s7384_s26]]  }
 0x56b   :  { %vm983_vm8 = vcmp.eq.f32.partialorder %v982_v1, 8.507059e+37 }
 0x56c   :  { %v986_v34 = vsel %vm983_vm8, %v985_v61, %v981_v54 }
 0x56d   :  { %v987_v29 = vmul.f32 %v986_v34, %v5926_v25 }
 0x56e   :  { %950 = vadd.xlane.f32.xlu1 %v949_v4  ;;  %v1029_v4 = vand.u32 2147483648, %v972_v44 }
 0x570   :  { %v1298_v44 = vld [vmem:[%s6184_s22] sm:$0x3]  ;;  %7435 = sst [smem:[#allocation12_spill]] %s6253_s12 }
 0x5c9   :  { %v954_v6 = vpop.xlane.xlu2 %953 }
 0x5ca   :  { %v966_v7 = vadd.f32 %v5372_v5, %v954_v6  ;;  %v1030_v6 = vor.u32 1.1754944e-38, %v1029_v4 }
 0x5cc   :  { %1040 = vperm.xlu1 %5366, %v966_v7  }
 0x5d1   :  { %v957_v19 = vpop.xlane.xlu0 %956 }
 0x5d2   :  { %v967_v8 = vadd.f32 %v5372_v5, %v957_v19 }
 0x5d4   :  { %1045 = vperm.xlu2 %5365, %v967_v8  }
 0x5d9   :  { %v960_v9 = vpop.xlane.xlu1 %959 }
 0x5da   :  { %v968_v49 = vadd.f32 %v5372_v5, %v960_v9 }
 0x5dc   :  { %1050 = vperm.xlu0 %5364, %v968_v49  }
 0x5e1   :  { %v951_v11 = vpop.xlane.xlu1 %950 }
 0x5e2   :  { %v965_v13 = vadd.f32 %v5372_v5, %v951_v11  ;;  %v1026_v5 = vsel %vm1025_vm12, %v5472_v48, %v1022_v3  ;;  %v1218_v48 = vld [vmem:[%s6205_s11 + $0x10] sm:$0xff] }
 0x5e3   :  { %v1031_v33 = vsel %vm1028_vm13, %v1030_v6, %v1026_v5  ;;  %1243 = vmatpush.msrb.mxu2 %v1218_v48  ;;  %v1653_v48 = vld [vmem:[%s6253_s12 + $0x18] sm:$0xff] }
 0x5e4   :  { %1109 = vperm.xlu0 %5364, %v1105_v12   ;;  %1035 = vperm.xlu2 %5365, %v965_v13   ;;  %v1032_v25 = vmul.f32 %v1031_v33, %v5915_v62  ;;  %v1066_v62 = vld [vmem:[%s6133_s21] sm:$0xff]  ;;  %v1067_v12 = vld [vmem:[%s6133_s21 + $0x8] sm:$0xff]  ;;  %v1142_v13 = vld [vmem:[%s6142_s29 + $0x38] sm:$0xff] }
 0x5e5   :  { %1161 = vmatpush.msrb.mxu3 %v1142_v13  ;;  %1244 = vmatpush.msrb.mxu2 %v1217_v50  ;;  %v5725_v50 = vmov 512.0  }
 0x5e7   :  { %1162 = vmatpush.msrb.mxu3 %v1141_v14  ;;  %1245 = vmatpush.msrb.mxu2 %v1216_v21  ;;  %v1652_v21 = vld [vmem:[%s6253_s12 + $0x10] sm:$0xff] }
 0x5e9   :  { %1163 = vmatpush.msrb.mxu3 %v1140_v16 }
 0x5eb   :  { %1164 = vmatpush.msrb.mxu3 %v1139_v17 }
 0x5ed   :  { %1165 = vmatpush.msrb.mxu3 %v1138_v23 }
 0x5ef   :  { %1166 = vmatpush.msrb.mxu3 %v1137_v24 }
 0x5f1   :  { %1167 = vmatpush.msrb.mxu3 %v1136_v22 }
 0x5f3   :  { %1168 = vmatpush.msrb.mxu3 %v1135_v26  ;;  %v5374_v26 = vld [vmem:[%s6219_s19] ss:$0 sm:$0xff] }
 0x5f5   :  { %5132 = vmatpush.msk.msra.mxu3 %vm1306_vm14, %v1298_v44 }
 0x62e   :  { %v1046_v41 = vpop.permute.xlu2 %1045 }
 0x62f   :  { %v1055_v42 = vmul.f32 %v1046_v41, %v1017_v27  ;;  %v1296_v27 = vld [vmem:[%s6195_s3] sm:$0xff]  ;;  %v1297_v41 = vld [vmem:[%s6195_s3 + $0x8] sm:$0xff] }
 0x631   :  { %1064 = vst.msk [vmem:[#allocation5 + $0x10] sm:$0xff] %vm1061_vm10, %v1055_v42  ;;  %v5373_v42 = vld [vmem:[%s6167_s6] ss:$0 sm:$0xff] }
 0x638   :  { %v1070_v9 = vld [vmem:[#allocation5 + $0x10] sm:$0xff] }
 0x63e   :  { %v1041_v2 = vpop.permute.xlu1 %1040  ;;  %v1036_v18 = vpop.permute.xlu2 %1035 }
 0x63f   :  { %v1054_v35 = vmul.f32 %v1041_v2, %v1002_v0  ;;  %v1053_v30 = vmul.f32 %v1036_v18, %v987_v29 }
 0x641   :  { %1063 = vst.msk [vmem:[#allocation5 + $0x8] sm:$0xff] %vm1061_vm10, %v1054_v35 }
 0x642   :  { %1062 = vst.msk [vmem:[#allocation5] sm:$0xff] %vm1061_vm10, %v1053_v30 }
 0x648   :  { %v1069_v49 = vld [vmem:[#allocation5 + $0x8] sm:$0xff] }
 0x649   :  { %v1068_v11 = vld [vmem:[#allocation5] sm:$0xff] }
 0x64e   :  { %v1051_v7 = vpop.permute.xlu0 %1050 }
 0x64f   :  { %v1056_v19 = vmul.f32 %v1051_v7, %v1032_v25 }
 0x651   :  { %1065 = vst.msk [vmem:[#allocation5 + $0x18] sm:$0xff] %vm1061_vm10, %v1056_v19 }
 0x656   :  { %v1110_v38 = vpop.permute.xlu0 %1109 }
 0x658   :  { %v1071_v8 = vld [vmem:[#allocation5 + $0x18] sm:$0xff] }
 0x659   :  { %1090 = vmatpush.msrb.mxu1 %v1071_v8 }
 0x65b   :  { %1091 = vmatpush.msrb.mxu1 %v1070_v9 }
 0x65d   :  { %1092 = vmatpush.msrb.mxu1 %v1069_v49 }
 0x65f   :  { %1093 = vmatpush.msrb.mxu1 %v1068_v11 }
 0x660   :  { %5122 = vmatmul.msk.f32.vlgmr.msrb.gmra.mxu1 %vm430_vm2, %v1066_v62 }
 0x668   :  { %5123 = vmatmul.msk.f32.gmra.mxu1 %vm430_vm2, %v1067_v12 }
 0x6dd   :  { %v1095_v10 = vpop.f32.mrf.mxu1 }
 0x6de   :  { %1101 = vst.msk [vmem:[#allocation6] sm:$0xff] %vm281_vm1, %v1095_v10 }
 0x6e5   :  { %v6154_v56 = vld [vmem:[#allocation6] sm:$0xff]  ;;  %v1098_v57 = vpop.f32.mrf.mxu1 }
 0x6e6   :  { %1125 = vrot.lane.b32.xlu1 %v6154_v56, %s7384_s26  ;;  %1102 = vst.msk [vmem:[#allocation6 + $0x8] sm:$0xff] %vm281_vm1, %v1098_v57  ;;  %v1117_v44 = vmul.f32 %v1110_v38, %v6154_v56 }
 0x6ed   :  { %v6160_v59 = vld [vmem:[#allocation6 + $0x8] sm:$0xff] }
 0x6ee   :  { %1114 = vperm.xlu1 %5366, %v1106_v58   ;;  %1127 = vrot.lane.b32.xlu2 %v6160_v59, %s7384_s26 }
 0x748   :  { %v1128_v37 = vpop.permute.xlu2 %1127 }
 0x749   :  { %1132 = vst.msk [vmem:[#allocation7 + $0x8] sm:$0xff] %vm608_vm3, %v1128_v37 }
 0x750   :  { %v1134_v40 = vld [vmem:[#allocation7 + $0x8] sm:$0xff] }
 0x758   :  { %v1126_v20 = vpop.permute.xlu1 %1125 }
 0x759   :  { %1131 = vst.msk [vmem:[#allocation7] sm:$0xff] %vm608_vm3, %v1126_v20 }
 0x760   :  { %v1133_v39 = vld [vmem:[#allocation7] sm:$0xff] }
 0x761   :  { %5124 = vmatmul.msk.f32.vlgmr.msrb.gmra.mxu3 %vm633_vm4, %v1133_v39 }
 0x769   :  { %5125 = vmatmul.msk.f32.gmra.mxu3 %vm633_vm4, %v1134_v40 }
 0x771   :  { %5133 = vmatmul.msk.f32.vlgmr.msra.gmra.mxu3 %vm7416_vm15, %v1296_v27  ;;  %v1257_v27 = vadd.f32 %v6147_v15, %v1117_v44 }
 0x779   :  { %5134 = vmatmul.msk.f32.gmra.mxu3 %vm7416_vm15, %v1297_v41  ;;  %v1115_v41 = vpop.permute.xlu1 %1114 }
 0x7e4   :  { %v1170_v43 = vpop.f32.mrf.mxu3 }
 0x7e5   :  { %v1171_v45 = vadd.f32 %v5373_v42, %v1170_v43 }
 0x7e7   :  { %v5126_v47 = vmul.f32 -1.442695, %v1171_v45 }
 0x7e9   :  { %5473 = vpow2.f32 %v5126_v47 }
 0x7ec   :  { %v1173_v51 = vpop.f32.mrf.mxu3 }
 0x7ed   :  { %v1174_v1 = vadd.f32 %v5373_v42, %v1173_v51  ;;  %v1118_v42 = vmul.f32 %v1115_v41, %v6160_v59  ;;  %v1651_v51 = vld [vmem:[%s6253_s12 + $0x8] sm:$0xff] }
 0x7ef   :  { %v5474_v52 = vpop.eup %5473  ;;  %v5127_v54 = vmul.f32 -1.442695, %v1174_v1  ;;  %v1258_v46 = vadd.f32 %v6172_v28, %v1118_v42 }
 0x7f0   :  { %v1182_v55 = vadd.f32 1.0, %v5474_v52  ;;  %v1650_v52 = vld [vmem:[%s6253_s12] sm:$0xff] }
 0x7f1   :  { %5475 = vpow2.f32 %v5127_v54  ;;  %v1262_v54 = vld [vmem:[%s6247_s4 + $0x8] sm:$0xff] }
 0x7f2   :  { %5477 = vrcp.f32 %v1182_v55  ;;  %v1195_v29 = vand.u32 2147483648, %v1182_v55  ;;  %v1193_v35 = vand.u32 2147483647, %v1182_v55  ;;  %vm1189_vm7 = vweird.f32 %v1182_v55 }
 0x7f4   :  { %v1327_v60 = vpop.f32.mrf.mxu3  ;;  %v1196_v3 = vor.u32 1.1754944e-38, %v1195_v29  ;;  %vm1194_vm9 = vcmp.eq.f32.partialorder %v1193_v35, 8.507059e+37 }
 0x7f5   :  { %1333 = vst.msk [vmem:[#allocation3] sm:$0xff] %vm281_vm1, %v1327_v60 }
 0x7f7   :  { %v5476_v61 = vpop.eup %5475 }
 0x7f8   :  { %v5478_v36 = vpop.eup %5477  ;;  %v1183_v34 = vadd.f32 1.0, %v5476_v61 }
 0x7f9   :  { %v1185_v32 = vmul.f32 %v5478_v36, %v1182_v55  ;;  %vm1190_vm6 = vweird.f32 %v5478_v36 }
 0x7fa   :  { %5479 = vrcp.f32 %v1183_v34  ;;  %vm1191_vm8 = vmor %vm1189_vm7, %vm1190_vm6  ;;  %v1210_v19 = vand.u32 2147483648, %v1183_v34  ;;  %v1208_v49 = vand.u32 2147483647, %v1183_v34  ;;  %vm1204_vm12 = vweird.f32 %v1183_v34 }
 0x7fb   :  { %v1186_v0 = vsub.f32 1.0, %v1185_v32  ;;  %5481 = vrcp.f32 %v5725_v50 }
 0x7fc   :  { %v1330_v2 = vpop.f32.mrf.mxu3  ;;  %v6214_v4 = vld [vmem:[#allocation3] sm:$0xff]  ;;  %v1211_v13 = vor.u32 1.1754944e-38, %v1210_v19  ;;  %vm1209_vm6 = vcmp.eq.f32.partialorder %v1208_v49, 8.507059e+37 }
 0x7fd   :  { %v1187_v18 = vmul.f32 %v5478_v36, %v1186_v0  ;;  %1334 = vst.msk [vmem:[#allocation3 + $0x8] sm:$0xff] %vm281_vm1, %v1330_v2  ;;  %v1381_v7 = vsel %vm430_vm2, %v6214_v4, 0.0 }
 0x7ff   :  { %v1188_v30 = vadd.f32 %v5478_v36, %v1187_v18 }
 0x800   :  { %v5480_v31 = vpop.eup %5479 }
 0x801   :  { %v1192_v63 = vsel %vm1191_vm8, %v5478_v36, %v1188_v30  ;;  %v1200_v5 = vmul.f32 %v5480_v31, %v1183_v34  ;;  %vm1205_vm11 = vweird.f32 %v5480_v31 }
 0x802   :  { %v1197_v6 = vsel %vm1194_vm9, %v1196_v3, %v1192_v63  ;;  %vm1206_vm13 = vmor %vm1204_vm12, %vm1205_vm11 }
 0x803   :  { %v1214_v33 = vmul.f32 %v1197_v6, %v1171_v45  ;;  %v1201_v25 = vsub.f32 1.0, %v1200_v5 }
 0x804   :  { %v6223_v8 = vld [vmem:[#allocation3 + $0x8] sm:$0xff] }
 0x805   :  { %v1202_v9 = vmul.f32 %v5480_v31, %v1201_v25  ;;  %5128 = vmatmul.msk.f32.vlgmr.msrb.gmra.mxu2 %vm430_vm2, %v1214_v33  ;;  %v1382_v62 = vsel %vm430_vm2, %v6223_v8, 0.0 }
 0x806   :  { %v1383_v11 = vadd.f32 %v1382_v62, %v1381_v7 }
 0x807   :  { %v1203_v12 = vadd.f32 %v5480_v31, %v1202_v9 }
 0x808   :  { %1384 = vadd.xlane.f32.xlu2 %v1383_v11 }
 0x809   :  { %v1207_v14 = vsel %vm1206_vm13, %v5480_v31, %v1203_v12 }
 0x80a   :  { %v1212_v16 = vsel %vm1209_vm6, %v1211_v13, %v1207_v14 }
 0x80b   :  { %v1215_v17 = vmul.f32 %v1212_v16, %v1174_v1  ;;  %v5482_v1 = vpop.eup %5481 }
 0x80c   :  { %v1395_v55 = vmul.f32 512.0, %v5482_v1  ;;  %vm1399_vm7 = vweird.f32 %v5482_v1 }
 0x80d   :  { %5129 = vmatmul.msk.f32.gmra.mxu2 %vm430_vm2, %v1215_v17 }
 0x80e   :  { %v1396_v60 = vsub.f32 1.0, %v1395_v55 }
 0x810   :  { %v1397_v61 = vmul.f32 %v5482_v1, %v1396_v60 }
 0x812   :  { %v1398_v36 = vadd.f32 %v5482_v1, %v1397_v61 }
 0x814   :  { %v6270_v34 = vsel %vm1399_vm7, %v5482_v1, %v1398_v36 }
 0x87b   :  { %v1385_v10 = vpop.xlane.xlu2 %1384 }
 0x87c   :  { %v1386_v57 = vrot.slane %v1385_v10, 4 }
 0x87e   :  { %v1387_v58 = vadd.f32 %v1386_v57, %v1385_v10 }
 0x880   :  { %v1388_v23 = vrot.slane %v1387_v58, 2 }
 0x882   :  { %v1389_v24 = vadd.f32 %v1388_v23, %v1387_v58 }
 0x884   :  { %v1390_v22 = vrot.slane %v1389_v24, 1 }
 0x886   :  { %v1391_v37 = vadd.f32 %v1390_v22, %v1389_v24 }
 0x888   :  { %v1247_v20 = vpop.f32.mrf.mxu2  ;;  %5266 = vpush %v1391_v37 }
 0x889   :  { %v1248_v39 = vadd.f32 %v5374_v26, %v1247_v20 }
 0x88b   :  { %v1253_v40 = vadd.f32 %v1248_v39, %v6147_v15 }
 0x88d   :  { %1255 = vst.msk [vmem:[%s5768_s9] sm:$0xff] %vm430_vm2, %v1253_v40 }
 0x88e   :  { %1259 = vst.msk [vmem:[%s5768_s9] sm:$0xff] %vm1061_vm10, %v1257_v27 }
 0x890   :  { %v1250_v43 = vpop.f32.mrf.mxu2 }
 0x891   :  { %v1251_v45 = vadd.f32 %v5374_v26, %v1250_v43 }
 0x893   :  { %v1254_v56 = vadd.f32 %v1251_v45, %v6172_v28  ;;  %v1261_v28 = vld [vmem:[%s6247_s4] sm:$0xff] }
 0x895   :  { %1256 = vst.msk [vmem:[%s5768_s9 + $0x8] sm:$0xff] %vm430_vm2, %v1254_v56  ;;  %v1263_v47 = vld [vmem:[%s5768_s9] sm:$0xff] }
 0x896   :  { %1260 = vst.msk [vmem:[%s5768_s9 + $0x8] sm:$0xff] %vm1061_vm10, %v1258_v46 }
 0x89d   :  { %v1264_v15 = vld [vmem:[%s5768_s9 + $0x8] sm:$0xff] }
 0x89e   :  { %v6257_v59 = vld [vmem:[%s5768_s9 + $0x8] sm:$0xff]  ;;  %1285 = vmatpush.msra.mxu1 %v1264_v15 }
 0x89f   :  { %2507 = vst.msk [vmem:[#allocation7 + $0x8] sm:$0xff] %vm430_vm2, %v6257_v59 }
 0x8a0   :  { %1286 = vmatpush.msra.mxu1 %v1263_v47 }
 0x8a1   :  { %5130 = vmatmul.msk.f32.vlgmr.msra.gmra.mxu1 %vm239_vm0, %v1261_v28 }
 0x8a2   :  { %1676 = vmatpush.msrb.mxu1 %v1653_v48 }
 0x8a4   :  { %1677 = vmatpush.msrb.mxu1 %v1652_v21 }
 0x8a6   :  { %1678 = vmatpush.msrb.mxu1 %v1651_v51 }
 0x8a8   :  { %1679 = vmatpush.msrb.mxu1 %v1650_v52 }
 0x8a9   :  { %5131 = vmatmul.msk.f32.gmra.mxu1 %vm239_vm0, %v1262_v54 }
 0x8aa   :  { %1991 = vmatpush.msra.mxu1 %v1264_v15 }
 0x8ac   :  { %1992 = vmatpush.msra.mxu1 %v1263_v47 }
 0x8b9   :  { %s5267_s16 = spop %5266 }
 0x8ba   :  { %v1393_v32 = vstv %s5267_s16  ;;  %s6312_s16 = sld [smem:[%s7381_s0 + %s5726_s30]]  }
 0x8bb   :  { %v1401_v0 = vmul.f32 %v6270_v34, %v1393_v32 }
 0x8bd   :  { %v1402_v29 = vsub.f32 %v6214_v4, %v1401_v0  ;;  %v1403_v2 = vsub.f32 %v6223_v8, %v1401_v0 }
 0x8bf   :  { %v1404_v18 = vmul.f32 %v1402_v29, %v1402_v29  ;;  %v1405_v35 = vmul.f32 %v1403_v2, %v1403_v2 }
 0x8c0   :  { %7436 = sst [smem:[#allocation13_spill]] %s6312_s16 }
 0x8c1   :  { %v1406_v30 = vsel %vm430_vm2, %v1404_v18, 0.0  ;;  %v1407_v31 = vsel %vm430_vm2, %v1405_v35, 0.0 }
 0x8c2   :  { %v1408_v3 = vadd.f32 %v1407_v31, %v1406_v30 }
 0x8c4   :  { %1409 = vadd.xlane.f32.xlu1 %v1408_v3 }
 0x91e   :  { %v1288_v63 = vpop.f32.mrf.mxu1 }
 0x91f   :  { %1294 = vst.msk [vmem:[#allocation2] sm:$0xff] %vm281_vm1, %v1288_v63 }
 0x926   :  { %v1291_v5 = vpop.f32.mrf.mxu1  ;;  %v6279_v6 = vld [vmem:[#allocation2] sm:$0xff] }
 0x927   :  { %1295 = vst.msk [vmem:[#allocation2 + $0x8] sm:$0xff] %vm281_vm1, %v1291_v5  ;;  %v1451_v25 = vsel %vm430_vm2, %v6279_v6, 0.0  ;;  %v6297_v35 = vsub.f32 %v6214_v4, %v6279_v6 }
 0x929   :  { %v1341_v30 = vmul.f32 %v6297_v35, %v6297_v35 }
 0x92e   :  { %v6281_v33 = vld [vmem:[#allocation2 + $0x8] sm:$0xff] }
 0x92f   :  { %v1452_v7 = vsel %vm430_vm2, %v6281_v33, 0.0 }
 0x930   :  { %v1453_v19 = vadd.f32 %v1452_v7, %v1451_v25 }
 0x932   :  { %1454 = vadd.xlane.f32.xlu0 %v1453_v19 }
 0x937   :  { %v1410_v9 = vpop.xlane.xlu1 %1409 }
 0x938   :  { %v1411_v49 = vrot.slane %v1410_v9, 4 }
 0x93a   :  { %v1412_v62 = vadd.f32 %v1411_v49, %v1410_v9 }
 0x93c   :  { %v1413_v11 = vrot.slane %v1412_v62, 2 }
 0x93e   :  { %v1414_v12 = vadd.f32 %v1413_v11, %v1412_v62 }
 0x940   :  { %v1415_v13 = vrot.slane %v1414_v12, 1 }
 0x942   :  { %v1416_v14 = vadd.f32 %v1415_v13, %v1414_v12 }
 0x944   :  { %5268 = vpush %v1416_v14 }
 0x975   :  { %s5269_s18 = spop %5268 }
 0x976   :  { %v1418_v16 = vstv %s5269_s18  ;;  %s5727_s18 = smov 28  }
 0x977   :  { %v1419_v17 = vmul.f32 %v1418_v16, %v6270_v34  ;;  %s6325_s30 = sld [smem:[%s7381_s0 + %s5727_s18]]  }
 0x978   :  { %s6336_s18 = sld [smem:[%s7381_s0 + %s5728_s7]]   ;;  %s5732_s7 = smov 34  }
 0x979   :  { %5483 = vrsqrt.f32 %v1419_v17  ;;  %vm1427_vm8 = vcmp.eq.f32.partialorder %v1419_v17, inf  ;;  %v1430_v37 = vand.u32 2147483648, %v1419_v17  ;;  %vm1429_vm9 = vcmp.eq.f32.partialorder %v1419_v17, 0.0 }
 0x97d   :  { %7437 = sst [smem:[#allocation14_spill]] %s6325_s30 }
 0x97e   :  { %7438 = sst [smem:[#allocation15_spill]] %s6336_s18 }
 0x97f   :  { %v5484_v10 = vpop.eup %5483 }
 0x980   :  { %v1421_v57 = vmul.f32 %v5484_v10, %v1419_v17 }
 0x982   :  { %v1422_v58 = vmul.f32 %v5484_v10, %v1421_v57 }
 0x984   :  { %v1423_v23 = vmul.f32 0.5, %v1422_v58 }
 0x986   :  { %v1424_v24 = vsub.f32 1.5, %v1423_v23 }
 0x988   :  { %v1425_v22 = vmul.f32 %v5484_v10, %v1424_v24 }
 0x98a   :  { %v1426_v26 = vmul.f32 %v1425_v22, %v1419_v17 }
 0x98c   :  { %v1428_v38 = vsel %vm1427_vm8, %v1419_v17, %v1426_v26 }
 0x98d   :  { %v1431_v44 = vsel %vm1429_vm9, %v1430_v37, %v1428_v38 }
 0x98e   :  { %v1432_v20 = vadd.f32 1e-05, %v1431_v44 }
 0x990   :  { %5485 = vrcp.f32 %v1432_v20  ;;  %v1444_v41 = vand.u32 2147483648, %v1432_v20  ;;  %v1442_v43 = vand.u32 2147483647, %v1432_v20  ;;  %vm1438_vm12 = vweird.f32 %v1432_v20 }
 0x992   :  { %v1445_v56 = vor.u32 1.1754944e-38, %v1444_v41  ;;  %vm1443_vm6 = vcmp.eq.f32.partialorder %v1442_v43, 8.507059e+37  ;;  %v6307_v41 = vsub.f32 %v6223_v8, %v6281_v33  ;;  %v1531_v43 = vld [vmem:[%s6312_s16 + $0x38] sm:$0xff]  ;;  %v1530_v8 = vld [vmem:[%s6312_s16 + $0x30] sm:$0xff] }
 0x993   :  { %1552 = vmatpush.msra.mxu2 %v1531_v43 }
 0x995   :  { %1553 = vmatpush.msra.mxu2 %v1530_v8 }
 0x996   :  { %v5486_v39 = vpop.eup %5485 }
 0x997   :  { %v1434_v40 = vmul.f32 %v5486_v39, %v1432_v20  ;;  %vm1439_vm11 = vweird.f32 %v5486_v39 }
 0x998   :  { %vm1440_vm13 = vmor %vm1438_vm12, %vm1439_vm11 }
 0x999   :  { %v1435_v27 = vsub.f32 1.0, %v1434_v40 }
 0x99b   :  { %v1436_v42 = vmul.f32 %v5486_v39, %v1435_v27 }
 0x99d   :  { %v1437_v45 = vadd.f32 %v5486_v39, %v1436_v42  ;;  %v1342_v42 = vmul.f32 %v6307_v41, %v6307_v41 }
 0x99f   :  { %v1441_v46 = vsel %vm1440_vm13, %v5486_v39, %v1437_v45  ;;  %v1528_v45 = vld [vmem:[%s6312_s16 + $0x20] sm:$0xff] }
 0x9a0   :  { %v1446_v15 = vsel %vm1443_vm6, %v1445_v56, %v1441_v46 }
 0x9a1   :  { %v1448_v28 = vmul.f32 %v1446_v15, %v1403_v2  ;;  %v1447_v47 = vmul.f32 %v1446_v15, %v1402_v29  ;;  %v1527_v15 = vld [vmem:[%s6312_s16 + $0x18] sm:$0xff] }
 0x9a3   :  { %1450 = vst.msk [vmem:[#allocation4 + $0x8] sm:$0xff] %vm430_vm2, %v1448_v28  ;;  %v1526_v28 = vld [vmem:[%s6312_s16 + $0x10] sm:$0xff] }
 0x9a4   :  { %1449 = vst.msk [vmem:[#allocation4] sm:$0xff] %vm430_vm2, %v1447_v47  ;;  %v1525_v47 = vld [vmem:[%s6312_s16 + $0x8] sm:$0xff] }
 0x9a5   :  { %v1455_v48 = vpop.xlane.xlu0 %1454 }
 0x9a6   :  { %v1456_v50 = vrot.slane %v1455_v48, 4 }
 0x9a8   :  { %v1457_v21 = vadd.f32 %v1456_v50, %v1455_v48  ;;  %v1524_v48 = vld [vmem:[%s6312_s16] sm:$0xff] }
 0x9aa   :  { %v1458_v51 = vrot.slane %v1457_v21, 2 }
 0x9ac   :  { %v1459_v1 = vadd.f32 %v1458_v51, %v1457_v21 }
 0x9ae   :  { %v1460_v52 = vrot.slane %v1459_v1, 1 }
 0x9b0   :  { %v1461_v54 = vadd.f32 %v1460_v52, %v1459_v1 }
 0x9b2   :  { %5270 = vpush %v1461_v54 }
 0x9e3   :  { %s5271_s23 = spop %5270 }
 0x9e4   :  { %v1463_v55 = vstv %s5271_s23  ;;  %s5729_s23 = smov 31  }
 0x9e5   :  { %v1464_v60 = vmul.f32 %v1463_v55, %v6270_v34 }
 0x9e7   :  { %v1465_v61 = vsub.f32 %v6279_v6, %v1464_v60  ;;  %v1466_v36 = vsub.f32 %v6281_v33, %v1464_v60  ;;  %v1529_v33 = vld [vmem:[%s6312_s16 + $0x28] sm:$0xff]  ;;  %s6344_s16 = sld [smem:[%s7381_s0 + %s5729_s23]]   ;;  %s5731_s23 = smov 33  }
 0x9e8   :  { %1554 = vmatpush.msra.mxu2 %v1529_v33 }
 0x9e9   :  { %v1467_v32 = vmul.f32 %v1465_v61, %v1465_v61  ;;  %v1468_v0 = vmul.f32 %v1466_v36, %v1466_v36 }
 0x9ea   :  { %1555 = vmatpush.msra.mxu2 %v1528_v45 }
 0x9eb   :  { %v1469_v29 = vsel %vm430_vm2, %v1467_v32, 0.0  ;;  %v1470_v2 = vsel %vm430_vm2, %v1468_v0, 0.0 }
 0x9ec   :  { %v1471_v18 = vadd.f32 %v1470_v2, %v1469_v29  ;;  %1556 = vmatpush.msra.mxu2 %v1527_v15 }
 0x9ed   :  { %7439 = sst [smem:[#allocation16_spill]] %s6344_s16 }
 0x9ee   :  { %1472 = vadd.xlane.f32.xlu2 %v1471_v18  ;;  %1557 = vmatpush.msra.mxu2 %v1526_v28 }
 0x9f0   :  { %1558 = vmatpush.msra.mxu2 %v1525_v47 }
 0x9f2   :  { %1559 = vmatpush.msra.mxu2 %v1524_v48 }
 0xa06   :  { %1345 = vrot.lane.b32.xlu2 %v1341_v30, %s7382_s27 }
 0xa61   :  { %v1473_v31 = vpop.xlane.xlu2 %1472 }
 0xa62   :  { %v1474_v3 = vrot.slane %v1473_v31, 4 }
 0xa64   :  { %v1475_v63 = vadd.f32 %v1474_v3, %v1473_v31 }
 0xa66   :  { %v1476_v5 = vrot.slane %v1475_v63, 2 }
 0xa68   :  { %v1477_v25 = vadd.f32 %v1476_v5, %v1475_v63 }
 0xa69   :  { %v1346_v56 = vpop.permute.xlu2 %1345 }
 0xa6a   :  { %v1478_v7 = vrot.slane %v1477_v25, 1  ;;  %v1351_v46 = vsel %vm369_vm5, %v1346_v56, 0.0 }
 0xa6c   :  { %v1479_v19 = vadd.f32 %v1478_v7, %v1477_v25  ;;  %v5375_v25 = vld [vmem:[%s6325_s30] ss:$0 sm:$0xff] }
 0xa6e   :  { %5272 = vpush %v1479_v19 }
 0xa9f   :  { %s5273_s28 = spop %5272 }
 0xaa0   :  { %v1481_v9 = vstv %s5273_s28  ;;  %s5733_s28 = smov 35  }
 0xaa1   :  { %v1482_v49 = vmul.f32 %v1481_v9, %v6270_v34  ;;  %s5074_s30 = sld [smem:[%s7381_s0 + %s5733_s28]]   ;;  %s7446_s28 = smov 32  }
 0xaa3   :  { %5487 = vrsqrt.f32 %v1482_v49  ;;  %vm1490_vm7 = vcmp.eq.f32.partialorder %v1482_v49, inf  ;;  %v1493_v16 = vand.u32 2147483648, %v1482_v49  ;;  %vm1492_vm8 = vcmp.eq.f32.partialorder %v1482_v49, 0.0 }
 0xaa9   :  { %v5488_v4 = vpop.eup %5487 }
 0xaaa   :  { %v1484_v6 = vmul.f32 %v5488_v4, %v1482_v49 }
 0xaac   :  { %v1485_v62 = vmul.f32 %v5488_v4, %v1484_v6 }
 0xaae   :  { %v1486_v11 = vmul.f32 0.5, %v1485_v62 }
 0xab0   :  { %v1487_v12 = vsub.f32 1.5, %v1486_v11 }
 0xab2   :  { %v1488_v13 = vmul.f32 %v5488_v4, %v1487_v12  ;;  %v5376_v4 = vld [vmem:[%s6336_s18] ss:$0 sm:$0xff] }
 0xab4   :  { %v1489_v14 = vmul.f32 %v1488_v13, %v1482_v49 }
 0xab6   :  { %v1491_v17 = vsel %vm1490_vm7, %v1482_v49, %v1489_v14 }
 0xab7   :  { %v1494_v10 = vsel %vm1492_vm8, %v1493_v16, %v1491_v17 }
 0xab8   :  { %v1495_v57 = vadd.f32 1e-05, %v1494_v10 }
 0xaba   :  { %5489 = vrcp.f32 %v1495_v57  ;;  %v1507_v22 = vand.u32 2147483648, %v1495_v57  ;;  %v1505_v37 = vand.u32 2147483647, %v1495_v57  ;;  %vm1501_vm11 = vweird.f32 %v1495_v57 }
 0xabc   :  { %v1508_v44 = vor.u32 1.1754944e-38, %v1507_v22  ;;  %vm1506_vm13 = vcmp.eq.f32.partialorder %v1505_v37, 8.507059e+37 }
 0xac0   :  { %v5490_v58 = vpop.eup %5489 }
 0xac1   :  { %v1497_v23 = vmul.f32 %v5490_v58, %v1495_v57  ;;  %vm1502_vm9 = vweird.f32 %v5490_v58 }
 0xac2   :  { %vm1503_vm12 = vmor %vm1501_vm11, %vm1502_vm9 }
 0xac3   :  { %v1498_v24 = vsub.f32 1.0, %v1497_v23 }
 0xac5   :  { %v1499_v26 = vmul.f32 %v5490_v58, %v1498_v24 }
 0xac7   :  { %v1500_v38 = vadd.f32 %v5490_v58, %v1499_v26 }
 0xac9   :  { %v1504_v20 = vsel %vm1503_vm12, %v5490_v58, %v1500_v38 }
 0xaca   :  { %v1509_v39 = vsel %vm1506_vm13, %v1508_v44, %v1504_v20 }
 0xacb   :  { %v1511_v40 = vmul.f32 %v1509_v39, %v1466_v36  ;;  %v1510_v27 = vmul.f32 %v1509_v39, %v1465_v61 }
 0xacd   :  { %1516 = vrot.lane.b32.xlu0 %v1511_v40, %s7384_s26  ;;  %1514 = vrot.lane.b32.xlu1 %v1510_v27, %s7384_s26  ;;  %s5730_s26 = smov 30  }
 0xace   :  { %s6349_s8 = sld [smem:[%s7381_s0 + %s5730_s26]]   ;;  %s5737_s26 = smov 37  }
 0xacf   :  { %s6433_s18 = sld [smem:[%s7381_s0 + %s5737_s26]]  }
 0xad4   :  { %7440 = sst [smem:[#allocation17_spill]] %s6349_s8  ;;  %v1616_v12 = vld [vmem:[%s6349_s8 + $0x18] sm:$0xff]  ;;  %v1615_v13 = vld [vmem:[%s6349_s8 + $0x10] sm:$0xff]  ;;  %v1614_v10 = vld [vmem:[%s6349_s8 + $0x8] sm:$0xff] }
 0xad5   :  { %1347 = vrot.lane.b32.xlu0 %v1342_v42, %s7382_s27  ;;  %1639 = vmatpush.msrb.mxu0 %v1616_v12  ;;  %v1613_v24 = vld [vmem:[%s6349_s8] sm:$0xff]  ;;  %s6368_s27 = sld [smem:[%s7381_s0 + %s5731_s23]]  }
 0xad6   :  { %s6378_s23 = sld [smem:[%s7381_s0 + %s5732_s7]]   ;;  %s5735_s7 = smov 9  }
 0xad7   :  { %1640 = vmatpush.msrb.mxu0 %v1615_v13  ;;  %7447 = sst [smem:[#allocation23_spill]] %s6433_s18 }
 0xad9   :  { %1641 = vmatpush.msrb.mxu0 %v1614_v10 }
 0xadb   :  { %1642 = vmatpush.msrb.mxu0 %v1613_v24  ;;  %7441 = sst [smem:[#allocation18_spill]] %s6368_s27 }
 0xadc   :  { %7442 = sst [smem:[#allocation19_spill]] %s6378_s23 }
 0xaf7   :  { %1352 = vadd.xlane.f32.xlu1 %v1351_v46 }
 0xb3f   :  { %v1517_v50 = vpop.permute.xlu0 %1516  ;;  %v1515_v21 = vpop.permute.xlu1 %1514 }
 0xb40   :  { %1521 = vst.msk [vmem:[#allocation4 + $0x8] sm:$0xff] %vm608_vm3, %v1517_v50 }
 0xb41   :  { %1520 = vst.msk [vmem:[#allocation4] sm:$0xff] %vm608_vm3, %v1515_v21 }
 0xb47   :  { %v1348_v51 = vpop.permute.xlu0 %1347  ;;  %v1523_v54 = vld [vmem:[#allocation4 + $0x8] sm:$0xff] }
 0xb48   :  { %v1522_v1 = vld [vmem:[#allocation4] sm:$0xff]  ;;  %v1354_v52 = vsel %vm369_vm5, %v1348_v51, 0.0 }
 0xb49   :  { %5135 = vmatmul.msk.f32.vlgmr.msra.gmra.mxu2 %vm633_vm4, %v1522_v1  ;;  %1355 = vadd.xlane.f32.xlu2 %v1354_v52 }
 0xb51   :  { %5136 = vmatmul.msk.f32.gmra.mxu2 %vm633_vm4, %v1523_v54 }
 0xb6a   :  { %v1353_v55 = vpop.xlane.xlu1 %1352 }
 0xb6b   :  { %5491 = vrsqrt.f32 %v1353_v55  ;;  %vm1364_vm6 = vcmp.eq.f32.partialorder %v1353_v55, inf  ;;  %v1367_v63 = vand.u32 2147483648, %v1353_v55  ;;  %vm1366_vm7 = vcmp.eq.f32.partialorder %v1353_v55, 0.0 }
 0xb71   :  { %v5492_v60 = vpop.eup %5491 }
 0xb72   :  { %v1358_v61 = vmul.f32 %v5492_v60, %v1353_v55 }
 0xb74   :  { %v1359_v36 = vmul.f32 %v5492_v60, %v1358_v61 }
 0xb76   :  { %v1360_v32 = vmul.f32 0.5, %v1359_v36 }
 0xb78   :  { %v1361_v0 = vsub.f32 1.5, %v1360_v32 }
 0xb7a   :  { %v1362_v2 = vmul.f32 %v5492_v60, %v1361_v0  ;;  %v5377_v0 = vld [vmem:[%s6344_s16] ss:$0 sm:$0xff]  ;;  %s5734_s16 = smov 11  }
 0xb7b   :  { %s6390_s8 = sld [smem:[%s7381_s0 + %s5734_s16]]   ;;  %s5736_s16 = smov 8  }
 0xb7c   :  { %v1363_v18 = vmul.f32 %v1362_v2, %v1353_v55 }
 0xb7e   :  { %v1365_v3 = vsel %vm1364_vm6, %v1353_v55, %v1363_v18 }
 0xb7f   :  { %v6352_v7 = vsel %vm1366_vm7, %v1367_v63, %v1365_v3 }
 0xb80   :  { %v1536_v49 = vmul.f32 %v5375_v25, %v6352_v7 }
 0xb81   :  { %7443 = sst [smem:[#allocation20_spill]] %s6390_s8 }
 0xbbc   :  { %v1356_v29 = vpop.xlane.xlu2 %1355 }
 0xbbd   :  { %5493 = vrsqrt.f32 %v1356_v29  ;;  %vm1376_vm8 = vcmp.eq.f32.partialorder %v1356_v29, inf  ;;  %v1379_v17 = vand.u32 2147483648, %v1356_v29  ;;  %vm1378_vm9 = vcmp.eq.f32.partialorder %v1356_v29, 0.0 }
 0xbc3   :  { %v5494_v30 = vpop.eup %5493 }
 0xbc4   :  { %v1370_v31 = vmul.f32 %v5494_v30, %v1356_v29 }
 0xbc6   :  { %v1371_v5 = vmul.f32 %v5494_v30, %v1370_v31  ;;  %v5378_v31 = vld [vmem:[%s6368_s27] ss:$0 sm:$0xff] }
 0xbc8   :  { %v1372_v19 = vmul.f32 0.5, %v1371_v5 }
 0xbca   :  { %v1373_v9 = vsub.f32 1.5, %v1372_v19 }
 0xbcc   :  { %v1561_v6 = vpop.f32.mrf.mxu2  ;;  %v1374_v62 = vmul.f32 %v5494_v30, %v1373_v9 }
 0xbcd   :  { %v1562_v11 = vadd.f32 %v1561_v6, %v1536_v49  ;;  %v117_v6 = vstv %s5074_s30  ;;  %s5740_s30 = smov 38  }
 0xbce   :  { %v1375_v14 = vmul.f32 %v1374_v62, %v1356_v29  ;;  %118 = vst [vmem:[#allocation9] sm:$0x1] %v117_v6  ;;  %s6483_s12 = sld [smem:[%s7381_s0 + %s5740_s30]]  }
 0xbcf   :  { %v1571_v16 = vadd.f32 %v5376_v4, %v1562_v11 }
 0xbd0   :  { %v1377_v57 = vsel %vm1376_vm8, %v1356_v29, %v1375_v14 }
 0xbd1   :  { %v5137_v58 = vmul.f32 -1.442695, %v1571_v16  ;;  %v6359_v23 = vsel %vm1378_vm9, %v1379_v17, %v1377_v57 }
 0xbd2   :  { %v1537_v22 = vmul.f32 %v5375_v25, %v6359_v23 }
 0xbd3   :  { %5495 = vpow2.f32 %v5137_v58 }
 0xbd4   :  { %v1564_v26 = vpop.f32.mrf.mxu2  ;;  %7450 = sst [smem:[#allocation26_spill]] %s6483_s12 }
 0xbd5   :  { %v1565_v37 = vadd.f32 %v1564_v26, %v1537_v22 }
 0xbd7   :  { %v1572_v38 = vadd.f32 %v5376_v4, %v1565_v37  ;;  %v5379_v37 = vld [vmem:[%s6378_s23] ss:$0 sm:$0xff]  ;;  %s6397_s23 = sld [smem:[%s7381_s0 + %s5735_s7]]  }
 0xbd8   :  { %s6411_s7 = sld [smem:[%s7381_s0 + %s5736_s16]]  }
 0xbd9   :  { %v5496_v44 = vpop.eup %5495  ;;  %v5138_v20 = vmul.f32 -1.442695, %v1572_v38 }
 0xbda   :  { %v1579_v39 = vadd.f32 1.0, %v5496_v44 }
 0xbdb   :  { %5497 = vpow2.f32 %v5138_v20 }
 0xbdc   :  { %5499 = vrcp.f32 %v1579_v39  ;;  %v1592_v33 = vand.u32 2147483648, %v1579_v39  ;;  %v1590_v56 = vand.u32 2147483647, %v1579_v39  ;;  %vm1586_vm12 = vweird.f32 %v1579_v39 }
 0xbdd   :  { %7444 = sst [smem:[#allocation21_spill]] %s6397_s23 }
 0xbde   :  { %v1593_v28 = vor.u32 1.1754944e-38, %v1592_v33  ;;  %vm1591_vm6 = vcmp.eq.f32.partialorder %v1590_v56, 8.507059e+37  ;;  %7445 = sst [smem:[#allocation22_spill]] %s6411_s7 }
 0xbe1   :  { %v5498_v40 = vpop.eup %5497 }
 0xbe2   :  { %v5500_v27 = vpop.eup %5499  ;;  %v1580_v42 = vadd.f32 1.0, %v5498_v40 }
 0xbe3   :  { %v1582_v43 = vmul.f32 %v5500_v27, %v1579_v39  ;;  %vm1587_vm11 = vweird.f32 %v5500_v27 }
 0xbe4   :  { %5501 = vrcp.f32 %v1580_v42  ;;  %vm1588_vm13 = vmor %vm1586_vm12, %vm1587_vm11  ;;  %v1607_v1 = vand.u32 2147483648, %v1580_v42  ;;  %v1605_v54 = vand.u32 2147483647, %v1580_v42  ;;  %vm1601_vm8 = vweird.f32 %v1580_v42 }
 0xbe5   :  { %v1583_v8 = vsub.f32 1.0, %v1582_v43 }
 0xbe6   :  { %v1608_v60 = vor.u32 1.1754944e-38, %v1607_v1  ;;  %vm1606_vm11 = vcmp.eq.f32.partialorder %v1605_v54, 8.507059e+37  ;;  %v1822_v1 = vld [vmem:[%s6397_s23] sm:$0x3]  ;;  %v1746_v54 = vmax.f32 %v6359_v23, 1e-08 }
 0xbe7   :  { %v1584_v45 = vmul.f32 %v5500_v27, %v1583_v8 }
 0xbe9   :  { %v1585_v46 = vadd.f32 %v5500_v27, %v1584_v45 }
 0xbea   :  { %v5502_v15 = vpop.eup %5501 }
 0xbeb   :  { %v1589_v47 = vsel %vm1588_vm13, %v5500_v27, %v1585_v46  ;;  %v1597_v48 = vmul.f32 %v5502_v15, %v1580_v42  ;;  %vm1602_vm7 = vweird.f32 %v5502_v15 }
 0xbec   :  { %v1594_v50 = vsel %vm1591_vm6, %v1593_v28, %v1589_v47  ;;  %vm1603_vm9 = vmor %vm1601_vm8, %vm1602_vm7  ;;  %v1967_v47 = vld [vmem:[%s6390_s8] sm:$0xff] }
 0xbed   :  { %v1611_v21 = vmul.f32 %v1594_v50, %v1571_v16  ;;  %v1598_v51 = vsub.f32 1.0, %v1597_v48  ;;  %v5380_v48 = vld [vmem:[#allocation9] ss:$0 sm:$0xff] }
 0xbef   :  { %5139 = vmatmul.msk.f32.vlgmr.msrb.gmra.mxu0 %vm430_vm2, %v1611_v21  ;;  %v1599_v52 = vmul.f32 %v5502_v15, %v1598_v51 }
 0xbf1   :  { %v1600_v55 = vadd.f32 %v5502_v15, %v1599_v52 }
 0xbf3   :  { %v1604_v61 = vsel %vm1603_vm9, %v5502_v15, %v1600_v55  ;;  %v1968_v55 = vld [vmem:[%s6390_s8 + $0x8] sm:$0xff]  ;;  %s5739_s8 = smov 39  }
 0xbf4   :  { %v1609_v36 = vsel %vm1606_vm11, %v1608_v60, %v1604_v61  ;;  %s6476_s16 = sld [smem:[%s7381_s0 + %s5739_s8]]   ;;  %s5741_s8 = smov 10  }
 0xbf5   :  { %v1612_v32 = vmul.f32 %v1609_v36, %v1572_v38  ;;  %v1745_v36 = vmax.f32 %v6352_v7, 1e-08  ;;  %s6504_s30 = sld [smem:[%s7381_s0 + %s5741_s8]]   ;;  %s5742_s8 = smov 41  }
 0xbf7   :  { %5140 = vmatmul.msk.f32.gmra.mxu0 %vm430_vm2, %v1612_v32  ;;  %v1758_v6 = vand.u32 2147483648, %v1745_v36 }
 0xbfa   :  { %7449 = sst [smem:[#allocation25_spill]] %s6476_s16 }
 0xbfb   :  { %7451 = sst [smem:[#allocation27_spill]] %s6504_s30 }
 0xc6c   :  { %v1644_v29 = vpop.f32.mrf.mxu0 }
 0xc6d   :  { %v1645_v2 = vadd.f32 %v5377_v0, %v1644_v29 }
 0xc6f   :  { %1789 = vst.msk [vmem:[#allocation5] sm:$0xff] %vm430_vm2, %v1645_v2  ;;  %5141 = vmatmul.msk.f32.vlgmr.msrb.gmra.mxu1 %vm430_vm2, %v1645_v2 }
 0xc74   :  { %v1647_v18 = vpop.f32.mrf.mxu0 }
 0xc75   :  { %v1648_v30 = vadd.f32 %v5377_v0, %v1647_v18  ;;  %v1773_v18 = vand.u32 2147483648, %v1746_v54 }
 0xc77   :  { %1790 = vst.msk [vmem:[#allocation5 + $0x8] sm:$0xff] %vm430_vm2, %v1648_v30  ;;  %5142 = vmatmul.msk.f32.gmra.mxu1 %vm430_vm2, %v1648_v30  ;;  %v1771_v30 = vand.u32 2147483647, %v1746_v54 }
 0xc7f   :  { %5152 = vmatmul.msk.f32.vlgmr.msra.gmra.mxu1 %vm239_vm0, %v1967_v47 }
 0xc87   :  { %5153 = vmatmul.msk.f32.gmra.mxu1 %vm239_vm0, %v1968_v55 }
 0xcec   :  { %v1681_v3 = vpop.f32.mrf.mxu1 }
 0xced   :  { %v1682_v63 = vadd.f32 %v5378_v31, %v1681_v3  ;;  %v1774_v3 = vor.u32 1.1754944e-38, %v1773_v18 }
 0xcef   :  { %v5143_v5 = vmul.f32 -1.442695, %v1682_v63 }
 0xcf1   :  { %5503 = vpow2.f32 %v5143_v5 }
 0xcf4   :  { %v1684_v25 = vpop.f32.mrf.mxu1 }
 0xcf5   :  { %v1685_v19 = vadd.f32 %v5378_v31, %v1684_v25 }
 0xcf7   :  { %v5504_v9 = vpop.eup %5503  ;;  %v5144_v49 = vmul.f32 -1.442695, %v1685_v19 }
 0xcf8   :  { %v1693_v4 = vadd.f32 1.0, %v5504_v9 }
 0xcf9   :  { %5505 = vpow2.f32 %v5144_v49 }
 0xcfa   :  { %5507 = vrcp.f32 %v1693_v4  ;;  %v1706_v16 = vand.u32 2147483648, %v1693_v4  ;;  %v1704_v10 = vand.u32 2147483647, %v1693_v4  ;;  %vm1700_vm13 = vweird.f32 %v1693_v4 }
 0xcfc   :  { %v1707_v24 = vor.u32 1.1754944e-38, %v1706_v16  ;;  %vm1705_vm7 = vcmp.eq.f32.partialorder %v1704_v10, 8.507059e+37  ;;  %v1994_v49 = vpop.f32.mrf.mxu1  ;;  %v1793_v10 = vld [vmem:[%s6411_s7] sm:$0x3]  ;;  %s5738_s7 = smov 36  }
 0xcfd   :  { %2000 = vst.msk [vmem:[#allocation3] sm:$0xff] %vm281_vm1, %v1994_v49  ;;  %s6438_s27 = sld [smem:[%s7381_s0 + %s5738_s7]]   ;;  %v1894_v49 = vld [vmem:[%s6483_s12] sm:$0xff]  ;;  %s5747_s7 = smov 45  }
 0xcff   :  { %v5506_v62 = vpop.eup %5505 }
 0xd00   :  { %v5508_v11 = vpop.eup %5507  ;;  %v1694_v12 = vadd.f32 1.0, %v5506_v62  ;;  %v1756_v62 = vand.u32 2147483647, %v1745_v36 }
 0xd01   :  { %v1696_v13 = vmul.f32 %v5508_v11, %v1693_v4  ;;  %vm1701_vm12 = vweird.f32 %v5508_v11 }
 0xd02   :  { %5509 = vrcp.f32 %v1694_v12  ;;  %vm1702_vm6 = vmor %vm1700_vm13, %vm1701_vm12  ;;  %v1721_v39 = vand.u32 2147483648, %v1694_v12  ;;  %v1719_v27 = vand.u32 2147483647, %v1694_v12  ;;  %vm1715_vm9 = vweird.f32 %v1694_v12 }
 0xd03   :  { %v1697_v14 = vsub.f32 1.0, %v1696_v13  ;;  %5511 = vrcp.f32 %v1746_v54  ;;  %v1759_v13 = vor.u32 1.1754944e-38, %v1758_v6  ;;  %7448 = sst [smem:[#allocation24_spill]] %s6438_s27  ;;  %v1841_v47 = vld [vmem:[%s6438_s27 + $0x10] sm:$0xff] }
 0xd04   :  { %v1722_v33 = vor.u32 1.1754944e-38, %v1721_v39  ;;  %vm1720_vm12 = vcmp.eq.f32.partialorder %v1719_v27, 8.507059e+37  ;;  %5513 = vrcp.f32 %v1745_v36  ;;  %v1846_v39 = vld [vmem:[%s6438_s27 + $0x38] sm:$0xff]  ;;  %v1844_v27 = vld [vmem:[%s6438_s27 + $0x28] sm:$0xff] }
 0xd05   :  { %v1698_v17 = vmul.f32 %v5508_v11, %v1697_v14  ;;  %1862 = vmatpush.msrb.mxu2 %v1846_v39 }
 0xd07   :  { %v1699_v57 = vadd.f32 %v5508_v11, %v1698_v17 }
 0xd08   :  { %v5510_v58 = vpop.eup %5509 }
 0xd09   :  { %v1703_v22 = vsel %vm1702_vm6, %v5508_v11, %v1699_v57  ;;  %v1711_v26 = vmul.f32 %v5510_v58, %v1694_v12  ;;  %vm1716_vm8 = vweird.f32 %v5510_v58  ;;  %v5512_v60 = vpop.eup %5511  ;;  %vm1767_vm6 = vweird.f32 %v1746_v54 }
 0xd0a   :  { %v1708_v38 = vsel %vm1705_vm7, %v1707_v24, %v1703_v22  ;;  %vm1717_vm11 = vmor %vm1715_vm9, %vm1716_vm8  ;;  %v1763_v61 = vmul.f32 %v5512_v60, %v1746_v54  ;;  %vm1768_vm13 = vweird.f32 %v5512_v60  ;;  %v5514_v2 = vpop.eup %5513  ;;  %vm1772_vm8 = vcmp.eq.f32.partialorder %v1771_v30, 8.507059e+37  ;;  %v5381_v30 = vld [vmem:[%s6433_s18] ss:$0 sm:$0xff]  ;;  %s6603_s18 = sld [smem:[%s7381_s0 + %s5747_s7]]   ;;  %s5756_s7 = smov 51  }
 0xd0b   :  { %v1725_v44 = vmul.f32 %v1708_v38, %v1682_v63  ;;  %v1712_v20 = vsub.f32 1.0, %v1711_v26  ;;  %vm1769_vm7 = vmor %vm1767_vm6, %vm1768_vm13  ;;  %v1748_v23 = vmul.f32 %v5514_v2, %v1745_v36  ;;  %vm1753_vm9 = vweird.f32 %v5514_v2 }
 0xd0c   :  { %v1764_v32 = vsub.f32 1.0, %v1763_v61  ;;  %vm1757_vm13 = vcmp.eq.f32.partialorder %v1756_v62, 8.507059e+37  ;;  %vm7404_vm6 = vcmask 279552  }
 0xd0d   :  { %v1713_v40 = vmul.f32 %v5510_v58, %v1712_v20  ;;  %v1731_v42 = vmul.f32 %v5379_v37, %v1725_v44  ;;  %v1749_v5 = vsub.f32 1.0, %v1748_v23  ;;  %v6441_v20 = vld [vmem:[%s6184_s22] sm:$0x3] }
 0xd0e   :  { %v1765_v0 = vmul.f32 %v5512_v60, %v1764_v32 }
 0xd0f   :  { %v1714_v43 = vadd.f32 %v5510_v58, %v1713_v40  ;;  %v1733_v8 = vsel %vm430_vm2, %v1731_v42, 0.0  ;;  %v1750_v9 = vmul.f32 %v5514_v2, %v1749_v5  ;;  %v1845_v40 = vld [vmem:[%s6438_s27 + $0x30] sm:$0xff]  ;;  %v1843_v42 = vld [vmem:[%s6438_s27 + $0x20] sm:$0xff] }
 0xd10   :  { %1734 = vadd.xlane.f32.xlu1 %v1733_v8  ;;  %v1766_v29 = vadd.f32 %v5512_v60, %v1765_v0  ;;  %1863 = vmatpush.msrb.mxu2 %v1845_v40  ;;  %7458 = sst [smem:[#allocation33_spill]] %s6603_s18 }
 0xd11   :  { %v1718_v45 = vsel %vm1717_vm11, %v5510_v58, %v1714_v43  ;;  %v1751_v4 = vadd.f32 %v5514_v2, %v1750_v9  ;;  %vm1752_vm11 = vweird.f32 %v1745_v36  ;;  %v1997_v58 = vpop.f32.mrf.mxu1 }
 0xd12   :  { %v1723_v56 = vsel %vm1720_vm12, %v1722_v33, %v1718_v45  ;;  %v1770_v31 = vsel %vm1769_vm7, %v5512_v60, %v1766_v29  ;;  %vm1754_vm12 = vmor %vm1752_vm11, %vm1753_vm9  ;;  %2001 = vst.msk [vmem:[#allocation3 + $0x8] sm:$0xff] %vm281_vm1, %v1997_v58  ;;  %vm1830_vm7 = vcmask 254976   ;;  %1864 = vmatpush.msrb.mxu2 %v1844_v27  ;;  %v6462_v60 = vld [vmem:[%s5768_s9] sm:$0xff] }
 0xd13   :  { %v1726_v46 = vmul.f32 %v1723_v56, %v1685_v19  ;;  %v1775_v63 = vsel %vm1772_vm8, %v1774_v3, %v1770_v31  ;;  %v1755_v11 = vsel %vm1754_vm12, %v5514_v2, %v1751_v4  ;;  %1831 = vst.msk [vmem:[#allocation7] sm:$0x3] %vm1830_vm7, %v6441_v20  ;;  %vm7403_vm8 = vcmask 517376   ;;  %v1897_v3 = vld [vmem:[%s6483_s12 + $0x18] sm:$0xff] }
 0xd14   :  { %v1776_v25 = vmul.f32 %v1775_v63, %v6307_v41  ;;  %v1760_v41 = vsel %vm1757_vm13, %v1759_v13, %v1755_v11  ;;  %1865 = vmatpush.msrb.mxu2 %v1843_v42  ;;  %v1896_v63 = vld [vmem:[%s6483_s12 + $0x10] sm:$0xff] }
 0xd15   :  { %v1732_v15 = vmul.f32 %v5379_v37, %v1726_v46  ;;  %v1761_v14 = vmul.f32 %v1760_v41, %v6297_v35  ;;  %v6417_v35 = vld [vmem:[#allocation3] sm:$0xff] }
 0xd16   :  { %v2048_v24 = vsel %vm430_vm2, %v6417_v35, 0.0 }
 0xd17   :  { %v1736_v28 = vsel %vm430_vm2, %v1732_v15, 0.0 }
 0xd18   :  { %1737 = vadd.xlane.f32.xlu0 %v1736_v28  ;;  %v1842_v28 = vld [vmem:[%s6438_s27 + $0x18] sm:$0xff] }
 0xd19   :  { %v6421_v22 = vld [vmem:[#allocation3 + $0x8] sm:$0xff]  ;;  %1866 = vmatpush.msrb.mxu2 %v1842_v28 }
 0xd1a   :  { %v2049_v26 = vsel %vm430_vm2, %v6421_v22, 0.0 }
 0xd1b   :  { %v2050_v37 = vadd.f32 %v2049_v26, %v2048_v24  ;;  %1867 = vmatpush.msrb.mxu2 %v1841_v47 }
 0xd83   :  { %v1735_v50 = vpop.xlane.xlu1 %1734 }
 0xd84   :  { %v1743_v21 = vadd.f32 %v5380_v48, %v1735_v50  ;;  %v1839_v50 = vld [vmem:[%s6438_s27] sm:$0xff] }
 0xd86   :  { %1779 = vperm.xlu0 %5364, %v1743_v21  }
 0xd8b   :  { %v1738_v51 = vpop.xlane.xlu0 %1737 }
 0xd8c   :  { %v1744_v52 = vadd.f32 %v5380_v48, %v1738_v51  ;;  %v1840_v48 = vld [vmem:[%s6438_s27 + $0x8] sm:$0xff] }
 0xd8d   :  { %1868 = vmatpush.msrb.mxu2 %v1840_v48 }
 0xd8e   :  { %1825 = vperm.xlu0 %5364, %v1822_v1   ;;  %1784 = vperm.xlu2 %5365, %v1744_v52  }
 0xd8f   :  { %1869 = vmatpush.msrb.mxu2 %v1839_v50 }
 0xdb7   :  { %2051 = vadd.xlane.f32.xlu2 %v2050_v37 }
 0xde8   :  { %v1785_v19 = vpop.permute.xlu2 %1784 }
 0xde9   :  { %v1788_v7 = vmul.f32 %v1785_v19, %v1776_v25 }
 0xdeb   :  { %1792 = vst.msk [vmem:[#allocation5 + $0x8] sm:$0xff] %vm1061_vm10, %v1788_v7  ;;  %v1895_v7 = vld [vmem:[%s6483_s12 + $0x8] sm:$0xff]  ;;  %s5746_s12 = smov 43  }
 0xdf2   :  { %v1795_v12 = vld [vmem:[#allocation5 + $0x8] sm:$0xff] }
 0xdf3   :  { %1813 = vmatpush.msrb.mxu3 %v1795_v12 }
 0xdf8   :  { %v1780_v16 = vpop.permute.xlu0 %1779 }
 0xdf9   :  { %v1787_v17 = vmul.f32 %v1780_v16, %v1761_v14 }
 0xdfb   :  { %1791 = vst.msk [vmem:[#allocation5] sm:$0xff] %vm1061_vm10, %v1787_v17 }
 0xe00   :  { %v6478_v2 = vpop.permute.xlu0 %1825 }
 0xe02   :  { %v1794_v57 = vld [vmem:[#allocation5] sm:$0xff] }
 0xe03   :  { %1814 = vmatpush.msrb.mxu3 %v1794_v57 }
 0xe04   :  { %5145 = vmatmul.msk.f32.vlgmr.msrb.gmra.mxu3 %vm239_vm0, %v1793_v10 }
 0xe05   :  { %1917 = vmatpush.msra.mxu3 %v1897_v3 }
 0xe07   :  { %1918 = vmatpush.msra.mxu3 %v1896_v63 }
 0xe09   :  { %1919 = vmatpush.msra.mxu3 %v1895_v7 }
 0xe0b   :  { %1920 = vmatpush.msra.mxu3 %v1894_v49 }
 0xe2a   :  { %v2052_v43 = vpop.xlane.xlu2 %2051 }
 0xe2b   :  { %v2053_v8 = vrot.slane %v2052_v43, 4 }
 0xe2d   :  { %v2054_v33 = vadd.f32 %v2053_v8, %v2052_v43 }
 0xe2f   :  { %v2055_v45 = vrot.slane %v2054_v33, 2 }
 0xe31   :  { %v2056_v56 = vadd.f32 %v2055_v45, %v2054_v33 }
 0xe33   :  { %v2057_v46 = vrot.slane %v2056_v56, 1 }
 0xe35   :  { %v2058_v15 = vadd.f32 %v2057_v46, %v2056_v56 }
 0xe37   :  { %5274 = vpush %v2058_v15 }
 0xe68   :  { %s5275_s23 = spop %5274 }
 0xe69   :  { %v2060_v51 = vstv %s5275_s23 }
 0xe6a   :  { %v2061_v1 = vmul.f32 %v2060_v51, %v6270_v34 }
 0xe6c   :  { %v6456_v54 = vsub.f32 %v6417_v35, %v2061_v1  ;;  %v6459_v55 = vsub.f32 %v6421_v22, %v2061_v1 }
 0xe6e   :  { %v2064_v61 = vmul.f32 %v6456_v54, %v6456_v54  ;;  %v2065_v36 = vmul.f32 %v6459_v55, %v6459_v55 }
 0xe70   :  { %v2066_v32 = vsel %vm430_vm2, %v2064_v61, 0.0  ;;  %v2067_v0 = vsel %vm430_vm2, %v2065_v36, 0.0 }
 0xe71   :  { %v2068_v29 = vadd.f32 %v2067_v0, %v2066_v32 }
 0xe73   :  { %2069 = vadd.xlane.f32.xlu0 %v2068_v29 }
 0xe87   :  { %v1816_v38 = vpop.f32.mrf.mxu3 }
 0xe88   :  { %1820 = vst.msk [vmem:[#allocation6] sm:$0x3] %vm7404_vm6, %v1816_v38 }
 0xe8f   :  { %v6426_v44 = vld [vmem:[#allocation6] sm:$0x3] }
 0xe90   :  { %1833 = vrot.lane.b32.xlu1 %v6426_v44, %s7446_s28 }
 0xee6   :  { %v2070_v18 = vpop.xlane.xlu0 %2069 }
 0xee7   :  { %v2071_v31 = vrot.slane %v2070_v18, 4 }
 0xee9   :  { %v2072_v23 = vadd.f32 %v2071_v31, %v2070_v18  ;;  %v5382_v18 = vld [vmem:[%s6476_s16] ss:$0 sm:$0xff] }
 0xeeb   :  { %v2073_v19 = vrot.slane %v2072_v23, 2 }
 0xeed   :  { %v2074_v4 = vadd.f32 %v2073_v19, %v2072_v23 }
 0xeef   :  { %v2075_v6 = vrot.slane %v2074_v4, 1 }
 0xef1   :  { %v2076_v62 = vadd.f32 %v2075_v6, %v2074_v4 }
 0xef3   :  { %5276 = vpush %v2076_v62 }
 0xf02   :  { %v1834_v21 = vpop.permute.xlu1 %1833 }
 0xf03   :  { %1837 = vst.msk [vmem:[#allocation7] sm:$0x3] %vm7403_vm8, %v1834_v21 }
 0xf0a   :  { %v1838_v52 = vld [vmem:[#allocation7] sm:$0x3] }
 0xf0b   :  { %5146 = vmatmul.msk.f32.vlgmr.msrb.gmra.mxu2 %vm633_vm4, %v1838_v52  ;;  %2506 = vst.msk [vmem:[#allocation7] sm:$0xff] %vm430_vm2, %v6462_v60 }
 0xf24   :  { %s5277_s27 = spop %5276 }
 0xf25   :  { %v2078_v38 = vstv %s5277_s27  ;;  %s7452_s27 = smov 96  }
 0xf26   :  { %v2079_v39 = vmul.f32 %v2078_v38, %v6270_v34 }
 0xf28   :  { %vm2087_vm8 = vcmp.eq.f32.partialorder %v2079_v39, inf  ;;  %v2090_v45 = vand.u32 2147483648, %v2079_v39 }
 0xf8e   :  { %v1871_v5 = vpop.f32.mrf.mxu2 }
 0xf8f   :  { %v1872_v25 = vadd.f32 %v5381_v30, %v1871_v5  ;;  %v1828_v30 = vmul.f32 %v6478_v2, %v6426_v44  ;;  %v1930_v44 = vld [vmem:[%s6504_s30] sm:$0xff] }
 0xf91   :  { %v5147_v9 = vmul.f32 -1.442695, %v1872_v25  ;;  %v1927_v63 = vadd.f32 %v6441_v20, %v1828_v30 }
 0xf93   :  { %5515 = vpow2.f32 %v5147_v9 }
 0xf99   :  { %v5516_v11 = vpop.eup %5515 }
 0xf9a   :  { %v1877_v12 = vadd.f32 1.0, %v5516_v11 }
 0xf9c   :  { %5517 = vrcp.f32 %v1877_v12  ;;  %v1889_v16 = vand.u32 2147483648, %v1877_v12  ;;  %v1887_v10 = vand.u32 2147483647, %v1877_v12  ;;  %vm1883_vm11 = vweird.f32 %v1877_v12 }
 0xf9d   :  { %5519 = vrsqrt.f32 %v2079_v39 }
 0xf9e   :  { %v1890_v58 = vor.u32 1.1754944e-38, %v1889_v16  ;;  %vm1888_vm13 = vcmp.eq.f32.partialorder %v1887_v10, 8.507059e+37 }
 0xfa2   :  { %v5518_v13 = vpop.eup %5517 }
 0xfa3   :  { %v1879_v41 = vmul.f32 %v5518_v13, %v1877_v12  ;;  %vm1884_vm9 = vweird.f32 %v5518_v13  ;;  %v5520_v40 = vpop.eup %5519 }
 0xfa4   :  { %vm1885_vm12 = vmor %vm1883_vm11, %vm1884_vm9  ;;  %v2081_v27 = vmul.f32 %v5520_v40, %v2079_v39  ;;  %vm2089_vm9 = vcmp.eq.f32.partialorder %v2079_v39, 0.0 }
 0xfa5   :  { %v1880_v14 = vsub.f32 1.0, %v1879_v41 }
 0xfa6   :  { %v2082_v42 = vmul.f32 %v5520_v40, %v2081_v27 }
 0xfa7   :  { %v1881_v17 = vmul.f32 %v5518_v13, %v1880_v14 }
 0xfa8   :  { %v2083_v43 = vmul.f32 0.5, %v2082_v42 }
 0xfa9   :  { %v1882_v57 = vadd.f32 %v5518_v13, %v1881_v17 }
 0xfaa   :  { %v2084_v8 = vsub.f32 1.5, %v2083_v43 }
 0xfab   :  { %v1886_v24 = vsel %vm1885_vm12, %v5518_v13, %v1882_v57 }
 0xfac   :  { %v1891_v26 = vsel %vm1888_vm13, %v1890_v58, %v1886_v24  ;;  %v2085_v33 = vmul.f32 %v5520_v40, %v2084_v8 }
 0xfad   :  { %v1893_v37 = vmul.f32 %v1891_v26, %v1872_v25 }
 0xfae   :  { %v2086_v56 = vmul.f32 %v2085_v33, %v2079_v39 }
 0xfaf   :  { %5148 = vmatmul.msk.f32.vlgmr.msra.gmra.mxu3 %vm430_vm2, %v1893_v37 }
 0xfb0   :  { %v2088_v46 = vsel %vm2087_vm8, %v2079_v39, %v2086_v56  ;;  %vm7415_vm8 = vcmask 279808  }
 0xfb1   :  { %v2091_v15 = vsel %vm2089_vm9, %v2090_v45, %v2088_v46 }
 0xfb2   :  { %v2092_v28 = vadd.f32 1e-05, %v2091_v15 }
 0xfb4   :  { %5521 = vrcp.f32 %v2092_v28  ;;  %v2104_v51 = vand.u32 2147483648, %v2092_v28  ;;  %vm2098_vm11 = vweird.f32 %v2092_v28  ;;  %v2102_v52 = vand.u32 2147483647, %v2092_v28 }
 0xfb6   :  { %v2105_v61 = vor.u32 1.1754944e-38, %v2104_v51  ;;  %vm2103_vm6 = vcmp.eq.f32.partialorder %v2102_v52, 8.507059e+37 }
 0xfba   :  { %v5522_v47 = vpop.eup %5521 }
 0xfbb   :  { %v2094_v48 = vmul.f32 %v5522_v47, %v2092_v28  ;;  %vm2099_vm12 = vweird.f32 %v5522_v47 }
 0xfbc   :  { %vm2100_vm13 = vmor %vm2098_vm11, %vm2099_vm12 }
 0xfbd   :  { %v2095_v50 = vsub.f32 1.0, %v2094_v48 }
 0xfbf   :  { %v2096_v21 = vmul.f32 %v5522_v47, %v2095_v50 }
 0xfc1   :  { %v2097_v1 = vadd.f32 %v5522_v47, %v2096_v21 }
 0xfc3   :  { %v2101_v36 = vsel %vm2100_vm13, %v5522_v47, %v2097_v1 }
 0xfc4   :  { %v2106_v32 = vsel %vm2103_vm6, %v2105_v61, %v2101_v36 }
 0xfc5   :  { %v2107_v0 = vmul.f32 %v2106_v32, %v6456_v54  ;;  %v2108_v29 = vmul.f32 %v2106_v32, %v6459_v55  ;;  %v1931_v55 = vld [vmem:[%s6504_s30 + $0x8] sm:$0xff] }
 0xfc7   :  { %2109 = vst.msk [vmem:[#allocation4] sm:$0xff] %vm430_vm2, %v2107_v0 }
 0xfc8   :  { %2110 = vst.msk [vmem:[#allocation4 + $0x8] sm:$0xff] %vm430_vm2, %v2108_v29 }
0x1032   :  { %v1922_v31 = vpop.f32.mrf.mxu3 }
0x1033   :  { %v1923_v23 = vadd.f32 %v5382_v18, %v1922_v31 }
0x1035   :  { %v1925_v3 = vadd.f32 %v1923_v23, %v6441_v20 }
0x1037   :  { %1926 = vst.msk [vmem:[%s6184_s22] sm:$0x3] %vm1830_vm7, %v1925_v3 }
0x1038   :  { %1929 = vst.msk [vmem:[%s6184_s22] sm:$0x3] %vm7415_vm8, %v1927_v63 }
0x103f   :  { %v1932_v54 = vld [vmem:[%s6184_s22] sm:$0x3] }
0x1040   :  { %5149 = vmatpush.msk.msra.mxu0 %vm1306_vm14, %v1932_v54 }
0x1041   :  { %5150 = vmatmul.msk.f32.vlgmr.msra.gmra.mxu0 %vm7416_vm15, %v1930_v44 }
0x1049   :  { %5151 = vmatmul.msk.f32.gmra.mxu0 %vm7416_vm15, %v1931_v55 }
0x10be   :  { %v1959_v20 = vpop.f32.mrf.mxu0 }
0x10bf   :  { %1965 = vst.msk [vmem:[#allocation2] sm:$0xff] %vm281_vm1, %v1959_v20 }
0x10c6   :  { %v1962_v2 = vpop.f32.mrf.mxu0  ;;  %v2002_v5 = vld [vmem:[#allocation2] sm:$0xff] }
0x10c7   :  { %1966 = vst.msk [vmem:[#allocation2 + $0x8] sm:$0xff] %vm281_vm1, %v1962_v2  ;;  %v2111_v19 = vsel %vm430_vm2, %v2002_v5, 0.0  ;;  %v6536_v37 = vsub.f32 %v6417_v35, %v2002_v5 }
0x10c9   :  { %v2008_v38 = vmul.f32 %v6536_v37, %v6536_v37 }
0x10ce   :  { %v6518_v25 = vld [vmem:[#allocation2 + $0x8] sm:$0xff] }
0x10cf   :  { %v2112_v7 = vsel %vm430_vm2, %v6518_v25, 0.0 }
0x10d0   :  { %v2113_v9 = vadd.f32 %v2112_v7, %v2111_v19  ;;  %v6563_v7 = vsub.f32 %v6421_v22, %v6518_v25 }
0x10d2   :  { %2114 = vadd.xlane.f32.xlu1 %v2113_v9  ;;  %v2009_v9 = vmul.f32 %v6563_v7, %v6563_v7 }
0x1145   :  { %v2115_v49 = vpop.xlane.xlu1 %2114 }
0x1146   :  { %v2116_v4 = vrot.slane %v2115_v49, 4 }
0x1148   :  { %v2117_v6 = vadd.f32 %v2116_v4, %v2115_v49 }
0x114a   :  { %v2118_v62 = vrot.slane %v2117_v6, 2 }
0x114c   :  { %v2119_v11 = vadd.f32 %v2118_v62, %v2117_v6 }
0x114e   :  { %v2120_v12 = vrot.slane %v2119_v11, 1 }
0x1150   :  { %v2121_v13 = vadd.f32 %v2120_v12, %v2119_v11 }
0x1152   :  { %5278 = vpush %v2121_v13 }
0x1183   :  { %s5279_s23 = spop %5278 }
0x1184   :  { %v2123_v41 = vstv %s5279_s23  ;;  %s6545_s23 = sld [smem:[%s7381_s0 + %s5742_s8]]   ;;  %s5743_s8 = smov 40  }
0x1185   :  { %v2124_v14 = vmul.f32 %v2123_v41, %v6270_v34  ;;  %s6551_s26 = sld [smem:[%s7381_s0 + %s5743_s8]]   ;;  %s5744_s8 = smov 42  }
0x1186   :  { %s6577_s16 = sld [smem:[%s7381_s0 + %s5744_s8]]  }
0x1187   :  { %v6524_v16 = vsub.f32 %v2002_v5, %v2124_v14  ;;  %v6527_v17 = vsub.f32 %v6518_v25, %v2124_v14  ;;  %s6590_s8 = sld [smem:[%s7381_s0 + %s5746_s12]]  }
0x1189   :  { %v2127_v10 = vmul.f32 %v6524_v16, %v6524_v16  ;;  %v2128_v57 = vmul.f32 %v6527_v17, %v6527_v17 }
0x118a   :  { %7453 = sst [smem:[#allocation28_spill]] %s6545_s23 }
0x118b   :  { %v2129_v58 = vsel %vm430_vm2, %v2127_v10, 0.0  ;;  %v2130_v24 = vsel %vm430_vm2, %v2128_v57, 0.0  ;;  %7454 = sst [smem:[#allocation29_spill]] %s6551_s26  ;;  %v2191_v23 = vld [vmem:[%s6551_s26 + $0x38] sm:$0xff]  ;;  %v2190_v3 = vld [vmem:[%s6551_s26 + $0x30] sm:$0xff]  ;;  %v2189_v54 = vld [vmem:[%s6551_s26 + $0x28] sm:$0xff] }
0x118c   :  { %v2131_v26 = vadd.f32 %v2130_v24, %v2129_v58  ;;  %2212 = vmatpush.msra.mxu2 %v2191_v23  ;;  %v2188_v19 = vld [vmem:[%s6551_s26 + $0x20] sm:$0xff]  ;;  %v2187_v49 = vld [vmem:[%s6551_s26 + $0x18] sm:$0xff]  ;;  %v2186_v4 = vld [vmem:[%s6551_s26 + $0x10] sm:$0xff]  ;;  %7455 = sst [smem:[#allocation30_spill]] %s6577_s16 }
0x118d   :  { %v2185_v6 = vld [vmem:[%s6551_s26 + $0x8] sm:$0xff]  ;;  %v2184_v62 = vld [vmem:[%s6551_s26] sm:$0xff]  ;;  %s5745_s26 = smov 44   ;;  %7457 = sst [smem:[#allocation32_spill]] %s6590_s8  ;;  %v2313_v23 = vld [vmem:[%s6603_s18 + $0x18] sm:$0xff] }
0x118e   :  { %2132 = vadd.xlane.f32.xlu2 %v2131_v26  ;;  %2213 = vmatpush.msra.mxu2 %v2190_v3  ;;  %s6585_s4 = sld [smem:[%s7381_s0 + %s5745_s26]]   ;;  %v2312_v3 = vld [vmem:[%s6603_s18 + $0x10] sm:$0xff]  ;;  %s5748_s26 = smov 46  }
0x118f   :  { %2336 = vmatpush.msrb.mxu0 %v2313_v23  ;;  %s6616_s12 = sld [smem:[%s7381_s0 + %s5748_s26]]   ;;  %s5749_s26 = smov 47  }
0x1190   :  { %2214 = vmatpush.msra.mxu2 %v2189_v54 }
0x1191   :  { %2337 = vmatpush.msrb.mxu0 %v2312_v3 }
0x1192   :  { %2215 = vmatpush.msra.mxu2 %v2188_v19 }
0x1194   :  { %2216 = vmatpush.msra.mxu2 %v2187_v49  ;;  %7456 = sst [smem:[#allocation31_spill]] %s6585_s4 }
0x1195   :  { %7459 = sst [smem:[#allocation34_spill]] %s6616_s12 }
0x1196   :  { %2217 = vmatpush.msra.mxu2 %v2186_v4 }
0x1198   :  { %2218 = vmatpush.msra.mxu2 %v2185_v6 }
0x119a   :  { %2219 = vmatpush.msra.mxu2 %v2184_v62 }
0x11a6   :  { %2012 = vrot.lane.b32.xlu2 %v2008_v38, %s7452_s27 }
0x1201   :  { %v2133_v39 = vpop.xlane.xlu2 %2132 }
0x1202   :  { %v2134_v40 = vrot.slane %v2133_v39, 4 }
0x1204   :  { %v2135_v27 = vadd.f32 %v2134_v40, %v2133_v39 }
0x1206   :  { %v2136_v42 = vrot.slane %v2135_v27, 2 }
0x1208   :  { %v2137_v43 = vadd.f32 %v2136_v42, %v2135_v27 }
0x1209   :  { %v2013_v8 = vpop.permute.xlu2 %2012 }
0x120a   :  { %v2018_v33 = vsel %vm369_vm5, %v2013_v8, 0.0  ;;  %v2138_v45 = vrot.slane %v2137_v43, 1  ;;  %v5383_v8 = vld [vmem:[%s6545_s23] ss:$0 sm:$0xff] }
0x120b   :  { %2019 = vadd.xlane.f32.xlu2 %v2018_v33 }
0x120c   :  { %v2139_v56 = vadd.f32 %v2138_v45, %v2137_v43 }
0x120e   :  { %5280 = vpush %v2139_v56 }
0x123f   :  { %s5281_s30 = spop %5280 }
0x1240   :  { %v2141_v35 = vstv %s5281_s30 }
0x1241   :  { %v2142_v46 = vmul.f32 %v2141_v35, %v6270_v34 }
0x1243   :  { %5523 = vrsqrt.f32 %v2142_v46  ;;  %vm2150_vm6 = vcmp.eq.f32.partialorder %v2142_v46, inf  ;;  %v2153_v1 = vand.u32 2147483648, %v2142_v46  ;;  %vm2152_vm9 = vcmp.eq.f32.partialorder %v2142_v46, 0.0 }
0x1249   :  { %v5524_v15 = vpop.eup %5523 }
0x124a   :  { %v2144_v28 = vmul.f32 %v5524_v15, %v2142_v46 }
0x124c   :  { %v2145_v47 = vmul.f32 %v5524_v15, %v2144_v28 }
0x124e   :  { %v2146_v48 = vmul.f32 0.5, %v2145_v47 }
0x1250   :  { %v2147_v50 = vsub.f32 1.5, %v2146_v48  ;;  %v2276_v48 = vld [vmem:[%s6590_s8 + $0x18] sm:$0xff] }
0x1251   :  { %2299 = vmatpush.msrb.mxu3 %v2276_v48 }
0x1252   :  { %v2148_v21 = vmul.f32 %v5524_v15, %v2147_v50  ;;  %v2275_v50 = vld [vmem:[%s6590_s8 + $0x10] sm:$0xff] }
0x1253   :  { %2300 = vmatpush.msrb.mxu3 %v2275_v50 }
0x1254   :  { %v2149_v51 = vmul.f32 %v2148_v21, %v2142_v46 }
0x1256   :  { %v2151_v52 = vsel %vm2150_vm6, %v2142_v46, %v2149_v51  ;;  %v5384_v46 = vld [vmem:[%s6577_s16] ss:$0 sm:$0xff]  ;;  %s5753_s16 = smov 49  }
0x1257   :  { %v2154_v61 = vsel %vm2152_vm9, %v2153_v1, %v2151_v52  ;;  %v2274_v52 = vld [vmem:[%s6590_s8 + $0x8] sm:$0xff] }
0x1258   :  { %v2155_v36 = vadd.f32 1e-05, %v2154_v61  ;;  %2301 = vmatpush.msrb.mxu3 %v2274_v52 }
0x125a   :  { %5525 = vrcp.f32 %v2155_v36  ;;  %v2167_v18 = vand.u32 2147483648, %v2155_v36  ;;  %v2165_v31 = vand.u32 2147483647, %v2155_v36  ;;  %vm2161_vm12 = vweird.f32 %v2155_v36 }
0x125c   :  { %v2168_v44 = vor.u32 1.1754944e-38, %v2167_v18  ;;  %vm2166_vm6 = vcmp.eq.f32.partialorder %v2165_v31, 8.507059e+37 }
0x1260   :  { %v5526_v32 = vpop.eup %5525 }
0x1261   :  { %v2157_v0 = vmul.f32 %v5526_v32, %v2155_v36  ;;  %vm2162_vm11 = vweird.f32 %v5526_v32 }
0x1262   :  { %vm2163_vm13 = vmor %vm2161_vm12, %vm2162_vm11 }
0x1263   :  { %v2158_v29 = vsub.f32 1.0, %v2157_v0  ;;  %v2273_v0 = vld [vmem:[%s6590_s8] sm:$0xff] }
0x1264   :  { %2302 = vmatpush.msrb.mxu3 %v2273_v0 }
0x1265   :  { %v2159_v30 = vmul.f32 %v5526_v32, %v2158_v29 }
0x1267   :  { %v2160_v63 = vadd.f32 %v5526_v32, %v2159_v30 }
0x1269   :  { %v2164_v55 = vsel %vm2163_vm13, %v5526_v32, %v2160_v63 }
0x126a   :  { %v2169_v20 = vsel %vm2166_vm6, %v2168_v44, %v2164_v55 }
0x126b   :  { %v2171_v2 = vmul.f32 %v2169_v20, %v6527_v17  ;;  %v2170_v5 = vmul.f32 %v2169_v20, %v6524_v16 }
0x126d   :  { %2176 = vrot.lane.b32.xlu1 %v2171_v2, %s7446_s28  ;;  %2174 = vrot.lane.b32.xlu0 %v2170_v5, %s7446_s28 }
0x1275   :  { %2014 = vrot.lane.b32.xlu0 %v2009_v9, %s7452_s27 }
0x127e   :  { %v2020_v14 = vpop.xlane.xlu2 %2019 }
0x127f   :  { %5527 = vrsqrt.f32 %v2020_v14  ;;  %vm2031_vm9 = vcmp.eq.f32.partialorder %v2020_v14, inf  ;;  %v2034_v42 = vand.u32 2147483648, %v2020_v14  ;;  %vm2033_vm11 = vcmp.eq.f32.partialorder %v2020_v14, 0.0 }
0x1285   :  { %v5528_v16 = vpop.eup %5527 }
0x1286   :  { %v2025_v17 = vmul.f32 %v5528_v16, %v2020_v14 }
0x1288   :  { %v2026_v10 = vmul.f32 %v5528_v16, %v2025_v17 }
0x128a   :  { %v2027_v57 = vmul.f32 0.5, %v2026_v10 }
0x128c   :  { %v2028_v58 = vsub.f32 1.5, %v2027_v57 }
0x128e   :  { %v2029_v26 = vmul.f32 %v5528_v16, %v2028_v58 }
0x1290   :  { %v2030_v38 = vmul.f32 %v2029_v26, %v2020_v14 }
0x1292   :  { %v2032_v27 = vsel %vm2031_vm9, %v2020_v14, %v2030_v38  ;;  %v2311_v38 = vld [vmem:[%s6603_s18 + $0x8] sm:$0xff] }
0x1293   :  { %v6593_v33 = vsel %vm2033_vm11, %v2034_v42, %v2032_v27  ;;  %2338 = vmatpush.msrb.mxu0 %v2311_v38 }
0x1294   :  { %v2196_v35 = vmul.f32 %v5383_v8, %v6593_v33 }
0x12df   :  { %v2177_v11 = vpop.permute.xlu1 %2176  ;;  %v2175_v12 = vpop.permute.xlu0 %2174 }
0x12e0   :  { %2181 = vst.msk [vmem:[#allocation4 + $0x8] sm:$0xff] %vm608_vm3, %v2177_v11 }
0x12e1   :  { %2180 = vst.msk [vmem:[#allocation4] sm:$0xff] %vm608_vm3, %v2175_v12 }
0x12e7   :  { %v2015_v22 = vpop.permute.xlu0 %2014  ;;  %v2183_v41 = vld [vmem:[#allocation4 + $0x8] sm:$0xff] }
0x12e8   :  { %v2182_v25 = vld [vmem:[#allocation4] sm:$0xff]  ;;  %v2021_v13 = vsel %vm369_vm5, %v2015_v22, 0.0 }
0x12e9   :  { %5154 = vmatmul.msk.f32.vlgmr.msra.gmra.mxu2 %vm633_vm4, %v2182_v25  ;;  %2022 = vadd.xlane.f32.xlu1 %v2021_v13 }
0x12f1   :  { %5155 = vmatmul.msk.f32.gmra.mxu2 %vm633_vm4, %v2183_v41 }
0x135c   :  { %v2023_v24 = vpop.xlane.xlu1 %2022 }
0x135d   :  { %5529 = vrsqrt.f32 %v2023_v24  ;;  %vm2043_vm12 = vcmp.eq.f32.partialorder %v2023_v24, inf  ;;  %v2046_v1 = vand.u32 2147483648, %v2023_v24  ;;  %vm2045_vm13 = vcmp.eq.f32.partialorder %v2023_v24, 0.0 }
0x1363   :  { %v5530_v39 = vpop.eup %5529 }
0x1364   :  { %v2037_v40 = vmul.f32 %v5530_v39, %v2023_v24 }
0x1366   :  { %v2038_v43 = vmul.f32 %v5530_v39, %v2037_v40  ;;  %v5385_v40 = vld [vmem:[%s6585_s4] ss:$0 sm:$0xff]  ;;  %s5750_s4 = smov 48  }
0x1367   :  { %s5087_s23 = sld [smem:[%s7381_s0 + %s5750_s4]]   ;;  %s5751_s4 = smov 13  }
0x1368   :  { %v2039_v45 = vmul.f32 0.5, %v2038_v43  ;;  %s6640_s8 = sld [smem:[%s7381_s0 + %s5751_s4]]  }
0x136a   :  { %v2040_v56 = vsub.f32 1.5, %v2039_v45  ;;  %v5386_v45 = vld [vmem:[%s6616_s12] ss:$0 sm:$0xff]  ;;  %s6661_s12 = sld [smem:[%s7381_s0 + %s5753_s16]]   ;;  %s5755_s16 = smov 52  }
0x136c   :  { %v2221_v15 = vpop.f32.mrf.mxu2  ;;  %v2041_v28 = vmul.f32 %v5530_v39, %v2040_v56  ;;  %v2310_v39 = vld [vmem:[%s6603_s18] sm:$0xff]  ;;  %s6628_s18 = sld [smem:[%s7381_s0 + %s5749_s26]]   ;;  %s5752_s26 = smov 12  }
0x136d   :  { %v2222_v47 = vadd.f32 %v2221_v15, %v2196_v35  ;;  %2339 = vmatpush.msrb.mxu0 %v2310_v39  ;;  %s6652_s4 = sld [smem:[%s7381_s0 + %s5752_s26]]  }
0x136e   :  { %v2042_v21 = vmul.f32 %v2041_v28, %v2023_v24  ;;  %7461 = sst [smem:[#allocation36_spill]] %s6640_s8 }
0x136f   :  { %v2231_v51 = vadd.f32 %v5384_v46, %v2222_v47  ;;  %s6694_s26 = sld [smem:[%s7381_s0 + %s5755_s16]]  }
0x1370   :  { %v2044_v61 = vsel %vm2043_vm12, %v2023_v24, %v2042_v21  ;;  %v119_v21 = vstv %s5087_s23  ;;  %7463 = sst [smem:[#allocation38_spill]] %s6661_s12 }
0x1371   :  { %v5156_v36 = vmul.f32 -1.442695, %v2231_v51  ;;  %v6605_v32 = vsel %vm2045_vm13, %v2046_v1, %v2044_v61  ;;  %120 = vst [vmem:[#allocation10] sm:$0x1] %v119_v21  ;;  %s7480_s16 = sld [smem:[#allocation24_spill]] }
0x1372   :  { %v2197_v29 = vmul.f32 %v5383_v8, %v6605_v32  ;;  %7460 = sst [smem:[#allocation35_spill]] %s6628_s18 }
0x1373   :  { %5531 = vpow2.f32 %v5156_v36  ;;  %7462 = sst [smem:[#allocation37_spill]] %s6652_s4 }
0x1374   :  { %v2224_v18 = vpop.f32.mrf.mxu2  ;;  %s7483_s23 = sld [smem:[#allocation23_spill]] }
0x1375   :  { %v2225_v30 = vadd.f32 %v2224_v18, %v2197_v29 }
0x1377   :  { %v2232_v31 = vadd.f32 %v5384_v46, %v2225_v30 }
0x1379   :  { %v5532_v63 = vpop.eup %5531  ;;  %v5157_v44 = vmul.f32 -1.442695, %v2232_v31 }
0x137a   :  { %v2239_v54 = vadd.f32 1.0, %v5532_v63 }
0x137b   :  { %5533 = vpow2.f32 %v5157_v44  ;;  %v5387_v44 = vld [vmem:[%s6628_s18] ss:$0 sm:$0xff]  ;;  %s5754_s18 = smov 50  }
0x137c   :  { %5535 = vrcp.f32 %v2239_v54  ;;  %v2252_v9 = vand.u32 2147483648, %v2239_v54  ;;  %v2250_v4 = vand.u32 2147483647, %v2239_v54  ;;  %vm2246_vm9 = vweird.f32 %v2239_v54  ;;  %s6676_s30 = sld [smem:[%s7381_s0 + %s5754_s18]]  }
0x137d   :  { %s7484_s18 = sld [smem:[#allocation26_spill]] }
0x137e   :  { %v2253_v11 = vor.u32 1.1754944e-38, %v2252_v9  ;;  %vm2251_vm12 = vcmp.eq.f32.partialorder %v2250_v4, 8.507059e+37 }
0x1381   :  { %v5534_v55 = vpop.eup %5533 }
0x1382   :  { %v5536_v20 = vpop.eup %5535  ;;  %v2240_v2 = vadd.f32 1.0, %v5534_v55 }
0x1383   :  { %v2242_v5 = vmul.f32 %v5536_v20, %v2239_v54  ;;  %vm2247_vm6 = vweird.f32 %v5536_v20 }
0x1384   :  { %5537 = vrcp.f32 %v2240_v2  ;;  %vm2248_vm11 = vmor %vm2246_vm9, %vm2247_vm6  ;;  %v2267_v14 = vand.u32 2147483648, %v2240_v2  ;;  %v2265_v17 = vand.u32 2147483647, %v2240_v2  ;;  %vm2261_vm8 = vweird.f32 %v2240_v2 }
0x1385   :  { %v2243_v19 = vsub.f32 1.0, %v2242_v5 }
0x1386   :  { %v2268_v57 = vor.u32 1.1754944e-38, %v2267_v14  ;;  %vm2266_vm6 = vcmp.eq.f32.partialorder %v2265_v17, 8.507059e+37 }
0x1387   :  { %v2244_v49 = vmul.f32 %v5536_v20, %v2243_v19 }
0x1389   :  { %v2245_v6 = vadd.f32 %v5536_v20, %v2244_v49 }
0x138a   :  { %v5538_v62 = vpop.eup %5537 }
0x138b   :  { %v2249_v12 = vsel %vm2248_vm11, %v5536_v20, %v2245_v6  ;;  %v2257_v22 = vmul.f32 %v5538_v62, %v2240_v2  ;;  %vm2262_vm13 = vweird.f32 %v5538_v62 }
0x138c   :  { %v2254_v25 = vsel %vm2251_vm12, %v2253_v11, %v2249_v12  ;;  %vm2263_vm15 = vmor %vm2261_vm8, %vm2262_vm13 }
0x138d   :  { %v2271_v13 = vmul.f32 %v2254_v25, %v2231_v51  ;;  %v2258_v41 = vsub.f32 1.0, %v2257_v22 }
0x138f   :  { %5158 = vmatmul.msk.f32.vlgmr.msrb.gmra.mxu3 %vm430_vm2, %v2271_v13  ;;  %v2259_v16 = vmul.f32 %v5538_v62, %v2258_v41  ;;  %v5388_v13 = vld [vmem:[#allocation10] ss:$0 sm:$0xff] }
0x1391   :  { %v2260_v10 = vadd.f32 %v5538_v62, %v2259_v16 }
0x1393   :  { %v2264_v58 = vsel %vm2263_vm15, %v5538_v62, %v2260_v10  ;;  %v2491_v10 = vld [vmem:[%s6640_s8 + $0x8] sm:$0xff] }
0x1394   :  { %v2269_v24 = vsel %vm2266_vm6, %v2268_v57, %v2264_v58  ;;  %v2405_v57 = vmax.f32 %v6593_v33, 1e-08  ;;  %v2406_v58 = vmax.f32 %v6605_v32, 1e-08 }
0x1395   :  { %v2272_v26 = vmul.f32 %v2269_v24, %v2232_v31 }
0x1397   :  { %5159 = vmatmul.msk.f32.gmra.mxu3 %vm430_vm2, %v2272_v26 }
0x1412   :  { %v2304_v27 = vpop.f32.mrf.mxu3 }
0x1413   :  { %v2305_v42 = vadd.f32 %v5385_v40, %v2304_v27 }
0x1415   :  { %2449 = vst.msk [vmem:[#allocation5] sm:$0xff] %vm430_vm2, %v2305_v42  ;;  %5160 = vmatmul.msk.f32.vlgmr.msrb.gmra.mxu0 %vm430_vm2, %v2305_v42 }
0x141a   :  { %v2307_v43 = vpop.f32.mrf.mxu3 }
0x141b   :  { %v2308_v8 = vadd.f32 %v5385_v40, %v2307_v43 }
0x141d   :  { %2450 = vst.msk [vmem:[#allocation5 + $0x8] sm:$0xff] %vm430_vm2, %v2308_v8  ;;  %5161 = vmatmul.msk.f32.gmra.mxu0 %vm430_vm2, %v2308_v8  ;;  %v2418_v8 = vand.u32 2147483648, %v2405_v57 }
0x141f   :  { %v2419_v33 = vor.u32 1.1754944e-38, %v2418_v8 }
0x1492   :  { %v2341_v56 = vpop.f32.mrf.mxu0 }
0x1493   :  { %v2342_v35 = vadd.f32 %v5386_v45, %v2341_v56 }
0x1495   :  { %v5162_v46 = vmul.f32 -1.442695, %v2342_v35 }
0x1497   :  { %5539 = vpow2.f32 %v5162_v46 }
0x149a   :  { %v2344_v15 = vpop.f32.mrf.mxu0 }
0x149b   :  { %v2345_v28 = vadd.f32 %v5386_v45, %v2344_v15  ;;  %v2416_v45 = vand.u32 2147483647, %v2405_v57  ;;  %v2433_v15 = vand.u32 2147483648, %v2406_v58 }
0x149d   :  { %v5540_v47 = vpop.eup %5539  ;;  %v5163_v48 = vmul.f32 -1.442695, %v2345_v28 }
0x149e   :  { %v2353_v50 = vadd.f32 1.0, %v5540_v47  ;;  %v2431_v47 = vand.u32 2147483647, %v2406_v58 }
0x149f   :  { %5541 = vpow2.f32 %v5163_v48 }
0x14a0   :  { %5543 = vrcp.f32 %v2353_v50  ;;  %v2366_v0 = vand.u32 2147483648, %v2353_v50  ;;  %v2364_v18 = vand.u32 2147483647, %v2353_v50  ;;  %vm2360_vm8 = vweird.f32 %v2353_v50 }
0x14a2   :  { %v2367_v23 = vor.u32 1.1754944e-38, %v2366_v0  ;;  %vm2365_vm11 = vcmp.eq.f32.partialorder %v2364_v18, 8.507059e+37  ;;  %v2453_v0 = vld [vmem:[%s6652_s4] sm:$0xff]  ;;  %v2527_v18 = vld [vmem:[%s6661_s12 + $0x38] sm:$0xff] }
0x14a3   :  { %2546 = vmatpush.msra.mxu3 %v2527_v18 }
0x14a5   :  { %v5542_v51 = vpop.eup %5541 }
0x14a6   :  { %v5544_v1 = vpop.eup %5543  ;;  %v2354_v52 = vadd.f32 1.0, %v5542_v51  ;;  %v2434_v51 = vor.u32 1.1754944e-38, %v2433_v15 }
0x14a7   :  { %v2356_v61 = vmul.f32 %v5544_v1, %v2353_v50  ;;  %vm2361_vm15 = vweird.f32 %v5544_v1 }
0x14a8   :  { %5545 = vrcp.f32 %v2354_v52  ;;  %vm2362_vm9 = vmor %vm2360_vm8, %vm2361_vm15  ;;  %v2381_v2 = vand.u32 2147483648, %v2354_v52  ;;  %v2379_v19 = vand.u32 2147483647, %v2354_v52  ;;  %vm2375_vm13 = vweird.f32 %v2354_v52 }
0x14a9   :  { %v2357_v36 = vsub.f32 1.0, %v2356_v61  ;;  %5547 = vrcp.f32 %v2405_v57 }
0x14aa   :  { %v2382_v6 = vor.u32 1.1754944e-38, %v2381_v2  ;;  %vm2380_vm15 = vcmp.eq.f32.partialorder %v2379_v19, 8.507059e+37  ;;  %5549 = vrcp.f32 %v2406_v58  ;;  %v2522_v2 = vld [vmem:[%s6661_s12 + $0x10] sm:$0xff]  ;;  %v2520_v19 = vld [vmem:[%s6661_s12] sm:$0xff] }
0x14ab   :  { %v2358_v29 = vmul.f32 %v5544_v1, %v2357_v36 }
0x14ad   :  { %v2359_v30 = vadd.f32 %v5544_v1, %v2358_v29 }
0x14ae   :  { %v5546_v31 = vpop.eup %5545 }
0x14af   :  { %v2363_v3 = vsel %vm2362_vm9, %v5544_v1, %v2359_v30  ;;  %v2371_v63 = vmul.f32 %v5546_v31, %v2354_v52  ;;  %vm2376_vm12 = vweird.f32 %v5546_v31  ;;  %v5548_v24 = vpop.eup %5547  ;;  %vm2412_vm9 = vweird.f32 %v2405_v57  ;;  %v2526_v30 = vld [vmem:[%s6661_s12 + $0x30] sm:$0xff] }
0x14b0   :  { %v2368_v54 = vsel %vm2365_vm11, %v2367_v23, %v2363_v3  ;;  %vm2377_vm6 = vmor %vm2375_vm13, %vm2376_vm12  ;;  %v2408_v26 = vmul.f32 %v5548_v24, %v2405_v57  ;;  %v5550_v39 = vpop.eup %5549  ;;  %vm2413_vm8 = vweird.f32 %v5548_v24  ;;  %vm2417_vm12 = vcmp.eq.f32.partialorder %v2416_v45, 8.507059e+37  ;;  %2547 = vmatpush.msra.mxu3 %v2526_v30  ;;  %v2524_v23 = vld [vmem:[%s6661_s12 + $0x20] sm:$0xff] }
0x14b1   :  { %v2385_v55 = vmul.f32 %v2368_v54, %v2342_v35  ;;  %v2372_v20 = vsub.f32 1.0, %v2371_v63  ;;  %v2423_v27 = vmul.f32 %v5550_v39, %v2406_v58  ;;  %vm2414_vm11 = vmor %vm2412_vm9, %vm2413_vm8  ;;  %vm2428_vm13 = vweird.f32 %v5550_v39  ;;  %v2490_v54 = vld [vmem:[%s6640_s8] sm:$0xff]  ;;  %s6699_s8 = sld [smem:[%s7381_s0 + %s5756_s7]]  }
0x14b2   :  { %v2409_v38 = vsub.f32 1.0, %v2408_v26  ;;  %vm2432_vm8 = vcmp.eq.f32.partialorder %v2431_v47, 8.507059e+37 }
0x14b3   :  { %v2373_v5 = vmul.f32 %v5546_v31, %v2372_v20  ;;  %v2391_v9 = vmul.f32 %v5387_v44, %v2385_v55  ;;  %v2424_v43 = vsub.f32 1.0, %v2423_v27  ;;  %v2523_v20 = vld [vmem:[%s6661_s12 + $0x18] sm:$0xff] }
0x14b4   :  { %v2410_v40 = vmul.f32 %v5548_v24, %v2409_v38 }
0x14b5   :  { %v2374_v49 = vadd.f32 %v5546_v31, %v2373_v5  ;;  %v2393_v4 = vsel %vm430_vm2, %v2391_v9, 0.0  ;;  %v2425_v35 = vmul.f32 %v5550_v39, %v2424_v43  ;;  %v2521_v5 = vld [vmem:[%s6661_s12 + $0x8] sm:$0xff] }
0x14b6   :  { %2394 = vadd.xlane.f32.xlu2 %v2393_v4  ;;  %v2411_v42 = vadd.f32 %v5548_v24, %v2410_v40 }
0x14b7   :  { %v2378_v62 = vsel %vm2377_vm6, %v5546_v31, %v2374_v49  ;;  %v2426_v32 = vadd.f32 %v5550_v39, %v2425_v35  ;;  %vm2427_vm6 = vweird.f32 %v2406_v58  ;;  %v2525_v31 = vld [vmem:[%s6661_s12 + $0x28] sm:$0xff] }
0x14b8   :  { %v2383_v11 = vsel %vm2380_vm15, %v2382_v6, %v2378_v62  ;;  %v2415_v56 = vsel %vm2414_vm11, %v5548_v24, %v2411_v42  ;;  %vm2429_vm15 = vmor %vm2427_vm6, %vm2428_vm13  ;;  %2548 = vmatpush.msra.mxu3 %v2525_v31  ;;  %v5389_v62 = vld [vmem:[%s6676_s30] ss:$0 sm:$0xff] }
0x14b9   :  { %v2386_v12 = vmul.f32 %v2383_v11, %v2345_v28  ;;  %v2420_v46 = vsel %vm2417_vm12, %v2419_v33, %v2415_v56  ;;  %v2430_v21 = vsel %vm2429_vm15, %v5550_v39, %v2426_v32  ;;  %v2604_v11 = vld [vmem:[%s6699_s8 + $0x18] sm:$0xff] }
0x14ba   :  { %v2421_v28 = vmul.f32 %v2420_v46, %v6536_v37  ;;  %v2435_v1 = vsel %vm2432_vm8, %v2434_v51, %v2430_v21  ;;  %2549 = vmatpush.msra.mxu3 %v2524_v23  ;;  %2627 = vmatpush.msrb.mxu2 %v2604_v11 }
0x14bb   :  { %v2392_v22 = vmul.f32 %v5387_v44, %v2386_v12  ;;  %v2436_v52 = vmul.f32 %v2435_v1, %v6563_v7  ;;  %v2454_v7 = vld [vmem:[%s6652_s4 + $0x8] sm:$0xff]  ;;  %v2603_v12 = vld [vmem:[%s6699_s8 + $0x10] sm:$0xff]  ;;  %s7479_s4 = sld [smem:[#allocation22_spill]] }
0x14bc   :  { %2550 = vmatpush.msra.mxu3 %v2523_v20  ;;  %2628 = vmatpush.msrb.mxu2 %v2603_v12 }
0x14bd   :  { %v2396_v25 = vsel %vm430_vm2, %v2392_v22, 0.0 }
0x14be   :  { %2397 = vadd.xlane.f32.xlu0 %v2396_v25  ;;  %2551 = vmatpush.msra.mxu3 %v2522_v2  ;;  %v2646_v2 = vld [vmem:[%s5773_s13] sm:$0xff] }
0x14c0   :  { %2552 = vmatpush.msra.mxu3 %v2521_v5  ;;  %v2698_v5 = vld [vmem:[%s5778_s17 + $0x8] sm:$0xff] }
0x14c2   :  { %2553 = vmatpush.msra.mxu3 %v2520_v19  ;;  %v2647_v19 = vld [vmem:[%s5773_s13 + $0x8] sm:$0xff] }
0x1529   :  { %v2395_v41 = vpop.xlane.xlu2 %2394 }
0x152a   :  { %v2403_v14 = vadd.f32 %v5388_v13, %v2395_v41 }
0x152c   :  { %2439 = vperm.xlu0 %5364, %v2403_v14   ;;  %v2601_v14 = vld [vmem:[%s6699_s8] sm:$0xff] }
0x1531   :  { %v2398_v16 = vpop.xlane.xlu0 %2397 }
0x1532   :  { %v2404_v17 = vadd.f32 %v5388_v13, %v2398_v16  ;;  %v2602_v13 = vld [vmem:[%s6699_s8 + $0x8] sm:$0xff] }
0x1533   :  { %2629 = vmatpush.msrb.mxu2 %v2602_v13 }
0x1534   :  { %2444 = vperm.xlu1 %5366, %v2404_v17  }
0x1535   :  { %2630 = vmatpush.msrb.mxu2 %v2601_v14 }
0x153c   :  { %2499 = vperm.xlu1 %5366, %v2491_v10  }
0x159e   :  { %v2440_v48 = vpop.permute.xlu0 %2439 }
0x159f   :  { %v2447_v50 = vmul.f32 %v2440_v48, %v2421_v28 }
0x15a1   :  { %2451 = vst.msk [vmem:[#allocation5] sm:$0xff] %vm1061_vm10, %v2447_v50 }
0x15a6   :  { %v2445_v61 = vpop.permute.xlu1 %2444 }
0x15a7   :  { %v2448_v36 = vmul.f32 %v2445_v61, %v2436_v52 }
0x15a8   :  { %v2455_v29 = vld [vmem:[#allocation5] sm:$0xff] }
0x15a9   :  { %2452 = vst.msk [vmem:[#allocation5 + $0x8] sm:$0xff] %vm1061_vm10, %v2448_v36  ;;  %v5390_v36 = vld [vmem:[%s6694_s26] ss:$0 sm:$0xff] }
0x15ae   :  { %v2500_v31 = vpop.permute.xlu1 %2499 }
0x15b0   :  { %v2456_v37 = vld [vmem:[#allocation5 + $0x8] sm:$0xff] }
0x15b1   :  { %2477 = vmatpush.msrb.mxu1 %v2456_v37 }
0x15b3   :  { %2478 = vmatpush.msrb.mxu1 %v2455_v29 }
0x15b4   :  { %5164 = vmatmul.msk.f32.vlgmr.msrb.gmra.mxu1 %vm239_vm0, %v2453_v0 }
0x15bc   :  { %5165 = vmatmul.msk.f32.gmra.mxu1 %vm239_vm0, %v2454_v7 }
0x1631   :  { %v2480_v3 = vpop.f32.mrf.mxu1 }
0x1632   :  { %2486 = vst.msk [vmem:[#allocation6] sm:$0xff] %vm281_vm1, %v2480_v3 }
0x1639   :  { %v2483_v63 = vpop.f32.mrf.mxu1  ;;  %v6668_v44 = vld [vmem:[#allocation6] sm:$0xff] }
0x163a   :  { %2487 = vst.msk [vmem:[#allocation6 + $0x8] sm:$0xff] %vm281_vm1, %v2483_v63  ;;  %2510 = vrot.lane.b32.xlu2 %v6668_v44, %s7446_s28 }
0x1641   :  { %v6679_v55 = vld [vmem:[#allocation6 + $0x8] sm:$0xff] }
0x1642   :  { %2494 = vperm.xlu2 %5365, %v2490_v54   ;;  %2512 = vrot.lane.b32.xlu0 %v6679_v55, %s7446_s28  ;;  %v2503_v23 = vmul.f32 %v2500_v31, %v6679_v55  ;;  %v2697_v55 = vld [vmem:[%s5778_s17] sm:$0xff] }
0x1694   :  { %v2511_v9 = vpop.permute.xlu2 %2510 }
0x1695   :  { %2516 = vst.msk [vmem:[#allocation7] sm:$0xff] %vm608_vm3, %v2511_v9  ;;  %v2699_v9 = vld [vmem:[%s5778_s17 + $0x10] sm:$0xff] }
0x169c   :  { %v2518_v49 = vld [vmem:[#allocation7] sm:$0xff]  ;;  %v2495_v61 = vpop.permute.xlu2 %2494 }
0x169d   :  { %5166 = vmatmul.msk.f32.vlgmr.msra.gmra.mxu3 %vm633_vm4, %v2518_v49  ;;  %v2502_v37 = vmul.f32 %v2495_v61, %v6668_v44  ;;  %v2648_v49 = vld [vmem:[%s5773_s13 + $0x10] sm:$0xff] }
0x169f   :  { %v2642_v18 = vadd.f32 %v6462_v60, %v2502_v37 }
0x16b4   :  { %v2513_v4 = vpop.permute.xlu0 %2512 }
0x16b5   :  { %2517 = vst.msk [vmem:[#allocation7 + $0x8] sm:$0xff] %vm608_vm3, %v2513_v4  ;;  %v2700_v4 = vld [vmem:[%s5778_s17 + $0x18] sm:$0xff] }
0x16bc   :  { %v2519_v6 = vld [vmem:[#allocation7 + $0x8] sm:$0xff] }
0x16bd   :  { %5167 = vmatmul.msk.f32.gmra.mxu3 %vm633_vm4, %v2519_v6  ;;  %v2649_v6 = vld [vmem:[%s5773_s13 + $0x18] sm:$0xff] }
0x1720   :  { %v2555_v22 = vpop.f32.mrf.mxu3 }
0x1721   :  { %v2556_v25 = vadd.f32 %v5389_v62, %v2555_v22 }
0x1723   :  { %v5168_v41 = vmul.f32 -1.442695, %v2556_v25 }
0x1725   :  { %5551 = vpow2.f32 %v5168_v41 }
0x172b   :  { %v5552_v16 = vpop.eup %5551 }
0x172c   :  { %v2567_v17 = vadd.f32 1.0, %v5552_v16 }
0x172e   :  { %5553 = vrcp.f32 %v2567_v17  ;;  %v2580_v24 = vand.u32 2147483648, %v2567_v17  ;;  %v2578_v38 = vand.u32 2147483647, %v2567_v17  ;;  %vm2574_vm11 = vweird.f32 %v2567_v17 }
0x1730   :  { %v2581_v40 = vor.u32 1.1754944e-38, %v2580_v24  ;;  %vm2579_vm13 = vcmp.eq.f32.partialorder %v2578_v38, 8.507059e+37 }
0x1734   :  { %v5554_v10 = vpop.eup %5553 }
0x1735   :  { %v2570_v57 = vmul.f32 %v5554_v10, %v2567_v17  ;;  %vm2575_vm9 = vweird.f32 %v5554_v10 }
0x1736   :  { %vm2576_vm12 = vmor %vm2574_vm11, %vm2575_vm9 }
0x1737   :  { %v2571_v58 = vsub.f32 1.0, %v2570_v57 }
0x1739   :  { %v2572_v26 = vmul.f32 %v5554_v10, %v2571_v58 }
0x173b   :  { %v2573_v39 = vadd.f32 %v5554_v10, %v2572_v26 }
0x173d   :  { %v2577_v27 = vsel %vm2576_vm12, %v5554_v10, %v2573_v39 }
0x173e   :  { %v2582_v42 = vsel %vm2579_vm13, %v2581_v40, %v2577_v27 }
0x173f   :  { %v2599_v43 = vmul.f32 %v2582_v42, %v2556_v25 }
0x1740   :  { %v2558_v8 = vpop.f32.mrf.mxu3 }
0x1741   :  { %v2559_v45 = vadd.f32 %v5389_v62, %v2558_v8  ;;  %5170 = vmatmul.msk.f32.vlgmr.msrb.gmra.mxu2 %vm430_vm2, %v2599_v43 }
0x1743   :  { %v5169_v56 = vmul.f32 -1.442695, %v2559_v45 }
0x1745   :  { %5555 = vpow2.f32 %v5169_v56 }
0x174b   :  { %v5556_v35 = vpop.eup %5555 }
0x174c   :  { %v2568_v33 = vadd.f32 1.0, %v5556_v35 }
0x174e   :  { %5557 = vrcp.f32 %v2568_v33  ;;  %v2595_v28 = vand.u32 2147483648, %v2568_v33  ;;  %v2593_v48 = vand.u32 2147483647, %v2568_v33  ;;  %vm2589_vm15 = vweird.f32 %v2568_v33 }
0x1750   :  { %v2596_v21 = vor.u32 1.1754944e-38, %v2595_v28  ;;  %vm2594_vm9 = vcmp.eq.f32.partialorder %v2593_v48, 8.507059e+37 }
0x1754   :  { %v5558_v46 = vpop.eup %5557 }
0x1755   :  { %v2585_v32 = vmul.f32 %v5558_v46, %v2568_v33  ;;  %vm2590_vm6 = vweird.f32 %v5558_v46 }
0x1756   :  { %vm2591_vm8 = vmor %vm2589_vm15, %vm2590_vm6 }
0x1757   :  { %v2586_v15 = vsub.f32 1.0, %v2585_v32 }
0x1759   :  { %v2587_v47 = vmul.f32 %v5558_v46, %v2586_v15 }
0x175b   :  { %v2588_v50 = vadd.f32 %v5558_v46, %v2587_v47 }
0x175d   :  { %v2592_v51 = vsel %vm2591_vm8, %v5558_v46, %v2588_v50 }
0x175e   :  { %v2597_v1 = vsel %vm2594_vm9, %v2596_v21, %v2592_v51 }
0x175f   :  { %v2600_v52 = vmul.f32 %v2597_v1, %v2559_v45 }
0x1761   :  { %5171 = vmatmul.msk.f32.gmra.mxu2 %vm430_vm2, %v2600_v52 }
0x17c4   :  { %v2632_v0 = vpop.f32.mrf.mxu2 }
0x17c5   :  { %v2633_v29 = vadd.f32 %v5390_v36, %v2632_v0 }
0x17c7   :  { %v2638_v7 = vadd.f32 %v2633_v29, %v6462_v60  ;;  %v2643_v60 = vadd.f32 %v6257_v59, %v2503_v23 }
0x17c9   :  { %2640 = vst.msk [vmem:[%s5768_s9] sm:$0xff] %vm430_vm2, %v2638_v7 }
0x17ca   :  { %2644 = vst.msk [vmem:[%s5768_s9] sm:$0xff] %vm1061_vm10, %v2642_v18 }
0x17d1   :  { %v6717_v30 = vld [vmem:[%s5768_s9] sm:$0xff] }
0x17d2   :  { %3520 = vst.msk [vmem:[#allocation7] sm:$0xff] %vm430_vm2, %v6717_v30 }
0x17e4   :  { %v2635_v3 = vpop.f32.mrf.mxu2 }
0x17e5   :  { %v2636_v63 = vadd.f32 %v5390_v36, %v2635_v3 }
0x17e7   :  { %v2639_v44 = vadd.f32 %v2636_v63, %v6257_v59  ;;  %v2650_v59 = vld [vmem:[%s5768_s9] sm:$0xff] }
0x17e9   :  { %2641 = vst.msk [vmem:[%s5768_s9 + $0x8] sm:$0xff] %vm430_vm2, %v2639_v44 }
0x17ea   :  { %2645 = vst.msk [vmem:[%s5768_s9 + $0x8] sm:$0xff] %vm1061_vm10, %v2643_v60 }
0x17f1   :  { %v2651_v54 = vld [vmem:[%s5768_s9 + $0x8] sm:$0xff] }
0x17f2   :  { %v6730_v20 = vld [vmem:[%s5768_s9 + $0x8] sm:$0xff]  ;;  %2678 = vmatpush.msra.mxu0 %v2651_v54  ;;  %2729 = vmatpush.msra.mxu1 %v2651_v54 }
0x17f3   :  { %3521 = vst.msk [vmem:[#allocation7 + $0x8] sm:$0xff] %vm430_vm2, %v6730_v20 }
0x17f4   :  { %2679 = vmatpush.msra.mxu0 %v2650_v59  ;;  %2730 = vmatpush.msra.mxu1 %v2650_v59 }
0x17f5   :  { %5176 = vmatmul.msk.f32.vlgmr.msra.gmra.mxu1 %vm239_vm0, %v2697_v55  ;;  %5172 = vmatmul.msk.f32.vlgmr.msra.gmra.mxu0 %vm239_vm0, %v2646_v2 }
0x17fd   :  { %5177 = vmatmul.msk.f32.gmra.mxu1 %vm239_vm0, %v2698_v5  ;;  %5173 = vmatmul.msk.f32.gmra.mxu0 %vm239_vm0, %v2647_v19 }
0x1805   :  { %5178 = vmatmul.msk.f32.gmra.mxu1 %vm239_vm0, %v2699_v9  ;;  %5174 = vmatmul.msk.f32.gmra.mxu0 %vm239_vm0, %v2648_v49 }
0x180d   :  { %5179 = vmatmul.msk.f32.gmra.mxu1 %vm239_vm0, %v2700_v4  ;;  %5175 = vmatmul.msk.f32.gmra.mxu0 %vm239_vm0, %v2649_v6 }
0x1872   :  { %v2732_v62 = vpop.f32.mrf.mxu1  ;;  %v2681_v11 = vpop.f32.mrf.mxu0 }
0x1873   :  { %2744 = vst.msk [vmem:[#allocation3] sm:$0xff] %vm281_vm1, %v2732_v62 }
0x1874   :  { %2693 = vst.msk [vmem:[#allocation2] sm:$0xff] %vm281_vm1, %v2681_v11 }
0x187a   :  { %v2735_v12 = vpop.f32.mrf.mxu1  ;;  %v2684_v22 = vpop.f32.mrf.mxu0  ;;  %v6761_v17 = vld [vmem:[#allocation3] sm:$0xff] }
0x187b   :  { %2745 = vst.msk [vmem:[#allocation3 + $0x8] sm:$0xff] %vm281_vm1, %v2735_v12  ;;  %v2840_v58 = vsel %vm430_vm2, %v6761_v17, 0.0  ;;  %v6775_v42 = vld [vmem:[#allocation2] sm:$0xff] }
0x187c   :  { %2694 = vst.msk [vmem:[#allocation2 + $0x8] sm:$0xff] %vm281_vm1, %v2684_v22  ;;  %v2919_v45 = vsel %vm430_vm2, %v6775_v42, 0.0 }
0x1882   :  { %v2738_v25 = vpop.f32.mrf.mxu1  ;;  %v2687_v13 = vpop.f32.mrf.mxu0  ;;  %v6757_v16 = vld [vmem:[#allocation3 + $0x8] sm:$0xff] }
0x1883   :  { %2746 = vst.msk [vmem:[#allocation3 + $0x10] sm:$0xff] %vm281_vm1, %v2738_v25  ;;  %v2841_v57 = vsel %vm430_vm2, %v6757_v16, 0.0  ;;  %v6777_v43 = vld [vmem:[#allocation2 + $0x8] sm:$0xff] }
0x1884   :  { %2695 = vst.msk [vmem:[#allocation2 + $0x10] sm:$0xff] %vm281_vm1, %v2687_v13  ;;  %v2842_v26 = vadd.f32 %v2841_v57, %v2840_v58  ;;  %v2920_v56 = vsel %vm430_vm2, %v6777_v43, 0.0 }
0x1885   :  { %v2921_v46 = vadd.f32 %v2920_v56, %v2919_v45 }
0x188a   :  { %v2741_v41 = vpop.f32.mrf.mxu1  ;;  %v2690_v14 = vpop.f32.mrf.mxu0  ;;  %v6763_v10 = vld [vmem:[#allocation3 + $0x10] sm:$0xff] }
0x188b   :  { %2747 = vst.msk [vmem:[#allocation3 + $0x18] sm:$0xff] %vm281_vm1, %v2741_v41  ;;  %v2843_v24 = vsel %vm430_vm2, %v6763_v10, 0.0  ;;  %v6779_v8 = vld [vmem:[#allocation2 + $0x10] sm:$0xff] }
0x188c   :  { %2696 = vst.msk [vmem:[#allocation2 + $0x18] sm:$0xff] %vm281_vm1, %v2690_v14  ;;  %v2844_v39 = vadd.f32 %v2843_v24, %v2842_v26  ;;  %v2922_v35 = vsel %vm430_vm2, %v6779_v8, 0.0 }
0x188d   :  { %v2923_v15 = vadd.f32 %v2922_v35, %v2921_v46 }
0x1892   :  { %v6771_v38 = vld [vmem:[#allocation3 + $0x18] sm:$0xff] }
0x1893   :  { %v2845_v40 = vsel %vm430_vm2, %v6771_v38, 0.0  ;;  %v6787_v33 = vld [vmem:[#allocation2 + $0x18] sm:$0xff] }
0x1894   :  { %v2846_v27 = vadd.f32 %v2845_v40, %v2844_v39  ;;  %v2924_v32 = vsel %vm430_vm2, %v6787_v33, 0.0 }
0x1895   :  { %v2925_v28 = vadd.f32 %v2924_v32, %v2923_v15 }
0x1896   :  { %2847 = vadd.xlane.f32.xlu0 %v2846_v27 }
0x1897   :  { %2926 = vadd.xlane.f32.xlu2 %v2925_v28 }
0x1909   :  { %v2848_v47 = vpop.xlane.xlu0 %2847 }
0x190a   :  { %v2849_v48 = vrot.slane %v2848_v47, 4  ;;  %v2927_v5 = vpop.xlane.xlu2 %2926 }
0x190b   :  { %v2928_v19 = vrot.slane %v2927_v5, 4 }
0x190c   :  { %v2850_v50 = vadd.f32 %v2849_v48, %v2848_v47 }
0x190d   :  { %v2929_v9 = vadd.f32 %v2928_v19, %v2927_v5 }
0x190e   :  { %v2851_v21 = vrot.slane %v2850_v50, 2 }
0x190f   :  { %v2930_v49 = vrot.slane %v2929_v9, 2 }
0x1910   :  { %v2852_v51 = vadd.f32 %v2851_v21, %v2850_v50 }
0x1911   :  { %v2931_v11 = vadd.f32 %v2930_v49, %v2929_v9 }
0x1912   :  { %v2853_v1 = vrot.slane %v2852_v51, 1 }
0x1913   :  { %v2932_v25 = vrot.slane %v2931_v11, 1 }
0x1914   :  { %v2854_v52 = vadd.f32 %v2853_v1, %v2852_v51 }
0x1915   :  { %v2933_v14 = vadd.f32 %v2932_v25, %v2931_v11 }
0x1916   :  { %5282 = vpush %v2854_v52 }
0x1947   :  { %s5283_s0 = spop %5282 }
0x1948   :  { %v2856_v61 = vstv %s5283_s0  ;;  %s7485_s0 = sld [smem:[#allocation25_spill]] }
0x1949   :  { %v2857_v36 = vmul.f32 %v2856_v61, %v5838_v53 }
0x194b   :  { %v6793_v37 = vsub.f32 %v6761_v17, %v2857_v36  ;;  %v6796_v0 = vsub.f32 %v6757_v16, %v2857_v36  ;;  %v6799_v29 = vsub.f32 %v6763_v10, %v2857_v36  ;;  %v6802_v7 = vsub.f32 %v6771_v38, %v2857_v36 }
0x194d   :  { %v2862_v18 = vmul.f32 %v6793_v37, %v6793_v37  ;;  %v2863_v31 = vmul.f32 %v6796_v0, %v6796_v0  ;;  %v2864_v23 = vmul.f32 %v6799_v29, %v6799_v29  ;;  %v2865_v3 = vmul.f32 %v6802_v7, %v6802_v7 }
0x194f   :  { %v2866_v63 = vsel %vm430_vm2, %v2862_v18, 0.0  ;;  %v2867_v44 = vsel %vm430_vm2, %v2863_v31, 0.0  ;;  %v2869_v54 = vsel %vm430_vm2, %v2864_v23, 0.0  ;;  %v2871_v2 = vsel %vm430_vm2, %v2865_v3, 0.0 }
0x1950   :  { %v2868_v60 = vadd.f32 %v2867_v44, %v2866_v63 }
0x1952   :  { %v2870_v55 = vadd.f32 %v2869_v54, %v2868_v60 }
0x1954   :  { %v2872_v59 = vadd.f32 %v2871_v2, %v2870_v55 }
0x1956   :  { %2873 = vadd.xlane.f32.xlu1 %v2872_v59 }
0x19c9   :  { %v2874_v4 = vpop.xlane.xlu1 %2873 }
0x19ca   :  { %v2875_v6 = vrot.slane %v2874_v4, 4 }
0x19cc   :  { %v2876_v62 = vadd.f32 %v2875_v6, %v2874_v4 }
0x19ce   :  { %v2877_v12 = vrot.slane %v2876_v62, 2 }
0x19d0   :  { %v2878_v22 = vadd.f32 %v2877_v12, %v2876_v62 }
0x19d2   :  { %v2879_v13 = vrot.slane %v2878_v22, 1 }
0x19d4   :  { %v2880_v41 = vadd.f32 %v2879_v13, %v2878_v22 }
0x19d6   :  { %5284 = vpush %v2880_v41 }
0x19d7   :  { %5286 = vpush %v2933_v14 }
0x1a07   :  { %s5285_s13 = spop %5284 }
0x1a08   :  { %v2882_v57 = vstv %s5285_s13  ;;  %s5287_s17 = spop %5286 }
0x1a09   :  { %v2883_v58 = vmul.f32 %v2882_v57, %v5838_v53  ;;  %v2935_v24 = vstv %s5287_s17  ;;  %s7486_s17 = sld [smem:[#allocation27_spill]] }
0x1a0a   :  { %v2936_v26 = vmul.f32 %v2935_v24, %v5838_v53 }
0x1a0b   :  { %5559 = vrsqrt.f32 %v2883_v58  ;;  %vm2891_vm11 = vcmp.eq.f32.partialorder %v2883_v58, inf  ;;  %v2894_v3 = vand.u32 2147483648, %v2883_v58  ;;  %vm2893_vm12 = vcmp.eq.f32.partialorder %v2883_v58, 0.0 }
0x1a0c   :  { %v6819_v39 = vsub.f32 %v6775_v42, %v2936_v26  ;;  %v6822_v40 = vsub.f32 %v6777_v43, %v2936_v26  ;;  %v6825_v27 = vsub.f32 %v6779_v8, %v2936_v26  ;;  %v6828_v45 = vsub.f32 %v6787_v33, %v2936_v26 }
0x1a0e   :  { %v2941_v56 = vmul.f32 %v6819_v39, %v6819_v39  ;;  %v2942_v35 = vmul.f32 %v6822_v40, %v6822_v40  ;;  %v2943_v46 = vmul.f32 %v6825_v27, %v6825_v27  ;;  %v2944_v32 = vmul.f32 %v6828_v45, %v6828_v45 }
0x1a10   :  { %v2945_v15 = vsel %vm430_vm2, %v2941_v56, 0.0  ;;  %v2946_v28 = vsel %vm430_vm2, %v2942_v35, 0.0  ;;  %v2948_v21 = vsel %vm430_vm2, %v2943_v46, 0.0  ;;  %v2950_v52 = vsel %vm430_vm2, %v2944_v32, 0.0 }
0x1a11   :  { %v5560_v47 = vpop.eup %5559  ;;  %v2947_v48 = vadd.f32 %v2946_v28, %v2945_v15 }
0x1a12   :  { %v2885_v50 = vmul.f32 %v5560_v47, %v2883_v58 }
0x1a13   :  { %v2949_v51 = vadd.f32 %v2948_v21, %v2947_v48 }
0x1a14   :  { %v2886_v1 = vmul.f32 %v5560_v47, %v2885_v50 }
0x1a15   :  { %v2951_v61 = vadd.f32 %v2950_v52, %v2949_v51 }
0x1a16   :  { %v2887_v36 = vmul.f32 0.5, %v2886_v1 }
0x1a17   :  { %2952 = vadd.xlane.f32.xlu0 %v2951_v61 }
0x1a18   :  { %v2888_v18 = vsub.f32 1.5, %v2887_v36 }
0x1a1a   :  { %v2889_v31 = vmul.f32 %v5560_v47, %v2888_v18 }
0x1a1c   :  { %v2890_v23 = vmul.f32 %v2889_v31, %v2883_v58 }
0x1a1e   :  { %v2892_v63 = vsel %vm2891_vm11, %v2883_v58, %v2890_v23 }
0x1a1f   :  { %v2895_v44 = vsel %vm2893_vm12, %v2894_v3, %v2892_v63 }
0x1a20   :  { %v2896_v60 = vadd.f32 1e-05, %v2895_v44  ;;  %v6859_v44 = vsub.f32 %v6761_v17, %v6775_v42  ;;  %v6879_v17 = vsub.f32 %v6763_v10, %v6779_v8  ;;  %v3022_v10 = vld [vmem:[%s5903_s25 + $0x20] sm:$0xff]  ;;  %v3021_v8 = vld [vmem:[%s5903_s25 + $0x18] sm:$0xff] }
0x1a22   :  { %5561 = vrcp.f32 %v2896_v60  ;;  %v2908_v59 = vand.u32 2147483648, %v2896_v60  ;;  %v2906_v19 = vand.u32 2147483647, %v2896_v60  ;;  %vm2902_vm6 = vweird.f32 %v2896_v60 }
0x1a24   :  { %v2909_v49 = vor.u32 1.1754944e-38, %v2908_v59  ;;  %vm2907_vm8 = vcmp.eq.f32.partialorder %v2906_v19, 8.507059e+37  ;;  %v3541_v59 = vld [vmem:[%s6142_s29 + $0x38] sm:$0xff]  ;;  %v3539_v19 = vld [vmem:[%s6142_s29 + $0x28] sm:$0xff] }
0x1a28   :  { %v5562_v54 = vpop.eup %5561 }
0x1a29   :  { %v2898_v55 = vmul.f32 %v5562_v54, %v2896_v60  ;;  %vm2903_vm13 = vweird.f32 %v5562_v54  ;;  %v6863_v60 = vsub.f32 %v6757_v16, %v6777_v43  ;;  %v6875_v16 = vsub.f32 %v6771_v38, %v6787_v33  ;;  %v3024_v38 = vld [vmem:[%s5903_s25 + $0x30] sm:$0xff]  ;;  %v3023_v33 = vld [vmem:[%s5903_s25 + $0x28] sm:$0xff] }
0x1a2a   :  { %vm2904_vm15 = vmor %vm2902_vm6, %vm2903_vm13  ;;  %v2762_v43 = vmul.f32 %v6879_v17, %v6879_v17 }
0x1a2b   :  { %v2899_v2 = vsub.f32 1.0, %v2898_v55  ;;  %v2763_v42 = vmul.f32 %v6875_v16, %v6875_v16  ;;  %v3019_v55 = vld [vmem:[%s5903_s25 + $0x8] sm:$0xff] }
0x1a2d   :  { %v2900_v5 = vmul.f32 %v5562_v54, %v2899_v2  ;;  %v3018_v2 = vld [vmem:[%s5903_s25] sm:$0xff] }
0x1a2f   :  { %v2901_v9 = vadd.f32 %v5562_v54, %v2900_v5  ;;  %v3540_v5 = vld [vmem:[%s6142_s29 + $0x30] sm:$0xff] }
0x1a31   :  { %v2905_v4 = vsel %vm2904_vm15, %v5562_v54, %v2901_v9  ;;  %v3020_v54 = vld [vmem:[%s5903_s25 + $0x10] sm:$0xff]  ;;  %v3538_v9 = vld [vmem:[%s6142_s29 + $0x20] sm:$0xff] }
0x1a32   :  { %v2910_v6 = vsel %vm2907_vm8, %v2909_v49, %v2905_v4  ;;  %v3537_v49 = vld [vmem:[%s6142_s29 + $0x18] sm:$0xff]  ;;  %v3536_v4 = vld [vmem:[%s6142_s29 + $0x10] sm:$0xff] }
0x1a33   :  { %v2912_v62 = vmul.f32 %v2910_v6, %v6796_v0  ;;  %v2913_v11 = vmul.f32 %v2910_v6, %v6799_v29  ;;  %v2911_v12 = vmul.f32 %v2910_v6, %v6793_v37  ;;  %v2914_v22 = vmul.f32 %v2910_v6, %v6802_v7  ;;  %v3535_v6 = vld [vmem:[%s6142_s29 + $0x8] sm:$0xff] }
0x1a35   :  { %2916 = vst.msk [vmem:[#allocation4 + $0x8] sm:$0xff] %vm430_vm2, %v2912_v62  ;;  %v3534_v62 = vld [vmem:[%s6142_s29] sm:$0xff]  ;;  %s7474_s29 = sld [smem:[#allocation16_spill]] }
0x1a36   :  { %2917 = vst.msk [vmem:[#allocation4 + $0x10] sm:$0xff] %vm430_vm2, %v2913_v11 }
0x1a37   :  { %2915 = vst.msk [vmem:[#allocation4] sm:$0xff] %vm430_vm2, %v2911_v12 }
0x1a38   :  { %2918 = vst.msk [vmem:[#allocation4 + $0x18] sm:$0xff] %vm430_vm2, %v2914_v22 }
0x1a8a   :  { %v2953_v25 = vpop.xlane.xlu0 %2952 }
0x1a8b   :  { %v2954_v13 = vrot.slane %v2953_v25, 4 }
0x1a8d   :  { %v2955_v41 = vadd.f32 %v2954_v13, %v2953_v25 }
0x1a8f   :  { %v2956_v14 = vrot.slane %v2955_v41, 2 }
0x1a91   :  { %v2957_v57 = vadd.f32 %v2956_v14, %v2955_v41 }
0x1a93   :  { %v2958_v0 = vrot.slane %v2957_v57, 1 }
0x1a95   :  { %v2959_v58 = vadd.f32 %v2958_v0, %v2957_v57 }
0x1a97   :  { %5288 = vpush %v2959_v58  ;;  %v3697_v58 = vld [vmem:[%s6184_s22] sm:$0x3] }
0x1ac8   :  { %s5289_s12 = spop %5288 }
0x1ac9   :  { %v2961_v37 = vstv %s5289_s12 }
0x1aca   :  { %v2962_v29 = vmul.f32 %v2961_v37, %v5838_v53 }
0x1acc   :  { %5563 = vrsqrt.f32 %v2962_v29  ;;  %vm2970_vm9 = vcmp.eq.f32.partialorder %v2962_v29, inf  ;;  %v2973_v15 = vand.u32 2147483648, %v2962_v29  ;;  %vm2972_vm11 = vcmp.eq.f32.partialorder %v2962_v29, 0.0 }
0x1ad2   :  { %v5564_v7 = vpop.eup %5563 }
0x1ad3   :  { %v2964_v24 = vmul.f32 %v5564_v7, %v2962_v29 }
0x1ad5   :  { %v2965_v26 = vmul.f32 %v5564_v7, %v2964_v24 }
0x1ad7   :  { %v2966_v56 = vmul.f32 0.5, %v2965_v26 }
0x1ad9   :  { %v2967_v35 = vsub.f32 1.5, %v2966_v56 }
0x1adb   :  { %v2968_v46 = vmul.f32 %v5564_v7, %v2967_v35 }
0x1add   :  { %v2969_v32 = vmul.f32 %v2968_v46, %v2962_v29 }
0x1adf   :  { %v2971_v28 = vsel %vm2970_vm9, %v2962_v29, %v2969_v32 }
0x1ae0   :  { %v2974_v47 = vsel %vm2972_vm11, %v2973_v15, %v2971_v28 }
0x1ae1   :  { %v2975_v48 = vadd.f32 1e-05, %v2974_v47 }
0x1ae3   :  { %5565 = vrcp.f32 %v2975_v48  ;;  %v2987_v1 = vand.u32 2147483648, %v2975_v48  ;;  %v2985_v52 = vand.u32 2147483647, %v2975_v48  ;;  %vm2981_vm13 = vweird.f32 %v2975_v48 }
0x1ae5   :  { %v2988_v36 = vor.u32 1.1754944e-38, %v2987_v1  ;;  %vm2986_vm15 = vcmp.eq.f32.partialorder %v2985_v52, 8.507059e+37 }
0x1ae9   :  { %v5566_v50 = vpop.eup %5565 }
0x1aea   :  { %v2977_v21 = vmul.f32 %v5566_v50, %v2975_v48  ;;  %vm2982_vm12 = vweird.f32 %v5566_v50 }
0x1aeb   :  { %vm2983_vm6 = vmor %vm2981_vm13, %vm2982_vm12 }
0x1aec   :  { %v2978_v51 = vsub.f32 1.0, %v2977_v21 }
0x1aee   :  { %v2979_v53 = vmul.f32 %v5566_v50, %v2978_v51 }
0x1af0   :  { %v2980_v61 = vadd.f32 %v5566_v50, %v2979_v53 }
0x1af2   :  { %v2984_v18 = vsel %vm2983_vm6, %v5566_v50, %v2980_v61 }
0x1af3   :  { %v2989_v31 = vsel %vm2986_vm15, %v2988_v36, %v2984_v18 }
0x1af4   :  { %v2992_v23 = vmul.f32 %v2989_v31, %v6825_v27  ;;  %v2991_v3 = vmul.f32 %v2989_v31, %v6822_v40  ;;  %v2990_v63 = vmul.f32 %v2989_v31, %v6819_v39  ;;  %v2760_v39 = vmul.f32 %v6859_v44, %v6859_v44 }
0x1af5   :  { %v2761_v40 = vmul.f32 %v6863_v60, %v6863_v60  ;;  %v2993_v27 = vmul.f32 %v2989_v31, %v6828_v45  ;;  %v3025_v45 = vld [vmem:[%s5903_s25 + $0x38] sm:$0xff]  ;;  %s7468_s25 = sld [smem:[#allocation11_spill]] }
0x1af6   :  { %3002 = vrot.lane.b32.xlu0 %v2992_v23, %s7446_s28  ;;  %3000 = vrot.lane.b32.xlu2 %v2991_v3, %s7446_s28 }
0x1af7   :  { %2998 = vrot.lane.b32.xlu1 %v2990_v63, %s7446_s28  ;;  %3054 = vmatpush.msrb.mxu3 %v3025_v45 }
0x1af9   :  { %3055 = vmatpush.msrb.mxu3 %v3024_v38 }
0x1afb   :  { %3056 = vmatpush.msrb.mxu3 %v3023_v33 }
0x1afd   :  { %3057 = vmatpush.msrb.mxu3 %v3022_v10  ;;  %v5391_v10 = vld [vmem:[%s5955_s1] ss:$0 sm:$0xff]  ;;  %s7469_s1 = sld [smem:[#allocation12_spill]] }
0x1afe   :  { %2768 = vrot.lane.b32.xlu0 %v2760_v39, %s7452_s27  ;;  %2770 = vrot.lane.b32.xlu2 %v2761_v40, %s7452_s27 }
0x1aff   :  { %3004 = vrot.lane.b32.xlu1 %v2993_v27, %s7446_s28  ;;  %3058 = vmatpush.msrb.mxu3 %v3021_v8 }
0x1b01   :  { %3059 = vmatpush.msrb.mxu3 %v3020_v54 }
0x1b03   :  { %3060 = vmatpush.msrb.mxu3 %v3019_v55 }
0x1b05   :  { %3061 = vmatpush.msrb.mxu3 %v3018_v2 }
0x1b06   :  { %2774 = vrot.lane.b32.xlu0 %v2763_v42, %s7452_s27 }
0x1b07   :  { %2772 = vrot.lane.b32.xlu1 %v2762_v43, %s7452_s27  ;;  %3560 = vmatpush.msra.mxu3 %v3541_v59 }
0x1b09   :  { %3561 = vmatpush.msra.mxu3 %v3540_v5 }
0x1b0b   :  { %3562 = vmatpush.msra.mxu3 %v3539_v19 }
0x1b0d   :  { %3563 = vmatpush.msra.mxu3 %v3538_v9  ;;  %v5392_v9 = vld [vmem:[%s5960_s5] ss:$0 sm:$0xff] }
0x1b0f   :  { %3564 = vmatpush.msra.mxu3 %v3537_v49 }
0x1b11   :  { %3565 = vmatpush.msra.mxu3 %v3536_v4 }
0x1b13   :  { %3566 = vmatpush.msra.mxu3 %v3535_v6 }
0x1b15   :  { %3567 = vmatpush.msra.mxu3 %v3534_v62  ;;  %v3166_v62 = vld [vmem:[%s5979_s15 + $0x18] sm:$0xff] }
0x1b16   :  { %3195 = vmatpush.msra.mxu2 %v3166_v62 }
0x1b50   :  { %v3001_v11 = vpop.permute.xlu2 %3000 }
0x1b51   :  { %3011 = vst.msk [vmem:[#allocation4 + $0x8] sm:$0xff] %vm608_vm3, %v3001_v11 }
0x1b58   :  { %v2771_v12 = vpop.permute.xlu2 %2770  ;;  %v3015_v7 = vld [vmem:[#allocation4 + $0x8] sm:$0xff] }
0x1b59   :  { %v2783_v22 = vsel %vm369_vm5, %v2771_v12, 0.0 }
0x1b5a   :  { %2784 = vadd.xlane.f32.xlu1 %v2783_v22  ;;  %v3165_v22 = vld [vmem:[%s5979_s15 + $0x10] sm:$0xff] }
0x1b5b   :  { %3196 = vmatpush.msra.mxu2 %v3165_v22 }
0x1b68   :  { %v3003_v25 = vpop.permute.xlu0 %3002 }
0x1b69   :  { %3012 = vst.msk [vmem:[#allocation4 + $0x10] sm:$0xff] %vm608_vm3, %v3003_v25  ;;  %v2999_v13 = vpop.permute.xlu1 %2998 }
0x1b6a   :  { %3010 = vst.msk [vmem:[#allocation4] sm:$0xff] %vm608_vm3, %v2999_v13 }
0x1b70   :  { %v2769_v41 = vpop.permute.xlu0 %2768  ;;  %v3016_v56 = vld [vmem:[#allocation4 + $0x10] sm:$0xff] }
0x1b71   :  { %v3005_v14 = vpop.permute.xlu1 %3004  ;;  %v3014_v57 = vld [vmem:[#allocation4] sm:$0xff]  ;;  %v2780_v0 = vsel %vm369_vm5, %v2769_v41, 0.0 }
0x1b72   :  { %3013 = vst.msk [vmem:[#allocation4 + $0x18] sm:$0xff] %vm608_vm3, %v3005_v14  ;;  %5180 = vmatmul.msk.f32.vlgmr.msrb.gmra.mxu3 %vm633_vm4, %v3014_v57  ;;  %2781 = vadd.xlane.f32.xlu2 %v2780_v0  ;;  %v3164_v14 = vld [vmem:[%s5979_s15 + $0x8] sm:$0xff] }
0x1b73   :  { %5210 = vmatpush.msk.msrb.mxu3 %vm1306_vm14, %v3697_v58  ;;  %3197 = vmatpush.msra.mxu2 %v3164_v14 }
0x1b78   :  { %v2775_v37 = vpop.permute.xlu0 %2774 }
0x1b79   :  { %v2773_v29 = vpop.permute.xlu1 %2772  ;;  %v2789_v24 = vsel %vm369_vm5, %v2775_v37, 0.0  ;;  %v3017_v35 = vld [vmem:[#allocation4 + $0x18] sm:$0xff]  ;;  %v3163_v37 = vld [vmem:[%s5979_s15] sm:$0xff] }
0x1b7a   :  { %5181 = vmatmul.msk.f32.gmra.mxu3 %vm633_vm4, %v3015_v7  ;;  %v2786_v26 = vsel %vm369_vm5, %v2773_v29, 0.0  ;;  %2790 = vadd.xlane.f32.xlu2 %v2789_v24 }
0x1b7b   :  { %2787 = vadd.xlane.f32.xlu0 %v2786_v26  ;;  %3198 = vmatpush.msra.mxu2 %v3163_v37 }
0x1b82   :  { %5182 = vmatmul.msk.f32.gmra.mxu3 %vm633_vm4, %v3016_v56 }
0x1b8a   :  { %5183 = vmatmul.msk.f32.gmra.mxu3 %vm633_vm4, %v3017_v35 }
0x1bcd   :  { %v2785_v46 = vpop.xlane.xlu1 %2784 }
0x1bce   :  { %5567 = vrsqrt.f32 %v2785_v46  ;;  %vm2811_vm8 = vcmp.eq.f32.partialorder %v2785_v46, inf  ;;  %v2814_v45 = vand.u32 2147483648, %v2785_v46  ;;  %vm2813_vm11 = vcmp.eq.f32.partialorder %v2785_v46, 0.0 }
0x1bd4   :  { %v5568_v32 = vpop.eup %5567 }
0x1bd5   :  { %v2805_v15 = vmul.f32 %v5568_v32, %v2785_v46 }
0x1bd7   :  { %v2806_v28 = vmul.f32 %v5568_v32, %v2805_v15 }
0x1bd9   :  { %v2807_v48 = vmul.f32 0.5, %v2806_v28 }
0x1bdb   :  { %v2808_v50 = vsub.f32 1.5, %v2807_v48 }
0x1bdd   :  { %v2809_v52 = vmul.f32 %v5568_v32, %v2808_v50 }
0x1bdf   :  { %v2810_v18 = vmul.f32 %v2809_v52, %v2785_v46 }
0x1be1   :  { %v2812_v42 = vsel %vm2811_vm8, %v2785_v46, %v2810_v18 }
0x1be2   :  { %v6922_v55 = vsel %vm2813_vm11, %v2814_v45, %v2812_v42 }
0x1be3   :  { %v3031_v4 = vmul.f32 %v5391_v10, %v6922_v55 }
0x1be5   :  { %v2782_v47 = vpop.xlane.xlu2 %2781 }
0x1be6   :  { %5569 = vrsqrt.f32 %v2782_v47  ;;  %vm2799_vm9 = vcmp.eq.f32.partialorder %v2782_v47, inf  ;;  %v2802_v33 = vand.u32 2147483648, %v2782_v47  ;;  %vm2801_vm12 = vcmp.eq.f32.partialorder %v2782_v47, 0.0 }
0x1bec   :  { %v5570_v21 = vpop.eup %5569 }
0x1bed   :  { %v2793_v51 = vmul.f32 %v5570_v21, %v2782_v47  ;;  %v6917_v1 = vpop.xlane.xlu2 %2790 }
0x1bee   :  { %5571 = vrsqrt.f32 %v6917_v1  ;;  %v2788_v53 = vpop.xlane.xlu0 %2787  ;;  %vm2835_vm15 = vcmp.eq.f32.partialorder %v6917_v1, inf  ;;  %vm2837_vm8 = vcmp.eq.f32.partialorder %v6917_v1, 0.0 }
0x1bef   :  { %5573 = vrsqrt.f32 %v2788_v53  ;;  %v2794_v61 = vmul.f32 %v5570_v21, %v2793_v51  ;;  %vm2823_vm13 = vcmp.eq.f32.partialorder %v2788_v53, inf  ;;  %v2826_v7 = vand.u32 2147483648, %v2788_v53 }
0x1bf0   :  { %vm2825_vm6 = vcmp.eq.f32.partialorder %v2788_v53, 0.0 }
0x1bf1   :  { %v2795_v36 = vmul.f32 0.5, %v2794_v61 }
0x1bf3   :  { %v2796_v31 = vsub.f32 1.5, %v2795_v36 }
0x1bf4   :  { %v5572_v23 = vpop.eup %5571 }
0x1bf5   :  { %v5574_v3 = vpop.eup %5573  ;;  %v2829_v63 = vmul.f32 %v5572_v23, %v6917_v1  ;;  %v2797_v39 = vmul.f32 %v5570_v21, %v2796_v31  ;;  %v3063_v40 = vpop.f32.mrf.mxu3 }
0x1bf6   :  { %v2817_v27 = vmul.f32 %v5574_v3, %v2788_v53 }
0x1bf7   :  { %v2798_v43 = vmul.f32 %v2797_v39, %v2782_v47  ;;  %v2830_v38 = vmul.f32 %v5572_v23, %v2829_v63 }
0x1bf8   :  { %v2818_v8 = vmul.f32 %v5574_v3, %v2817_v27 }
0x1bf9   :  { %v2800_v54 = vsel %vm2799_vm9, %v2782_v47, %v2798_v43  ;;  %v2831_v2 = vmul.f32 0.5, %v2830_v38  ;;  %v2838_v47 = vand.u32 2147483648, %v6917_v1 }
0x1bfa   :  { %v6924_v59 = vsel %vm2801_vm12, %v2802_v33, %v2800_v54  ;;  %v2819_v5 = vmul.f32 0.5, %v2818_v8  ;;  %v3215_v8 = vld [vmem:[%s6036_s20 + $0x18] sm:$0xff]  ;;  %v3214_v54 = vld [vmem:[%s6036_s20 + $0x10] sm:$0xff] }
0x1bfb   :  { %v3030_v19 = vmul.f32 %v5391_v10, %v6924_v59  ;;  %v2832_v49 = vsub.f32 1.5, %v2831_v2  ;;  %3244 = vmatpush.msrb.mxu0 %v3215_v8 }
0x1bfc   :  { %v2820_v6 = vsub.f32 1.5, %v2819_v5 }
0x1bfd   :  { %v3064_v11 = vadd.f32 %v3063_v40, %v3030_v19  ;;  %v3066_v12 = vpop.f32.mrf.mxu3  ;;  %v2833_v41 = vmul.f32 %v5572_v23, %v2832_v49  ;;  %3245 = vmatpush.msrb.mxu0 %v3214_v54 }
0x1bfe   :  { %v3067_v25 = vadd.f32 %v3066_v12, %v3031_v4  ;;  %v2821_v13 = vmul.f32 %v5574_v3, %v2820_v6 }
0x1bff   :  { %v6932_v57 = vadd.f32 %v5392_v9, %v3064_v11  ;;  %v2834_v56 = vmul.f32 %v2833_v41, %v6917_v1 }
0x1c00   :  { %v6934_v0 = vadd.f32 %v5392_v9, %v3067_v25  ;;  %v2822_v58 = vmul.f32 %v2821_v13, %v2788_v53 }
0x1c01   :  { %v5184_v29 = vmul.f32 -1.442695, %v6932_v57  ;;  %v2836_v28 = vsel %vm2835_vm15, %v6917_v1, %v2834_v56 }
0x1c02   :  { %v5185_v24 = vmul.f32 -1.442695, %v6934_v0  ;;  %v2824_v26 = vsel %vm2823_vm13, %v2788_v53, %v2822_v58  ;;  %v6949_v21 = vsel %vm2837_vm8, %v2838_v47, %v2836_v28 }
0x1c03   :  { %5575 = vpow2.f32 %v5184_v29  ;;  %v6940_v35 = vsel %vm2825_vm6, %v2826_v7, %v2824_v26  ;;  %v3033_v36 = vmul.f32 %v5391_v10, %v6949_v21 }
0x1c04   :  { %5577 = vpow2.f32 %v5185_v24  ;;  %v3032_v46 = vmul.f32 %v5391_v10, %v6940_v35 }
0x1c05   :  { %v3069_v32 = vpop.f32.mrf.mxu3 }
0x1c06   :  { %v3070_v15 = vadd.f32 %v3069_v32, %v3032_v46 }
0x1c08   :  { %v6946_v48 = vadd.f32 %v5392_v9, %v3070_v15 }
0x1c09   :  { %v5576_v50 = vpop.eup %5575 }
0x1c0a   :  { %v5578_v51 = vpop.eup %5577  ;;  %v3095_v53 = vadd.f32 1.0, %v5576_v50  ;;  %v5186_v52 = vmul.f32 -1.442695, %v6946_v48 }
0x1c0b   :  { %v3096_v61 = vadd.f32 1.0, %v5578_v51 }
0x1c0c   :  { %5579 = vrcp.f32 %v3095_v53  ;;  %v3108_v45 = vand.u32 2147483647, %v3095_v53  ;;  %v3110_v38 = vand.u32 2147483648, %v3095_v53  ;;  %vm3104_vm11 = vweird.f32 %v3095_v53 }
0x1c0d   :  { %5581 = vrcp.f32 %v3096_v61  ;;  %v3072_v18 = vpop.f32.mrf.mxu3  ;;  %v3125_v11 = vand.u32 2147483648, %v3096_v61  ;;  %vm3119_vm15 = vweird.f32 %v3096_v61  ;;  %v3123_v25 = vand.u32 2147483647, %v3096_v61 }
0x1c0e   :  { %5583 = vpow2.f32 %v5186_v52  ;;  %v3073_v31 = vadd.f32 %v3072_v18, %v3033_v36  ;;  %vm3109_vm13 = vcmp.eq.f32.partialorder %v3108_v45, 8.507059e+37 }
0x1c0f   :  { %v3126_v14 = vor.u32 1.1754944e-38, %v3125_v11 }
0x1c10   :  { %v6953_v23 = vadd.f32 %v5392_v9, %v3073_v31  ;;  %v3111_v9 = vor.u32 1.1754944e-38, %v3110_v38 }
0x1c12   :  { %v5580_v3 = vpop.eup %5579  ;;  %v5187_v1 = vmul.f32 -1.442695, %v6953_v23 }
0x1c13   :  { %v5582_v63 = vpop.eup %5581  ;;  %v3100_v39 = vmul.f32 %v5580_v3, %v3095_v53  ;;  %vm3105_vm9 = vweird.f32 %v5580_v3 }
0x1c14   :  { %v5584_v40 = vpop.eup %5583  ;;  %5585 = vpow2.f32 %v5187_v1  ;;  %v3115_v27 = vmul.f32 %v5582_v63, %v3096_v61  ;;  %vm3106_vm12 = vmor %vm3104_vm11, %vm3105_vm9  ;;  %vm3120_vm6 = vweird.f32 %v5582_v63  ;;  %vm3124_vm9 = vcmp.eq.f32.partialorder %v3123_v25, 8.507059e+37  ;;  %v3212_v1 = vld [vmem:[%s6036_s20] sm:$0xff] }
0x1c15   :  { %v3101_v42 = vsub.f32 1.0, %v3100_v39  ;;  %v3097_v43 = vadd.f32 1.0, %v5584_v40  ;;  %vm3121_vm8 = vmor %vm3119_vm15, %vm3120_vm6 }
0x1c16   :  { %v3116_v33 = vsub.f32 1.0, %v3115_v27 }
0x1c17   :  { %v3102_v10 = vmul.f32 %v5580_v3, %v3101_v42  ;;  %5587 = vrcp.f32 %v3097_v43  ;;  %v3140_v26 = vand.u32 2147483648, %v3097_v43  ;;  %v3138_v46 = vand.u32 2147483647, %v3097_v43 }
0x1c18   :  { %v3117_v2 = vmul.f32 %v5582_v63, %v3116_v33  ;;  %v5394_v33 = vld [vmem:[%s6053_s24] ss:$0 sm:$0xff]  ;;  %s7470_s24 = sld [smem:[#allocation13_spill]] }
0x1c19   :  { %v3103_v5 = vadd.f32 %v5580_v3, %v3102_v10  ;;  %v3141_v28 = vor.u32 1.1754944e-38, %v3140_v26  ;;  %vm3139_vm6 = vcmp.eq.f32.partialorder %v3138_v46, 8.507059e+37 }
0x1c1a   :  { %v5586_v19 = vpop.eup %5585  ;;  %v3118_v6 = vadd.f32 %v5582_v63, %v3117_v2 }
0x1c1b   :  { %v3107_v49 = vsel %vm3106_vm12, %v5580_v3, %v3103_v5  ;;  %v3098_v4 = vadd.f32 1.0, %v5586_v19  ;;  %vm3134_vm12 = vweird.f32 %v3097_v43  ;;  %v3213_v3 = vld [vmem:[%s6036_s20 + $0x8] sm:$0xff] }
0x1c1c   :  { %v3112_v62 = vsel %vm3109_vm13, %v3111_v9, %v3107_v49  ;;  %v3122_v41 = vsel %vm3121_vm8, %v5582_v63, %v3118_v6  ;;  %3246 = vmatpush.msrb.mxu0 %v3213_v3  ;;  %v5393_v63 = vld [vmem:[%s5974_s10] ss:$0 sm:$0xff] }
0x1c1d   :  { %v5588_v12 = vpop.eup %5587  ;;  %v3159_v22 = vmul.f32 %v3112_v62, %v6932_v57  ;;  %5589 = vrcp.f32 %v3098_v4  ;;  %v3127_v37 = vsel %vm3124_vm9, %v3126_v14, %v3122_v41  ;;  %v3155_v53 = vand.u32 2147483648, %v3098_v4 }
0x1c1e   :  { %v3130_v13 = vmul.f32 %v5588_v12, %v3097_v43  ;;  %vm3135_vm11 = vweird.f32 %v5588_v12  ;;  %v3160_v57 = vmul.f32 %v3127_v37, %v6934_v0  ;;  %vm3149_vm8 = vweird.f32 %v3098_v4  ;;  %3247 = vmatpush.msrb.mxu0 %v3212_v1 }
0x1c1f   :  { %5188 = vmatmul.msk.f32.vlgmr.msra.gmra.mxu2 %vm430_vm2, %v3159_v22  ;;  %vm3136_vm13 = vmor %vm3134_vm12, %vm3135_vm11  ;;  %v3153_v0 = vand.u32 2147483647, %v3098_v4  ;;  %v3156_v36 = vor.u32 1.1754944e-38, %v3155_v53 }
0x1c20   :  { %v3131_v58 = vsub.f32 1.0, %v3130_v13 }
0x1c21   :  { %vm3154_vm11 = vcmp.eq.f32.partialorder %v3153_v0, 8.507059e+37  ;;  %v5395_v0 = vld [vmem:[%s6069_s2] ss:$0 sm:$0xff]  ;;  %s7471_s2 = sld [smem:[#allocation14_spill]] }
0x1c22   :  { %v3132_v29 = vmul.f32 %v5588_v12, %v3131_v58 }
0x1c23   :  { %v5590_v7 = vpop.eup %5589 }
0x1c24   :  { %v3133_v24 = vadd.f32 %v5588_v12, %v3132_v29  ;;  %v3145_v56 = vmul.f32 %v5590_v7, %v3098_v4  ;;  %vm3150_vm15 = vweird.f32 %v5590_v7 }
0x1c25   :  { %vm3151_vm9 = vmor %vm3149_vm8, %vm3150_vm15 }
0x1c26   :  { %v3146_v32 = vsub.f32 1.0, %v3145_v56  ;;  %v3137_v15 = vsel %vm3136_vm13, %v5588_v12, %v3133_v24 }
0x1c27   :  { %5189 = vmatmul.msk.f32.gmra.mxu2 %vm430_vm2, %v3160_v57  ;;  %v3142_v50 = vsel %vm3139_vm6, %v3141_v28, %v3137_v15 }
0x1c28   :  { %v3147_v47 = vmul.f32 %v5590_v7, %v3146_v32  ;;  %v3161_v52 = vmul.f32 %v3142_v50, %v6946_v48 }
0x1c2a   :  { %v3148_v51 = vadd.f32 %v5590_v7, %v3147_v47 }
0x1c2c   :  { %v3152_v61 = vsel %vm3151_vm9, %v5590_v7, %v3148_v51 }
0x1c2d   :  { %v3157_v18 = vsel %vm3154_vm11, %v3156_v36, %v3152_v61 }
0x1c2e   :  { %v3162_v31 = vmul.f32 %v3157_v18, %v6953_v23 }
0x1c2f   :  { %5190 = vmatmul.msk.f32.gmra.mxu2 %vm430_vm2, %v3161_v52 }
0x1c37   :  { %5191 = vmatmul.msk.f32.gmra.mxu2 %vm430_vm2, %v3162_v31 }
0x1ca2   :  { %v3200_v39 = vpop.f32.mrf.mxu2 }
0x1ca3   :  { %v3201_v48 = vadd.f32 %v5393_v63, %v3200_v39 }
0x1ca5   :  { %3457 = vst.msk [vmem:[#allocation5] sm:$0xff] %vm430_vm2, %v3201_v48  ;;  %5192 = vmatmul.msk.f32.vlgmr.msrb.gmra.mxu0 %vm430_vm2, %v3201_v48 }
0x1caa   :  { %v3203_v40 = vpop.f32.mrf.mxu2 }
0x1cab   :  { %v3204_v27 = vadd.f32 %v5393_v63, %v3203_v40 }
0x1cad   :  { %3458 = vst.msk [vmem:[#allocation5 + $0x8] sm:$0xff] %vm430_vm2, %v3204_v27  ;;  %5193 = vmatmul.msk.f32.gmra.mxu0 %vm430_vm2, %v3204_v27 }
0x1cb2   :  { %v3206_v23 = vpop.f32.mrf.mxu2 }
0x1cb3   :  { %v3207_v42 = vadd.f32 %v5393_v63, %v3206_v23 }
0x1cb5   :  { %3459 = vst.msk [vmem:[#allocation5 + $0x10] sm:$0xff] %vm430_vm2, %v3207_v42  ;;  %5194 = vmatmul.msk.f32.gmra.mxu0 %vm430_vm2, %v3207_v42 }
0x1cba   :  { %v3209_v43 = vpop.f32.mrf.mxu2 }
0x1cbb   :  { %v3210_v45 = vadd.f32 %v5393_v63, %v3209_v43 }
0x1cbd   :  { %3460 = vst.msk [vmem:[#allocation5 + $0x18] sm:$0xff] %vm430_vm2, %v3210_v45  ;;  %5195 = vmatmul.msk.f32.gmra.mxu0 %vm430_vm2, %v3210_v45 }
0x1d22   :  { %v3249_v38 = vpop.f32.mrf.mxu0 }
0x1d23   :  { %v6978_v10 = vadd.f32 %v5394_v33, %v3249_v38 }
0x1d25   :  { %v5196_v2 = vmul.f32 -1.442695, %v6978_v10 }
0x1d2a   :  { %v3252_v8 = vpop.f32.mrf.mxu0 }
0x1d2b   :  { %v3253_v54 = vadd.f32 %v5394_v33, %v3252_v8 }
0x1d2d   :  { %v5197_v5 = vmul.f32 -1.442695, %v3253_v54 }
0x1d2f   :  { %5591 = vpow2.f32 %v5197_v5 }
0x1d30   :  { %5593 = vpow2.f32 %v5196_v2 }
0x1d32   :  { %v3255_v19 = vpop.f32.mrf.mxu0 }
0x1d33   :  { %v3256_v9 = vadd.f32 %v5394_v33, %v3255_v19 }
0x1d35   :  { %v5592_v49 = vpop.eup %5591  ;;  %v5198_v4 = vmul.f32 -1.442695, %v3256_v9 }
0x1d36   :  { %v5594_v6 = vpop.eup %5593  ;;  %v3274_v62 = vadd.f32 1.0, %v5592_v49 }
0x1d37   :  { %5595 = vpow2.f32 %v5198_v4  ;;  %v6981_v11 = vadd.f32 1.0, %v5594_v6 }
0x1d38   :  { %5597 = vrcp.f32 %v3274_v62  ;;  %v3303_v29 = vand.u32 2147483648, %v3274_v62  ;;  %v3301_v26 = vand.u32 2147483647, %v3274_v62  ;;  %vm3297_vm13 = vweird.f32 %v3274_v62 }
0x1d39   :  { %5599 = vrcp.f32 %v6981_v11  ;;  %v3288_v5 = vand.u32 2147483648, %v6981_v11 }
0x1d3a   :  { %v3258_v12 = vpop.f32.mrf.mxu0  ;;  %v3304_v15 = vor.u32 1.1754944e-38, %v3303_v29  ;;  %vm3302_vm15 = vcmp.eq.f32.partialorder %v3301_v26, 8.507059e+37 }
0x1d3b   :  { %v6983_v22 = vadd.f32 %v5394_v33, %v3258_v12 }
0x1d3d   :  { %v5596_v25 = vpop.eup %5595  ;;  %v5199_v13 = vmul.f32 -1.442695, %v6983_v22 }
0x1d3e   :  { %v5598_v41 = vpop.eup %5597  ;;  %v3275_v14 = vadd.f32 1.0, %v5596_v25  ;;  %v3289_v25 = vor.u32 1.1754944e-38, %v3288_v5 }
0x1d3f   :  { %v3293_v58 = vmul.f32 %v5598_v41, %v3274_v62  ;;  %5601 = vpow2.f32 %v5199_v13  ;;  %v6987_v7 = vpop.eup %5599  ;;  %vm3298_vm12 = vweird.f32 %v5598_v41 }
0x1d40   :  { %5603 = vrcp.f32 %v3275_v14  ;;  %v3278_v32 = vmul.f32 %v6987_v7, %v6981_v11  ;;  %vm3299_vm6 = vmor %vm3297_vm13, %vm3298_vm12  ;;  %v3318_v36 = vand.u32 2147483648, %v3275_v14  ;;  %v3316_v31 = vand.u32 2147483647, %v3275_v14 }
0x1d41   :  { %v3294_v37 = vsub.f32 1.0, %v3293_v58  ;;  %vm3312_vm9 = vweird.f32 %v3275_v14  ;;  %vm3283_vm13 = vweird.f32 %v6987_v7 }
0x1d42   :  { %v3279_v61 = vsub.f32 1.0, %v3278_v32  ;;  %v3319_v40 = vor.u32 1.1754944e-38, %v3318_v36  ;;  %vm3317_vm12 = vcmp.eq.f32.partialorder %v3316_v31, 8.507059e+37 }
0x1d43   :  { %v3295_v24 = vmul.f32 %v5598_v41, %v3294_v37 }
0x1d44   :  { %v3280_v48 = vmul.f32 %v6987_v7, %v3279_v61 }
0x1d45   :  { %v5602_v56 = vpop.eup %5601  ;;  %v3296_v57 = vadd.f32 %v5598_v41, %v3295_v24 }
0x1d46   :  { %v5604_v46 = vpop.eup %5603  ;;  %v3276_v28 = vadd.f32 1.0, %v5602_v56  ;;  %v3281_v38 = vadd.f32 %v6987_v7, %v3280_v48 }
0x1d47   :  { %v3300_v47 = vsel %vm3299_vm6, %v5598_v41, %v3296_v57  ;;  %v3308_v50 = vmul.f32 %v5604_v46, %v3275_v14  ;;  %vm3313_vm8 = vweird.f32 %v5604_v46 }
0x1d48   :  { %v3305_v51 = vsel %vm3302_vm15, %v3304_v15, %v3300_v47  ;;  %5605 = vrcp.f32 %v3276_v28  ;;  %vm3314_vm11 = vmor %vm3312_vm9, %vm3313_vm8  ;;  %v3333_v33 = vand.u32 2147483648, %v3276_v28  ;;  %vm3282_vm15 = vweird.f32 %v6981_v11 }
0x1d49   :  { %v3338_v53 = vmul.f32 %v3305_v51, %v3253_v54  ;;  %v3309_v52 = vsub.f32 1.0, %v3308_v50  ;;  %v3331_v54 = vand.u32 2147483647, %v3276_v28  ;;  %vm6998_vm8 = vmor %vm3282_vm15, %vm3283_vm13  ;;  %vm3327_vm9 = vweird.f32 %v3276_v28 }
0x1d4a   :  { %v3334_v6 = vor.u32 1.1754944e-38, %v3333_v33  ;;  %v3285_v62 = vsel %vm6998_vm8, %v6987_v7, %v3281_v38  ;;  %v5396_v7 = vld [vmem:[#allocation8] ss:$0 sm:$0xff]  ;;  %v3371_v47 = vmax.f32 %v6940_v35, 1e-08 }
0x1d4b   :  { %v3310_v18 = vmul.f32 %v5604_v46, %v3309_v52  ;;  %v3346_v3 = vmul.f32 %v5395_v0, %v3338_v53  ;;  %v3370_v53 = vmax.f32 %v6922_v55, 1e-08  ;;  %v3372_v35 = vmax.f32 %v6949_v21, 1e-08 }
0x1d4c   :  { %5607 = vrcp.f32 %v3371_v47  ;;  %vm3408_vm15 = vweird.f32 %v3371_v47  ;;  %v3412_v31 = vand.u32 2147483647, %v3371_v47 }
0x1d4d   :  { %v3311_v1 = vadd.f32 %v5604_v46, %v3310_v18  ;;  %v3352_v63 = vsel %vm430_vm2, %v3346_v3, 0.0  ;;  %5609 = vrcp.f32 %v3370_v53  ;;  %v3414_v18 = vand.u32 2147483648, %v3371_v47 }
0x1d4e   :  { %v5606_v39 = vpop.eup %5605  ;;  %3353 = vadd.xlane.f32.xlu2 %v3352_v63  ;;  %5611 = vrcp.f32 %v3372_v35  ;;  %v3399_v38 = vand.u32 2147483648, %v3370_v53  ;;  %v3397_v33 = vand.u32 2147483647, %v3370_v53 }
0x1d4f   :  { %v3315_v27 = vsel %vm3314_vm11, %v5604_v46, %v3311_v1  ;;  %v3323_v23 = vmul.f32 %v5606_v39, %v3276_v28  ;;  %vm3328_vm6 = vweird.f32 %v5606_v39  ;;  %v3505_v46 = vld [vmem:[%s6115_s14 + $0x8] sm:$0xff]  ;;  %v3415_v63 = vor.u32 1.1754944e-38, %v3414_v18 }
0x1d50   :  { %v3320_v42 = vsel %vm3317_vm12, %v3319_v40, %v3315_v27  ;;  %vm3329_vm11 = vmor %vm3327_vm9, %vm3328_vm6  ;;  %vm3332_vm12 = vcmp.eq.f32.partialorder %v3331_v54, 8.507059e+37  ;;  %vm3413_vm9 = vcmp.eq.f32.partialorder %v3412_v31, 8.507059e+37  ;;  %v3400_v54 = vor.u32 1.1754944e-38, %v3399_v38 }
0x1d51   :  { %v3339_v43 = vmul.f32 %v3320_v42, %v3256_v9  ;;  %v3324_v45 = vsub.f32 1.0, %v3323_v23  ;;  %v3286_v9 = vand.u32 2147483647, %v6981_v11  ;;  %v3369_v42 = vmax.f32 %v6924_v59, 1e-08 }
0x1d52   :  { %v5608_v50 = vpop.eup %5607 }
0x1d53   :  { %v3325_v8 = vmul.f32 %v5606_v39, %v3324_v45  ;;  %v3347_v2 = vmul.f32 %v5395_v0, %v3339_v43  ;;  %vm3287_vm13 = vcmp.eq.f32.partialorder %v3286_v9, 8.507059e+37  ;;  %v3404_v51 = vmul.f32 %v5608_v50, %v3371_v47  ;;  %v5610_v36 = vpop.eup %5609 }
0x1d54   :  { %v3290_v11 = vsel %vm3287_vm13, %v3289_v25, %v3285_v62  ;;  %vm3409_vm6 = vweird.f32 %v5608_v50  ;;  %v3389_v1 = vmul.f32 %v5610_v36, %v3370_v53  ;;  %v5612_v45 = vpop.eup %5611  ;;  %5613 = vrcp.f32 %v3369_v42 }
0x1d55   :  { %v3326_v49 = vadd.f32 %v5606_v39, %v3325_v8  ;;  %v3355_v4 = vsel %vm430_vm2, %v3347_v2, 0.0  ;;  %v3337_v58 = vmul.f32 %v3290_v11, %v6978_v10  ;;  %v3405_v52 = vsub.f32 1.0, %v3404_v51  ;;  %vm3410_vm8 = vmor %vm3408_vm15, %vm3409_vm6 }
0x1d56   :  { %3356 = vadd.xlane.f32.xlu0 %v3355_v4  ;;  %v3390_v48 = vsub.f32 1.0, %v3389_v1  ;;  %v3419_v8 = vmul.f32 %v5612_v45, %v3372_v35  ;;  %vm3398_vm6 = vcmp.eq.f32.partialorder %v3397_v33, 8.507059e+37  ;;  %vm3424_vm15 = vweird.f32 %v5612_v45  ;;  %v3695_v1 = vld [vmem:[%s6195_s3] sm:$0xff] }
0x1d57   :  { %v3330_v12 = vsel %vm3329_vm11, %v5606_v39, %v3326_v49  ;;  %v3345_v29 = vmul.f32 %v5395_v0, %v3337_v58  ;;  %vm3394_vm11 = vweird.f32 %v5610_v36  ;;  %v3427_v25 = vand.u32 2147483647, %v3372_v35 }
0x1d58   :  { %v3335_v13 = vsel %vm3332_vm12, %v3334_v6, %v3330_v12  ;;  %v3391_v23 = vmul.f32 %v5610_v36, %v3390_v48  ;;  %vm3393_vm12 = vweird.f32 %v3370_v53  ;;  %v3420_v2 = vsub.f32 1.0, %v3419_v8  ;;  %v3617_v48 = vld [vmem:[%s6205_s11 + $0x10] sm:$0xff] }
0x1d59   :  { %v3340_v41 = vmul.f32 %v3335_v13, %v6983_v22  ;;  %v3349_v24 = vsel %vm430_vm2, %v3345_v29, 0.0  ;;  %vm3395_vm13 = vmor %vm3393_vm12, %vm3394_vm11  ;;  %v3429_v12 = vand.u32 2147483648, %v3372_v35  ;;  %vm3428_vm11 = vcmp.eq.f32.partialorder %v3427_v25, 8.507059e+37 }
0x1d5a   :  { %v3392_v43 = vadd.f32 %v5610_v36, %v3391_v23  ;;  %v5614_v5 = vpop.eup %5613  ;;  %v3421_v59 = vmul.f32 %v5612_v45, %v3420_v2  ;;  %v3382_v29 = vand.u32 2147483647, %v3369_v42 }
0x1d5b   :  { %v3348_v14 = vmul.f32 %v5395_v0, %v3340_v41  ;;  %v3406_v0 = vmul.f32 %v5608_v50, %v3405_v52  ;;  %v3374_v4 = vmul.f32 %v5614_v5, %v3369_v42  ;;  %v3430_v11 = vor.u32 1.1754944e-38, %v3429_v12  ;;  %v3504_v52 = vld [vmem:[%s6115_s14] sm:$0xff]  ;;  %s7472_s14 = sld [smem:[#allocation15_spill]] }
0x1d5c   :  { %v3396_v21 = vsel %vm3395_vm13, %v5610_v36, %v3392_v43  ;;  %v3422_v6 = vadd.f32 %v5612_v45, %v3421_v59  ;;  %vm3379_vm12 = vweird.f32 %v5614_v5  ;;  %vm3378_vm13 = vweird.f32 %v3369_v42  ;;  %v7041_v36 = vld [vmem:[%s6184_s22] sm:$0x3] }
0x1d5d   :  { %v3358_v37 = vsel %vm430_vm2, %v3348_v14, 0.0  ;;  %v3407_v61 = vadd.f32 %v5608_v50, %v3406_v0  ;;  %v3375_v62 = vsub.f32 1.0, %v3374_v4 }
0x1d5e   :  { %3359 = vadd.xlane.f32.xlu1 %v3358_v37 }
0x1d5f   :  { %v3411_v3 = vsel %vm3410_vm8, %v5608_v50, %v3407_v61  ;;  %vm3423_vm8 = vweird.f32 %v3372_v35  ;;  %v3376_v41 = vmul.f32 %v5614_v5, %v3375_v62  ;;  %v3466_v50 = vld [vmem:[%s6133_s21 + $0x8] sm:$0xff]  ;;  %v5397_v35 = vld [vmem:[%s6167_s6] ss:$0 sm:$0xff]  ;;  %s7475_s6 = sld [smem:[#allocation18_spill]] }
0x1d60   :  { %v3416_v39 = vsel %vm3413_vm9, %v3415_v63, %v3411_v3  ;;  %vm3425_vm9 = vmor %vm3423_vm8, %vm3424_vm15  ;;  %vm3383_vm15 = vcmp.eq.f32.partialorder %v3382_v29, 8.507059e+37  ;;  %vm7466_vm8 = vcmask 15360   ;;  %v3696_v63 = vld [vmem:[%s6195_s3 + $0x8] sm:$0xff]  ;;  %s7476_s3 = sld [smem:[#allocation19_spill]] }
0x1d61   :  { %v3417_v55 = vmul.f32 %v3416_v39, %v6879_v17  ;;  %v3401_v17 = vsel %vm3398_vm6, %v3400_v54, %v3396_v21  ;;  %v3426_v13 = vsel %vm3425_vm9, %v5612_v45, %v3422_v6  ;;  %v3377_v58 = vadd.f32 %v5614_v5, %v3376_v41  ;;  %vm3380_vm6 = vmor %vm3378_vm13, %vm3379_vm12  ;;  %v3618_v39 = vld [vmem:[%s6205_s11 + $0x18] sm:$0xff] }
0x1d62   :  { %v3402_v19 = vmul.f32 %v3401_v17, %v6863_v60  ;;  %v3431_v14 = vsel %vm3428_vm11, %v3430_v11, %v3426_v13  ;;  %v3384_v60 = vand.u32 2147483648, %v3369_v42  ;;  %vm7467_vm9 = vmmov %vm7466_vm8  ;;  %3641 = vmatpush.msrb.mxu2 %v3618_v39  ;;  %v3615_v42 = vld [vmem:[%s6205_s11] sm:$0xff] }
0x1d63   :  { %v3432_v37 = vmul.f32 %v3431_v14, %v6875_v16 }
0x1d64   :  { %3642 = vmatpush.msrb.mxu2 %v3617_v48 }
0x1d66   :  { %3350 = vadd.xlane.f32.xlu1 %v3349_v24 }
0x1dc1   :  { %v3354_v26 = vpop.xlane.xlu2 %3353 }
0x1dc2   :  { %v3366_v56 = vadd.f32 %v5396_v7, %v3354_v26  ;;  %v3381_v26 = vsel %vm3380_vm6, %v5614_v5, %v3377_v58 }
0x1dc4   :  { %3440 = vperm.xlu1 %5366, %v3366_v56   ;;  %v3385_v56 = vor.u32 1.1754944e-38, %v3384_v60 }
0x1dc9   :  { %v3357_v57 = vpop.xlane.xlu0 %3356 }
0x1dca   :  { %v3367_v32 = vadd.f32 %v5396_v7, %v3357_v57  ;;  %v3386_v57 = vsel %vm3383_vm15, %v3385_v56, %v3381_v26 }
0x1dcc   :  { %3513 = vperm.xlu1 %5366, %v3505_v46   ;;  %3445 = vperm.xlu2 %5365, %v3367_v32   ;;  %v3387_v46 = vmul.f32 %v3386_v57, %v6859_v44 }
0x1dd1   :  { %v3360_v22 = vpop.xlane.xlu1 %3359 }
0x1dd2   :  { %v3368_v15 = vadd.f32 %v5396_v7, %v3360_v22 }
0x1dd4   :  { %3450 = vperm.xlu0 %5364, %v3368_v15  }
0x1dd9   :  { %v3351_v10 = vpop.xlane.xlu1 %3350 }
0x1dda   :  { %v3365_v28 = vadd.f32 %v5396_v7, %v3351_v10 }
0x1ddc   :  { %3435 = vperm.xlu0 %5364, %v3365_v28   ;;  %v3465_v28 = vld [vmem:[%s6133_s21] sm:$0xff]  ;;  %s7473_s21 = sld [smem:[#allocation17_spill]] }
0x1e26   :  { %v3446_v40 = vpop.permute.xlu2 %3445 }
0x1e27   :  { %v3455_v27 = vmul.f32 %v3446_v40, %v3417_v55  ;;  %v3616_v40 = vld [vmem:[%s6205_s11 + $0x8] sm:$0xff]  ;;  %s7477_s11 = sld [smem:[#allocation21_spill]] }
0x1e28   :  { %3643 = vmatpush.msrb.mxu2 %v3616_v40 }
0x1e29   :  { %3463 = vst.msk [vmem:[#allocation5 + $0x10] sm:$0xff] %vm1061_vm10, %v3455_v27 }
0x1e2a   :  { %3644 = vmatpush.msrb.mxu2 %v3615_v42  ;;  %v4043_v42 = vld [vmem:[%s7469_s1 + $0x18] sm:$0xff] }
0x1e30   :  { %v3469_v16 = vld [vmem:[#allocation5 + $0x10] sm:$0xff] }
0x1e36   :  { %v3441_v9 = vpop.permute.xlu1 %3440 }
0x1e37   :  { %v3454_v49 = vmul.f32 %v3441_v9, %v3402_v19 }
0x1e39   :  { %3462 = vst.msk [vmem:[#allocation5 + $0x8] sm:$0xff] %vm1061_vm10, %v3454_v49 }
0x1e40   :  { %v3468_v10 = vld [vmem:[#allocation5 + $0x8] sm:$0xff] }
0x1e46   :  { %v3451_v24 = vpop.permute.xlu0 %3450 }
0x1e47   :  { %v3456_v7 = vmul.f32 %v3451_v24, %v3432_v37 }
0x1e49   :  { %3464 = vst.msk [vmem:[#allocation5 + $0x18] sm:$0xff] %vm1061_vm10, %v3456_v7 }
0x1e4e   :  { %v3436_v32 = vpop.permute.xlu0 %3435 }
0x1e4f   :  { %v3453_v22 = vmul.f32 %v3436_v32, %v3387_v46 }
0x1e50   :  { %v3470_v15 = vld [vmem:[#allocation5 + $0x18] sm:$0xff] }
0x1e51   :  { %3461 = vst.msk [vmem:[#allocation5] sm:$0xff] %vm1061_vm10, %v3453_v22  ;;  %3489 = vmatpush.msrb.mxu1 %v3470_v15 }
0x1e53   :  { %3490 = vmatpush.msrb.mxu1 %v3469_v16 }
0x1e55   :  { %3491 = vmatpush.msrb.mxu1 %v3468_v10  ;;  %v5398_v10 = vld [vmem:[%s6219_s19] ss:$0 sm:$0xff]  ;;  %s7478_s19 = sld [smem:[#allocation20_spill]] }
0x1e58   :  { %v3467_v47 = vld [vmem:[#allocation5] sm:$0xff] }
0x1e59   :  { %3492 = vmatpush.msrb.mxu1 %v3467_v47 }
0x1e5a   :  { %5200 = vmatmul.msk.f32.vlgmr.msrb.gmra.mxu1 %vm430_vm2, %v3465_v28 }
0x1e62   :  { %5201 = vmatmul.msk.f32.gmra.mxu1 %vm430_vm2, %v3466_v50 }
0x1ed7   :  { %v3494_v44 = vpop.f32.mrf.mxu1 }
0x1ed8   :  { %3500 = vst.msk [vmem:[#allocation6] sm:$0xff] %vm281_vm1, %v3494_v44 }
0x1edf   :  { %v3497_v51 = vpop.f32.mrf.mxu1  ;;  %v7029_v53 = vld [vmem:[#allocation6] sm:$0xff] }
0x1ee0   :  { %3501 = vst.msk [vmem:[#allocation6 + $0x8] sm:$0xff] %vm281_vm1, %v3497_v51  ;;  %3524 = vrot.lane.b32.xlu2 %v7029_v53, %s7446_s28 }
0x1ee7   :  { %v7035_v0 = vld [vmem:[#allocation6 + $0x8] sm:$0xff] }
0x1ee8   :  { %3508 = vperm.xlu2 %5365, %v3504_v52   ;;  %3526 = vrot.lane.b32.xlu0 %v7035_v0, %s7446_s28 }
0x1f3a   :  { %v3525_v61 = vpop.permute.xlu2 %3524 }
0x1f3b   :  { %3530 = vst.msk [vmem:[#allocation7] sm:$0xff] %vm608_vm3, %v3525_v61 }
0x1f42   :  { %v3532_v18 = vld [vmem:[#allocation7] sm:$0xff]  ;;  %v3509_v16 = vpop.permute.xlu2 %3508 }
0x1f43   :  { %4219 = vst.msk [vmem:[#allocation7] sm:$0x3] %vm1830_vm7, %v7041_v36  ;;  %5202 = vmatmul.msk.f32.vlgmr.msra.gmra.mxu3 %vm633_vm4, %v3532_v18  ;;  %v3516_v28 = vmul.f32 %v3509_v16, %v7029_v53 }
0x1f45   :  { %v3656_v51 = vadd.f32 %v6717_v30, %v3516_v28 }
0x1f5a   :  { %v3527_v31 = vpop.permute.xlu0 %3526 }
0x1f5b   :  { %3531 = vst.msk [vmem:[#allocation7 + $0x8] sm:$0xff] %vm608_vm3, %v3527_v31 }
0x1f62   :  { %v3533_v3 = vld [vmem:[#allocation7 + $0x8] sm:$0xff] }
0x1f63   :  { %5203 = vmatmul.msk.f32.gmra.mxu3 %vm633_vm4, %v3533_v3 }
0x1f6b   :  { %5211 = vmatmul.msk.f32.vlgmr.msrb.gmra.mxu3 %vm7466_vm8, %v3695_v1 }
0x1f73   :  { %5212 = vmatmul.msk.f32.gmra.mxu3 %vm7467_vm9, %v3696_v63 }
0x1fc6   :  { %v3569_v55 = vpop.f32.mrf.mxu3 }
0x1fc7   :  { %v3570_v27 = vadd.f32 %v5397_v35, %v3569_v55 }
0x1fc9   :  { %v5204_v23 = vmul.f32 -1.442695, %v3570_v27 }
0x1fcb   :  { %5615 = vpow2.f32 %v5204_v23  ;;  %v3660_v23 = vld [vmem:[%s7468_s25] sm:$0xff] }
0x1fd1   :  { %v5616_v43 = vpop.eup %5615 }
0x1fd2   :  { %v3581_v45 = vadd.f32 1.0, %v5616_v43  ;;  %v4041_v43 = vld [vmem:[%s7469_s1 + $0x8] sm:$0xff] }
0x1fd4   :  { %5617 = vrcp.f32 %v3581_v45  ;;  %v3594_v8 = vand.u32 2147483648, %v3581_v45  ;;  %v3592_v17 = vand.u32 2147483647, %v3581_v45  ;;  %vm3588_vm12 = vweird.f32 %v3581_v45 }
0x1fd6   :  { %v3595_v5 = vor.u32 1.1754944e-38, %v3594_v8  ;;  %vm3593_vm6 = vcmp.eq.f32.partialorder %v3592_v17, 8.507059e+37 }
0x1fda   :  { %v5618_v38 = vpop.eup %5617 }
0x1fdb   :  { %v3584_v33 = vmul.f32 %v5618_v38, %v3581_v45  ;;  %vm3589_vm11 = vweird.f32 %v5618_v38  ;;  %v4040_v45 = vld [vmem:[%s7469_s1] sm:$0xff] }
0x1fdc   :  { %vm3590_vm13 = vmor %vm3588_vm12, %vm3589_vm11 }
0x1fdd   :  { %v3585_v21 = vsub.f32 1.0, %v3584_v33 }
0x1fdf   :  { %v3586_v54 = vmul.f32 %v5618_v38, %v3585_v21 }
0x1fe1   :  { %v3587_v2 = vadd.f32 %v5618_v38, %v3586_v54 }
0x1fe3   :  { %v3591_v19 = vsel %vm3590_vm13, %v5618_v38, %v3587_v2  ;;  %v3661_v38 = vld [vmem:[%s7468_s25 + $0x8] sm:$0xff]  ;;  %s7490_s25 = sld [smem:[#allocation29_spill]] }
0x1fe4   :  { %v3596_v9 = vsel %vm3593_vm6, %v3595_v5, %v3591_v19 }
0x1fe5   :  { %v3613_v49 = vmul.f32 %v3596_v9, %v3570_v27 }
0x1fe6   :  { %v3572_v59 = vpop.f32.mrf.mxu3 }
0x1fe7   :  { %v3573_v4 = vadd.f32 %v5397_v35, %v3572_v59  ;;  %5206 = vmatmul.msk.f32.vlgmr.msrb.gmra.mxu2 %vm430_vm2, %v3613_v49 }
0x1fe9   :  { %v5205_v6 = vmul.f32 -1.442695, %v3573_v4 }
0x1feb   :  { %5619 = vpow2.f32 %v5205_v6 }
0x1fee   :  { %v3724_v62 = vpop.f32.mrf.mxu3 }
0x1fef   :  { %3730 = vst.msk [vmem:[#allocation3] sm:$0xff] %vm281_vm1, %v3724_v62 }
0x1ff1   :  { %v5620_v12 = vpop.eup %5619 }
0x1ff2   :  { %v3582_v25 = vadd.f32 1.0, %v5620_v12 }
0x1ff4   :  { %5621 = vrcp.f32 %v3582_v25  ;;  %v3609_v37 = vand.u32 2147483648, %v3582_v25  ;;  %v3607_v7 = vand.u32 2147483647, %v3582_v25  ;;  %vm3603_vm8 = vweird.f32 %v3582_v25 }
0x1ff6   :  { %v3727_v13 = vpop.f32.mrf.mxu3  ;;  %v7060_v11 = vld [vmem:[#allocation3] sm:$0xff]  ;;  %v3610_v46 = vor.u32 1.1754944e-38, %v3609_v37  ;;  %vm3608_vm11 = vcmp.eq.f32.partialorder %v3607_v7, 8.507059e+37 }
0x1ff7   :  { %3731 = vst.msk [vmem:[#allocation3 + $0x8] sm:$0xff] %vm281_vm1, %v3727_v13  ;;  %v3778_v60 = vsel %vm430_vm2, %v7060_v11, 0.0 }
0x1ffa   :  { %v5622_v41 = vpop.eup %5621 }
0x1ffb   :  { %v3599_v14 = vmul.f32 %v5622_v41, %v3582_v25  ;;  %vm3604_vm15 = vweird.f32 %v5622_v41 }
0x1ffc   :  { %vm3605_vm9 = vmor %vm3603_vm8, %vm3604_vm15 }
0x1ffd   :  { %v3600_v58 = vsub.f32 1.0, %v3599_v14 }
0x1ffe   :  { %v7064_v29 = vld [vmem:[#allocation3 + $0x8] sm:$0xff] }
0x1fff   :  { %v3601_v24 = vmul.f32 %v5622_v41, %v3600_v58  ;;  %v3779_v26 = vsel %vm430_vm2, %v7064_v29, 0.0 }
0x2000   :  { %v3780_v56 = vadd.f32 %v3779_v26, %v3778_v60 }
0x2001   :  { %v3602_v57 = vadd.f32 %v5622_v41, %v3601_v24 }
0x2002   :  { %3781 = vadd.xlane.f32.xlu0 %v3780_v56 }
0x2003   :  { %v3606_v32 = vsel %vm3605_vm9, %v5622_v41, %v3602_v57 }
0x2004   :  { %v3611_v22 = vsel %vm3608_vm11, %v3610_v46, %v3606_v32 }
0x2005   :  { %v3614_v15 = vmul.f32 %v3611_v22, %v3573_v4 }
0x2007   :  { %5207 = vmatmul.msk.f32.gmra.mxu2 %vm430_vm2, %v3614_v15 }
0x206a   :  { %v3646_v47 = vpop.f32.mrf.mxu2 }
0x206b   :  { %v3647_v50 = vadd.f32 %v5398_v10, %v3646_v47 }
0x206d   :  { %v3652_v44 = vadd.f32 %v3647_v50, %v6717_v30  ;;  %v3514_v30 = vpop.permute.xlu1 %3513 }
0x206e   :  { %v3517_v63 = vmul.f32 %v3514_v30, %v7035_v0 }
0x206f   :  { %3654 = vst.msk [vmem:[%s5768_s9] sm:$0xff] %vm430_vm2, %v3652_v44 }
0x2070   :  { %3658 = vst.msk [vmem:[%s5768_s9] sm:$0xff] %vm1061_vm10, %v3656_v51  ;;  %v3657_v55 = vadd.f32 %v6730_v20, %v3517_v63 }
0x2075   :  { %v3782_v52 = vpop.xlane.xlu0 %3781 }
0x2076   :  { %v3783_v61 = vrot.slane %v3782_v52, 4 }
0x2077   :  { %v3662_v0 = vld [vmem:[%s5768_s9] sm:$0xff] }
0x2078   :  { %v3784_v18 = vadd.f32 %v3783_v61, %v3782_v52 }
0x207a   :  { %v3785_v31 = vrot.slane %v3784_v18, 2 }
0x207c   :  { %v3786_v53 = vadd.f32 %v3785_v31, %v3784_v18 }
0x207e   :  { %v3787_v3 = vrot.slane %v3786_v53, 1 }
0x2080   :  { %v3788_v1 = vadd.f32 %v3787_v3, %v3786_v53 }
0x2082   :  { %5290 = vpush %v3788_v1 }
0x208a   :  { %v3649_v35 = vpop.f32.mrf.mxu2 }
0x208b   :  { %v3650_v39 = vadd.f32 %v5398_v10, %v3649_v35 }
0x208d   :  { %v3653_v48 = vadd.f32 %v3650_v39, %v6730_v20  ;;  %v4042_v20 = vld [vmem:[%s7469_s1 + $0x10] sm:$0xff]  ;;  %s7492_s1 = sld [smem:[#allocation30_spill]] }
0x208f   :  { %3655 = vst.msk [vmem:[%s5768_s9 + $0x8] sm:$0xff] %vm430_vm2, %v3653_v48 }
0x2090   :  { %3659 = vst.msk [vmem:[%s5768_s9 + $0x8] sm:$0xff] %vm1061_vm10, %v3657_v55 }
0x2097   :  { %v3663_v40 = vld [vmem:[%s5768_s9 + $0x8] sm:$0xff] }
0x2098   :  { %v7086_v27 = vld [vmem:[%s5768_s9 + $0x8] sm:$0xff]  ;;  %3684 = vmatpush.msra.mxu1 %v3663_v40 }
0x2099   :  { %4893 = vst.msk [vmem:[#allocation7 + $0x8] sm:$0xff] %vm430_vm2, %v7086_v27 }
0x209a   :  { %3685 = vmatpush.msra.mxu1 %v3662_v0 }
0x209b   :  { %5208 = vmatmul.msk.f32.vlgmr.msra.gmra.mxu1 %vm239_vm0, %v3660_v23 }
0x209c   :  { %4066 = vmatpush.msrb.mxu1 %v4043_v42 }
0x209e   :  { %4067 = vmatpush.msrb.mxu1 %v4042_v20 }
0x20a0   :  { %4068 = vmatpush.msrb.mxu1 %v4041_v43 }
0x20a2   :  { %4069 = vmatpush.msrb.mxu1 %v4040_v45 }
0x20a3   :  { %5209 = vmatmul.msk.f32.gmra.mxu1 %vm239_vm0, %v3661_v38 }
0x20a4   :  { %4377 = vmatpush.msra.mxu1 %v3663_v40 }
0x20a6   :  { %4378 = vmatpush.msra.mxu1 %v3662_v0 }
0x20b3   :  { %s5291_s5 = spop %5290 }
0x20b4   :  { %v3790_v33 = vstv %s5291_s5  ;;  %s7493_s5 = sld [smem:[#allocation32_spill]] }
0x20b5   :  { %v3791_v21 = vmul.f32 %v3790_v33, %v6270_v34 }
0x20b7   :  { %v3792_v8 = vsub.f32 %v7060_v11, %v3791_v21  ;;  %v3793_v54 = vsub.f32 %v7064_v29, %v3791_v21 }
0x20b9   :  { %v3794_v17 = vmul.f32 %v3792_v8, %v3792_v8  ;;  %v3795_v2 = vmul.f32 %v3793_v54, %v3793_v54 }
0x20bb   :  { %v3796_v5 = vsel %vm430_vm2, %v3794_v17, 0.0  ;;  %v3797_v19 = vsel %vm430_vm2, %v3795_v2, 0.0 }
0x20bc   :  { %v3798_v9 = vadd.f32 %v3797_v19, %v3796_v5 }
0x20be   :  { %3799 = vadd.xlane.f32.xlu1 %v3798_v9 }
0x2118   :  { %v3687_v49 = vpop.f32.mrf.mxu1 }
0x2119   :  { %3693 = vst.msk [vmem:[#allocation2] sm:$0xff] %vm281_vm1, %v3687_v49 }
0x2120   :  { %v3690_v59 = vpop.f32.mrf.mxu1  ;;  %v7106_v4 = vld [vmem:[#allocation2] sm:$0xff] }
0x2121   :  { %3694 = vst.msk [vmem:[#allocation2 + $0x8] sm:$0xff] %vm281_vm1, %v3690_v59  ;;  %v3841_v62 = vsel %vm430_vm2, %v7106_v4, 0.0  ;;  %v7124_v2 = vsub.f32 %v7060_v11, %v7106_v4 }
0x2123   :  { %v3738_v5 = vmul.f32 %v7124_v2, %v7124_v2 }
0x2128   :  { %v7108_v6 = vld [vmem:[#allocation2 + $0x8] sm:$0xff] }
0x2129   :  { %v3842_v12 = vsel %vm430_vm2, %v7108_v6, 0.0  ;;  %v7131_v19 = vsub.f32 %v7064_v29, %v7108_v6 }
0x212a   :  { %v3843_v25 = vadd.f32 %v3842_v12, %v3841_v62 }
0x212b   :  { %v3739_v9 = vmul.f32 %v7131_v19, %v7131_v19 }
0x212c   :  { %3844 = vadd.xlane.f32.xlu2 %v3843_v25 }
0x2131   :  { %v3800_v13 = vpop.xlane.xlu1 %3799 }
0x2132   :  { %v3801_v41 = vrot.slane %v3800_v13, 4 }
0x2134   :  { %v3802_v14 = vadd.f32 %v3801_v41, %v3800_v13 }
0x2136   :  { %v3803_v58 = vrot.slane %v3802_v14, 2 }
0x2138   :  { %v3804_v60 = vadd.f32 %v3803_v58, %v3802_v14 }
0x213a   :  { %v3805_v37 = vrot.slane %v3804_v60, 1 }
0x213c   :  { %v3806_v24 = vadd.f32 %v3805_v37, %v3804_v60 }
0x213e   :  { %5292 = vpush %v3806_v24 }
0x216f   :  { %s5293_s10 = spop %5292 }
0x2170   :  { %v3808_v7 = vstv %s5293_s10  ;;  %s7494_s10 = sld [smem:[#allocation33_spill]] }
0x2171   :  { %v3809_v26 = vmul.f32 %v3808_v7, %v6270_v34 }
0x2173   :  { %5623 = vrsqrt.f32 %v3809_v26  ;;  %vm3817_vm12 = vcmp.eq.f32.partialorder %v3809_v26, inf  ;;  %v3820_v10 = vand.u32 2147483648, %v3809_v26  ;;  %vm3819_vm13 = vcmp.eq.f32.partialorder %v3809_v26, 0.0 }
0x2179   :  { %v5624_v56 = vpop.eup %5623 }
0x217a   :  { %v3811_v57 = vmul.f32 %v5624_v56, %v3809_v26 }
0x217c   :  { %v3812_v46 = vmul.f32 %v5624_v56, %v3811_v57 }
0x217e   :  { %v3813_v32 = vmul.f32 0.5, %v3812_v46 }
0x2180   :  { %v3814_v22 = vsub.f32 1.5, %v3813_v32 }
0x2182   :  { %v3815_v15 = vmul.f32 %v5624_v56, %v3814_v22 }
0x2184   :  { %v3816_v16 = vmul.f32 %v3815_v15, %v3809_v26 }
0x2186   :  { %v3818_v28 = vsel %vm3817_vm12, %v3809_v26, %v3816_v16 }
0x2187   :  { %v3821_v47 = vsel %vm3819_vm13, %v3820_v10, %v3818_v28 }
0x2188   :  { %v3822_v50 = vadd.f32 1e-05, %v3821_v47 }
0x218a   :  { %5625 = vrcp.f32 %v3822_v50  ;;  %v3834_v61 = vand.u32 2147483648, %v3822_v50  ;;  %v3832_v31 = vand.u32 2147483647, %v3822_v50  ;;  %vm3828_vm15 = vweird.f32 %v3822_v50 }
0x218c   :  { %v3835_v3 = vor.u32 1.1754944e-38, %v3834_v61  ;;  %vm3833_vm9 = vcmp.eq.f32.partialorder %v3832_v31, 8.507059e+37 }
0x2190   :  { %v5626_v44 = vpop.eup %5625 }
0x2191   :  { %v3824_v51 = vmul.f32 %v5626_v44, %v3822_v50  ;;  %vm3829_vm6 = vweird.f32 %v5626_v44 }
0x2192   :  { %vm3830_vm8 = vmor %vm3828_vm15, %vm3829_vm6 }
0x2193   :  { %v3825_v52 = vsub.f32 1.0, %v3824_v51 }
0x2195   :  { %v3826_v18 = vmul.f32 %v5626_v44, %v3825_v52 }
0x2197   :  { %v3827_v53 = vadd.f32 %v5626_v44, %v3826_v18 }
0x2199   :  { %v3831_v1 = vsel %vm3830_vm8, %v5626_v44, %v3827_v53 }
0x219a   :  { %v3836_v30 = vsel %vm3833_vm9, %v3835_v3, %v3831_v1  ;;  %v3921_v3 = vld [vmem:[%s7470_s24 + $0x38] sm:$0xff]  ;;  %v3920_v1 = vld [vmem:[%s7470_s24 + $0x30] sm:$0xff] }
0x219b   :  { %v3838_v63 = vmul.f32 %v3836_v30, %v3793_v54  ;;  %v3837_v35 = vmul.f32 %v3836_v30, %v3792_v8  ;;  %3942 = vmatpush.msra.mxu2 %v3921_v3  ;;  %v3919_v30 = vld [vmem:[%s7470_s24 + $0x28] sm:$0xff] }
0x219d   :  { %3840 = vst.msk [vmem:[#allocation4 + $0x8] sm:$0xff] %vm430_vm2, %v3838_v63  ;;  %3943 = vmatpush.msra.mxu2 %v3920_v1  ;;  %v3918_v63 = vld [vmem:[%s7470_s24 + $0x20] sm:$0xff] }
0x219e   :  { %3839 = vst.msk [vmem:[#allocation4] sm:$0xff] %vm430_vm2, %v3837_v35  ;;  %v3917_v35 = vld [vmem:[%s7470_s24 + $0x18] sm:$0xff] }
0x219f   :  { %v3845_v39 = vpop.xlane.xlu2 %3844  ;;  %3944 = vmatpush.msra.mxu2 %v3919_v30 }
0x21a0   :  { %v3846_v48 = vrot.slane %v3845_v39, 4 }
0x21a1   :  { %3945 = vmatpush.msra.mxu2 %v3918_v63 }
0x21a2   :  { %v3847_v55 = vadd.f32 %v3846_v48, %v3845_v39  ;;  %v3916_v39 = vld [vmem:[%s7470_s24 + $0x10] sm:$0xff]  ;;  %v3915_v48 = vld [vmem:[%s7470_s24 + $0x8] sm:$0xff] }
0x21a3   :  { %3946 = vmatpush.msra.mxu2 %v3917_v35 }
0x21a4   :  { %v3848_v40 = vrot.slane %v3847_v55, 2 }
0x21a5   :  { %3947 = vmatpush.msra.mxu2 %v3916_v39 }
0x21a6   :  { %v3849_v23 = vadd.f32 %v3848_v40, %v3847_v55  ;;  %v3914_v55 = vld [vmem:[%s7470_s24] sm:$0xff]  ;;  %s7497_s24 = sld [smem:[#allocation35_spill]] }
0x21a7   :  { %3948 = vmatpush.msra.mxu2 %v3915_v48 }
0x21a8   :  { %v3850_v0 = vrot.slane %v3849_v23, 1 }
0x21a9   :  { %3949 = vmatpush.msra.mxu2 %v3914_v55 }
0x21aa   :  { %v3851_v42 = vadd.f32 %v3850_v0, %v3849_v23 }
0x21ac   :  { %5294 = vpush %v3851_v42 }
0x21dd   :  { %s5295_s15 = spop %5294 }
0x21de   :  { %v3853_v20 = vstv %s5295_s15  ;;  %s7495_s15 = sld [smem:[#allocation31_spill]] }
0x21df   :  { %v3854_v43 = vmul.f32 %v3853_v20, %v6270_v34 }
0x21e1   :  { %v3855_v45 = vsub.f32 %v7106_v4, %v3854_v43  ;;  %v3856_v38 = vsub.f32 %v7108_v6, %v3854_v43 }
0x21e3   :  { %v3857_v33 = vmul.f32 %v3855_v45, %v3855_v45  ;;  %v3858_v21 = vmul.f32 %v3856_v38, %v3856_v38 }
0x21e5   :  { %v3859_v8 = vsel %vm430_vm2, %v3857_v33, 0.0  ;;  %v3860_v54 = vsel %vm430_vm2, %v3858_v21, 0.0 }
0x21e6   :  { %v3861_v17 = vadd.f32 %v3860_v54, %v3859_v8 }
0x21e8   :  { %3862 = vadd.xlane.f32.xlu0 %v3861_v17 }
0x21fc   :  { %3742 = vrot.lane.b32.xlu0 %v3738_v5, %s7452_s27 }
0x2204   :  { %3744 = vrot.lane.b32.xlu0 %v3739_v9, %s7452_s27 }
0x225b   :  { %v3863_v49 = vpop.xlane.xlu0 %3862 }
0x225c   :  { %v3864_v59 = vrot.slane %v3863_v49, 4 }
0x225e   :  { %v3865_v62 = vadd.f32 %v3864_v59, %v3863_v49 }
0x2260   :  { %v3866_v12 = vrot.slane %v3865_v62, 2 }
0x2262   :  { %v3867_v11 = vadd.f32 %v3866_v12, %v3865_v62 }
0x2264   :  { %v3868_v4 = vrot.slane %v3867_v11, 1 }
0x2266   :  { %v3869_v25 = vadd.f32 %v3868_v4, %v3867_v11 }
0x2268   :  { %5296 = vpush %v3869_v25  ;;  %v5399_v25 = vld [vmem:[%s7471_s2] ss:$0 sm:$0xff]  ;;  %s7498_s2 = sld [smem:[#allocation36_spill]] }
0x226e   :  { %v3743_v61 = vpop.permute.xlu0 %3742 }
0x226f   :  { %v3748_v31 = vsel %vm369_vm5, %v3743_v61, 0.0 }
0x2276   :  { %v3745_v18 = vpop.permute.xlu0 %3744 }
0x2277   :  { %v3751_v53 = vsel %vm369_vm5, %v3745_v18, 0.0 }
0x2299   :  { %s5297_s20 = spop %5296 }
0x229a   :  { %v3871_v13 = vstv %s5297_s20  ;;  %s7496_s20 = sld [smem:[#allocation34_spill]] }
0x229b   :  { %v3872_v41 = vmul.f32 %v3871_v13, %v6270_v34 }
0x229d   :  { %5627 = vrsqrt.f32 %v3872_v41  ;;  %vm3880_vm11 = vcmp.eq.f32.partialorder %v3872_v41, inf  ;;  %v3883_v7 = vand.u32 2147483648, %v3872_v41  ;;  %vm3882_vm12 = vcmp.eq.f32.partialorder %v3872_v41, 0.0 }
0x22a3   :  { %v5628_v29 = vpop.eup %5627 }
0x22a4   :  { %v3874_v6 = vmul.f32 %v5628_v29, %v3872_v41 }
0x22a6   :  { %v3875_v14 = vmul.f32 %v5628_v29, %v3874_v6  ;;  %v5400_v6 = vld [vmem:[%s7472_s14] ss:$0 sm:$0xff]  ;;  %s7499_s14 = sld [smem:[#allocation37_spill]] }
0x22a8   :  { %v3876_v58 = vmul.f32 0.5, %v3875_v14  ;;  %v4006_v14 = vld [vmem:[%s7473_s21 + $0x18] sm:$0xff] }
0x22a9   :  { %4029 = vmatpush.msra.mxu0 %v4006_v14 }
0x22aa   :  { %v3877_v60 = vsub.f32 1.5, %v3876_v58 }
0x22ac   :  { %v3878_v37 = vmul.f32 %v5628_v29, %v3877_v60 }
0x22ae   :  { %v3879_v24 = vmul.f32 %v3878_v37, %v3872_v41 }
0x22b0   :  { %v3881_v26 = vsel %vm3880_vm11, %v3872_v41, %v3879_v24  ;;  %v4005_v24 = vld [vmem:[%s7473_s21 + $0x10] sm:$0xff] }
0x22b1   :  { %v3884_v56 = vsel %vm3882_vm12, %v3883_v7, %v3881_v26  ;;  %4030 = vmatpush.msra.mxu0 %v4005_v24 }
0x22b2   :  { %v3885_v57 = vadd.f32 1e-05, %v3884_v56  ;;  %v4004_v56 = vld [vmem:[%s7473_s21 + $0x8] sm:$0xff] }
0x22b3   :  { %4031 = vmatpush.msra.mxu0 %v4004_v56 }
0x22b4   :  { %5629 = vrcp.f32 %v3885_v57  ;;  %v3897_v15 = vand.u32 2147483648, %v3885_v57  ;;  %v3895_v10 = vand.u32 2147483647, %v3885_v57  ;;  %vm3891_vm6 = vweird.f32 %v3885_v57 }
0x22b6   :  { %v3898_v47 = vor.u32 1.1754944e-38, %v3897_v15  ;;  %vm3896_vm8 = vcmp.eq.f32.partialorder %v3895_v10, 8.507059e+37 }
0x22ba   :  { %v5630_v46 = vpop.eup %5629 }
0x22bb   :  { %v3887_v32 = vmul.f32 %v5630_v46, %v3885_v57  ;;  %vm3892_vm13 = vweird.f32 %v5630_v46 }
0x22bc   :  { %vm3893_vm15 = vmor %vm3891_vm6, %vm3892_vm13 }
0x22bd   :  { %v3888_v22 = vsub.f32 1.0, %v3887_v32  ;;  %v4003_v32 = vld [vmem:[%s7473_s21] sm:$0xff]  ;;  %s7500_s21 = sld [smem:[#allocation38_spill]] }
0x22be   :  { %4032 = vmatpush.msra.mxu0 %v4003_v32 }
0x22bf   :  { %v3889_v16 = vmul.f32 %v5630_v46, %v3888_v22 }
0x22c1   :  { %v3890_v28 = vadd.f32 %v5630_v46, %v3889_v16 }
0x22c3   :  { %v3894_v50 = vsel %vm3893_vm15, %v5630_v46, %v3890_v28 }
0x22c4   :  { %v3899_v44 = vsel %vm3896_vm8, %v3898_v47, %v3894_v50 }
0x22c5   :  { %v3901_v51 = vmul.f32 %v3899_v44, %v3856_v38  ;;  %v3900_v52 = vmul.f32 %v3899_v44, %v3855_v45 }
0x22c7   :  { %3906 = vrot.lane.b32.xlu2 %v3901_v51, %s7446_s28  ;;  %3904 = vrot.lane.b32.xlu1 %v3900_v52, %s7446_s28 }
0x22f0   :  { %3749 = vadd.xlane.f32.xlu2 %v3748_v31 }
0x22f1   :  { %3752 = vadd.xlane.f32.xlu1 %v3751_v53 }
0x2321   :  { %v3907_v40 = vpop.permute.xlu2 %3906 }
0x2322   :  { %3911 = vst.msk [vmem:[#allocation4 + $0x8] sm:$0xff] %vm608_vm3, %v3907_v40 }
0x2329   :  { %v3913_v42 = vld [vmem:[#allocation4 + $0x8] sm:$0xff] }
0x2339   :  { %v3905_v23 = vpop.permute.xlu1 %3904 }
0x233a   :  { %3910 = vst.msk [vmem:[#allocation4] sm:$0xff] %vm608_vm3, %v3905_v23 }
0x2341   :  { %v3912_v0 = vld [vmem:[#allocation4] sm:$0xff] }
0x2342   :  { %5213 = vmatmul.msk.f32.vlgmr.msra.gmra.mxu2 %vm633_vm4, %v3912_v0 }
0x234a   :  { %5214 = vmatmul.msk.f32.gmra.mxu2 %vm633_vm4, %v3913_v42 }
0x2363   :  { %v3750_v20 = vpop.xlane.xlu2 %3749 }
0x2364   :  { %5631 = vrsqrt.f32 %v3750_v20  ;;  %v3753_v43 = vpop.xlane.xlu1 %3752  ;;  %vm3761_vm9 = vcmp.eq.f32.partialorder %v3750_v20, inf  ;;  %v3764_v4 = vand.u32 2147483648, %v3750_v20  ;;  %vm3763_vm11 = vcmp.eq.f32.partialorder %v3750_v20, 0.0 }
0x2365   :  { %5633 = vrsqrt.f32 %v3753_v43  ;;  %vm3773_vm12 = vcmp.eq.f32.partialorder %v3753_v43, inf  ;;  %v3776_v7 = vand.u32 2147483648, %v3753_v43  ;;  %vm3775_vm13 = vcmp.eq.f32.partialorder %v3753_v43, 0.0 }
0x236a   :  { %v5632_v45 = vpop.eup %5631 }
0x236b   :  { %v3755_v38 = vmul.f32 %v5632_v45, %v3750_v20  ;;  %v5634_v21 = vpop.eup %5633 }
0x236c   :  { %v3767_v8 = vmul.f32 %v5634_v21, %v3753_v43 }
0x236d   :  { %v3756_v33 = vmul.f32 %v5632_v45, %v3755_v38 }
0x236e   :  { %v3768_v5 = vmul.f32 %v5634_v21, %v3767_v8 }
0x236f   :  { %v3757_v54 = vmul.f32 0.5, %v3756_v33 }
0x2370   :  { %v3769_v49 = vmul.f32 0.5, %v3768_v5 }
0x2371   :  { %v3758_v17 = vsub.f32 1.5, %v3757_v54 }
0x2372   :  { %v3770_v62 = vsub.f32 1.5, %v3769_v49 }
0x2373   :  { %v3759_v9 = vmul.f32 %v5632_v45, %v3758_v17 }
0x2374   :  { %v3771_v11 = vmul.f32 %v5634_v21, %v3770_v62  ;;  %v5401_v21 = vld [vmem:[%s7474_s29] ss:$0 sm:$0xff] }
0x2375   :  { %v3760_v59 = vmul.f32 %v3759_v9, %v3750_v20  ;;  %v5402_v9 = vld [vmem:[%s7475_s6] ss:$0 sm:$0xff] }
0x2376   :  { %v3772_v41 = vmul.f32 %v3771_v11, %v3753_v43 }
0x2377   :  { %v3762_v12 = vsel %vm3761_vm9, %v3750_v20, %v3760_v59 }
0x2378   :  { %v7154_v13 = vsel %vm3763_vm11, %v3764_v4, %v3762_v12  ;;  %v3774_v37 = vsel %vm3773_vm12, %v3753_v43, %v3772_v41 }
0x2379   :  { %v3926_v29 = vmul.f32 %v5399_v25, %v7154_v13  ;;  %v7161_v57 = vsel %vm3775_vm13, %v3776_v7, %v3774_v37 }
0x237a   :  { %v3927_v22 = vmul.f32 %v5399_v25, %v7161_v57 }
0x23c5   :  { %v3951_v58 = vpop.f32.mrf.mxu2 }
0x23c6   :  { %v3952_v60 = vadd.f32 %v3951_v58, %v3926_v29 }
0x23c8   :  { %v3961_v26 = vadd.f32 %v5400_v6, %v3952_v60 }
0x23ca   :  { %v5215_v46 = vmul.f32 -1.442695, %v3961_v26 }
0x23cc   :  { %5635 = vpow2.f32 %v5215_v46 }
0x23cd   :  { %v3954_v15 = vpop.f32.mrf.mxu2 }
0x23ce   :  { %v3955_v16 = vadd.f32 %v3954_v15, %v3927_v22  ;;  %v5403_v15 = vld [vmem:[%s7476_s3] ss:$0 sm:$0xff] }
0x23d0   :  { %v3962_v10 = vadd.f32 %v5400_v6, %v3955_v16 }
0x23d2   :  { %v5636_v28 = vpop.eup %5635  ;;  %v5216_v47 = vmul.f32 -1.442695, %v3962_v10 }
0x23d3   :  { %v3969_v50 = vadd.f32 1.0, %v5636_v28 }
0x23d4   :  { %5637 = vpow2.f32 %v5216_v47 }
0x23d5   :  { %5639 = vrcp.f32 %v3969_v50  ;;  %v3982_v31 = vand.u32 2147483648, %v3969_v50  ;;  %v3980_v3 = vand.u32 2147483647, %v3969_v50  ;;  %vm3976_vm15 = vweird.f32 %v3969_v50 }
0x23d7   :  { %v3983_v63 = vor.u32 1.1754944e-38, %v3982_v31  ;;  %vm3981_vm9 = vcmp.eq.f32.partialorder %v3980_v3, 8.507059e+37 }
0x23da   :  { %v5638_v44 = vpop.eup %5637 }
0x23db   :  { %v5640_v51 = vpop.eup %5639  ;;  %v3970_v52 = vadd.f32 1.0, %v5638_v44 }
0x23dc   :  { %v3972_v61 = vmul.f32 %v5640_v51, %v3969_v50  ;;  %vm3977_vm6 = vweird.f32 %v5640_v51 }
0x23dd   :  { %5641 = vrcp.f32 %v3970_v52  ;;  %vm3978_vm8 = vmor %vm3976_vm15, %vm3977_vm6  ;;  %v3997_v23 = vand.u32 2147483648, %v3970_v52  ;;  %v3995_v42 = vand.u32 2147483647, %v3970_v52  ;;  %vm3991_vm12 = vweird.f32 %v3970_v52 }
0x23de   :  { %v3973_v18 = vsub.f32 1.0, %v3972_v61 }
0x23df   :  { %v3998_v43 = vor.u32 1.1754944e-38, %v3997_v23  ;;  %vm3996_vm6 = vcmp.eq.f32.partialorder %v3995_v42, 8.507059e+37  ;;  %v4135_v23 = vmax.f32 %v7154_v13, 1e-08 }
0x23e0   :  { %v3974_v53 = vmul.f32 %v5640_v51, %v3973_v18 }
0x23e2   :  { %v3975_v1 = vadd.f32 %v5640_v51, %v3974_v53 }
0x23e3   :  { %v5642_v30 = vpop.eup %5641 }
0x23e4   :  { %v3979_v35 = vsel %vm3978_vm8, %v5640_v51, %v3975_v1  ;;  %v3987_v39 = vmul.f32 %v5642_v30, %v3970_v52  ;;  %vm3992_vm11 = vweird.f32 %v5642_v30 }
0x23e5   :  { %v3984_v48 = vsel %vm3981_vm9, %v3983_v63, %v3979_v35  ;;  %vm3993_vm13 = vmor %vm3991_vm12, %vm3992_vm11  ;;  %v5404_v63 = vld [vmem:[#allocation9] ss:$0 sm:$0xff] }
0x23e6   :  { %v4001_v55 = vmul.f32 %v3984_v48, %v3961_v26  ;;  %v3988_v40 = vsub.f32 1.0, %v3987_v39 }
0x23e8   :  { %v3989_v0 = vmul.f32 %v5642_v30, %v3988_v40  ;;  %5217 = vmatmul.msk.f32.vlgmr.msra.gmra.mxu0 %vm430_vm2, %v4001_v55  ;;  %v4211_v40 = vld [vmem:[%s7477_s11] sm:$0x3] }
0x23ea   :  { %v3990_v20 = vadd.f32 %v5642_v30, %v3989_v0 }
0x23ec   :  { %v3994_v45 = vsel %vm3993_vm13, %v5642_v30, %v3990_v20 }
0x23ed   :  { %v3999_v38 = vsel %vm3996_vm6, %v3998_v43, %v3994_v45 }
0x23ee   :  { %v4002_v33 = vmul.f32 %v3999_v38, %v3962_v10  ;;  %v4148_v38 = vand.u32 2147483648, %v4135_v23 }
0x23f0   :  { %5218 = vmatmul.msk.f32.gmra.mxu0 %vm430_vm2, %v4002_v33  ;;  %v4146_v33 = vand.u32 2147483647, %v4135_v23 }
0x2465   :  { %v4034_v8 = vpop.f32.mrf.mxu0 }
0x2466   :  { %v4035_v54 = vadd.f32 %v5401_v21, %v4034_v8  ;;  %v4149_v8 = vor.u32 1.1754944e-38, %v4148_v38 }
0x2468   :  { %4179 = vst.msk [vmem:[#allocation5] sm:$0xff] %vm430_vm2, %v4035_v54  ;;  %5219 = vmatmul.msk.f32.vlgmr.msrb.gmra.mxu1 %vm430_vm2, %v4035_v54  ;;  %v4136_v54 = vmax.f32 %v7161_v57, 1e-08 }
0x246a   :  { %v4163_v57 = vand.u32 2147483648, %v4136_v54 }
0x246d   :  { %v4037_v17 = vpop.f32.mrf.mxu0 }
0x246e   :  { %v4038_v5 = vadd.f32 %v5401_v21, %v4037_v17 }
0x2470   :  { %4180 = vst.msk [vmem:[#allocation5 + $0x8] sm:$0xff] %vm430_vm2, %v4038_v5  ;;  %5220 = vmatmul.msk.f32.gmra.mxu1 %vm430_vm2, %v4038_v5 }
0x24e5   :  { %v4071_v49 = vpop.f32.mrf.mxu1 }
0x24e6   :  { %v4072_v59 = vadd.f32 %v5402_v9, %v4071_v49 }
0x24e8   :  { %v5221_v62 = vmul.f32 -1.442695, %v4072_v59 }
0x24ea   :  { %5643 = vpow2.f32 %v5221_v62 }
0x24ed   :  { %v4074_v12 = vpop.f32.mrf.mxu1 }
0x24ee   :  { %v4075_v11 = vadd.f32 %v5402_v9, %v4074_v12  ;;  %v4353_v12 = vld [vmem:[%s7478_s19] sm:$0xff] }
0x24ef   :  { %5230 = vmatmul.msk.f32.vlgmr.msra.gmra.mxu1 %vm239_vm0, %v4353_v12 }
0x24f0   :  { %v5644_v4 = vpop.eup %5643  ;;  %v5222_v25 = vmul.f32 -1.442695, %v4075_v11 }
0x24f1   :  { %v4083_v41 = vadd.f32 1.0, %v5644_v4  ;;  %v4354_v4 = vld [vmem:[%s7478_s19 + $0x8] sm:$0xff] }
0x24f2   :  { %5645 = vpow2.f32 %v5222_v25 }
0x24f3   :  { %5647 = vrcp.f32 %v4083_v41  ;;  %v4096_v37 = vand.u32 2147483648, %v4083_v41  ;;  %v4094_v7 = vand.u32 2147483647, %v4083_v41  ;;  %vm4090_vm8 = vweird.f32 %v4083_v41 }
0x24f5   :  { %v4097_v46 = vor.u32 1.1754944e-38, %v4096_v37  ;;  %vm4095_vm11 = vcmp.eq.f32.partialorder %v4094_v7, 8.507059e+37 }
0x24f7   :  { %5231 = vmatmul.msk.f32.gmra.mxu1 %vm239_vm0, %v4354_v4 }
0x24f8   :  { %v5646_v29 = vpop.eup %5645 }
0x24f9   :  { %v5648_v6 = vpop.eup %5647  ;;  %v4084_v14 = vadd.f32 1.0, %v5646_v29  ;;  %v4164_v29 = vor.u32 1.1754944e-38, %v4163_v57 }
0x24fa   :  { %v4086_v58 = vmul.f32 %v5648_v6, %v4083_v41  ;;  %vm4091_vm15 = vweird.f32 %v5648_v6  ;;  %v4161_v41 = vand.u32 2147483647, %v4136_v54 }
0x24fb   :  { %5649 = vrcp.f32 %v4084_v14  ;;  %vm4092_vm9 = vmor %vm4090_vm8, %vm4091_vm15  ;;  %v4111_v47 = vand.u32 2147483648, %v4084_v14  ;;  %v4109_v44 = vand.u32 2147483647, %v4084_v14  ;;  %vm4105_vm13 = vweird.f32 %v4084_v14 }
0x24fc   :  { %v4087_v60 = vsub.f32 1.0, %v4086_v58  ;;  %5651 = vrcp.f32 %v4135_v23 }
0x24fd   :  { %v4112_v18 = vor.u32 1.1754944e-38, %v4111_v47  ;;  %vm4110_vm15 = vcmp.eq.f32.partialorder %v4109_v44, 8.507059e+37  ;;  %5653 = vrcp.f32 %v4136_v54 }
0x24fe   :  { %v4088_v24 = vmul.f32 %v5648_v6, %v4087_v60 }
0x2500   :  { %v4089_v26 = vadd.f32 %v5648_v6, %v4088_v24  ;;  %v4183_v24 = vld [vmem:[%s7479_s4] sm:$0x3] }
0x2501   :  { %v5650_v56 = vpop.eup %5649 }
0x2502   :  { %v4093_v32 = vsel %vm4092_vm9, %v5648_v6, %v4089_v26  ;;  %v4101_v22 = vmul.f32 %v5650_v56, %v4084_v14  ;;  %vm4106_vm12 = vweird.f32 %v5650_v56  ;;  %v5652_v0 = vpop.eup %5651  ;;  %vm4142_vm9 = vweird.f32 %v4135_v23 }
0x2503   :  { %v4098_v16 = vsel %vm4095_vm11, %v4097_v46, %v4093_v32  ;;  %vm4107_vm6 = vmor %vm4105_vm13, %vm4106_vm12  ;;  %v4138_v42 = vmul.f32 %v5652_v0, %v4135_v23  ;;  %vm4143_vm8 = vweird.f32 %v5652_v0  ;;  %vm4147_vm12 = vcmp.eq.f32.partialorder %v4146_v33, 8.507059e+37  ;;  %v5654_v49 = vpop.eup %5653  ;;  %v4233_v32 = vld [vmem:[%s7480_s16 + $0x38] sm:$0xff] }
0x2504   :  { %v4115_v10 = vmul.f32 %v4098_v16, %v4072_v59  ;;  %v4102_v28 = vsub.f32 1.0, %v4101_v22  ;;  %vm4144_vm11 = vmor %vm4142_vm9, %vm4143_vm8  ;;  %v4153_v59 = vmul.f32 %v5654_v49, %v4136_v54  ;;  %vm4158_vm13 = vweird.f32 %v5654_v49  ;;  %v4232_v22 = vld [vmem:[%s7480_s16 + $0x30] sm:$0xff]  ;;  %4249 = vmatpush.msrb.mxu2 %v4233_v32  ;;  %v4230_v16 = vld [vmem:[%s7480_s16 + $0x20] sm:$0xff] }
0x2505   :  { %v4139_v20 = vsub.f32 1.0, %v4138_v42  ;;  %vm4162_vm8 = vcmp.eq.f32.partialorder %v4161_v41, 8.507059e+37  ;;  %vm7481_vm9 = vcmask 279552  }
0x2506   :  { %v4103_v50 = vmul.f32 %v5650_v56, %v4102_v28  ;;  %v4121_v51 = vmul.f32 %v5403_v15, %v4115_v10  ;;  %v4154_v62 = vsub.f32 1.0, %v4153_v59  ;;  %4250 = vmatpush.msrb.mxu2 %v4232_v22 }
0x2507   :  { %v4140_v43 = vmul.f32 %v5652_v0, %v4139_v20 }
0x2508   :  { %v4104_v52 = vadd.f32 %v5650_v56, %v4103_v50  ;;  %v4123_v61 = vsel %vm430_vm2, %v4121_v51, 0.0  ;;  %v4229_v51 = vld [vmem:[%s7480_s16 + $0x18] sm:$0xff] }
0x2509   :  { %4124 = vadd.xlane.f32.xlu2 %v4123_v61  ;;  %v4141_v45 = vadd.f32 %v5652_v0, %v4140_v43  ;;  %v4227_v61 = vld [vmem:[%s7480_s16 + $0x8] sm:$0xff] }
0x250a   :  { %v4108_v31 = vsel %vm4107_vm6, %v5650_v56, %v4104_v52  ;;  %vm4157_vm6 = vweird.f32 %v4136_v54  ;;  %v4228_v52 = vld [vmem:[%s7480_s16 + $0x10] sm:$0xff] }
0x250b   :  { %v4113_v53 = vsel %vm4110_vm15, %v4112_v18, %v4108_v31  ;;  %v4145_v21 = vsel %vm4144_vm11, %v5652_v0, %v4141_v45  ;;  %vm4159_vm15 = vmor %vm4157_vm6, %vm4158_vm13  ;;  %v4226_v18 = vld [vmem:[%s7480_s16] sm:$0xff]  ;;  %vm7482_vm11 = vcmask 517376   ;;  %v4283_v54 = vld [vmem:[%s7484_s18 + $0x10] sm:$0xff] }
0x250c   :  { %v4116_v3 = vmul.f32 %v4113_v53, %v4075_v11  ;;  %v4150_v17 = vsel %vm4147_vm12, %v4149_v8, %v4145_v21  ;;  %v4155_v11 = vmul.f32 %v5654_v49, %v4154_v62  ;;  %v5405_v21 = vld [vmem:[%s7483_s23] ss:$0 sm:$0xff]  ;;  %v4284_v8 = vld [vmem:[%s7484_s18 + $0x18] sm:$0xff] }
0x250d   :  { %v4151_v13 = vmul.f32 %v4150_v17, %v7124_v2  ;;  %v4282_v17 = vld [vmem:[%s7484_s18 + $0x8] sm:$0xff] }
0x250e   :  { %v4122_v1 = vmul.f32 %v5403_v15, %v4116_v3  ;;  %v4156_v25 = vadd.f32 %v5654_v49, %v4155_v11  ;;  %v4231_v15 = vld [vmem:[%s7480_s16 + $0x28] sm:$0xff]  ;;  %v7214_v3 = vld [vmem:[%s5768_s9] sm:$0xff] }
0x250f   :  { %4251 = vmatpush.msrb.mxu2 %v4231_v15  ;;  %v5406_v15 = vld [vmem:[%s7485_s0] ss:$0 sm:$0xff] }
0x2510   :  { %v4126_v30 = vsel %vm430_vm2, %v4122_v1, 0.0  ;;  %v4160_v2 = vsel %vm4159_vm15, %v5654_v49, %v4156_v25 }
0x2511   :  { %4127 = vadd.xlane.f32.xlu0 %v4126_v30  ;;  %v4165_v6 = vsel %vm4162_vm8, %v4164_v29, %v4160_v2  ;;  %4252 = vmatpush.msrb.mxu2 %v4230_v16  ;;  %vm7487_vm8 = vcmask 279808  }
0x2512   :  { %v4166_v14 = vmul.f32 %v4165_v6, %v7131_v19 }
0x2513   :  { %4253 = vmatpush.msrb.mxu2 %v4229_v51 }
0x2515   :  { %4254 = vmatpush.msrb.mxu2 %v4228_v52 }
0x2517   :  { %4255 = vmatpush.msrb.mxu2 %v4227_v61 }
0x2519   :  { %4256 = vmatpush.msrb.mxu2 %v4226_v18 }
0x256c   :  { %v4380_v26 = vpop.f32.mrf.mxu1 }
0x256d   :  { %4386 = vst.msk [vmem:[#allocation3] sm:$0xff] %vm281_vm1, %v4380_v26 }
0x2574   :  { %v4383_v56 = vpop.f32.mrf.mxu1  ;;  %v7200_v10 = vld [vmem:[#allocation3] sm:$0xff] }
0x2575   :  { %4387 = vst.msk [vmem:[#allocation3 + $0x8] sm:$0xff] %vm281_vm1, %v4383_v56  ;;  %v4434_v47 = vsel %vm430_vm2, %v7200_v10, 0.0 }
0x257c   :  { %v4125_v35 = vpop.xlane.xlu2 %4124  ;;  %v7202_v28 = vld [vmem:[#allocation3 + $0x8] sm:$0xff] }
0x257d   :  { %v4133_v39 = vadd.f32 %v5404_v63, %v4125_v35  ;;  %v4435_v50 = vsel %vm430_vm2, %v7202_v28, 0.0 }
0x257e   :  { %v4436_v44 = vadd.f32 %v4435_v50, %v4434_v47 }
0x257f   :  { %4169 = vperm.xlu2 %5365, %v4133_v39  }
0x2584   :  { %v4128_v48 = vpop.xlane.xlu0 %4127 }
0x2585   :  { %v4134_v55 = vadd.f32 %v5404_v63, %v4128_v48 }
0x2587   :  { %4174 = vperm.xlu1 %5366, %v4134_v55  }
0x258f   :  { %4214 = vperm.xlu1 %5366, %v4211_v40  }
0x25d9   :  { %v4170_v5 = vpop.permute.xlu2 %4169 }
0x25da   :  { %v4177_v9 = vmul.f32 %v4170_v5, %v4151_v13 }
0x25dc   :  { %4181 = vst.msk [vmem:[#allocation5] sm:$0xff] %vm1061_vm10, %v4177_v9  ;;  %v4281_v9 = vld [vmem:[%s7484_s18] sm:$0xff] }
0x25e3   :  { %v4184_v7 = vld [vmem:[#allocation5] sm:$0xff] }
0x25f9   :  { %v4175_v58 = vpop.permute.xlu1 %4174 }
0x25fa   :  { %v4178_v60 = vmul.f32 %v4175_v58, %v4166_v14 }
0x25fc   :  { %4182 = vst.msk [vmem:[#allocation5 + $0x8] sm:$0xff] %vm1061_vm10, %v4178_v60 }
0x2601   :  { %v4215_v47 = vpop.permute.xlu1 %4214 }
0x2603   :  { %v4185_v37 = vld [vmem:[#allocation5 + $0x8] sm:$0xff] }
0x2604   :  { %4203 = vmatpush.msra.mxu3 %v4185_v37 }
0x2606   :  { %4204 = vmatpush.msra.mxu3 %v4184_v7 }
0x2607   :  { %5223 = vmatmul.msk.f32.vlgmr.msra.gmra.mxu3 %vm239_vm0, %v4183_v24 }
0x2608   :  { %4304 = vmatpush.msrb.mxu3 %v4284_v8 }
0x260a   :  { %4305 = vmatpush.msrb.mxu3 %v4283_v54 }
0x260c   :  { %4306 = vmatpush.msrb.mxu3 %v4282_v17 }
0x260e   :  { %4307 = vmatpush.msrb.mxu3 %v4281_v9 }
0x268a   :  { %v4206_v19 = vpop.f32.mrf.mxu3 }
0x268b   :  { %4209 = vst.msk [vmem:[#allocation6] sm:$0x3] %vm7481_vm9, %v4206_v19 }
0x2692   :  { %v7192_v46 = vld [vmem:[#allocation6] sm:$0x3] }
0x2693   :  { %4221 = vrot.lane.b32.xlu0 %v7192_v46, %s7446_s28  ;;  %v4217_v50 = vmul.f32 %v4215_v47, %v7192_v46 }
0x26bd   :  { %4437 = vadd.xlane.f32.xlu0 %v4436_v44 }
0x2705   :  { %v4222_v31 = vpop.permute.xlu0 %4221 }
0x2706   :  { %4224 = vst.msk [vmem:[#allocation7] sm:$0x3] %vm7482_vm11, %v4222_v31  ;;  %v4314_v31 = vadd.f32 %v7041_v36, %v4217_v50 }
0x270d   :  { %v4225_v53 = vld [vmem:[#allocation7] sm:$0x3] }
0x270e   :  { %5224 = vmatmul.msk.f32.vlgmr.msrb.gmra.mxu2 %vm633_vm4, %v4225_v53  ;;  %4892 = vst.msk [vmem:[#allocation7] sm:$0xff] %vm430_vm2, %v7214_v3 }
0x2730   :  { %v4438_v1 = vpop.xlane.xlu0 %4437 }
0x2731   :  { %v4439_v30 = vrot.slane %v4438_v1, 4 }
0x2733   :  { %v4440_v63 = vadd.f32 %v4439_v30, %v4438_v1 }
0x2735   :  { %v4441_v35 = vrot.slane %v4440_v63, 2 }
0x2737   :  { %v4442_v39 = vadd.f32 %v4441_v35, %v4440_v63 }
0x2739   :  { %v4443_v48 = vrot.slane %v4442_v39, 1 }
0x273b   :  { %v4444_v55 = vadd.f32 %v4443_v48, %v4442_v39  ;;  %v4316_v39 = vld [vmem:[%s7486_s17] sm:$0xff] }
0x273d   :  { %5298 = vpush %v4444_v55 }
0x276e   :  { %s5299_s7 = spop %5298 }
0x276f   :  { %v4446_v40 = vstv %s5299_s7 }
0x2770   :  { %v4447_v23 = vmul.f32 %v4446_v40, %v6270_v34 }
0x2772   :  { %v7221_v0 = vsub.f32 %v7200_v10, %v4447_v23  ;;  %v7224_v42 = vsub.f32 %v7202_v28, %v4447_v23 }
0x2774   :  { %v4450_v20 = vmul.f32 %v7221_v0, %v7221_v0  ;;  %v4451_v43 = vmul.f32 %v7224_v42, %v7224_v42 }
0x2776   :  { %v4452_v45 = vsel %vm430_vm2, %v4450_v20, 0.0  ;;  %v4453_v38 = vsel %vm430_vm2, %v4451_v43, 0.0 }
0x2777   :  { %v4454_v33 = vadd.f32 %v4453_v38, %v4452_v45 }
0x2779   :  { %4455 = vadd.xlane.f32.xlu2 %v4454_v33 }
0x2791   :  { %v4258_v13 = vpop.f32.mrf.mxu2 }
0x2792   :  { %v4259_v5 = vadd.f32 %v5405_v21, %v4258_v13 }
0x2794   :  { %v5225_v49 = vmul.f32 -1.442695, %v4259_v5 }
0x2796   :  { %5655 = vpow2.f32 %v5225_v49 }
0x279c   :  { %v5656_v59 = vpop.eup %5655 }
0x279d   :  { %v4264_v62 = vadd.f32 1.0, %v5656_v59 }
0x279f   :  { %5657 = vrcp.f32 %v4264_v62  ;;  %v4276_v25 = vand.u32 2147483648, %v4264_v62  ;;  %v4274_v41 = vand.u32 2147483647, %v4264_v62  ;;  %vm4270_vm13 = vweird.f32 %v4264_v62 }
0x27a1   :  { %v4277_v29 = vor.u32 1.1754944e-38, %v4276_v25  ;;  %vm4275_vm15 = vcmp.eq.f32.partialorder %v4274_v41, 8.507059e+37 }
0x27a5   :  { %v5658_v12 = vpop.eup %5657 }
0x27a6   :  { %v4266_v11 = vmul.f32 %v5658_v12, %v4264_v62  ;;  %vm4271_vm12 = vweird.f32 %v5658_v12 }
0x27a7   :  { %vm4272_vm6 = vmor %vm4270_vm13, %vm4271_vm12  ;;  %vm7488_vm12 = vcmask 15360  }
0x27a8   :  { %v4267_v4 = vsub.f32 1.0, %v4266_v11 }
0x27aa   :  { %v4268_v57 = vmul.f32 %v5658_v12, %v4267_v4 }
0x27ac   :  { %v4269_v2 = vadd.f32 %v5658_v12, %v4268_v57 }
0x27ae   :  { %v4273_v6 = vsel %vm4272_vm6, %v5658_v12, %v4269_v2 }
0x27af   :  { %v4278_v14 = vsel %vm4275_vm15, %v4277_v29, %v4273_v6 }
0x27b0   :  { %v4280_v58 = vmul.f32 %v4278_v14, %v4259_v5 }
0x27b2   :  { %5226 = vmatmul.msk.f32.vlgmr.msrb.gmra.mxu3 %vm430_vm2, %v4280_v58 }
0x27ec   :  { %v4456_v60 = vpop.xlane.xlu2 %4455 }
0x27ed   :  { %v4457_v37 = vrot.slane %v4456_v60, 4 }
0x27ef   :  { %v4458_v24 = vadd.f32 %v4457_v37, %v4456_v60 }
0x27f1   :  { %v4459_v7 = vrot.slane %v4458_v24, 2 }
0x27f3   :  { %v4460_v26 = vadd.f32 %v4459_v7, %v4458_v24 }
0x27f5   :  { %v4461_v56 = vrot.slane %v4460_v26, 1 }
0x27f7   :  { %v4462_v19 = vadd.f32 %v4461_v56, %v4460_v26 }
0x27f9   :  { %5300 = vpush %v4462_v19 }
0x282a   :  { %s5301_s13 = spop %5300 }
0x282b   :  { %v4464_v32 = vstv %s5301_s13 }
0x282c   :  { %v4465_v22 = vmul.f32 %v4464_v32, %v6270_v34 }
0x282e   :  { %5659 = vrsqrt.f32 %v4465_v22  ;;  %vm4473_vm9 = vcmp.eq.f32.partialorder %v4465_v22, inf  ;;  %v4476_v46 = vand.u32 2147483648, %v4465_v22  ;;  %vm4475_vm11 = vcmp.eq.f32.partialorder %v4465_v22, 0.0 }
0x2834   :  { %v5660_v16 = vpop.eup %5659 }
0x2835   :  { %v4467_v44 = vmul.f32 %v5660_v16, %v4465_v22  ;;  %v4309_v51 = vpop.f32.mrf.mxu3 }
0x2836   :  { %v4310_v52 = vadd.f32 %v5406_v15, %v4309_v51 }
0x2837   :  { %v4468_v61 = vmul.f32 %v5660_v16, %v4467_v44 }
0x2838   :  { %v4312_v18 = vadd.f32 %v4310_v52, %v7041_v36  ;;  %v4317_v36 = vld [vmem:[%s7486_s17 + $0x8] sm:$0xff] }
0x2839   :  { %v4469_v53 = vmul.f32 0.5, %v4468_v61 }
0x283a   :  { %4313 = vst.msk [vmem:[%s6184_s22] sm:$0x3] %vm1830_vm7, %v4312_v18  ;;  %vm7489_vm7 = vmmov %vm7488_vm12 }
0x283b   :  { %v4470_v1 = vsub.f32 1.5, %v4469_v53  ;;  %4315 = vst.msk [vmem:[%s6184_s22] sm:$0x3] %vm7487_vm8, %v4314_v31 }
0x283d   :  { %v4471_v30 = vmul.f32 %v5660_v16, %v4470_v1 }
0x283f   :  { %v4472_v63 = vmul.f32 %v4471_v30, %v4465_v22 }
0x2841   :  { %v4474_v35 = vsel %vm4473_vm9, %v4465_v22, %v4472_v63 }
0x2842   :  { %v4477_v48 = vsel %vm4475_vm11, %v4476_v46, %v4474_v35  ;;  %v4318_v55 = vld [vmem:[%s6184_s22] sm:$0x3] }
0x2843   :  { %5227 = vmatpush.msk.msrb.mxu0 %vm1306_vm14, %v4318_v55  ;;  %v4478_v40 = vadd.f32 1e-05, %v4477_v48 }
0x2844   :  { %5228 = vmatmul.msk.f32.vlgmr.msrb.gmra.mxu0 %vm7488_vm12, %v4316_v39 }
0x2845   :  { %5661 = vrcp.f32 %v4478_v40  ;;  %v4490_v43 = vand.u32 2147483648, %v4478_v40  ;;  %vm4484_vm13 = vweird.f32 %v4478_v40  ;;  %v4488_v38 = vand.u32 2147483647, %v4478_v40 }
0x2847   :  { %v4491_v21 = vor.u32 1.1754944e-38, %v4490_v43  ;;  %vm4489_vm8 = vcmp.eq.f32.partialorder %v4488_v38, 8.507059e+37 }
0x284b   :  { %v5662_v23 = vpop.eup %5661 }
0x284c   :  { %5229 = vmatmul.msk.f32.gmra.mxu0 %vm7489_vm7, %v4317_v36  ;;  %v4480_v20 = vmul.f32 %v5662_v23, %v4478_v40  ;;  %vm4485_vm6 = vweird.f32 %v5662_v23 }
0x284d   :  { %vm4486_vm15 = vmor %vm4484_vm13, %vm4485_vm6 }
0x284e   :  { %v4481_v45 = vsub.f32 1.0, %v4480_v20 }
0x2850   :  { %v4482_v33 = vmul.f32 %v5662_v23, %v4481_v45 }
0x2852   :  { %v4483_v8 = vadd.f32 %v5662_v23, %v4482_v33 }
0x2854   :  { %v4487_v54 = vsel %vm4486_vm15, %v5662_v23, %v4483_v8 }
0x2855   :  { %v4492_v17 = vsel %vm4489_vm8, %v4491_v21, %v4487_v54 }
0x2856   :  { %v4493_v13 = vmul.f32 %v4492_v17, %v7221_v0  ;;  %v4494_v5 = vmul.f32 %v4492_v17, %v7224_v42 }
0x2858   :  { %4495 = vst.msk [vmem:[#allocation4] sm:$0xff] %vm430_vm2, %v4493_v13 }
0x2859   :  { %4496 = vst.msk [vmem:[#allocation4 + $0x8] sm:$0xff] %vm430_vm2, %v4494_v5  ;;  %v4577_v5 = vld [vmem:[%s7490_s25 + $0x38] sm:$0xff] }
0x285a   :  { %4598 = vmatpush.msra.mxu2 %v4577_v5  ;;  %v4699_v5 = vld [vmem:[%s7494_s10 + $0x18] sm:$0xff] }
0x285b   :  { %4722 = vmatpush.msra.mxu0 %v4699_v5 }
0x28c1   :  { %v4345_v9 = vpop.f32.mrf.mxu0 }
0x28c2   :  { %4351 = vst.msk [vmem:[#allocation2] sm:$0xff] %vm281_vm1, %v4345_v9  ;;  %v4576_v9 = vld [vmem:[%s7490_s25 + $0x30] sm:$0xff] }
0x28c3   :  { %4599 = vmatpush.msra.mxu2 %v4576_v9  ;;  %v4698_v9 = vld [vmem:[%s7494_s10 + $0x10] sm:$0xff] }
0x28c4   :  { %4723 = vmatpush.msra.mxu0 %v4698_v9 }
0x28c9   :  { %v4348_v49 = vpop.f32.mrf.mxu0  ;;  %v4388_v59 = vld [vmem:[#allocation2] sm:$0xff] }
0x28ca   :  { %4352 = vst.msk [vmem:[#allocation2 + $0x8] sm:$0xff] %vm281_vm1, %v4348_v49  ;;  %v4497_v12 = vsel %vm430_vm2, %v4388_v59, 0.0  ;;  %v7269_v19 = vsub.f32 %v7200_v10, %v4388_v59 }
0x28cc   :  { %v4394_v32 = vmul.f32 %v7269_v19, %v7269_v19 }
0x28d1   :  { %v7259_v62 = vld [vmem:[#allocation2 + $0x8] sm:$0xff] }
0x28d2   :  { %v4498_v0 = vsel %vm430_vm2, %v7259_v62, 0.0  ;;  %v7280_v13 = vsub.f32 %v7202_v28, %v7259_v62  ;;  %v4570_v28 = vld [vmem:[%s7490_s25] sm:$0xff] }
0x28d3   :  { %v4499_v11 = vadd.f32 %v4498_v0, %v4497_v12  ;;  %v4574_v12 = vld [vmem:[%s7490_s25 + $0x20] sm:$0xff]  ;;  %v4573_v0 = vld [vmem:[%s7490_s25 + $0x18] sm:$0xff] }
0x28d4   :  { %v4395_v49 = vmul.f32 %v7280_v13, %v7280_v13 }
0x28d5   :  { %4500 = vadd.xlane.f32.xlu1 %v4499_v11  ;;  %v4572_v11 = vld [vmem:[%s7490_s25 + $0x10] sm:$0xff] }
0x2948   :  { %v4501_v42 = vpop.xlane.xlu1 %4500 }
0x2949   :  { %v4502_v4 = vrot.slane %v4501_v42, 4 }
0x294b   :  { %v4503_v25 = vadd.f32 %v4502_v4, %v4501_v42  ;;  %v4571_v42 = vld [vmem:[%s7490_s25 + $0x8] sm:$0xff] }
0x294d   :  { %v4504_v57 = vrot.slane %v4503_v25, 2 }
0x294f   :  { %v4505_v41 = vadd.f32 %v4504_v57, %v4503_v25 }
0x2951   :  { %v4506_v2 = vrot.slane %v4505_v41, 1 }
0x2953   :  { %v4507_v29 = vadd.f32 %v4506_v2, %v4505_v41 }
0x2955   :  { %5302 = vpush %v4507_v29 }
0x2986   :  { %s5303_s22 = spop %5302 }
0x2987   :  { %v4509_v6 = vstv %s5303_s22 }
0x2988   :  { %v4510_v14 = vmul.f32 %v4509_v6, %v6270_v34 }
0x298a   :  { %v4511_v58 = vsub.f32 %v4388_v59, %v4510_v14  ;;  %v4512_v60 = vsub.f32 %v7259_v62, %v4510_v14  ;;  %v4575_v59 = vld [vmem:[%s7490_s25 + $0x28] sm:$0xff] }
0x298b   :  { %4600 = vmatpush.msra.mxu2 %v4575_v59 }
0x298c   :  { %v4513_v37 = vmul.f32 %v4511_v58, %v4511_v58  ;;  %v4514_v24 = vmul.f32 %v4512_v60, %v4512_v60 }
0x298d   :  { %4601 = vmatpush.msra.mxu2 %v4574_v12 }
0x298e   :  { %v4515_v7 = vsel %vm430_vm2, %v4513_v37, 0.0  ;;  %v4516_v26 = vsel %vm430_vm2, %v4514_v24, 0.0 }
0x298f   :  { %v4517_v56 = vadd.f32 %v4516_v26, %v4515_v7  ;;  %4602 = vmatpush.msra.mxu2 %v4573_v0 }
0x2991   :  { %4518 = vadd.xlane.f32.xlu0 %v4517_v56  ;;  %4603 = vmatpush.msra.mxu2 %v4572_v11 }
0x2993   :  { %4604 = vmatpush.msra.mxu2 %v4571_v42 }
0x2995   :  { %4605 = vmatpush.msra.mxu2 %v4570_v28 }
0x29a5   :  { %4398 = vrot.lane.b32.xlu0 %v4394_v32, %s7452_s27 }
0x2a04   :  { %v4519_v22 = vpop.xlane.xlu0 %4518 }
0x2a05   :  { %v4520_v15 = vrot.slane %v4519_v22, 4 }
0x2a07   :  { %v4521_v16 = vadd.f32 %v4520_v15, %v4519_v22 }
0x2a09   :  { %v4522_v47 = vrot.slane %v4521_v16, 2 }
0x2a0b   :  { %v4523_v50 = vadd.f32 %v4522_v47, %v4521_v16 }
0x2a0d   :  { %v4524_v44 = vrot.slane %v4523_v50, 1 }
0x2a0f   :  { %v4525_v51 = vadd.f32 %v4524_v44, %v4523_v50 }
0x2a11   :  { %5304 = vpush %v4525_v51  ;;  %v5408_v51 = vld [vmem:[%s7492_s1] ss:$0 sm:$0xff] }
0x2a17   :  { %v4399_v52 = vpop.permute.xlu0 %4398 }
0x2a18   :  { %v4404_v61 = vsel %vm369_vm5, %v4399_v52, 0.0  ;;  %v4662_v52 = vld [vmem:[%s7493_s5 + $0x18] sm:$0xff] }
0x2a19   :  { %4405 = vadd.xlane.f32.xlu0 %v4404_v61  ;;  %4685 = vmatpush.msra.mxu3 %v4662_v52 }
0x2a42   :  { %s5305_s12 = spop %5304 }
0x2a43   :  { %v4527_v10 = vstv %s5305_s12 }
0x2a44   :  { %v4528_v18 = vmul.f32 %v4527_v10, %v6270_v34 }
0x2a46   :  { %5663 = vrsqrt.f32 %v4528_v18  ;;  %vm4536_vm14 = vcmp.eq.f32.partialorder %v4528_v18, inf  ;;  %v4539_v39 = vand.u32 2147483648, %v4528_v18  ;;  %vm4538_vm9 = vcmp.eq.f32.partialorder %v4528_v18, 0.0 }
0x2a4c   :  { %v5664_v31 = vpop.eup %5663 }
0x2a4d   :  { %v4530_v53 = vmul.f32 %v5664_v31, %v4528_v18 }
0x2a4f   :  { %v4531_v1 = vmul.f32 %v5664_v31, %v4530_v53 }
0x2a51   :  { %v4532_v30 = vmul.f32 0.5, %v4531_v1  ;;  %v4660_v1 = vld [vmem:[%s7493_s5 + $0x8] sm:$0xff] }
0x2a53   :  { %v4533_v46 = vsub.f32 1.5, %v4532_v30 }
0x2a55   :  { %v4534_v63 = vmul.f32 %v5664_v31, %v4533_v46  ;;  %v4661_v31 = vld [vmem:[%s7493_s5 + $0x10] sm:$0xff] }
0x2a56   :  { %4686 = vmatpush.msra.mxu3 %v4661_v31 }
0x2a57   :  { %v4535_v35 = vmul.f32 %v4534_v63, %v4528_v18  ;;  %v4659_v63 = vld [vmem:[%s7493_s5] sm:$0xff] }
0x2a58   :  { %4687 = vmatpush.msra.mxu3 %v4660_v1 }
0x2a59   :  { %v4537_v48 = vsel %vm4536_vm14, %v4528_v18, %v4535_v35 }
0x2a5a   :  { %v4540_v55 = vsel %vm4538_vm9, %v4539_v39, %v4537_v48  ;;  %4688 = vmatpush.msra.mxu3 %v4659_v63 }
0x2a5b   :  { %v4541_v40 = vadd.f32 1e-05, %v4540_v55 }
0x2a5d   :  { %5665 = vrcp.f32 %v4541_v40  ;;  %v4553_v43 = vand.u32 2147483648, %v4541_v40  ;;  %v4551_v45 = vand.u32 2147483647, %v4541_v40  ;;  %vm4547_vm12 = vweird.f32 %v4541_v40 }
0x2a5f   :  { %v4554_v33 = vor.u32 1.1754944e-38, %v4553_v43  ;;  %vm4552_vm13 = vcmp.eq.f32.partialorder %v4551_v45, 8.507059e+37 }
0x2a63   :  { %v5666_v36 = vpop.eup %5665 }
0x2a64   :  { %v4543_v23 = vmul.f32 %v5666_v36, %v4541_v40  ;;  %vm4548_vm11 = vweird.f32 %v5666_v36 }
0x2a65   :  { %vm4549_vm7 = vmor %vm4547_vm12, %vm4548_vm11 }
0x2a66   :  { %v4544_v20 = vsub.f32 1.0, %v4543_v23 }
0x2a68   :  { %v4545_v34 = vmul.f32 %v5666_v36, %v4544_v20 }
0x2a6a   :  { %v4546_v38 = vadd.f32 %v5666_v36, %v4545_v34 }
0x2a6c   :  { %v4550_v21 = vsel %vm4549_vm7, %v5666_v36, %v4546_v38 }
0x2a6d   :  { %v4555_v8 = vsel %vm4552_vm13, %v4554_v33, %v4550_v21 }
0x2a6e   :  { %v4557_v54 = vmul.f32 %v4555_v8, %v4512_v60  ;;  %v4556_v17 = vmul.f32 %v4555_v8, %v4511_v58 }
0x2a70   :  { %4562 = vrot.lane.b32.xlu1 %v4557_v54, %s7446_s28  ;;  %4560 = vrot.lane.b32.xlu2 %v4556_v17, %s7446_s28 }
0x2a78   :  { %4400 = vrot.lane.b32.xlu2 %v4395_v49, %s7452_s27  ;;  %s7491_s27 = sld [smem:[#allocation28_spill]] }
0x2a7e   :  { %v5407_v16 = vld [vmem:[%s7491_s27] ss:$0 sm:$0xff] }
0x2a8c   :  { %v4406_v29 = vpop.xlane.xlu0 %4405 }
0x2a8d   :  { %5667 = vrsqrt.f32 %v4406_v29  ;;  %v4420_v15 = vand.u32 2147483648, %v4406_v29  ;;  %vm4419_vm6 = vcmp.eq.f32.partialorder %v4406_v29, 0.0 }
0x2a93   :  { %v5668_v6 = vpop.eup %5667 }
0x2a94   :  { %v4411_v14 = vmul.f32 %v5668_v6, %v4406_v29 }
0x2a96   :  { %v4412_v58 = vmul.f32 %v5668_v6, %v4411_v14 }
0x2a98   :  { %v4413_v60 = vmul.f32 0.5, %v4412_v58 }
0x2a9a   :  { %v4414_v37 = vsub.f32 1.5, %v4413_v60 }
0x2a9c   :  { %v4415_v7 = vmul.f32 %v5668_v6, %v4414_v37 }
0x2a9e   :  { %v4416_v26 = vmul.f32 %v4415_v7, %v4406_v29  ;;  %v4696_v7 = vld [vmem:[%s7494_s10] sm:$0xff] }
0x2aca   :  { %v4561_v62 = vpop.permute.xlu2 %4560 }
0x2acb   :  { %4566 = vst.msk [vmem:[#allocation4] sm:$0xff] %vm608_vm3, %v4561_v62 }
0x2ad2   :  { %v4401_v4 = vpop.permute.xlu2 %4400  ;;  %v4568_v25 = vld [vmem:[#allocation4] sm:$0xff] }
0x2ad3   :  { %5232 = vmatmul.msk.f32.vlgmr.msra.gmra.mxu2 %vm633_vm4, %v4568_v25  ;;  %v4407_v57 = vsel %vm369_vm5, %v4401_v4, 0.0  ;;  %vm4417_vm5 = vcmp.eq.f32.partialorder %v4406_v29, inf }
0x2ad4   :  { %4408 = vadd.xlane.f32.xlu1 %v4407_v57  ;;  %v4418_v22 = vsel %vm4417_vm5, %v4406_v29, %v4416_v26  ;;  %v5409_v26 = vld [vmem:[%s7495_s15] ss:$0 sm:$0xff] }
0x2ad5   :  { %v7299_v47 = vsel %vm4419_vm6, %v4420_v15, %v4418_v22 }
0x2ad6   :  { %v4582_v44 = vmul.f32 %v5407_v16, %v7299_v47 }
0x2ae2   :  { %v4563_v41 = vpop.permute.xlu1 %4562 }
0x2ae3   :  { %4567 = vst.msk [vmem:[#allocation4 + $0x8] sm:$0xff] %vm608_vm3, %v4563_v41 }
0x2aea   :  { %v4569_v2 = vld [vmem:[#allocation4 + $0x8] sm:$0xff] }
0x2aeb   :  { %5233 = vmatmul.msk.f32.gmra.mxu2 %vm633_vm4, %v4569_v2 }
0x2b47   :  { %v4409_v24 = vpop.xlane.xlu1 %4408 }
0x2b48   :  { %5669 = vrsqrt.f32 %v4409_v24  ;;  %vm4429_vm15 = vcmp.eq.f32.partialorder %v4409_v24, inf  ;;  %v4432_v36 = vand.u32 2147483648, %v4409_v24  ;;  %vm4431_vm8 = vcmp.eq.f32.partialorder %v4409_v24, 0.0 }
0x2b4e   :  { %v5670_v56 = vpop.eup %5669 }
0x2b4f   :  { %v4423_v32 = vmul.f32 %v5670_v56, %v4409_v24 }
0x2b51   :  { %v4424_v50 = vmul.f32 %v5670_v56, %v4423_v32 }
0x2b53   :  { %v4425_v18 = vmul.f32 0.5, %v4424_v50 }
0x2b55   :  { %v4426_v46 = vsub.f32 1.5, %v4425_v18 }
0x2b56   :  { %v4607_v61 = vpop.f32.mrf.mxu2 }
0x2b57   :  { %v4608_v10 = vadd.f32 %v4607_v61, %v4582_v44  ;;  %v4427_v35 = vmul.f32 %v5670_v56, %v4426_v46 }
0x2b59   :  { %v4617_v53 = vadd.f32 %v5408_v51, %v4608_v10  ;;  %v4428_v48 = vmul.f32 %v4427_v35, %v4409_v24 }
0x2b5b   :  { %v5234_v30 = vmul.f32 -1.442695, %v4617_v53  ;;  %v4430_v40 = vsel %vm4429_vm15, %v4409_v24, %v4428_v48  ;;  %v4697_v24 = vld [vmem:[%s7494_s10 + $0x8] sm:$0xff] }
0x2b5c   :  { %v7307_v23 = vsel %vm4431_vm8, %v4432_v36, %v4430_v40  ;;  %4724 = vmatpush.msra.mxu0 %v4697_v24  ;;  %v5411_v40 = vld [vmem:[%s7497_s24] ss:$0 sm:$0xff] }
0x2b5d   :  { %5671 = vpow2.f32 %v5234_v30  ;;  %v4583_v34 = vmul.f32 %v5407_v16, %v7307_v23  ;;  %v5410_v16 = vld [vmem:[%s7496_s20] ss:$0 sm:$0xff] }
0x2b5e   :  { %4725 = vmatpush.msra.mxu0 %v4696_v7 }
0x2b63   :  { %v5672_v39 = vpop.eup %5671 }
0x2b64   :  { %v4625_v55 = vadd.f32 1.0, %v5672_v39 }
0x2b66   :  { %5673 = vrcp.f32 %v4625_v55  ;;  %v4638_v21 = vand.u32 2147483648, %v4625_v55  ;;  %v4636_v54 = vand.u32 2147483647, %v4625_v55  ;;  %vm4632_vm9 = vweird.f32 %v4625_v55 }
0x2b68   :  { %v4639_v12 = vor.u32 1.1754944e-38, %v4638_v21  ;;  %vm4637_vm12 = vcmp.eq.f32.partialorder %v4636_v54, 8.507059e+37 }
0x2b6c   :  { %v5674_v20 = vpop.eup %5673 }
0x2b6d   :  { %v4628_v43 = vmul.f32 %v5674_v20, %v4625_v55  ;;  %vm4633_vm14 = vweird.f32 %v5674_v20 }
0x2b6e   :  { %v4610_v45 = vpop.f32.mrf.mxu2  ;;  %vm4634_vm11 = vmor %vm4632_vm9, %vm4633_vm14 }
0x2b6f   :  { %v4629_v38 = vsub.f32 1.0, %v4628_v43  ;;  %v4611_v33 = vadd.f32 %v4610_v45, %v4583_v34 }
0x2b71   :  { %v4630_v8 = vmul.f32 %v5674_v20, %v4629_v38  ;;  %v4618_v17 = vadd.f32 %v5408_v51, %v4611_v33 }
0x2b73   :  { %v4631_v49 = vadd.f32 %v5674_v20, %v4630_v8  ;;  %v5235_v59 = vmul.f32 -1.442695, %v4618_v17 }
0x2b75   :  { %v4635_v0 = vsel %vm4634_vm11, %v5674_v20, %v4631_v49  ;;  %5675 = vpow2.f32 %v5235_v59 }
0x2b76   :  { %v4640_v11 = vsel %vm4637_vm12, %v4639_v12, %v4635_v0 }
0x2b77   :  { %v4657_v42 = vmul.f32 %v4640_v11, %v4617_v53 }
0x2b79   :  { %5236 = vmatmul.msk.f32.vlgmr.msra.gmra.mxu3 %vm430_vm2, %v4657_v42 }
0x2b7b   :  { %v5676_v28 = vpop.eup %5675 }
0x2b7c   :  { %v4626_v62 = vadd.f32 1.0, %v5676_v28  ;;  %v5412_v28 = vld [vmem:[#allocation10] ss:$0 sm:$0xff] }
0x2b7e   :  { %5677 = vrcp.f32 %v4626_v62  ;;  %v4653_v41 = vand.u32 2147483648, %v4626_v62  ;;  %v4651_v29 = vand.u32 2147483647, %v4626_v62  ;;  %vm4647_vm13 = vweird.f32 %v4626_v62 }
0x2b80   :  { %v4654_v14 = vor.u32 1.1754944e-38, %v4653_v41  ;;  %vm4652_vm6 = vcmp.eq.f32.partialorder %v4651_v29, 8.507059e+37  ;;  %v4791_v29 = vmax.f32 %v7299_v47, 1e-08  ;;  %v4792_v47 = vmax.f32 %v7307_v23, 1e-08 }
0x2b82   :  { %v4804_v24 = vand.u32 2147483648, %v4791_v29  ;;  %v4802_v7 = vand.u32 2147483647, %v4791_v29 }
0x2b84   :  { %v5678_v4 = vpop.eup %5677 }
0x2b85   :  { %v4643_v25 = vmul.f32 %v5678_v4, %v4626_v62  ;;  %vm4648_vm7 = vweird.f32 %v5678_v4 }
0x2b86   :  { %vm4649_vm5 = vmor %vm4647_vm13, %vm4648_vm7 }
0x2b87   :  { %v4644_v57 = vsub.f32 1.0, %v4643_v25  ;;  %v4877_v25 = vld [vmem:[%s7498_s2 + $0x8] sm:$0xff] }
0x2b89   :  { %v4645_v2 = vmul.f32 %v5678_v4, %v4644_v57 }
0x2b8b   :  { %v4646_v6 = vadd.f32 %v5678_v4, %v4645_v2  ;;  %v4876_v2 = vld [vmem:[%s7498_s2] sm:$0xff] }
0x2b8d   :  { %v4650_v58 = vsel %vm4649_vm5, %v5678_v4, %v4646_v6 }
0x2b8e   :  { %v4655_v60 = vsel %vm4652_vm6, %v4654_v14, %v4650_v58  ;;  %vm4798_vm6 = vweird.f32 %v4791_v29 }
0x2b8f   :  { %v4658_v37 = vmul.f32 %v4655_v60, %v4618_v17 }
0x2b91   :  { %5237 = vmatmul.msk.f32.gmra.mxu3 %vm430_vm2, %v4658_v37 }
0x2bfc   :  { %v4690_v56 = vpop.f32.mrf.mxu3 }
0x2bfd   :  { %v4691_v32 = vadd.f32 %v5409_v26, %v4690_v56  ;;  %v4805_v56 = vor.u32 1.1754944e-38, %v4804_v24 }
0x2bff   :  { %4835 = vst.msk [vmem:[#allocation5] sm:$0xff] %vm430_vm2, %v4691_v32  ;;  %5238 = vmatmul.msk.f32.vlgmr.msra.gmra.mxu0 %vm430_vm2, %v4691_v32 }
0x2c14   :  { %v4693_v22 = vpop.f32.mrf.mxu3 }
0x2c15   :  { %v4694_v15 = vadd.f32 %v5409_v26, %v4693_v22 }
0x2c17   :  { %4836 = vst.msk [vmem:[#allocation5 + $0x8] sm:$0xff] %vm430_vm2, %v4694_v15  ;;  %5239 = vmatmul.msk.f32.gmra.mxu0 %vm430_vm2, %v4694_v15 }
0x2c7c   :  { %v4727_v50 = vpop.f32.mrf.mxu0 }
0x2c7d   :  { %v4728_v44 = vadd.f32 %v5410_v16, %v4727_v50 }
0x2c7f   :  { %v5240_v51 = vmul.f32 -1.442695, %v4728_v44 }
0x2c81   :  { %5679 = vpow2.f32 %v5240_v51 }
0x2c87   :  { %v5680_v52 = vpop.eup %5679 }
0x2c88   :  { %v4739_v61 = vadd.f32 1.0, %v5680_v52 }
0x2c8a   :  { %5681 = vrcp.f32 %v4739_v61  ;;  %v4752_v53 = vand.u32 2147483648, %v4739_v61  ;;  %v4750_v46 = vand.u32 2147483647, %v4739_v61  ;;  %vm4746_vm8 = vweird.f32 %v4739_v61 }
0x2c8c   :  { %v4753_v48 = vor.u32 1.1754944e-38, %v4752_v53  ;;  %vm4751_vm9 = vcmp.eq.f32.partialorder %v4750_v46, 8.507059e+37 }
0x2c90   :  { %v5682_v10 = vpop.eup %5681 }
0x2c91   :  { %v4742_v18 = vmul.f32 %v5682_v10, %v4739_v61  ;;  %vm4747_vm15 = vweird.f32 %v5682_v10 }
0x2c92   :  { %vm4748_vm14 = vmor %vm4746_vm8, %vm4747_vm15  ;;  %vm4803_vm8 = vcmp.eq.f32.partialorder %v4802_v7, 8.507059e+37 }
0x2c93   :  { %v4743_v31 = vsub.f32 1.0, %v4742_v18  ;;  %v4817_v18 = vand.u32 2147483647, %v4792_v47 }
0x2c94   :  { %v4730_v1 = vpop.f32.mrf.mxu0 }
0x2c95   :  { %v4744_v30 = vmul.f32 %v5682_v10, %v4743_v31  ;;  %v4731_v63 = vadd.f32 %v5410_v16, %v4730_v1 }
0x2c97   :  { %v4745_v35 = vadd.f32 %v5682_v10, %v4744_v30  ;;  %v5241_v39 = vmul.f32 -1.442695, %v4731_v63 }
0x2c99   :  { %v4749_v55 = vsel %vm4748_vm14, %v5682_v10, %v4745_v35  ;;  %5683 = vpow2.f32 %v5241_v39  ;;  %v4819_v10 = vand.u32 2147483648, %v4792_v47  ;;  %v4840_v39 = vld [vmem:[%s7499_s14 + $0x8] sm:$0xff] }
0x2c9a   :  { %v4754_v36 = vsel %vm4751_vm9, %v4753_v48, %v4749_v55  ;;  %vm4813_vm9 = vweird.f32 %v4792_v47  ;;  %v4913_v48 = vld [vmem:[%s7500_s21 + $0x38] sm:$0xff]  ;;  %v4912_v55 = vld [vmem:[%s7500_s21 + $0x30] sm:$0xff] }
0x2c9b   :  { %v4771_v20 = vmul.f32 %v4754_v36, %v4728_v44  ;;  %v4820_v31 = vor.u32 1.1754944e-38, %v4819_v10  ;;  %4932 = vmatpush.msrb.mxu3 %v4913_v48 }
0x2c9d   :  { %v4777_v43 = vmul.f32 %v5411_v40, %v4771_v20  ;;  %4933 = vmatpush.msrb.mxu3 %v4912_v55 }
0x2c9f   :  { %v5684_v34 = vpop.eup %5683  ;;  %v4779_v45 = vsel %vm430_vm2, %v4777_v43, 0.0 }
0x2ca0   :  { %v4740_v38 = vadd.f32 1.0, %v5684_v34  ;;  %4780 = vadd.xlane.f32.xlu0 %v4779_v45  ;;  %v4909_v45 = vld [vmem:[%s7500_s21 + $0x18] sm:$0xff] }
0x2ca2   :  { %5685 = vrcp.f32 %v4740_v38  ;;  %v4767_v54 = vand.u32 2147483648, %v4740_v38  ;;  %v4765_v5 = vand.u32 2147483647, %v4740_v38  ;;  %vm4761_vm12 = vweird.f32 %v4740_v38 }
0x2ca3   :  { %5687 = vrcp.f32 %v4791_v29 }
0x2ca4   :  { %v4768_v49 = vor.u32 1.1754944e-38, %v4767_v54  ;;  %vm4766_vm13 = vcmp.eq.f32.partialorder %v4765_v5, 8.507059e+37  ;;  %5689 = vrcp.f32 %v4792_v47 }
0x2ca8   :  { %v5686_v33 = vpop.eup %5685 }
0x2ca9   :  { %v4757_v21 = vmul.f32 %v5686_v33, %v4740_v38  ;;  %vm4762_vm11 = vweird.f32 %v5686_v33  ;;  %v5688_v6 = vpop.eup %5687  ;;  %v4908_v38 = vld [vmem:[%s7500_s21 + $0x10] sm:$0xff] }
0x2caa   :  { %vm4763_vm7 = vmor %vm4761_vm12, %vm4762_vm11  ;;  %v4794_v14 = vmul.f32 %v5688_v6, %v4791_v29  ;;  %vm4799_vm5 = vweird.f32 %v5688_v6  ;;  %v5690_v50 = vpop.eup %5689  ;;  %vm4818_vm12 = vcmp.eq.f32.partialorder %v4817_v18, 8.507059e+37 }
0x2cab   :  { %v4758_v8 = vsub.f32 1.0, %v4757_v21  ;;  %vm4800_vm15 = vmor %vm4798_vm6, %vm4799_vm5  ;;  %v4809_v44 = vmul.f32 %v5690_v50, %v4792_v47  ;;  %vm4814_vm14 = vweird.f32 %v5690_v50  ;;  %v4906_v21 = vld [vmem:[%s7500_s21] sm:$0xff] }
0x2cac   :  { %v4795_v58 = vsub.f32 1.0, %v4794_v14  ;;  %vm4815_vm11 = vmor %vm4813_vm9, %vm4814_vm14 }
0x2cad   :  { %v4759_v17 = vmul.f32 %v5686_v33, %v4758_v8  ;;  %v4810_v51 = vsub.f32 1.0, %v4809_v44 }
0x2cae   :  { %v4796_v60 = vmul.f32 %v5688_v6, %v4795_v58 }
0x2caf   :  { %v4760_v9 = vadd.f32 %v5686_v33, %v4759_v17  ;;  %v4811_v52 = vmul.f32 %v5690_v50, %v4810_v51 }
0x2cb0   :  { %v4797_v37 = vadd.f32 %v5688_v6, %v4796_v60 }
0x2cb1   :  { %v4764_v59 = vsel %vm4763_vm7, %v5686_v33, %v4760_v9  ;;  %v4812_v61 = vadd.f32 %v5690_v50, %v4811_v52  ;;  %v4907_v33 = vld [vmem:[%s7500_s21 + $0x8] sm:$0xff]  ;;  %v5413_v9 = vld [vmem:[%s6676_s30] ss:$0 sm:$0xff] }
0x2cb2   :  { %v4769_v12 = vsel %vm4766_vm13, %v4768_v49, %v4764_v59  ;;  %v4801_v26 = vsel %vm4800_vm15, %v5688_v6, %v4797_v37  ;;  %v4990_v49 = vld [vmem:[%s6699_s8 + $0x18] sm:$0xff]  ;;  %v4989_v59 = vld [vmem:[%s6699_s8 + $0x10] sm:$0xff] }
0x2cb3   :  { %v4772_v0 = vmul.f32 %v4769_v12, %v4731_v63  ;;  %v4806_v32 = vsel %vm4803_vm8, %v4805_v56, %v4801_v26  ;;  %v4839_v63 = vld [vmem:[%s7499_s14] sm:$0xff]  ;;  %5013 = vmatpush.msrb.mxu2 %v4990_v49 }
0x2cb4   :  { %v4807_v22 = vmul.f32 %v4806_v32, %v7269_v19  ;;  %v4816_v19 = vsel %vm4815_vm11, %v5690_v50, %v4812_v61 }
0x2cb5   :  { %v4778_v11 = vmul.f32 %v5411_v40, %v4772_v0  ;;  %v4821_v53 = vsel %vm4818_vm12, %v4820_v31, %v4816_v19  ;;  %v4910_v40 = vld [vmem:[%s7500_s21 + $0x20] sm:$0xff]  ;;  %5014 = vmatpush.msrb.mxu2 %v4989_v59 }
0x2cb6   :  { %v4822_v23 = vmul.f32 %v4821_v53, %v7280_v13  ;;  %v4911_v13 = vld [vmem:[%s7500_s21 + $0x28] sm:$0xff]  ;;  %v5414_v31 = vld [vmem:[%s6694_s26] ss:$0 sm:$0xff] }
0x2cb7   :  { %v4782_v42 = vsel %vm430_vm2, %v4778_v11, 0.0  ;;  %4934 = vmatpush.msrb.mxu3 %v4911_v13  ;;  %v4988_v11 = vld [vmem:[%s6699_s8 + $0x8] sm:$0xff] }
0x2cb8   :  { %4783 = vadd.xlane.f32.xlu2 %v4782_v42  ;;  %5015 = vmatpush.msrb.mxu2 %v4988_v11 }
0x2cb9   :  { %4935 = vmatpush.msrb.mxu3 %v4910_v40 }
0x2cbb   :  { %4936 = vmatpush.msrb.mxu3 %v4909_v45 }
0x2cbd   :  { %4937 = vmatpush.msrb.mxu3 %v4908_v38 }
0x2cbf   :  { %4938 = vmatpush.msrb.mxu3 %v4907_v33 }
0x2cc1   :  { %4939 = vmatpush.msrb.mxu3 %v4906_v21 }
0x2d13   :  { %v4781_v62 = vpop.xlane.xlu0 %4780 }
0x2d14   :  { %v4789_v4 = vadd.f32 %v5412_v28, %v4781_v62 }
0x2d16   :  { %4825 = vperm.xlu2 %5365, %v4789_v4  }
0x2d1e   :  { %4885 = vperm.xlu2 %5365, %v4877_v25  }
0x2d2b   :  { %v4784_v57 = vpop.xlane.xlu2 %4783 }
0x2d2c   :  { %v4790_v41 = vadd.f32 %v5412_v28, %v4784_v57  ;;  %v4987_v28 = vld [vmem:[%s6699_s8] sm:$0xff] }
0x2d2d   :  { %5016 = vmatpush.msrb.mxu2 %v4987_v28 }
0x2d2e   :  { %4830 = vperm.xlu1 %5366, %v4790_v41  }
0x2d36   :  { %4880 = vperm.xlu1 %5366, %v4876_v2  }
0x2d70   :  { %v4826_v15 = vpop.permute.xlu2 %4825 }
0x2d71   :  { %v4833_v16 = vmul.f32 %v4826_v15, %v4807_v22 }
0x2d73   :  { %4837 = vst.msk [vmem:[#allocation5] sm:$0xff] %vm1061_vm10, %v4833_v16 }
0x2d7a   :  { %v4841_v35 = vld [vmem:[#allocation5] sm:$0xff] }
0x2da0   :  { %v4831_v1 = vpop.permute.xlu1 %4830 }
0x2da1   :  { %v4834_v30 = vmul.f32 %v4831_v1, %v4822_v23 }
0x2da3   :  { %4838 = vst.msk [vmem:[#allocation5 + $0x8] sm:$0xff] %vm1061_vm10, %v4834_v30 }
0x2da8   :  { %v4881_v53 = vpop.permute.xlu1 %4880 }
0x2daa   :  { %v4842_v46 = vld [vmem:[#allocation5 + $0x8] sm:$0xff] }
0x2dab   :  { %4863 = vmatpush.msrb.mxu1 %v4842_v46 }
0x2dad   :  { %4864 = vmatpush.msrb.mxu1 %v4841_v35  ;;  %v4886_v35 = vpop.permute.xlu2 %4885 }
0x2dae   :  { %5242 = vmatmul.msk.f32.vlgmr.msrb.gmra.mxu1 %vm239_vm0, %v4839_v63 }
0x2db6   :  { %5243 = vmatmul.msk.f32.gmra.mxu1 %vm239_vm0, %v4840_v39 }
0x2e2b   :  { %v4866_v36 = vpop.f32.mrf.mxu1 }
0x2e2c   :  { %4872 = vst.msk [vmem:[#allocation6] sm:$0xff] %vm281_vm1, %v4866_v36 }
0x2e33   :  { %v4869_v20 = vpop.f32.mrf.mxu1  ;;  %v7342_v43 = vld [vmem:[#allocation6] sm:$0xff] }
0x2e34   :  { %4873 = vst.msk [vmem:[#allocation6 + $0x8] sm:$0xff] %vm281_vm1, %v4869_v20  ;;  %4896 = vrot.lane.b32.xlu0 %v7342_v43, %s7446_s28  ;;  %v4888_v23 = vmul.f32 %v4881_v53, %v7342_v43 }
0x2e36   :  { %v5028_v63 = vadd.f32 %v7214_v3, %v4888_v23 }
0x2e3b   :  { %v7347_v34 = vld [vmem:[#allocation6 + $0x8] sm:$0xff] }
0x2e3c   :  { %4898 = vrot.lane.b32.xlu0 %v7347_v34, %s7446_s28  ;;  %v4889_v39 = vmul.f32 %v4886_v35, %v7347_v34 }
0x2e3e   :  { %v5029_v40 = vadd.f32 %v7086_v27, %v4889_v39 }
0x2ea6   :  { %v4897_v8 = vpop.permute.xlu0 %4896 }
0x2ea7   :  { %4902 = vst.msk [vmem:[#allocation7] sm:$0xff] %vm608_vm3, %v4897_v8 }
0x2eae   :  { %v4899_v54 = vpop.permute.xlu0 %4898  ;;  %v4904_v17 = vld [vmem:[#allocation7] sm:$0xff] }
0x2eaf   :  { %4903 = vst.msk [vmem:[#allocation7 + $0x8] sm:$0xff] %vm608_vm3, %v4899_v54  ;;  %5244 = vmatmul.msk.f32.vlgmr.msrb.gmra.mxu3 %vm633_vm4, %v4904_v17 }
0x2eb6   :  { %v4905_v5 = vld [vmem:[#allocation7 + $0x8] sm:$0xff] }
0x2eb7   :  { %5245 = vmatmul.msk.f32.gmra.mxu3 %vm633_vm4, %v4905_v5 }
0x2f32   :  { %v4941_v12 = vpop.f32.mrf.mxu3 }
0x2f33   :  { %v4942_v0 = vadd.f32 %v5413_v9, %v4941_v12 }
0x2f35   :  { %v5246_v42 = vmul.f32 -1.442695, %v4942_v0 }
0x2f37   :  { %5691 = vpow2.f32 %v5246_v42 }
0x2f3a   :  { %v4944_v62 = vpop.f32.mrf.mxu3 }
0x2f3b   :  { %v4945_v4 = vadd.f32 %v5413_v9, %v4944_v62 }
0x2f3d   :  { %v5692_v25 = vpop.eup %5691  ;;  %v5247_v57 = vmul.f32 -1.442695, %v4945_v4 }
0x2f3e   :  { %v4953_v41 = vadd.f32 1.0, %v5692_v25 }
0x2f3f   :  { %5693 = vpow2.f32 %v5247_v57 }
0x2f40   :  { %5695 = vrcp.f32 %v4953_v41  ;;  %v4966_v60 = vand.u32 2147483648, %v4953_v41  ;;  %v4964_v24 = vand.u32 2147483647, %v4953_v41  ;;  %vm4960_vm1 = vweird.f32 %v4953_v41 }
0x2f42   :  { %v4967_v56 = vor.u32 1.1754944e-38, %v4966_v60  ;;  %vm4965_vm4 = vcmp.eq.f32.partialorder %v4964_v24, 8.507059e+37 }
0x2f45   :  { %v5694_v2 = vpop.eup %5693 }
0x2f46   :  { %v5696_v29 = vpop.eup %5695  ;;  %v4954_v6 = vadd.f32 1.0, %v5694_v2 }
0x2f47   :  { %v4956_v14 = vmul.f32 %v5696_v29, %v4953_v41  ;;  %vm4961_vm0 = vweird.f32 %v5696_v29 }
0x2f48   :  { %5697 = vrcp.f32 %v4954_v6  ;;  %vm4962_vm3 = vmor %vm4960_vm1, %vm4961_vm0  ;;  %v4981_v50 = vand.u32 2147483648, %v4954_v6  ;;  %v4979_v51 = vand.u32 2147483647, %v4954_v6  ;;  %vm4975_vm13 = vweird.f32 %v4954_v6 }
0x2f49   :  { %v4957_v58 = vsub.f32 1.0, %v4956_v14 }
0x2f4a   :  { %v4982_v61 = vor.u32 1.1754944e-38, %v4981_v50  ;;  %vm4980_vm6 = vcmp.eq.f32.partialorder %v4979_v51, 8.507059e+37 }
0x2f4b   :  { %v4958_v37 = vmul.f32 %v5696_v29, %v4957_v58 }
0x2f4d   :  { %v4959_v7 = vadd.f32 %v5696_v29, %v4958_v37 }
0x2f4e   :  { %v5698_v26 = vpop.eup %5697 }
0x2f4f   :  { %v4963_v32 = vsel %vm4962_vm3, %v5696_v29, %v4959_v7  ;;  %v4971_v22 = vmul.f32 %v5698_v26, %v4954_v6  ;;  %vm4976_vm7 = vweird.f32 %v5698_v26 }
0x2f50   :  { %v4968_v15 = vsel %vm4965_vm4, %v4967_v56, %v4963_v32  ;;  %vm4977_vm5 = vmor %vm4975_vm13, %vm4976_vm7 }
0x2f51   :  { %v4985_v16 = vmul.f32 %v4968_v15, %v4942_v0  ;;  %v4972_v47 = vsub.f32 1.0, %v4971_v22 }
0x2f53   :  { %v4973_v44 = vmul.f32 %v5698_v26, %v4972_v47  ;;  %5248 = vmatmul.msk.f32.vlgmr.msrb.gmra.mxu2 %vm430_vm2, %v4985_v16 }
0x2f55   :  { %v4974_v52 = vadd.f32 %v5698_v26, %v4973_v44 }
0x2f57   :  { %v4978_v10 = vsel %vm4977_vm5, %v5698_v26, %v4974_v52 }
0x2f58   :  { %v4983_v18 = vsel %vm4980_vm6, %v4982_v61, %v4978_v10 }
0x2f59   :  { %v4986_v19 = vmul.f32 %v4983_v18, %v4945_v4 }
0x2f5b   :  { %5249 = vmatmul.msk.f32.gmra.mxu2 %vm430_vm2, %v4986_v19 }
0x2fd6   :  { %v5018_v1 = vpop.f32.mrf.mxu2 }
0x2fd7   :  { %v5019_v30 = vadd.f32 %v5414_v31, %v5018_v1 }
0x2fd9   :  { %v5024_v46 = vadd.f32 %v5019_v30, %v7214_v3 }
0x2fdb   :  { %5026 = vst.msk [vmem:[%s5768_s9] sm:$0xff] %vm430_vm2, %v5024_v46 }
0x2fdc   :  { %5030 = vst.msk [vmem:[%s5768_s9] sm:$0xff] %vm1061_vm10, %v5028_v63 }
0x2fde   :  { %v5021_v48 = vpop.f32.mrf.mxu2 }
0x2fdf   :  { %v5022_v55 = vadd.f32 %v5414_v31, %v5021_v48 }
0x2fe1   :  { %v5025_v13 = vadd.f32 %v5022_v55, %v7086_v27 }
0x2fe3   :  { %5027 = vst.msk [vmem:[%s5768_s9 + $0x8] sm:$0xff] %vm430_vm2, %v5025_v13 }
0x2fe4   :  { %5031 = vst.msk [vmem:[%s5768_s9 + $0x8] sm:$0xff] %vm1061_vm10, %v5029_v40 }

</bundles_post_ra>
